<compile_context>
chip_gen: v7x
topology: tpu7x:2x2x1
jax: 0.10.0
libtpu: 0.0.40
codegen_flags: <defaults>
</compile_context>

<pallas_src>
import functools
import math

import jax
import jax.numpy as jnp
from jax.experimental import pallas as pl
from jax.experimental.pallas import tpu as pltpu

EPS = 1e-5                      # nn.InstanceNorm2d default eps

_GELU_C0 = 0.7978845608028654   # sqrt(2/pi)
_GELU_C1 = 0.044715


def _gelu_tanh(x):
    # tanh-approx GELU (EUP).  PyTorch nn.GELU() defaults to exact erf; the
    # deviation is ~1e-3 max abs (acceptable for inference).
    return 0.5 * x * (1.0 + jnp.tanh(_GELU_C0 * (x + _GELU_C1 * x * x * x)))


def _ceil_to(x, m):
    return ((x + m - 1) // m) * m


# ----------------------------------------------------------------------------
# Fused kernel: 3 x (conv3x3 replicate-pad -> InstanceNorm -> GELU) -> FiLM
# One grid step == one image.
# ----------------------------------------------------------------------------
def _fused_input_conv_kernel(xp_ref, w1_ref, b1_ref, w2_ref, b2_ref,
                             w3_ref, b3_ref, film_ref, o_ref,
                             pad1_ref, pad2_ref, *, H, W, Wp):

    def conv_in_gelu(ap, w_ref, b_ref):
        # ap    : (H+2, Wp, Cin) f32 width/height replicate-padded activation
        #         (columns 0..W+1 valid, tail columns are zero and unused).
        # w_ref : (3, 3*Cin, Cout) bf16; lane index of dim 1 is dy*Cin + ci.
        # b_ref : (1, 1, Cout) f32.
        # The three dy row bands are contiguous leading-dim slices (free) and
        # are packed into the contraction dim -> one matmul per dx column tap.
        lhs = jnp.concatenate([ap[0:H], ap[1:H + 1], ap[2:H + 2]], axis=-1)
        k = lhs.shape[-1]                          # 3 * Cin
        cout = w_ref.shape[-1]
        lhs = lhs.reshape(H * Wp, k).astype(jnp.bfloat16)

        acc = None
        for dx in range(3):
            p = jnp.dot(lhs, w_ref[dx], preferred_element_type=jnp.float32)
            # Single small window extraction per dx (valid output columns).
            p = p.reshape(H, Wp, cout)[:, dx:dx + W, :]
            acc = p if acc is None else acc + p

        y = (acc + b_ref[...]).reshape(H * W, cout)        # (H*W, Cout) f32

        # InstanceNorm (biased variance, two-pass in f32: no E[x^2]-E[x]^2
        # cancellation), then GELU.
        mu = jnp.mean(y, axis=0, keepdims=True)
        yc = y - mu
        var = jnp.mean(yc * yc, axis=0, keepdims=True)
        g = _gelu_tanh(yc * jax.lax.rsqrt(var + EPS))
        return g.reshape(H, W, cout)

    def write_padded(g, pad_ref):
        # Replicate-pad g (H, W, C) into pad_ref (H+2, Wp, C) entirely in
        # VMEM: the intermediate activation never round-trips through HBM.
        gh = jnp.concatenate([g[0:1], g, g[H - 1:H]], axis=0)     # height pad
        pad_ref[:, 1:W + 1, :] = gh
        pad_ref[:, 0:1, :] = gh[:, 0:1, :]                        # left col
        pad_ref[:, W + 1:W + 2, :] = gh[:, W - 1:W, :]            # right col
        if Wp > W + 2:                                            # unused tail
            pad_ref[:, W + 2:, :] = jnp.zeros(
                (H + 2, Wp - (W + 2), gh.shape[-1]), jnp.float32)
        return pad_ref[...]

    ap0 = xp_ref[0].astype(jnp.float32)                  # (H+2, Wp, C0)
    g1 = conv_in_gelu(ap0, w1_ref, b1_ref)               # (H, W, C1)
    g2 = conv_in_gelu(write_padded(g1, pad1_ref), w2_ref, b2_ref)
    g3 = conv_in_gelu(write_padded(g2, pad2_ref), w3_ref, b3_ref)

    c3 = g3.shape[-1]
    scale = film_ref[0, 0:1, :].reshape(1, 1, c3)        # 1 + gamma
    shift = film_ref[0, 1:2, :].reshape(1, 1, c3)        # beta
    o_ref[0] = (g3 * scale + shift).astype(o_ref.dtype)


# ----------------------------------------------------------------------------
# InputConv forward (NCHW in / NCHW out, matching the PyTorch module)
# ----------------------------------------------------------------------------
def input_conv_fwd(params, x, cond):
    N, cin, H, W = x.shape
    c1 = params['c1_w'].shape[-1]
    c2 = params['c2_w'].shape[-1]
    c3 = params['c3_w'].shape[-1]
    Wp = _ceil_to(W + 2, 8)        # sublane-friendly padded width

    # Whole-image-in-VMEM fast path only (see TODO at top of file).
    vmem_est = 4 * ((H + 2) * Wp * (cin + c1 + c2)
                    + 8 * H * W * max(c1, c2, c3))
    assert vmem_est < 8 * 1024 * 1024, "feature map too large for fused kernel"

    # NCHW -> NHWC; replicate-pad the *raw* (true-channel) input once in XLA —
    # tiny — and zero-pad the width to Wp so in-kernel reshapes stay aligned.
    xn = jnp.transpose(x, (0, 2, 3, 1)).astype(jnp.float32)
    xp = jnp.pad(xn, ((0, 0), (1, 1), (1, 1), (0, 0)), mode='edge')
    if Wp > W + 2:
        xp = jnp.pad(xp, ((0, 0), (0, 0), (0, Wp - (W + 2)), (0, 0)))

    def prep_w(w):      # (3, 3, Cin, Cout) -> (3_dx, 3*Cin, Cout) bf16
        kh, kw, ci, co = w.shape
        return jnp.stack([w[:, dx].reshape(kh * ci, co) for dx in range(kw)],
                         axis=0).astype(jnp.bfloat16)

    def prep_b(b):
        return b.reshape(1, 1, -1).astype(jnp.float32)

    # TODO(synk): ConditionInjector is not defined in the reference source;
    # implemented as FiLM: Linear(1024 -> 2*C), out = act * (1+gamma) + beta.
    # The M=batch matmul stays in XLA (it would under-fill the MXU); the FiLM
    # apply itself is fused into the Pallas kernel epilogue.
    gb = (cond.astype(jnp.float32) @ params['inj_w'].astype(jnp.float32)
          + params['inj_b'].astype(jnp.float32))
    film = jnp.stack([1.0 + gb[:, :c3], gb[:, c3:]], axis=1)      # (N, 2, c3)

    kernel = functools.partial(_fused_input_conv_kernel, H=H, W=W, Wp=Wp)
    out = pl.pallas_call(
        kernel,
        grid=(N,),
        in_specs=[
            pl.BlockSpec((1, H + 2, Wp, cin), lambda n: (n, 0, 0, 0)),
            pl.BlockSpec((3, 3 * cin, c1), lambda n: (0, 0, 0)),
            pl.BlockSpec((1, 1, c1), lambda n: (0, 0, 0)),
            pl.BlockSpec((3, 3 * c1, c2), lambda n: (0, 0, 0)),
            pl.BlockSpec((1, 1, c2), lambda n: (0, 0, 0)),
            pl.BlockSpec((3, 3 * c2, c3), lambda n: (0, 0, 0)),
            pl.BlockSpec((1, 1, c3), lambda n: (0, 0, 0)),
            pl.BlockSpec((1, 2, c3), lambda n: (n, 0, 0)),
        ],
        out_specs=pl.BlockSpec((1, H, W, c3), lambda n: (n, 0, 0, 0)),
        out_shape=jax.ShapeDtypeStruct((N, H, W, c3), jnp.float32),
        scratch_shapes=[
            pltpu.VMEM((H + 2, Wp, c1), jnp.float32),   # padded act, layer 1->2
            pltpu.VMEM((H + 2, Wp, c2), jnp.float32),   # padded act, layer 2->3
        ],
        compiler_params=pltpu.CompilerParams(
            dimension_semantics=("parallel",)),          # batch across TCs
    )(xp,
      prep_w(params['c1_w']), prep_b(params['c1_b']),
      prep_w(params['c2_w']), prep_b(params['c2_b']),
      prep_w(params['c3_w']), prep_b(params['c3_b']),
      film)
    return jnp.transpose(out, (0, 3, 1, 2))              # NHWC -> NCHW


# ----------------------------------------------------------------------------
# Pure-JAX f32 reference (same tanh-GELU) for a sanity check
# ----------------------------------------------------------------------------
def _reference(params, x, cond):
    N, cin, H, W = x.shape
    h = jnp.transpose(x, (0, 2, 3, 1)).astype(jnp.float32)

    def conv3(h, w, b):
        hp = jnp.pad(h, ((0, 0), (1, 1), (1, 1), (0, 0)), mode='edge')
        out = b
        for dy in range(3):
            for dx in range(3):
                out = out + jnp.einsum('nhwc,cd->nhwd',
                                       hp[:, dy:dy + H, dx:dx + W, :],
                                       w[dy, dx])
        return out

    def inorm_gelu(h):
        m = h.mean(axis=(1, 2), keepdims=True)
        v = h.var(axis=(1, 2), keepdims=True)
        return _gelu_tanh((h - m) * jax.lax.rsqrt(v + EPS))

    h = inorm_gelu(conv3(h, params['c1_w'], params['c1_b']))
    h = inorm_gelu(conv3(h, params['c2_w'], params['c2_b']))
    h = inorm_gelu(conv3(h, params['c3_w'], params['c3_b']))
    gb = cond @ params['inj_w'] + params['inj_b']
    c3 = params['c3_w'].shape[-1]
    h = h * (1.0 + gb[:, :c3])[:, None, None, :] + gb[:, c3:][:, None, None, :]
    return jnp.transpose(h, (0, 3, 1, 2))


# ----------------------------------------------------------------------------
# Deterministic synthetic parameters (no checkpoint)
# ----------------------------------------------------------------------------
def build_params(key, channels=(1, 8, 12, 16), cond_dim=1024):
    ks = jax.random.split(key, 7)
    c0, c1, c2, c3 = channels

    def conv_w(k, ci, co):
        return jax.random.normal(k, (3, 3, ci, co), jnp.float32) / math.sqrt(9 * ci)

    return {
        'c1_w': conv_w(ks[0], c0, c1),
        'c1_b': 0.1 * jax.random.normal(ks[1], (c1,), jnp.float32),
        'c2_w': conv_w(ks[2], c1, c2),
        'c2_b': 0.1 * jax.random.normal(ks[3], (c2,), jnp.float32),
        'c3_w': conv_w(ks[4], c2, c3),
        'c3_b': 0.1 * jax.random.normal(ks[5], (c3,), jnp.float32),
        'inj_w': jax.random.normal(ks[6], (cond_dim, 2 * c3), jnp.float32)
                 / math.sqrt(cond_dim),
        'inj_b': jnp.zeros((2 * c3,), jnp.float32),
    }


# ----------------------------------------------------------------------------
if __name__ == "__main__":
    N, H, W = 2, 16, 16
    CHANNELS = (1, 8, 12, 16)
    COND_DIM = 1024               # fixed by ConditionInjector(1024, channels[3])

    root = jax.random.PRNGKey(0)
    kp, kx, kc = jax.random.split(root, 3)
    params = build_params(kp, CHANNELS, COND_DIM)
    x = jax.random.normal(kx, (N, CHANNELS[0], H, W), jnp.float32)
    cond = jax.random.normal(kc, (N, COND_DIM), jnp.float32)

    fwd = jax.jit(input_conv_fwd)
    out = jax.block_until_ready(fwd(params, x, cond))

    assert out.shape == (N, CHANNELS[3], H, W), out.shape
    assert bool(jnp.all(jnp.isfinite(out)))

    ref = _reference(params, x, cond)
    err = float(jnp.max(jnp.abs(out.astype(jnp.float32) - ref)))
    assert err < 0.5, f"max abs diff vs reference too large: {err}"

    print("KERNEL_OK")
</pallas_src>

<mosaic_0001>
module attributes {stable_mosaic.version = 11 : i64} {
  func.func @_fused_input_conv_kernel(%arg0: i32, %arg1: memref<1x18x24x1xf32, #tpu.memory_space<vmem>>, %arg2: memref<3x3x8xbf16, #tpu.memory_space<vmem>>, %arg3: memref<1x1x8xf32, #tpu.memory_space<vmem>>, %arg4: memref<3x24x12xbf16, #tpu.memory_space<vmem>>, %arg5: memref<1x1x12xf32, #tpu.memory_space<vmem>>, %arg6: memref<3x36x16xbf16, #tpu.memory_space<vmem>>, %arg7: memref<1x1x16xf32, #tpu.memory_space<vmem>>, %arg8: memref<1x2x16xf32, #tpu.memory_space<vmem>>, %arg9: memref<1x16x16x16xf32, #tpu.memory_space<vmem>>, %arg10: memref<18x24x8xf32, #tpu.memory_space<vmem>>, %arg11: memref<18x24x12xf32, #tpu.memory_space<vmem>>) attributes {dimension_semantics = [#tpu.dimension_semantics<parallel>], iteration_bounds = array<i64: 2>, scalar_prefetch = 0 : i64, scratch_operands = 2 : i64, tpu.core_type = #tpu.core_type<tc>, window_params = [{transform_indices = @transform_0, window_bounds = array<i64: 1, 18, 24, 1>}, {pipeline_mode = #tpu.pipeline_mode<synchronous>, transform_indices = @transform_1, window_bounds = array<i64: 3, 3, 8>}, {pipeline_mode = #tpu.pipeline_mode<synchronous>, transform_indices = @transform_2, window_bounds = array<i64: 1, 1, 8>}, {pipeline_mode = #tpu.pipeline_mode<synchronous>, transform_indices = @transform_3, window_bounds = array<i64: 3, 24, 12>}, {pipeline_mode = #tpu.pipeline_mode<synchronous>, transform_indices = @transform_4, window_bounds = array<i64: 1, 1, 12>}, {pipeline_mode = #tpu.pipeline_mode<synchronous>, transform_indices = @transform_5, window_bounds = array<i64: 3, 36, 16>}, {pipeline_mode = #tpu.pipeline_mode<synchronous>, transform_indices = @transform_6, window_bounds = array<i64: 1, 1, 16>}, {transform_indices = @transform_7, window_bounds = array<i64: 1, 2, 16>}, {transform_indices = @transform_8, window_bounds = array<i64: 1, 16, 16, 16>}]} {
    %c0 = arith.constant 0 : index
    %c0_0 = arith.constant 0 : index
    %c0_1 = arith.constant 0 : index
    %c0_2 = arith.constant 0 : index
    %0 = vector.load %arg1[%c0, %c0_0, %c0_1, %c0_2] : memref<1x18x24x1xf32, #tpu.memory_space<vmem>>, vector<1x18x24x1xf32>
    %1 = vector.shape_cast %0 : vector<1x18x24x1xf32> to vector<18x24x1xf32>
    %2 = vector.extract_strided_slice %1 {offsets = [0, 0, 0], sizes = [16, 24, 1], strides = [1, 1, 1]} : vector<18x24x1xf32> to vector<16x24x1xf32>
    %3 = vector.extract_strided_slice %1 {offsets = [1, 0, 0], sizes = [16, 24, 1], strides = [1, 1, 1]} : vector<18x24x1xf32> to vector<16x24x1xf32>
    %4 = vector.extract_strided_slice %1 {offsets = [2, 0, 0], sizes = [16, 24, 1], strides = [1, 1, 1]} : vector<18x24x1xf32> to vector<16x24x1xf32>
    %5 = tpu.concatenate %2, %3, %4 in 2 : vector<16x24x1xf32>, vector<16x24x1xf32>, vector<16x24x1xf32> -> vector<16x24x3xf32>
    %6 = vector.shape_cast %5 : vector<16x24x3xf32> to vector<384x3xf32>
    %7 = arith.truncf %6 : vector<384x3xf32> to vector<384x3xbf16>
    %c0_3 = arith.constant 0 : index
    %c0_4 = arith.constant 0 : index
    %c0_5 = arith.constant 0 : index
    %8 = vector.load %arg2[%c0_3, %c0_4, %c0_5] : memref<3x3x8xbf16, #tpu.memory_space<vmem>>, vector<1x3x8xbf16>
    %9 = vector.shape_cast %8 : vector<1x3x8xbf16> to vector<3x8xbf16>
    %cst = arith.constant dense<0.000000e+00> : vector<384x8xf32>
    %10 = tpu.matmul %7, %9, %cst {dimension_numbers = #tpu.dot_dimension_numbers<[1], [0], [0], [1], [0, 0, 1, 1], [], []>} : vector<384x3xbf16>, vector<3x8xbf16>, vector<384x8xf32> -> vector<384x8xf32>
    %11 = vector.shape_cast %10 : vector<384x8xf32> to vector<16x24x8xf32>
    %12 = vector.extract_strided_slice %11 {offsets = [0, 0, 0], sizes = [16, 16, 8], strides = [1, 1, 1]} : vector<16x24x8xf32> to vector<16x16x8xf32>
    %c1 = arith.constant 1 : index
    %c0_6 = arith.constant 0 : index
    %c0_7 = arith.constant 0 : index
    %13 = vector.load %arg2[%c1, %c0_6, %c0_7] : memref<3x3x8xbf16, #tpu.memory_space<vmem>>, vector<1x3x8xbf16>
    %14 = vector.shape_cast %13 : vector<1x3x8xbf16> to vector<3x8xbf16>
    %cst_8 = arith.constant dense<0.000000e+00> : vector<384x8xf32>
    %15 = tpu.matmul %7, %14, %cst_8 {dimension_numbers = #tpu.dot_dimension_numbers<[1], [0], [0], [1], [0, 0, 1, 1], [], []>} : vector<384x3xbf16>, vector<3x8xbf16>, vector<384x8xf32> -> vector<384x8xf32>
    %16 = vector.shape_cast %15 : vector<384x8xf32> to vector<16x24x8xf32>
    %17 = vector.extract_strided_slice %16 {offsets = [0, 1, 0], sizes = [16, 16, 8], strides = [1, 1, 1]} : vector<16x24x8xf32> to vector<16x16x8xf32>
    %18 = arith.addf %12, %17 : vector<16x16x8xf32>
    %c2 = arith.constant 2 : index
    %c0_9 = arith.constant 0 : index
    %c0_10 = arith.constant 0 : index
    %19 = vector.load %arg2[%c2, %c0_9, %c0_10] : memref<3x3x8xbf16, #tpu.memory_space<vmem>>, vector<1x3x8xbf16>
    %20 = vector.shape_cast %19 : vector<1x3x8xbf16> to vector<3x8xbf16>
    %cst_11 = arith.constant dense<0.000000e+00> : vector<384x8xf32>
    %21 = tpu.matmul %7, %20, %cst_11 {dimension_numbers = #tpu.dot_dimension_numbers<[1], [0], [0], [1], [0, 0, 1, 1], [], []>} : vector<384x3xbf16>, vector<3x8xbf16>, vector<384x8xf32> -> vector<384x8xf32>
    %22 = vector.shape_cast %21 : vector<384x8xf32> to vector<16x24x8xf32>
    %23 = vector.extract_strided_slice %22 {offsets = [0, 2, 0], sizes = [16, 16, 8], strides = [1, 1, 1]} : vector<16x24x8xf32> to vector<16x16x8xf32>
    %24 = arith.addf %18, %23 : vector<16x16x8xf32>
    %c0_12 = arith.constant 0 : index
    %c0_13 = arith.constant 0 : index
    %c0_14 = arith.constant 0 : index
    %25 = vector.load %arg3[%c0_12, %c0_13, %c0_14] : memref<1x1x8xf32, #tpu.memory_space<vmem>>, vector<1x1x8xf32>
    %26 = vector.broadcast %25 : vector<1x1x8xf32> to vector<16x16x8xf32>
    %27 = arith.addf %24, %26 : vector<16x16x8xf32>
    %28 = vector.shape_cast %27 : vector<16x16x8xf32> to vector<256x8xf32>
    %cst_15 = arith.constant dense<0.000000e+00> : vector<8xf32>
    %29 = vector.multi_reduction <add>, %28, %cst_15 [0] : vector<256x8xf32> to vector<8xf32>
    %30 = vector.shape_cast %29 : vector<8xf32> to vector<1x8xf32>
    %cst_16 = arith.constant 2.560000e+02 : f32
    %31 = vector.broadcast %cst_16 : f32 to vector<1x8xf32>
    %32 = arith.divf %30, %31 : vector<1x8xf32>
    %33 = vector.broadcast %32 : vector<1x8xf32> to vector<256x8xf32>
    %34 = arith.subf %28, %33 : vector<256x8xf32>
    %35 = arith.mulf %34, %34 : vector<256x8xf32>
    %cst_17 = arith.constant dense<0.000000e+00> : vector<8xf32>
    %36 = vector.multi_reduction <add>, %35, %cst_17 [0] : vector<256x8xf32> to vector<8xf32>
    %37 = vector.shape_cast %36 : vector<8xf32> to vector<1x8xf32>
    %cst_18 = arith.constant 2.560000e+02 : f32
    %38 = vector.broadcast %cst_18 : f32 to vector<1x8xf32>
    %39 = arith.divf %37, %38 : vector<1x8xf32>
    %cst_19 = arith.constant 9.99999974E-6 : f32
    %40 = vector.broadcast %cst_19 : f32 to vector<1x8xf32>
    %41 = arith.addf %39, %40 : vector<1x8xf32>
    %42 = math.rsqrt %41 : vector<1x8xf32>
    %43 = vector.broadcast %42 : vector<1x8xf32> to vector<256x8xf32>
    %44 = arith.mulf %34, %43 : vector<256x8xf32>
    %cst_20 = arith.constant 5.000000e-01 : f32
    %45 = vector.broadcast %cst_20 : f32 to vector<256x8xf32>
    %46 = arith.mulf %45, %44 : vector<256x8xf32>
    %cst_21 = arith.constant 4.471500e-02 : f32
    %47 = vector.broadcast %cst_21 : f32 to vector<256x8xf32>
    %48 = arith.mulf %47, %44 : vector<256x8xf32>
    %49 = arith.mulf %48, %44 : vector<256x8xf32>
    %50 = arith.mulf %49, %44 : vector<256x8xf32>
    %51 = arith.addf %44, %50 : vector<256x8xf32>
    %cst_22 = arith.constant 0.797884583 : f32
    %52 = vector.broadcast %cst_22 : f32 to vector<256x8xf32>
    %53 = arith.mulf %52, %51 : vector<256x8xf32>
    %54 = math.tanh %53 : vector<256x8xf32>
    %cst_23 = arith.constant 1.000000e+00 : f32
    %55 = vector.broadcast %cst_23 : f32 to vector<256x8xf32>
    %56 = arith.addf %55, %54 : vector<256x8xf32>
    %57 = arith.mulf %46, %56 : vector<256x8xf32>
    %58 = vector.shape_cast %57 : vector<256x8xf32> to vector<16x16x8xf32>
    %59 = vector.extract_strided_slice %58 {offsets = [0, 0, 0], sizes = [1, 16, 8], strides = [1, 1, 1]} : vector<16x16x8xf32> to vector<1x16x8xf32>
    %60 = vector.extract_strided_slice %58 {offsets = [15, 0, 0], sizes = [1, 16, 8], strides = [1, 1, 1]} : vector<16x16x8xf32> to vector<1x16x8xf32>
    %61 = tpu.concatenate %59, %58, %60 in 0 : vector<1x16x8xf32>, vector<16x16x8xf32>, vector<1x16x8xf32> -> vector<18x16x8xf32>
    %c0_24 = arith.constant 0 : index
    %c1_25 = arith.constant 1 : index
    %c0_26 = arith.constant 0 : index
    %62 = vector.load %arg10[%c0_24, %c1_25, %c0_26] : memref<18x24x8xf32, #tpu.memory_space<vmem>>, vector<18x16x8xf32>
    tpu.vector_store %arg10[%c0_24, %c1_25, %c0_26], %61 {strides = array<i32>} : memref<18x24x8xf32, #tpu.memory_space<vmem>>, vector<18x16x8xf32>,
    %63 = vector.extract_strided_slice %61 {offsets = [0, 0, 0], sizes = [18, 1, 8], strides = [1, 1, 1]} : vector<18x16x8xf32> to vector<18x1x8xf32>
    %c0_27 = arith.constant 0 : index
    %c0_28 = arith.constant 0 : index
    %c0_29 = arith.constant 0 : index
    %64 = vector.load %arg10[%c0_27, %c0_28, %c0_29] : memref<18x24x8xf32, #tpu.memory_space<vmem>>, vector<18x1x8xf32>
    tpu.vector_store %arg10[%c0_27, %c0_28, %c0_29], %63 {strides = array<i32>} : memref<18x24x8xf32, #tpu.memory_space<vmem>>, vector<18x1x8xf32>,
    %65 = vector.extract_strided_slice %61 {offsets = [0, 15, 0], sizes = [18, 1, 8], strides = [1, 1, 1]} : vector<18x16x8xf32> to vector<18x1x8xf32>
    %c0_30 = arith.constant 0 : index
    %c17 = arith.constant 17 : index
    %c0_31 = arith.constant 0 : index
    %66 = vector.load %arg10[%c0_30, %c17, %c0_31] : memref<18x24x8xf32, #tpu.memory_space<vmem>>, vector<18x1x8xf32>
    tpu.vector_store %arg10[%c0_30, %c17, %c0_31], %65 {strides = array<i32>} : memref<18x24x8xf32, #tpu.memory_space<vmem>>, vector<18x1x8xf32>,
    %cst_32 = arith.constant 0.000000e+00 : f32
    %67 = vector.broadcast %cst_32 : f32 to vector<18x6x8xf32>
    %c0_33 = arith.constant 0 : index
    %c18 = arith.constant 18 : index
    %c0_34 = arith.constant 0 : index
    %68 = vector.load %arg10[%c0_33, %c18, %c0_34] : memref<18x24x8xf32, #tpu.memory_space<vmem>>, vector<18x6x8xf32>
    tpu.vector_store %arg10[%c0_33, %c18, %c0_34], %67 {strides = array<i32>} : memref<18x24x8xf32, #tpu.memory_space<vmem>>, vector<18x6x8xf32>,
    %c0_35 = arith.constant 0 : index
    %c0_36 = arith.constant 0 : index
    %c0_37 = arith.constant 0 : index
    %69 = vector.load %arg10[%c0_35, %c0_36, %c0_37] : memref<18x24x8xf32, #tpu.memory_space<vmem>>, vector<18x24x8xf32>
    %70 = vector.extract_strided_slice %69 {offsets = [0, 0, 0], sizes = [16, 24, 8], strides = [1, 1, 1]} : vector<18x24x8xf32> to vector<16x24x8xf32>
    %71 = vector.extract_strided_slice %69 {offsets = [1, 0, 0], sizes = [16, 24, 8], strides = [1, 1, 1]} : vector<18x24x8xf32> to vector<16x24x8xf32>
    %72 = vector.extract_strided_slice %69 {offsets = [2, 0, 0], sizes = [16, 24, 8], strides = [1, 1, 1]} : vector<18x24x8xf32> to vector<16x24x8xf32>
    %73 = tpu.concatenate %70, %71, %72 in 2 : vector<16x24x8xf32>, vector<16x24x8xf32>, vector<16x24x8xf32> -> vector<16x24x24xf32>
    %74 = vector.shape_cast %73 : vector<16x24x24xf32> to vector<384x24xf32>
    %75 = arith.truncf %74 : vector<384x24xf32> to vector<384x24xbf16>
    %c0_38 = arith.constant 0 : index
    %c0_39 = arith.constant 0 : index
    %c0_40 = arith.constant 0 : index
    %76 = vector.load %arg4[%c0_38, %c0_39, %c0_40] : memref<3x24x12xbf16, #tpu.memory_space<vmem>>, vector<1x24x12xbf16>
    %77 = vector.shape_cast %76 : vector<1x24x12xbf16> to vector<24x12xbf16>
    %cst_41 = arith.constant dense<0.000000e+00> : vector<384x12xf32>
    %78 = tpu.matmul %75, %77, %cst_41 {dimension_numbers = #tpu.dot_dimension_numbers<[1], [0], [0], [1], [0, 0, 1, 1], [], []>} : vector<384x24xbf16>, vector<24x12xbf16>, vector<384x12xf32> -> vector<384x12xf32>
    %79 = vector.shape_cast %78 : vector<384x12xf32> to vector<16x24x12xf32>
    %80 = vector.extract_strided_slice %79 {offsets = [0, 0, 0], sizes = [16, 16, 12], strides = [1, 1, 1]} : vector<16x24x12xf32> to vector<16x16x12xf32>
    %c1_42 = arith.constant 1 : index
    %c0_43 = arith.constant 0 : index
    %c0_44 = arith.constant 0 : index
    %81 = vector.load %arg4[%c1_42, %c0_43, %c0_44] : memref<3x24x12xbf16, #tpu.memory_space<vmem>>, vector<1x24x12xbf16>
    %82 = vector.shape_cast %81 : vector<1x24x12xbf16> to vector<24x12xbf16>
    %cst_45 = arith.constant dense<0.000000e+00> : vector<384x12xf32>
    %83 = tpu.matmul %75, %82, %cst_45 {dimension_numbers = #tpu.dot_dimension_numbers<[1], [0], [0], [1], [0, 0, 1, 1], [], []>} : vector<384x24xbf16>, vector<24x12xbf16>, vector<384x12xf32> -> vector<384x12xf32>
    %84 = vector.shape_cast %83 : vector<384x12xf32> to vector<16x24x12xf32>
    %85 = vector.extract_strided_slice %84 {offsets = [0, 1, 0], sizes = [16, 16, 12], strides = [1, 1, 1]} : vector<16x24x12xf32> to vector<16x16x12xf32>
    %86 = arith.addf %80, %85 : vector<16x16x12xf32>
    %c2_46 = arith.constant 2 : index
    %c0_47 = arith.constant 0 : index
    %c0_48 = arith.constant 0 : index
    %87 = vector.load %arg4[%c2_46, %c0_47, %c0_48] : memref<3x24x12xbf16, #tpu.memory_space<vmem>>, vector<1x24x12xbf16>
    %88 = vector.shape_cast %87 : vector<1x24x12xbf16> to vector<24x12xbf16>
    %cst_49 = arith.constant dense<0.000000e+00> : vector<384x12xf32>
    %89 = tpu.matmul %75, %88, %cst_49 {dimension_numbers = #tpu.dot_dimension_numbers<[1], [0], [0], [1], [0, 0, 1, 1], [], []>} : vector<384x24xbf16>, vector<24x12xbf16>, vector<384x12xf32> -> vector<384x12xf32>
    %90 = vector.shape_cast %89 : vector<384x12xf32> to vector<16x24x12xf32>
    %91 = vector.extract_strided_slice %90 {offsets = [0, 2, 0], sizes = [16, 16, 12], strides = [1, 1, 1]} : vector<16x24x12xf32> to vector<16x16x12xf32>
    %92 = arith.addf %86, %91 : vector<16x16x12xf32>
    %c0_50 = arith.constant 0 : index
    %c0_51 = arith.constant 0 : index
    %c0_52 = arith.constant 0 : index
    %93 = vector.load %arg5[%c0_50, %c0_51, %c0_52] : memref<1x1x12xf32, #tpu.memory_space<vmem>>, vector<1x1x12xf32>
    %94 = vector.broadcast %93 : vector<1x1x12xf32> to vector<16x16x12xf32>
    %95 = arith.addf %92, %94 : vector<16x16x12xf32>
    %96 = vector.shape_cast %95 : vector<16x16x12xf32> to vector<256x12xf32>
    %cst_53 = arith.constant dense<0.000000e+00> : vector<12xf32>
    %97 = vector.multi_reduction <add>, %96, %cst_53 [0] : vector<256x12xf32> to vector<12xf32>
    %98 = vector.shape_cast %97 : vector<12xf32> to vector<1x12xf32>
    %cst_54 = arith.constant 2.560000e+02 : f32
    %99 = vector.broadcast %cst_54 : f32 to vector<1x12xf32>
    %100 = arith.divf %98, %99 : vector<1x12xf32>
    %101 = vector.broadcast %100 : vector<1x12xf32> to vector<256x12xf32>
    %102 = arith.subf %96, %101 : vector<256x12xf32>
    %103 = arith.mulf %102, %102 : vector<256x12xf32>
    %cst_55 = arith.constant dense<0.000000e+00> : vector<12xf32>
    %104 = vector.multi_reduction <add>, %103, %cst_55 [0] : vector<256x12xf32> to vector<12xf32>
    %105 = vector.shape_cast %104 : vector<12xf32> to vector<1x12xf32>
    %cst_56 = arith.constant 2.560000e+02 : f32
    %106 = vector.broadcast %cst_56 : f32 to vector<1x12xf32>
    %107 = arith.divf %105, %106 : vector<1x12xf32>
    %cst_57 = arith.constant 9.99999974E-6 : f32
    %108 = vector.broadcast %cst_57 : f32 to vector<1x12xf32>
    %109 = arith.addf %107, %108 : vector<1x12xf32>
    %110 = math.rsqrt %109 : vector<1x12xf32>
    %111 = vector.broadcast %110 : vector<1x12xf32> to vector<256x12xf32>
    %112 = arith.mulf %102, %111 : vector<256x12xf32>
    %cst_58 = arith.constant 5.000000e-01 : f32
    %113 = vector.broadcast %cst_58 : f32 to vector<256x12xf32>
    %114 = arith.mulf %113, %112 : vector<256x12xf32>
    %cst_59 = arith.constant 4.471500e-02 : f32
    %115 = vector.broadcast %cst_59 : f32 to vector<256x12xf32>
    %116 = arith.mulf %115, %112 : vector<256x12xf32>
    %117 = arith.mulf %116, %112 : vector<256x12xf32>
    %118 = arith.mulf %117, %112 : vector<256x12xf32>
    %119 = arith.addf %112, %118 : vector<256x12xf32>
    %cst_60 = arith.constant 0.797884583 : f32
    %120 = vector.broadcast %cst_60 : f32 to vector<256x12xf32>
    %121 = arith.mulf %120, %119 : vector<256x12xf32>
    %122 = math.tanh %121 : vector<256x12xf32>
    %cst_61 = arith.constant 1.000000e+00 : f32
    %123 = vector.broadcast %cst_61 : f32 to vector<256x12xf32>
    %124 = arith.addf %123, %122 : vector<256x12xf32>
    %125 = arith.mulf %114, %124 : vector<256x12xf32>
    %126 = vector.shape_cast %125 : vector<256x12xf32> to vector<16x16x12xf32>
    %127 = vector.extract_strided_slice %126 {offsets = [0, 0, 0], sizes = [1, 16, 12], strides = [1, 1, 1]} : vector<16x16x12xf32> to vector<1x16x12xf32>
    %128 = vector.extract_strided_slice %126 {offsets = [15, 0, 0], sizes = [1, 16, 12], strides = [1, 1, 1]} : vector<16x16x12xf32> to vector<1x16x12xf32>
    %129 = tpu.concatenate %127, %126, %128 in 0 : vector<1x16x12xf32>, vector<16x16x12xf32>, vector<1x16x12xf32> -> vector<18x16x12xf32>
    %c0_62 = arith.constant 0 : index
    %c1_63 = arith.constant 1 : index
    %c0_64 = arith.constant 0 : index
    %130 = vector.load %arg11[%c0_62, %c1_63, %c0_64] : memref<18x24x12xf32, #tpu.memory_space<vmem>>, vector<18x16x12xf32>
    tpu.vector_store %arg11[%c0_62, %c1_63, %c0_64], %129 {strides = array<i32>} : memref<18x24x12xf32, #tpu.memory_space<vmem>>, vector<18x16x12xf32>,
    %131 = vector.extract_strided_slice %129 {offsets = [0, 0, 0], sizes = [18, 1, 12], strides = [1, 1, 1]} : vector<18x16x12xf32> to vector<18x1x12xf32>
    %c0_65 = arith.constant 0 : index
    %c0_66 = arith.constant 0 : index
    %c0_67 = arith.constant 0 : index
    %132 = vector.load %arg11[%c0_65, %c0_66, %c0_67] : memref<18x24x12xf32, #tpu.memory_space<vmem>>, vector<18x1x12xf32>
    tpu.vector_store %arg11[%c0_65, %c0_66, %c0_67], %131 {strides = array<i32>} : memref<18x24x12xf32, #tpu.memory_space<vmem>>, vector<18x1x12xf32>,
    %133 = vector.extract_strided_slice %129 {offsets = [0, 15, 0], sizes = [18, 1, 12], strides = [1, 1, 1]} : vector<18x16x12xf32> to vector<18x1x12xf32>
    %c0_68 = arith.constant 0 : index
    %c17_69 = arith.constant 17 : index
    %c0_70 = arith.constant 0 : index
    %134 = vector.load %arg11[%c0_68, %c17_69, %c0_70] : memref<18x24x12xf32, #tpu.memory_space<vmem>>, vector<18x1x12xf32>
    tpu.vector_store %arg11[%c0_68, %c17_69, %c0_70], %133 {strides = array<i32>} : memref<18x24x12xf32, #tpu.memory_space<vmem>>, vector<18x1x12xf32>,
    %cst_71 = arith.constant 0.000000e+00 : f32
    %135 = vector.broadcast %cst_71 : f32 to vector<18x6x12xf32>
    %c0_72 = arith.constant 0 : index
    %c18_73 = arith.constant 18 : index
    %c0_74 = arith.constant 0 : index
    %136 = vector.load %arg11[%c0_72, %c18_73, %c0_74] : memref<18x24x12xf32, #tpu.memory_space<vmem>>, vector<18x6x12xf32>
    tpu.vector_store %arg11[%c0_72, %c18_73, %c0_74], %135 {strides = array<i32>} : memref<18x24x12xf32, #tpu.memory_space<vmem>>, vector<18x6x12xf32>,
    %c0_75 = arith.constant 0 : index
    %c0_76 = arith.constant 0 : index
    %c0_77 = arith.constant 0 : index
    %137 = vector.load %arg11[%c0_75, %c0_76, %c0_77] : memref<18x24x12xf32, #tpu.memory_space<vmem>>, vector<18x24x12xf32>
    %138 = vector.extract_strided_slice %137 {offsets = [0, 0, 0], sizes = [16, 24, 12], strides = [1, 1, 1]} : vector<18x24x12xf32> to vector<16x24x12xf32>
    %139 = vector.extract_strided_slice %137 {offsets = [1, 0, 0], sizes = [16, 24, 12], strides = [1, 1, 1]} : vector<18x24x12xf32> to vector<16x24x12xf32>
    %140 = vector.extract_strided_slice %137 {offsets = [2, 0, 0], sizes = [16, 24, 12], strides = [1, 1, 1]} : vector<18x24x12xf32> to vector<16x24x12xf32>
    %141 = tpu.concatenate %138, %139, %140 in 2 : vector<16x24x12xf32>, vector<16x24x12xf32>, vector<16x24x12xf32> -> vector<16x24x36xf32>
    %142 = vector.shape_cast %141 : vector<16x24x36xf32> to vector<384x36xf32>
    %143 = arith.truncf %142 : vector<384x36xf32> to vector<384x36xbf16>
    %c0_78 = arith.constant 0 : index
    %c0_79 = arith.constant 0 : index
    %c0_80 = arith.constant 0 : index
    %144 = vector.load %arg6[%c0_78, %c0_79, %c0_80] : memref<3x36x16xbf16, #tpu.memory_space<vmem>>, vector<1x36x16xbf16>
    %145 = vector.shape_cast %144 : vector<1x36x16xbf16> to vector<36x16xbf16>
    %cst_81 = arith.constant dense<0.000000e+00> : vector<384x16xf32>
    %146 = tpu.matmul %143, %145, %cst_81 {dimension_numbers = #tpu.dot_dimension_numbers<[1], [0], [0], [1], [0, 0, 1, 1], [], []>} : vector<384x36xbf16>, vector<36x16xbf16>, vector<384x16xf32> -> vector<384x16xf32>
    %147 = vector.shape_cast %146 : vector<384x16xf32> to vector<16x24x16xf32>
    %148 = vector.extract_strided_slice %147 {offsets = [0, 0, 0], sizes = [16, 16, 16], strides = [1, 1, 1]} : vector<16x24x16xf32> to vector<16x16x16xf32>
    %c1_82 = arith.constant 1 : index
    %c0_83 = arith.constant 0 : index
    %c0_84 = arith.constant 0 : index
    %149 = vector.load %arg6[%c1_82, %c0_83, %c0_84] : memref<3x36x16xbf16, #tpu.memory_space<vmem>>, vector<1x36x16xbf16>
    %150 = vector.shape_cast %149 : vector<1x36x16xbf16> to vector<36x16xbf16>
    %cst_85 = arith.constant dense<0.000000e+00> : vector<384x16xf32>
    %151 = tpu.matmul %143, %150, %cst_85 {dimension_numbers = #tpu.dot_dimension_numbers<[1], [0], [0], [1], [0, 0, 1, 1], [], []>} : vector<384x36xbf16>, vector<36x16xbf16>, vector<384x16xf32> -> vector<384x16xf32>
    %152 = vector.shape_cast %151 : vector<384x16xf32> to vector<16x24x16xf32>
    %153 = vector.extract_strided_slice %152 {offsets = [0, 1, 0], sizes = [16, 16, 16], strides = [1, 1, 1]} : vector<16x24x16xf32> to vector<16x16x16xf32>
    %154 = arith.addf %148, %153 : vector<16x16x16xf32>
    %c2_86 = arith.constant 2 : index
    %c0_87 = arith.constant 0 : index
    %c0_88 = arith.constant 0 : index
    %155 = vector.load %arg6[%c2_86, %c0_87, %c0_88] : memref<3x36x16xbf16, #tpu.memory_space<vmem>>, vector<1x36x16xbf16>
    %156 = vector.shape_cast %155 : vector<1x36x16xbf16> to vector<36x16xbf16>
    %cst_89 = arith.constant dense<0.000000e+00> : vector<384x16xf32>
    %157 = tpu.matmul %143, %156, %cst_89 {dimension_numbers = #tpu.dot_dimension_numbers<[1], [0], [0], [1], [0, 0, 1, 1], [], []>} : vector<384x36xbf16>, vector<36x16xbf16>, vector<384x16xf32> -> vector<384x16xf32>
    %158 = vector.shape_cast %157 : vector<384x16xf32> to vector<16x24x16xf32>
    %159 = vector.extract_strided_slice %158 {offsets = [0, 2, 0], sizes = [16, 16, 16], strides = [1, 1, 1]} : vector<16x24x16xf32> to vector<16x16x16xf32>
    %160 = arith.addf %154, %159 : vector<16x16x16xf32>
    %c0_90 = arith.constant 0 : index
    %c0_91 = arith.constant 0 : index
    %c0_92 = arith.constant 0 : index
    %161 = vector.load %arg7[%c0_90, %c0_91, %c0_92] : memref<1x1x16xf32, #tpu.memory_space<vmem>>, vector<1x1x16xf32>
    %162 = vector.broadcast %161 : vector<1x1x16xf32> to vector<16x16x16xf32>
    %163 = arith.addf %160, %162 : vector<16x16x16xf32>
    %164 = vector.shape_cast %163 : vector<16x16x16xf32> to vector<256x16xf32>
    %cst_93 = arith.constant dense<0.000000e+00> : vector<16xf32>
    %165 = vector.multi_reduction <add>, %164, %cst_93 [0] : vector<256x16xf32> to vector<16xf32>
    %166 = vector.shape_cast %165 : vector<16xf32> to vector<1x16xf32>
    %cst_94 = arith.constant 2.560000e+02 : f32
    %167 = vector.broadcast %cst_94 : f32 to vector<1x16xf32>
    %168 = arith.divf %166, %167 : vector<1x16xf32>
    %169 = vector.broadcast %168 : vector<1x16xf32> to vector<256x16xf32>
    %170 = arith.subf %164, %169 : vector<256x16xf32>
    %171 = arith.mulf %170, %170 : vector<256x16xf32>
    %cst_95 = arith.constant dense<0.000000e+00> : vector<16xf32>
    %172 = vector.multi_reduction <add>, %171, %cst_95 [0] : vector<256x16xf32> to vector<16xf32>
    %173 = vector.shape_cast %172 : vector<16xf32> to vector<1x16xf32>
    %cst_96 = arith.constant 2.560000e+02 : f32
    %174 = vector.broadcast %cst_96 : f32 to vector<1x16xf32>
    %175 = arith.divf %173, %174 : vector<1x16xf32>
    %cst_97 = arith.constant 9.99999974E-6 : f32
    %176 = vector.broadcast %cst_97 : f32 to vector<1x16xf32>
    %177 = arith.addf %175, %176 : vector<1x16xf32>
    %178 = math.rsqrt %177 : vector<1x16xf32>
    %179 = vector.broadcast %178 : vector<1x16xf32> to vector<256x16xf32>
    %180 = arith.mulf %170, %179 : vector<256x16xf32>
    %cst_98 = arith.constant 5.000000e-01 : f32
    %181 = vector.broadcast %cst_98 : f32 to vector<256x16xf32>
    %182 = arith.mulf %181, %180 : vector<256x16xf32>
    %cst_99 = arith.constant 4.471500e-02 : f32
    %183 = vector.broadcast %cst_99 : f32 to vector<256x16xf32>
    %184 = arith.mulf %183, %180 : vector<256x16xf32>
    %185 = arith.mulf %184, %180 : vector<256x16xf32>
    %186 = arith.mulf %185, %180 : vector<256x16xf32>
    %187 = arith.addf %180, %186 : vector<256x16xf32>
    %cst_100 = arith.constant 0.797884583 : f32
    %188 = vector.broadcast %cst_100 : f32 to vector<256x16xf32>
    %189 = arith.mulf %188, %187 : vector<256x16xf32>
    %190 = math.tanh %189 : vector<256x16xf32>
    %cst_101 = arith.constant 1.000000e+00 : f32
    %191 = vector.broadcast %cst_101 : f32 to vector<256x16xf32>
    %192 = arith.addf %191, %190 : vector<256x16xf32>
    %193 = arith.mulf %182, %192 : vector<256x16xf32>
    %194 = vector.shape_cast %193 : vector<256x16xf32> to vector<16x16x16xf32>
    %c0_102 = arith.constant 0 : index
    %c0_103 = arith.constant 0 : index
    %c0_104 = arith.constant 0 : index
    %195 = vector.load %arg8[%c0_102, %c0_103, %c0_104] : memref<1x2x16xf32, #tpu.memory_space<vmem>>, vector<1x1x16xf32>
    %196 = vector.shape_cast %195 : vector<1x1x16xf32> to vector<1x16xf32>
    %197 = vector.shape_cast %196 : vector<1x16xf32> to vector<1x1x16xf32>
    %c0_105 = arith.constant 0 : index
    %c1_106 = arith.constant 1 : index
    %c0_107 = arith.constant 0 : index
    %198 = vector.load %arg8[%c0_105, %c1_106, %c0_107] : memref<1x2x16xf32, #tpu.memory_space<vmem>>, vector<1x1x16xf32>
    %199 = vector.shape_cast %198 : vector<1x1x16xf32> to vector<1x16xf32>
    %200 = vector.shape_cast %199 : vector<1x16xf32> to vector<1x1x16xf32>
    %201 = vector.broadcast %197 : vector<1x1x16xf32> to vector<16x16x16xf32>
    %202 = arith.mulf %194, %201 : vector<16x16x16xf32>
    %203 = vector.broadcast %200 : vector<1x1x16xf32> to vector<16x16x16xf32>
    %204 = arith.addf %202, %203 : vector<16x16x16xf32>
    %c0_108 = arith.constant 0 : index
    %c0_109 = arith.constant 0 : index
    %c0_110 = arith.constant 0 : index
    %c0_111 = arith.constant 0 : index
    %205 = vector.load %arg9[%c0_108, %c0_109, %c0_110, %c0_111] : memref<1x16x16x16xf32, #tpu.memory_space<vmem>>, vector<1x16x16x16xf32>
    %206 = vector.shape_cast %205 : vector<1x16x16x16xf32> to vector<16x16x16xf32>
    %207 = vector.shape_cast %204 : vector<16x16x16xf32> to vector<1x16x16x16xf32>
    tpu.vector_store %arg9[%c0_108, %c0_109, %c0_110, %c0_111], %207 {strides = array<i32>} : memref<1x16x16x16xf32, #tpu.memory_space<vmem>>, vector<1x16x16x16xf32>,
    return
  }
  func.func @transform_0(%arg0: i32) -> (i32, i32, i32, i32) {
    %c0_i32 = arith.constant 0 : i32
    %c0_i32_0 = arith.constant 0 : i32
    %c0_i32_1 = arith.constant 0 : i32
    %c0_i32_2 = arith.constant 0 : i32
    return %arg0, %c0_i32, %c0_i32_0, %c0_i32_1 : i32, i32, i32, i32
  }
  func.func @transform_1(%arg0: i32) -> (i32, i32, i32) {
    %c0_i32 = arith.constant 0 : i32
    %c0_i32_0 = arith.constant 0 : i32
    %c0_i32_1 = arith.constant 0 : i32
    %c0_i32_2 = arith.constant 0 : i32
    return %c0_i32, %c0_i32_0, %c0_i32_1 : i32, i32, i32
  }
  func.func @transform_2(%arg0: i32) -> (i32, i32, i32) {
    %c0_i32 = arith.constant 0 : i32
    %c0_i32_0 = arith.constant 0 : i32
    %c0_i32_1 = arith.constant 0 : i32
    %c0_i32_2 = arith.constant 0 : i32
    return %c0_i32, %c0_i32_0, %c0_i32_1 : i32, i32, i32
  }
  func.func @transform_3(%arg0: i32) -> (i32, i32, i32) {
    %c0_i32 = arith.constant 0 : i32
    %c0_i32_0 = arith.constant 0 : i32
    %c0_i32_1 = arith.constant 0 : i32
    %c0_i32_2 = arith.constant 0 : i32
    return %c0_i32, %c0_i32_0, %c0_i32_1 : i32, i32, i32
  }
  func.func @transform_4(%arg0: i32) -> (i32, i32, i32) {
    %c0_i32 = arith.constant 0 : i32
    %c0_i32_0 = arith.constant 0 : i32
    %c0_i32_1 = arith.constant 0 : i32
    %c0_i32_2 = arith.constant 0 : i32
    return %c0_i32, %c0_i32_0, %c0_i32_1 : i32, i32, i32
  }
  func.func @transform_5(%arg0: i32) -> (i32, i32, i32) {
    %c0_i32 = arith.constant 0 : i32
    %c0_i32_0 = arith.constant 0 : i32
    %c0_i32_1 = arith.constant 0 : i32
    %c0_i32_2 = arith.constant 0 : i32
    return %c0_i32, %c0_i32_0, %c0_i32_1 : i32, i32, i32
  }
  func.func @transform_6(%arg0: i32) -> (i32, i32, i32) {
    %c0_i32 = arith.constant 0 : i32
    %c0_i32_0 = arith.constant 0 : i32
    %c0_i32_1 = arith.constant 0 : i32
    %c0_i32_2 = arith.constant 0 : i32
    return %c0_i32, %c0_i32_0, %c0_i32_1 : i32, i32, i32
  }
  func.func @transform_7(%arg0: i32) -> (i32, i32, i32) {
    %c0_i32 = arith.constant 0 : i32
    %c0_i32_0 = arith.constant 0 : i32
    %c0_i32_1 = arith.constant 0 : i32
    return %arg0, %c0_i32, %c0_i32_0 : i32, i32, i32
  }
  func.func @transform_8(%arg0: i32) -> (i32, i32, i32, i32) {
    %c0_i32 = arith.constant 0 : i32
    %c0_i32_0 = arith.constant 0 : i32
    %c0_i32_1 = arith.constant 0 : i32
    %c0_i32_2 = arith.constant 0 : i32
    return %arg0, %c0_i32, %c0_i32_0, %c0_i32_1 : i32, i32, i32, i32
  }
}

</mosaic_0001>

<bundles_post_ra>
// kernel: input_conv_fwd.1
= control target key start
LH: loop header
LB: loop body
LE: loop exit
PB: predicated region body
PF: predicated region fallthrough
CT: control target
= control target key end

     0   :  { %s9397_s27 = smov 0   ;;  %s14202_s0 = inlined_call_operand.vmem [shape: f32[2,18,24,1], index: 0, kind: input, shape index: {}]   ;;  %s14203_s1 = inlined_call_operand.vmem [shape: bf16[3,3,8], index: 1, kind: input, shape index: {}]   ;;  %s14204_s2 = inlined_call_operand.vmem [shape: f32[1,1,8], index: 2, kind: input, shape index: {}]   ;;  %s14205_s3 = inlined_call_operand.vmem [shape: bf16[3,24,12], index: 3, kind: input, shape index: {}]   ;;  %s14206_s4 = inlined_call_operand.vmem [shape: f32[1,1,12], index: 4, kind: input, shape index: {}]   ;;  %s14207_s5 = inlined_call_operand.vmem [shape: bf16[3,36,16], index: 5, kind: input, shape index: {}]   ;;  %s14208_s6 = inlined_call_operand.vmem [shape: f32[1,1,16], index: 6, kind: input, shape index: {}]   ;;  %s14209_s7 = inlined_call_operand.vmem [shape: f32[2,2,16], index: 7, kind: input, shape index: {}]   ;;  %s14210_s8 = inlined_call_operand.vmem [shape: f32[2,16,16,16], index: 8, kind: output, shape index: {}]  }
   0x1 LB: > { %s7410_s28 = sadd.s32 4294967295, %s9342_s27   ;;  %p7414_p0 = scmp.ge.s32.totalorder %s9342_s27, 1  ;;  %s9342_s27 = sphi %s9397_s27, %s18_s27  }
   0x2   : > { %p271_p1 = scmp.lt.s32.totalorder %s9342_s27, 3 }
   0x4   : > { %p272_p2 = pnand %p7414_p0, %p271_p1 }
   0x6   : > { %275 = sbr.rel (%p272_p2) target bundleno = 2209 (0x8a1), region = 52 }
   0xd   : > { %p309_p3 = scmp.lt.s32.totalorder %s7410_s28, 1  ;;  %vm913_vm0 = vcmask 1040384   ;;  %vm914_vm1 = vcmask 1041408   ;;  %v9344_v0 = vmov 65535   ;;  %v839_v2 = vld [vmem:[%s14203_s1] sm:$0x3] }
   0xe   : > { %v915_v1 = vsel %vm913_vm0, 4294967295, %v9344_v0  ;;  %s9345_s13 = smov 2   ;;  %s9346_s14 = smov 1   ;;  %v7443_v60 = vld [vmem:[%s14203_s1 + $0x2] sm:$0x3]  ;;  %vm717_vm2 = vcmask 7168  }
   0xf   : > { %s14533_s28 = smov (!%p309_p3, %s7410_s28), 1  ;;  %v9412_v3 = vsel %vm914_vm1, %v915_v1, 0  ;;  %v7468_v1 = vld [vmem:[%s14203_s1 + $0x4] sm:$0x3]  ;;  %vm766_vm3 = vcmask 15360   ;;  %vm840_vm4 = vcmask 23552  }
  0x10   : > { %s8386_s29 = smul.u32 432, %s14533_s28  ;;  %v918_v4 = vand.u32 %v9412_v3, %v839_v2  ;;  %v9587_v61 = vand.u32 %v7443_v60, %v9412_v3  ;;  %v9603_v2 = vand.u32 %v7468_v1, %v9412_v3  ;;  %vm1407_vm5 = vcmask 1046528   ;;  %s9348_s23 = smov 8  }
  0x11   : > { %vm1830_vm6 = vcmask 1045504   ;;  %vm2014_vm7 = vcmask 64512   ;;  %vm2616_vm8 = vcmask 62464   ;;  %vm2578_vm9 = vcmask 57344   ;;  %s9349_s10 = smov 16   ;;  %s9350_s25 = smov 12  }
  0x12   : > { %s9418_s12 = scalar_lea.vmem %s14202_s0, %s8386_s29  ;;  %8378 = vmatprep.subr.bf16.mxu1 %v918_v4  ;;  %7910 = vmatprep.subr.bf16.mxu0 %v918_v4  ;;  %vm2597_vm10 = vcmask 64519   ;;  %vm3234_vm11 = vcmask 1043456   ;;  %vm3076_vm12 = vcmask 130048   ;;  %vm3161_vm13 = vcmask 195584   ;;  %s7416_s19 = sshll.u32 %s14533_s28, 1 }
  0x13   : > { %v9421_v5 = vld [vmem:[%s9418_s12 + $0xf0] sm:$0xff]  ;;  %v9424_v6 = vld [vmem:[%s9418_s12 + $0xf8] sm:$0xff]  ;;  %v9432_v9 = vld [vmem:[%s9418_s12 + $0xe0] sm:$0xff]  ;;  %8379 = vmatpush3.bf16.msra.mxu1 %v918_v4  ;;  %7911 = vmatpush3.bf16.msra.mxu0 %v918_v4  ;;  %vm4352_vm14 = vcmask 97280   ;;  %vm4953_vm15 = vcmask 95232   ;;  %vm4915_vm0 = vcmask 90112   ;;  %s13932_s22 = scalar_lea.vmem %s14209_s7, %s7416_s19 }
  0x14   : > { %v9427_v7 = vld [vmem:[%s9418_s12 + $0xd8] sm:$0xff]  ;;  %v8413_v8 = vpack.i.bf16 %v9424_v6, %v9421_v5  ;;  %v9435_v10 = vld [vmem:[%s9418_s12 + $0xe8] sm:$0xff]  ;;  %v9443_v13 = vld [vmem:[%s9418_s12 + $0x20] sm:$0xff]  ;;  %7960 = vmatprep.subr.bf16.mxu1 %v9587_v61  ;;  %8010 = vmatprep.subr.bf16.mxu0 %v9603_v2 }
  0x15   : > { %v9438_v11 = vld [vmem:[%s9418_s12 + $0x18] sm:$0xff]  ;;  %v8403_v12 = vpack.i.bf16 %v9432_v9, %v9427_v7  ;;  %v8408_v15 = vpack.i.bf16 %v9421_v5, %v9435_v10  ;;  %v9452_v16 = vld [vmem:[%s9418_s12 + $0x28] sm:$0xff]  ;;  %v9455_v17 = vld [vmem:[%s9418_s12 + $0x30] sm:$0xff] }
  0x16   : > { %8414 = vrot.lane.b32.xlu1 %v8413_v8, %s9345_s13  ;;  %v8418_v14 = vpack.i.bf16 %v9443_v13, %v9438_v11  ;;  %v9458_v18 = vld [vmem:[%s9418_s12 + $0x100] sm:$0xff]  ;;  %v9461_v19 = vld [vmem:[%s9418_s12 + $0x108] sm:$0xff]  ;;  %v8428_v20 = vpack.i.bf16 %v9455_v17, %v9452_v16  ;;  %v9476_v24 = vld [vmem:[%s9418_s12 + $0x38] sm:$0xff] }
  0x17   : > { %8404 = vrot.lane.b32.xlu0 %v8403_v12, %s9346_s14  ;;  %v8423_v21 = vpack.i.bf16 %v9461_v19, %v9458_v18  ;;  %v9470_v22 = vld [vmem:[%s9418_s12 + $0x40] sm:$0xff]  ;;  %v9473_v23 = vld [vmem:[%s9418_s12 + $0x48] sm:$0xff]  ;;  %v8433_v26 = vpack.i.bf16 %v9476_v24, %v9455_v17  ;;  %v9485_v27 = vld [vmem:[%s9418_s12 + $0x110] sm:$0xff]  ;;  %v8443_v29 = vpack.i.bf16 %v9458_v18, %v9424_v6 }
  0x18   : > { %v8438_v25 = vpack.i.bf16 %v9473_v23, %v9470_v22  ;;  %v8448_v28 = vpack.i.bf16 %v9485_v27, %v9461_v19  ;;  %v9494_v30 = vld [vmem:[%s9418_s12 + $0x118] sm:$0xff]  ;;  %v9497_v31 = vld [vmem:[%s9418_s12 + $0x50] sm:$0xff]  ;;  %v8458_v32 = vpack.i.bf16 %v9470_v22, %v9476_v24  ;;  %v9503_v33 = vld [vmem:[%s9418_s12 + $0x120] sm:$0xff] }
  0x19   : > { %v9506_v34 = vld [vmem:[%s9418_s12 + $0x128] sm:$0xff]  ;;  %v8453_v35 = vpack.i.bf16 %v9494_v30, %v9485_v27  ;;  %v8468_v36 = vpack.i.bf16 %v9497_v31, %v9473_v23  ;;  %v9518_v38 = vld [vmem:[%s9418_s12 + $0x60] sm:$0xff]  ;;  %v9524_v40 = vld [vmem:[%s9418_s12 + $0x58] sm:$0xff]  ;;  %v8483_v45 = vpack.i.bf16 %v9503_v33, %v9494_v30 }
  0x1a   : > { %8419 = vrot.lane.b32.xlu1 %v8418_v14, %s9346_s14  ;;  %v8463_v37 = vpack.i.bf16 %v9506_v34, %v9503_v33  ;;  %v9521_v39 = vld [vmem:[%s9418_s12 + $0x68] sm:$0xff]  ;;  %v8473_v42 = vpack.i.bf16 %v9524_v40, %v9497_v31  ;;  %v9533_v43 = vld [vmem:[%s9418_s12 + $0x130] sm:$0xff]  ;;  %v9542_v46 = vld [vmem:[%s9418_s12 + $0x138] sm:$0xff]  ;;  %v8498_v47 = vpack.i.bf16 %v9518_v38, %v9524_v40 }
  0x1b   : > { %8409 = vrot.lane.b32.xlu0 %v8408_v15, %s9346_s14  ;;  %v8478_v41 = vpack.i.bf16 %v9521_v39, %v9518_v38  ;;  %v8488_v44 = vpack.i.bf16 %v9533_v43, %v9506_v34  ;;  %v8493_v48 = vpack.i.bf16 %v9542_v46, %v9533_v43  ;;  %v9551_v49 = vld [vmem:[%s9418_s12 + $0x70] sm:$0xff]  ;;  %v9554_v50 = vld [vmem:[%s9418_s12 + $0x140] sm:$0xff]  ;;  %v9557_v51 = vld [vmem:[%s9418_s12 + $0x148] sm:$0xff] }
  0x1c   : > { %v8508_v52 = vpack.i.bf16 %v9551_v49, %v9521_v39  ;;  %v8503_v53 = vpack.i.bf16 %v9557_v51, %v9554_v50  ;;  %v9566_v54 = vld [vmem:[%s9418_s12 + $0x80] sm:$0xff]  ;;  %v9569_v55 = vld [vmem:[%s9418_s12 + $0x88] sm:$0xff]  ;;  %v9572_v56 = vld [vmem:[%s9418_s12 + $0x78] sm:$0xff]  ;;  %v8523_v63 = vpack.i.bf16 %v9554_v50, %v9542_v46 }
  0x1d   : > { %v8518_v57 = vpack.i.bf16 %v9569_v55, %v9566_v54  ;;  %v8513_v58 = vpack.i.bf16 %v9572_v56, %v9551_v49  ;;  %v9581_v59 = vld [vmem:[%s9418_s12 + $0x150] sm:$0xff]  ;;  %v9597_v0 = vld [vmem:[%s9418_s12 + $0x158] sm:$0xff]  ;;  %v8538_v4 = vpack.i.bf16 %v9566_v54, %v9572_v56  ;;  %v9616_v14 = vld [vmem:[%s9418_s12 + $0x160] sm:$0xff] }
  0x1e   : > { %8429 = vrot.lane.b32.xlu1 %v8428_v20, %s9346_s14  ;;  %v8528_v62 = vpack.i.bf16 %v9581_v59, %v9557_v51  ;;  %v8533_v8 = vpack.i.bf16 %v9597_v0, %v9581_v59  ;;  %v9612_v12 = vld [vmem:[%s9418_s12 + $0x90] sm:$0xff]  ;;  %v9619_v15 = vld [vmem:[%s9418_s12 + $0x168] sm:$0xff] }
  0x1f   : > { %8424 = vrot.lane.b32.xlu0 %v8423_v21, %s9345_s13  ;;  %v8548_v3 = vpack.i.bf16 %v9612_v12, %v9569_v55  ;;  %v8543_v20 = vpack.i.bf16 %v9619_v15, %v9616_v14  ;;  %v9628_v21 = vld [vmem:[%s9418_s12 + $0xa0] sm:$0xff] }
  0x20   : > { %14297 = vst [vmem:[#allocation4_spill] sm:$0xff] %v9628_v21 }
  0x22   : > { %8439 = vrot.lane.b32.xlu1 %v8438_v25, %s9345_s13  ;;  %v9631_v25 = vld [vmem:[%s9418_s12 + $0xa8] sm:$0xff] }
  0x23   : > { %8434 = vrot.lane.b32.xlu0 %v8433_v26, %s9345_s13  ;;  %14298 = vst [vmem:[#allocation5_spill] sm:$0xff] %v9631_v25  ;;  %v9634_v26 = vld [vmem:[%s9418_s12 + $0x98] sm:$0xff] }
  0x26   : > { %8449 = vrot.lane.b32.xlu1 %v8448_v28, %s9346_s14  ;;  %v8558_v28 = vpack.i.bf16 %v9631_v25, %v9628_v21 }
  0x27   : > { %8444 = vrot.lane.b32.xlu0 %v8443_v29, %s9346_s14  ;;  %v8553_v29 = vpack.i.bf16 %v9634_v26, %v9612_v12 }
  0x2a   : > { %8459 = vrot.lane.b32.xlu1 %v8458_v32, %s9346_s14  ;;  %v9643_v32 = vld [vmem:[%s9418_s12 + $0x170] sm:$0xff] }
  0x2b   : > { %8454 = vrot.lane.b32.xlu0 %v8453_v35, %s9345_s13  ;;  %v8568_v35 = vpack.i.bf16 %v9643_v32, %v9619_v15 }
  0x2e   : > { %8469 = vrot.lane.b32.xlu1 %v8468_v36, %s9346_s14  ;;  %v8563_v36 = vpack.i.bf16 %v9616_v14, %v9597_v0 }
  0x2f   : > { %8464 = vrot.lane.b32.xlu0 %v8463_v37, %s9345_s13  ;;  %v9652_v37 = vld [vmem:[%s9418_s12 + $0x178] sm:$0xff] }
  0x32   : > { %8479 = vrot.lane.b32.xlu1 %v8478_v41, %s9345_s13  ;;  %v8578_v41 = vpack.i.bf16 %v9628_v21, %v9634_v26 }
  0x33   : > { %8474 = vrot.lane.b32.xlu0 %v8473_v42, %s9345_s13  ;;  %v8573_v42 = vpack.i.bf16 %v9652_v37, %v9643_v32 }
  0x36   : > { %8489 = vrot.lane.b32.xlu1 %v8488_v44, %s9346_s14  ;;  %v9661_v44 = vld [vmem:[%s9418_s12 + $0xb0] sm:$0xff] }
  0x37   : > { %8484 = vrot.lane.b32.xlu0 %v8483_v45, %s9346_s14  ;;  %14299 = vst [vmem:[#allocation6_spill] sm:$0xff] %v9661_v44  ;;  %v372_v45 = vld [vmem:[%s9418_s12 + $0x180] sm:$0xff] }
  0x3a   : > { %8499 = vrot.lane.b32.xlu1 %v8498_v47, %s9346_s14  ;;  %v373_v47 = vld [vmem:[%s9418_s12 + $0x188] sm:$0xff] }
  0x3b   : > { %8494 = vrot.lane.b32.xlu0 %v8493_v48, %s9345_s13  ;;  %v8588_v48 = vpack.i.bf16 %v9661_v44, %v9631_v25 }
  0x3e   : > { %8509 = vrot.lane.b32.xlu1 %v8508_v52, %s9346_s14  ;;  %v8583_v52 = vpack.i.bf16 %v373_v47, %v372_v45 }
  0x3f   : > { %8504 = vrot.lane.b32.xlu0 %v8503_v53, %s9345_s13  ;;  %v348_v53 = vld [vmem:[%s9418_s12 + $0xc0] sm:$0xff] }
  0x42   : > { %8519 = vrot.lane.b32.xlu1 %v8518_v57, %s9345_s13  ;;  %v349_v57 = vld [vmem:[%s9418_s12 + $0xc8] sm:$0xff] }
  0x43   : > { %8514 = vrot.lane.b32.xlu0 %v8513_v58, %s9345_s13  ;;  %v9672_v58 = vld [vmem:[%s9418_s12 + $0xb8] sm:$0xff]  ;;  %v8598_v60 = vpack.i.bf16 %v349_v57, %v348_v53 }
  0x46   : > { %8529 = vrot.lane.b32.xlu1 %v8528_v62, %s9346_s14  ;;  %v8593_v62 = vpack.i.bf16 %v9672_v58, %v9661_v44 }
  0x47   : > { %8524 = vrot.lane.b32.xlu0 %v8523_v63, %s9346_s14  ;;  %v374_v63 = vld [vmem:[%s9418_s12 + $0x190] sm:$0xff] }
  0x48   : > { %v8608_v1 = vpack.i.bf16 %v374_v63, %v373_v47 }
  0x4a   : > { %8539 = vrot.lane.b32.xlu1 %v8538_v4, %s9346_s14  ;;  %v8603_v4 = vpack.i.bf16 %v372_v45, %v9652_v37 }
  0x4b   : > { %8534 = vrot.lane.b32.xlu0 %v8533_v8, %s9345_s13  ;;  %v375_v8 = vld [vmem:[%s9418_s12 + $0x198] sm:$0xff] }
  0x4e   : > { %8549 = vrot.lane.b32.xlu1 %v8548_v3, %s9346_s14  ;;  %v8618_v3 = vpack.i.bf16 %v348_v53, %v9672_v58 }
  0x4f   : > { %8544 = vrot.lane.b32.xlu0 %v8543_v20, %s9345_s13  ;;  %v8613_v20 = vpack.i.bf16 %v375_v8, %v374_v63 }
  0x52   : > { %8559 = vrot.lane.b32.xlu1 %v8558_v28, %s9345_s13  ;;  %v350_v28 = vld [vmem:[%s9418_s12 + $0xd0] sm:$0xff] }
  0x53   : > { %8554 = vrot.lane.b32.xlu0 %v8553_v29, %s9345_s13  ;;  %v376_v29 = vld [vmem:[%s9418_s12 + $0x1a0] sm:$0xff]  ;;  %v8633_v45 = vpack.i.bf16 %v9427_v7, %v350_v28 }
  0x56   : > { %8569 = vrot.lane.b32.xlu1 %v8568_v35, %s9346_s14  ;;  %v377_v35 = vld [vmem:[%s9418_s12 + $0x1a8] sm:$0xff] }
  0x57   : > { %8564 = vrot.lane.b32.xlu0 %v8563_v36, %s9346_s14  ;;  %v8628_v36 = vpack.i.bf16 %v350_v28, %v349_v57 }
  0x5a   : > { %8579 = vrot.lane.b32.xlu1 %v8578_v41, %s9346_s14  ;;  %v8623_v41 = vpack.i.bf16 %v377_v35, %v376_v29 }
  0x5b   : > { %8574 = vrot.lane.b32.xlu0 %v8573_v42, %s9345_s13  ;;  %v8638_v42 = vpack.i.bf16 %v9435_v10, %v9432_v9 }
  0x5e   : > { %8589 = vrot.lane.b32.xlu1 %v8588_v48, %s9346_s14 }
  0x5f   : > { %8584 = vrot.lane.b32.xlu0 %v8583_v52, %s9345_s13 }
  0x62   : > { %8599 = vrot.lane.b32.xlu1 %v8598_v60, %s9345_s13 }
  0x63   : > { %8594 = vrot.lane.b32.xlu0 %v8593_v62, %s9345_s13 }
  0x66   : > { %8609 = vrot.lane.b32.xlu1 %v8608_v1, %s9346_s14 }
  0x67   : > { %8604 = vrot.lane.b32.xlu0 %v8603_v4, %s9346_s14 }
  0x6a   : > { %8619 = vrot.lane.b32.xlu1 %v8618_v3, %s9346_s14 }
  0x6b   : > { %8614 = vrot.lane.b32.xlu0 %v8613_v20, %s9345_s13 }
  0x6e   : > { %8629 = vrot.lane.b32.xlu1 %v8628_v36, %s9346_s14 }
  0x6f   : > { %8624 = vrot.lane.b32.xlu0 %v8623_v41, %s9345_s13 }
  0x72   : > { %8639 = vrot.lane.b32.xlu1 %v8638_v42, %s9345_s13 }
  0x73   : > { %8634 = vrot.lane.b32.xlu0 %v8633_v45, %s9345_s13 }
  0x88   : > { %v8415_v47 = vpop.permute.xlu1 %8414 }
  0x89   : > { %v8417_v48 = vunpack.i.h.bf16 %v8415_v47  ;;  %v8416_v52 = vunpack.i.l.bf16 %v8415_v47  ;;  %v8405_v60 = vpop.permute.xlu0 %8404 }
  0x8a   : > { %v8407_v62 = vunpack.i.h.bf16 %v8405_v60  ;;  %v8406_v63 = vunpack.i.l.bf16 %v8405_v60 }
  0x8c   : > { %v8420_v1 = vpop.permute.xlu1 %8419  ;;  %v742_v4 = vsel %vm717_vm2, %v348_v53, %v8406_v63  ;;  %v743_v8 = vsel %vm717_vm2, %v349_v57, %v8407_v62 }
  0x8d   : > { %v8410_v3 = vpop.permute.xlu0 %8409  ;;  %v791_v20 = vsel %vm766_vm3, %v742_v4, %v8416_v52  ;;  %v792_v29 = vsel %vm766_vm3, %v743_v8, %v8417_v48  ;;  %v8422_v62 = vunpack.i.h.bf16 %v8420_v1  ;;  %v8421_v63 = vunpack.i.l.bf16 %v8420_v1  ;;  %v326_v4 = vld [vmem:[%s9418_s12 + $0x10] sm:$0xff] }
  0x8e   : > { %v9702_v35 = vpack.c.bf16 %v792_v29, %v791_v20  ;;  %v8412_v36 = vunpack.i.h.bf16 %v8410_v3  ;;  %v8411_v41 = vunpack.i.l.bf16 %v8410_v3  ;;  %v324_v29 = vld [vmem:[%s9418_s12] sm:$0xff] }
  0x90   : > { %14300 = vst [vmem:[#allocation7_spill] sm:$0xff] %v9702_v35  ;;  %7936 = vmatprep.mubr.msk.bf16.mxu1 %vm840_vm4, %v9702_v35  ;;  %v8430_v42 = vpop.permute.xlu1 %8429  ;;  %v745_v48 = vsel %vm717_vm2, %v9427_v7, %v8412_v36  ;;  %v744_v52 = vsel %vm717_vm2, %v350_v28, %v8411_v41  ;;  %v325_v35 = vld [vmem:[%s9418_s12 + $0x8] sm:$0xff] }
  0x91   : > { %v8425_v53 = vpop.permute.xlu0 %8424  ;;  %v8432_v47 = vunpack.i.h.bf16 %v8430_v42  ;;  %v8431_v60 = vunpack.i.l.bf16 %v8430_v42 }
  0x92   : > { %v8427_v45 = vunpack.i.h.bf16 %v8425_v53  ;;  %v8426_v57 = vunpack.i.l.bf16 %v8425_v53 }
  0x93   : > { %v721_v7 = vsel %vm717_vm2, %v9438_v11, %v8432_v47  ;;  %v720_v28 = vsel %vm717_vm2, %v326_v4, %v8431_v60 }
  0x94   : > { %v793_v8 = vsel %vm766_vm3, %v744_v52, %v8426_v57  ;;  %v794_v3 = vsel %vm766_vm3, %v745_v48, %v8427_v45  ;;  %v8440_v20 = vpop.permute.xlu1 %8439  ;;  %v718_v45 = vsel %vm717_vm2, %v324_v29, %v8421_v63  ;;  %v719_v57 = vsel %vm717_vm2, %v325_v35, %v8422_v62 }
  0x95   : > { %v8435_v21 = vpop.permute.xlu0 %8434  ;;  %v8442_v25 = vunpack.i.h.bf16 %v8440_v20  ;;  %v8441_v53 = vunpack.i.l.bf16 %v8440_v20  ;;  %v9714_v44 = vpack.c.bf16 %v794_v3, %v793_v8 }
  0x96   : > { %v8437_v36 = vunpack.i.h.bf16 %v8435_v21  ;;  %v8436_v1 = vunpack.i.l.bf16 %v8435_v21 }
  0x97   : > { %v769_v41 = vsel %vm766_vm3, %v720_v28, %v8441_v53  ;;  %v770_v42 = vsel %vm766_vm3, %v721_v7, %v8442_v25  ;;  %7937 = vmatmul.mubr.msk.bf16.vlgmr.msra.gmra.mrb[0].mxu1 %vm840_vm4, %v9714_v44 }
  0x98   : > { %v8450_v48 = vpop.permute.xlu1 %8449  ;;  %v767_v52 = vsel %vm766_vm3, %v718_v45, %v8436_v1  ;;  %v768_v11 = vsel %vm766_vm3, %v719_v57, %v8437_v36  ;;  %v9727_v47 = vpack.c.bf16 %v770_v42, %v769_v41  ;;  %7961 = vmatpush3.bf16.msra.mxu1 %v9587_v61 }
  0x99   : > { %v8445_v21 = vpop.permute.xlu0 %8444  ;;  %v9730_v60 = vpack.c.bf16 %v768_v11, %v767_v52  ;;  %v8452_v20 = vunpack.i.h.bf16 %v8450_v48  ;;  %v8451_v29 = vunpack.i.l.bf16 %v8450_v48 }
  0x9a   : > { %v8447_v25 = vunpack.i.h.bf16 %v8445_v21  ;;  %v8446_v4 = vunpack.i.l.bf16 %v8445_v21 }
  0x9b   : > { %7912 = vmatprep.mubr.msk.bf16.mxu0 %vm840_vm4, %v9730_v60 }
  0x9c   : > { %7913 = vmatmul.mubr.msk.bf16.vlgmr.msra.gmra.mrb[0].mxu0 %vm840_vm4, %v9727_v47  ;;  %v8460_v35 = vpop.permute.xlu1 %8459  ;;  %v747_v61 = vsel %vm717_vm2, %v9435_v10, %v8447_v25  ;;  %v746_v3 = vsel %vm717_vm2, %v9432_v9, %v8446_v4  ;;  %v749_v10 = vsel %vm717_vm2, %v9424_v6, %v8452_v20  ;;  %v748_v9 = vsel %vm717_vm2, %v9421_v5, %v8451_v29 }
  0x9d   : > { %v8455_v62 = vpop.permute.xlu0 %8454  ;;  %8011 = vmatpush3.bf16.msra.mxu0 %v9603_v2  ;;  %v8462_v57 = vunpack.i.h.bf16 %v8460_v35  ;;  %v8461_v48 = vunpack.i.l.bf16 %v8460_v35 }
  0x9e   : > { %v8457_v63 = vunpack.i.h.bf16 %v8455_v62  ;;  %v8456_v8 = vunpack.i.l.bf16 %v8455_v62 }
  0xa0   : > { %v795_v53 = vsel %vm766_vm3, %v746_v3, %v8456_v8  ;;  %v796_v7 = vsel %vm766_vm3, %v747_v61, %v8457_v63  ;;  %v8470_v28 = vpop.permute.xlu1 %8469  ;;  %v723_v61 = vsel %vm717_vm2, %v9452_v16, %v8462_v57  ;;  %v722_v3 = vsel %vm717_vm2, %v9443_v13, %v8461_v48 }
  0xa1   : > { %v8465_v36 = vpop.permute.xlu0 %8464  ;;  %v9743_v1 = vpack.c.bf16 %v796_v7, %v795_v53  ;;  %v8472_v42 = vunpack.i.h.bf16 %v8470_v28  ;;  %v8471_v45 = vunpack.i.l.bf16 %v8470_v28 }
  0xa2   : > { %v8467_v41 = vunpack.i.h.bf16 %v8465_v36  ;;  %v8466_v2 = vunpack.i.l.bf16 %v8465_v36 }
  0xa3   : > { %7940 = vmatprep.mubr.msk.bf16.mxu1 %vm840_vm4, %v9743_v1  ;;  %v725_v6 = vsel %vm717_vm2, %v9476_v24, %v8472_v42  ;;  %v724_v5 = vsel %vm717_vm2, %v9455_v17, %v8471_v45 }
  0xa4   : > { %v797_v52 = vsel %vm766_vm3, %v748_v9, %v8466_v2  ;;  %v798_v11 = vsel %vm766_vm3, %v749_v10, %v8467_v41  ;;  %v8480_v21 = vpop.permute.xlu1 %8479 }
  0xa5   : > { %v8475_v25 = vpop.permute.xlu0 %8474  ;;  %v8482_v4 = vunpack.i.h.bf16 %v8480_v21  ;;  %v8481_v62 = vunpack.i.l.bf16 %v8480_v21  ;;  %v9753_v63 = vpack.c.bf16 %v798_v11, %v797_v52 }
  0xa6   : > { %v8477_v35 = vunpack.i.h.bf16 %v8475_v25  ;;  %v8476_v8 = vunpack.i.l.bf16 %v8475_v25 }
  0xa7   : > { %v773_v20 = vsel %vm766_vm3, %v724_v5, %v8481_v62  ;;  %v774_v29 = vsel %vm766_vm3, %v725_v6, %v8482_v4  ;;  %7941 = vmatmul.mubr.msk.bf16.gmra.mrb[4].mxu1 %vm840_vm4, %v9753_v63 }
  0xa8   : > { %v771_v24 = vsel %vm766_vm3, %v722_v3, %v8476_v8  ;;  %v772_v53 = vsel %vm766_vm3, %v723_v61, %v8477_v35  ;;  %v8490_v17 = vpop.permute.xlu1 %8489  ;;  %v9769_v7 = vpack.c.bf16 %v774_v29, %v773_v20 }
  0xa9   : > { %v8485_v28 = vpop.permute.xlu0 %8484  ;;  %v9771_v36 = vpack.c.bf16 %v772_v53, %v771_v24  ;;  %v8492_v57 = vunpack.i.h.bf16 %v8490_v17  ;;  %v8491_v48 = vunpack.i.l.bf16 %v8490_v17 }
  0xaa   : > { %v8487_v16 = vunpack.i.h.bf16 %v8485_v28  ;;  %v8486_v41 = vunpack.i.l.bf16 %v8485_v28 }
  0xab   : > { %7916 = vmatprep.mubr.msk.bf16.mxu0 %vm840_vm4, %v9771_v36 }
  0xac   : > { %7917 = vmatmul.mubr.msk.bf16.gmra.mrb[4].mxu0 %vm840_vm4, %v9769_v7  ;;  %v8500_v13 = vpop.permute.xlu1 %8499  ;;  %v751_v10 = vsel %vm717_vm2, %v9461_v19, %v8487_v16  ;;  %v750_v9 = vsel %vm717_vm2, %v9458_v18, %v8486_v41  ;;  %v753_v19 = vsel %vm717_vm2, %v9494_v30, %v8492_v57  ;;  %v752_v18 = vsel %vm717_vm2, %v9485_v27, %v8491_v48 }
  0xad   : > { %v8495_v2 = vpop.permute.xlu0 %8494  ;;  %v8502_v8 = vunpack.i.h.bf16 %v8500_v13  ;;  %v8501_v61 = vunpack.i.l.bf16 %v8500_v13 }
  0xae   : > { %v8497_v42 = vunpack.i.h.bf16 %v8495_v2  ;;  %v8496_v45 = vunpack.i.l.bf16 %v8495_v2 }
  0xaf   : > { %v727_v13 = vsel %vm717_vm2, %v9473_v23, %v8502_v8  ;;  %v726_v2 = vsel %vm717_vm2, %v9470_v22, %v8501_v61 }
  0xb0   : > { %v799_v52 = vsel %vm766_vm3, %v750_v9, %v8496_v45  ;;  %v800_v11 = vsel %vm766_vm3, %v751_v10, %v8497_v42  ;;  %v8510_v21 = vpop.permute.xlu1 %8509 }
  0xb1   : > { %v8505_v25 = vpop.permute.xlu0 %8504  ;;  %v9783_v4 = vpack.c.bf16 %v800_v11, %v799_v52  ;;  %v8512_v5 = vunpack.i.h.bf16 %v8510_v21  ;;  %v8511_v35 = vunpack.i.l.bf16 %v8510_v21 }
  0xb2   : > { %v8507_v62 = vunpack.i.h.bf16 %v8505_v25  ;;  %v8506_v6 = vunpack.i.l.bf16 %v8505_v25 }
  0xb3   : > { %7944 = vmatprep.mubr.msk.bf16.mxu1 %vm840_vm4, %v9783_v4  ;;  %v729_v30 = vsel %vm717_vm2, %v9524_v40, %v8512_v5  ;;  %v728_v27 = vsel %vm717_vm2, %v9497_v31, %v8511_v35 }
  0xb4   : > { %v801_v3 = vsel %vm766_vm3, %v752_v18, %v8506_v6  ;;  %v802_v20 = vsel %vm766_vm3, %v753_v19, %v8507_v62  ;;  %v8520_v29 = vpop.permute.xlu1 %8519 }
  0xb5   : > { %v8515_v24 = vpop.permute.xlu0 %8514  ;;  %v8522_v53 = vunpack.i.h.bf16 %v8520_v29  ;;  %v8521_v17 = vunpack.i.l.bf16 %v8520_v29  ;;  %v9793_v28 = vpack.c.bf16 %v802_v20, %v801_v3 }
  0xb6   : > { %v8517_v16 = vunpack.i.h.bf16 %v8515_v24  ;;  %v8516_v41 = vunpack.i.l.bf16 %v8515_v24 }
  0xb7   : > { %v777_v42 = vsel %vm766_vm3, %v728_v27, %v8521_v17  ;;  %v778_v45 = vsel %vm766_vm3, %v729_v30, %v8522_v53  ;;  %7945 = vmatmul.mubr.msk.bf16.gmra.mrb[8].mxu1 %vm840_vm4, %v9793_v28 }
  0xb8   : > { %v775_v40 = vsel %vm766_vm3, %v726_v2, %v8516_v41  ;;  %v776_v10 = vsel %vm766_vm3, %v727_v13, %v8517_v16  ;;  %v8530_v31 = vpop.permute.xlu1 %8529  ;;  %v9809_v9 = vpack.c.bf16 %v778_v45, %v777_v42 }
  0xb9   : > { %v8525_v57 = vpop.permute.xlu0 %8524  ;;  %v9811_v48 = vpack.c.bf16 %v776_v10, %v775_v40  ;;  %v8532_v5 = vunpack.i.h.bf16 %v8530_v31  ;;  %v8531_v35 = vunpack.i.l.bf16 %v8530_v31 }
  0xba   : > { %v8527_v23 = vunpack.i.h.bf16 %v8525_v57  ;;  %v8526_v52 = vunpack.i.l.bf16 %v8525_v57 }
  0xbb   : > { %7920 = vmatprep.mubr.msk.bf16.mxu0 %vm840_vm4, %v9811_v48 }
  0xbc   : > { %7921 = vmatmul.mubr.msk.bf16.gmra.mrb[8].mxu0 %vm840_vm4, %v9809_v9  ;;  %v8540_v22 = vpop.permute.xlu1 %8539  ;;  %v755_v62 = vsel %vm717_vm2, %v9506_v34, %v8527_v23  ;;  %v754_v6 = vsel %vm717_vm2, %v9503_v33, %v8526_v52  ;;  %v757_v34 = vsel %vm717_vm2, %v9542_v46, %v8532_v5  ;;  %v756_v33 = vsel %vm717_vm2, %v9533_v43, %v8531_v35 }
  0xbd   : > { %v8535_v11 = vpop.permute.xlu0 %8534  ;;  %v8542_v17 = vunpack.i.h.bf16 %v8540_v22  ;;  %v8541_v30 = vunpack.i.l.bf16 %v8540_v22 }
  0xbe   : > { %v8537_v21 = vunpack.i.h.bf16 %v8535_v11  ;;  %v8536_v25 = vunpack.i.l.bf16 %v8535_v11 }
  0xbf   : > { %v731_v31 = vsel %vm717_vm2, %v9521_v39, %v8542_v17  ;;  %v730_v57 = vsel %vm717_vm2, %v9518_v38, %v8541_v30 }
  0xc0   : > { %v803_v19 = vsel %vm766_vm3, %v754_v6, %v8536_v25  ;;  %v804_v18 = vsel %vm766_vm3, %v755_v62, %v8537_v21  ;;  %v8550_v8 = vpop.permute.xlu1 %8549 }
  0xc1   : > { %v8545_v61 = vpop.permute.xlu0 %8544  ;;  %v9823_v3 = vpack.c.bf16 %v804_v18, %v803_v19  ;;  %v8552_v24 = vunpack.i.h.bf16 %v8550_v8  ;;  %v8551_v53 = vunpack.i.l.bf16 %v8550_v8 }
  0xc2   : > { %v8547_v20 = vunpack.i.h.bf16 %v8545_v61  ;;  %v8546_v29 = vunpack.i.l.bf16 %v8545_v61 }
  0xc3   : > { %7948 = vmatprep.mubr.msk.bf16.mxu1 %vm840_vm4, %v9823_v3  ;;  %v733_v46 = vsel %vm717_vm2, %v9572_v56, %v8552_v24  ;;  %v732_v43 = vsel %vm717_vm2, %v9551_v49, %v8551_v53 }
  0xc4   : > { %v805_v27 = vsel %vm766_vm3, %v756_v33, %v8546_v29  ;;  %v806_v16 = vsel %vm766_vm3, %v757_v34, %v8547_v20  ;;  %v8560_v41 = vpop.permute.xlu1 %8559 }
  0xc5   : > { %v8555_v13 = vpop.permute.xlu0 %8554  ;;  %v8562_v2 = vunpack.i.h.bf16 %v8560_v41  ;;  %v8561_v42 = vunpack.i.l.bf16 %v8560_v41  ;;  %v9833_v45 = vpack.c.bf16 %v806_v16, %v805_v27 }
  0xc6   : > { %v8557_v40 = vunpack.i.h.bf16 %v8555_v13  ;;  %v8556_v10 = vunpack.i.l.bf16 %v8555_v13 }
  0xc7   : > { %v781_v23 = vsel %vm766_vm3, %v732_v43, %v8561_v42  ;;  %v782_v52 = vsel %vm766_vm3, %v733_v46, %v8562_v2  ;;  %7949 = vmatmul.mubr.msk.bf16.gmra.mrb[12].mxu1 %vm840_vm4, %v9833_v45 }
  0xc8   : > { %v779_v56 = vsel %vm766_vm3, %v730_v57, %v8556_v10  ;;  %v780_v22 = vsel %vm766_vm3, %v731_v31, %v8557_v40  ;;  %v8570_v49 = vpop.permute.xlu1 %8569  ;;  %v9849_v11 = vpack.c.bf16 %v782_v52, %v781_v23 }
  0xc9   : > { %v8565_v21 = vpop.permute.xlu0 %8564  ;;  %v9851_v25 = vpack.c.bf16 %v780_v22, %v779_v56  ;;  %v8572_v8 = vunpack.i.h.bf16 %v8570_v49  ;;  %v8571_v61 = vunpack.i.l.bf16 %v8570_v49 }
  0xca   : > { %v8567_v39 = vunpack.i.h.bf16 %v8565_v21  ;;  %v8566_v62 = vunpack.i.l.bf16 %v8565_v21 }
  0xcb   : > { %7924 = vmatprep.mubr.msk.bf16.mxu0 %vm840_vm4, %v9851_v25 }
  0xcc   : > { %7925 = vmatmul.mubr.msk.bf16.gmra.mrb[12].mxu0 %vm840_vm4, %v9849_v11  ;;  %v8580_v38 = vpop.permute.xlu1 %8579  ;;  %v759_v19 = vsel %vm717_vm2, %v9557_v51, %v8567_v39  ;;  %v758_v18 = vsel %vm717_vm2, %v9554_v50, %v8566_v62  ;;  %v761_v51 = vsel %vm717_vm2, %v9597_v0, %v8572_v8  ;;  %v760_v50 = vsel %vm717_vm2, %v9581_v59, %v8571_v61 }
  0xcd   : > { %v8575_v6 = vpop.permute.xlu0 %8574  ;;  %v8582_v16 = vunpack.i.h.bf16 %v8580_v38  ;;  %v8581_v41 = vunpack.i.l.bf16 %v8580_v38 }
  0xce   : > { %v8577_v5 = vunpack.i.h.bf16 %v8575_v6  ;;  %v8576_v35 = vunpack.i.l.bf16 %v8575_v6 }
  0xcf   : > { %v735_v23 = vsel %vm717_vm2, %v9569_v55, %v8582_v16  ;;  %v734_v52 = vsel %vm717_vm2, %v9566_v54, %v8581_v41 }
  0xd0   : > { %v807_v20 = vsel %vm766_vm3, %v758_v18, %v8576_v35  ;;  %v808_v29 = vsel %vm766_vm3, %v759_v19, %v8577_v5  ;;  %v8590_v24 = vpop.permute.xlu1 %8589 }
  0xd1   : > { %v8585_v53 = vpop.permute.xlu0 %8584  ;;  %v9863_v34 = vpack.c.bf16 %v808_v29, %v807_v20  ;;  %v8592_v30 = vunpack.i.h.bf16 %v8590_v24  ;;  %v8591_v27 = vunpack.i.l.bf16 %v8590_v24 }
  0xd2   : > { %v8587_v33 = vunpack.i.h.bf16 %v8585_v53  ;;  %v8586_v17 = vunpack.i.l.bf16 %v8585_v53 }
  0xd3   : > { %7952 = vmatprep.mubr.msk.bf16.mxu1 %vm840_vm4, %v9863_v34  ;;  %v737_v0 = vsel %vm717_vm2, %v9634_v26, %v8592_v30  ;;  %v736_v59 = vsel %vm717_vm2, %v9612_v12, %v8591_v27 }
  0xd4   : > { %v809_v13 = vsel %vm766_vm3, %v760_v50, %v8586_v17  ;;  %v810_v2 = vsel %vm766_vm3, %v761_v51, %v8587_v33  ;;  %v8600_v42 = vpop.permute.xlu1 %8599 }
  0xd5   : > { %v8595_v46 = vpop.permute.xlu0 %8594  ;;  %v8602_v43 = vunpack.i.h.bf16 %v8600_v42  ;;  %v8601_v40 = vunpack.i.l.bf16 %v8600_v42  ;;  %v9873_v10 = vpack.c.bf16 %v810_v2, %v809_v13 }
  0xd6   : > { %v8597_v31 = vunpack.i.h.bf16 %v8595_v46  ;;  %v8596_v57 = vunpack.i.l.bf16 %v8595_v46 }
  0xd7   : > { %v785_v56 = vsel %vm766_vm3, %v736_v59, %v8601_v40  ;;  %v786_v22 = vsel %vm766_vm3, %v737_v0, %v8602_v43  ;;  %7953 = vmatmul.mubr.msk.bf16.gmra.mrb[16].mxu1 %vm840_vm4, %v9873_v10  ;;  %v14301_v0 = vld [vmem:[#allocation6_spill] sm:$0xff] }
  0xd8   : > { %v783_v26 = vsel %vm766_vm3, %v734_v52, %v8596_v57  ;;  %v784_v49 = vsel %vm766_vm3, %v735_v23, %v8597_v31  ;;  %v8610_v12 = vpop.permute.xlu1 %8609  ;;  %v9889_v21 = vpack.c.bf16 %v786_v22, %v785_v56  ;;  %v14302_v57 = vld [vmem:[#allocation5_spill] sm:$0xff]  ;;  %v14303_v52 = vld [vmem:[#allocation4_spill] sm:$0xff] }
  0xd9   : > { %v8605_v39 = vpop.permute.xlu0 %8604  ;;  %v9891_v62 = vpack.c.bf16 %v784_v49, %v783_v26  ;;  %v8612_v8 = vunpack.i.h.bf16 %v8610_v12  ;;  %v8611_v61 = vunpack.i.l.bf16 %v8610_v12 }
  0xda   : > { %v8607_v55 = vunpack.i.h.bf16 %v8605_v39  ;;  %v8606_v38 = vunpack.i.l.bf16 %v8605_v39 }
  0xdb   : > { %7928 = vmatprep.mubr.msk.bf16.mxu0 %vm840_vm4, %v9891_v62 }
  0xdc   : > { %7929 = vmatmul.mubr.msk.bf16.gmra.mrb[16].mxu0 %vm840_vm4, %v9889_v21  ;;  %v8620_v54 = vpop.permute.xlu1 %8619  ;;  %v763_v19 = vsel %vm717_vm2, %v9619_v15, %v8607_v55  ;;  %v762_v18 = vsel %vm717_vm2, %v9616_v14, %v8606_v38  ;;  %v765_v15 = vsel %vm717_vm2, %v9652_v37, %v8612_v8  ;;  %v764_v14 = vsel %vm717_vm2, %v9643_v32, %v8611_v61 }
  0xdd   : > { %v8615_v6 = vpop.permute.xlu0 %8614  ;;  %v8622_v50 = vunpack.i.h.bf16 %v8620_v54  ;;  %v8621_v16 = vunpack.i.l.bf16 %v8620_v54 }
  0xde   : > { %v8617_v5 = vunpack.i.h.bf16 %v8615_v6  ;;  %v8616_v35 = vunpack.i.l.bf16 %v8615_v6 }
  0xdf   : > { %v739_v23 = vsel %vm717_vm2, %v14302_v57, %v8622_v50  ;;  %v738_v56 = vsel %vm717_vm2, %v14303_v52, %v8621_v16 }
  0xe0   : > { %v811_v20 = vsel %vm766_vm3, %v762_v18, %v8616_v35  ;;  %v812_v29 = vsel %vm766_vm3, %v763_v19, %v8617_v5  ;;  %v8630_v24 = vpop.permute.xlu1 %8629 }
  0xe1   : > { %v8625_v53 = vpop.permute.xlu0 %8624  ;;  %v9903_v33 = vpack.c.bf16 %v812_v29, %v811_v20  ;;  %v8632_v27 = vunpack.i.h.bf16 %v8630_v24  ;;  %v8631_v51 = vunpack.i.l.bf16 %v8630_v24 }
  0xe2   : > { %v8627_v17 = vunpack.i.h.bf16 %v8625_v53  ;;  %v8626_v30 = vunpack.i.l.bf16 %v8625_v53 }
  0xe3   : > { %7956 = vmatprep.mubr.msk.bf16.mxu1 %vm840_vm4, %v9903_v33  ;;  %v741_v37 = vsel %vm717_vm2, %v9672_v58, %v8632_v27  ;;  %v740_v32 = vsel %vm717_vm2, %v14301_v0, %v8631_v51  ;;  %vm4934_vm2 = vcmask 97287  }
  0xe4   : > { %v813_v41 = vsel %vm766_vm3, %v764_v14, %v8626_v30  ;;  %v814_v13 = vsel %vm766_vm3, %v765_v15, %v8627_v17  ;;  %v8640_v2 = vpop.permute.xlu1 %8639 }
  0xe5   : > { %v8635_v42 = vpop.permute.xlu0 %8634  ;;  %v8642_v46 = vunpack.i.h.bf16 %v8640_v2  ;;  %v8641_v43 = vunpack.i.l.bf16 %v8640_v2  ;;  %v9913_v40 = vpack.c.bf16 %v814_v13, %v813_v41 }
  0xe6   : > { %v8637_v59 = vunpack.i.h.bf16 %v8635_v42  ;;  %v8636_v31 = vunpack.i.l.bf16 %v8635_v42 }
  0xe7   : > { %v789_v22 = vsel %vm766_vm3, %v740_v32, %v8641_v43  ;;  %v790_v26 = vsel %vm766_vm3, %v741_v37, %v8642_v46  ;;  %7957 = vmatmul.mubr.msk.bf16.gmra.mrb[20].mxu1 %vm840_vm4, %v9913_v40 }
  0xe8   : > { %v787_v58 = vsel %vm766_vm3, %v738_v56, %v8636_v31  ;;  %v788_v49 = vsel %vm766_vm3, %v739_v23, %v8637_v59  ;;  %v826_v12 = vpack.c.bf16 %v790_v26, %v789_v22  ;;  %7962 = vmatprep.mubr.msk.bf16.mxu1 %vm840_vm4, %v9730_v60  ;;  %vm5505_vm3 = vcmask 293888  }
  0xe9   : > { %v825_v39 = vpack.c.bf16 %v788_v49, %v787_v58 }
  0xeb   : > { %7932 = vmatprep.mubr.msk.bf16.mxu0 %vm840_vm4, %v825_v39 }
  0xec   : > { %7933 = vmatmul.mubr.msk.bf16.gmra.mrb[20].mxu0 %vm840_vm4, %v826_v12 }
  0xed   : > { %8012 = vmatprep.mubr.msk.bf16.mxu0 %vm840_vm4, %v9730_v60 }
  0xef   : > { %7963 = vmatmul.mubr.msk.bf16.vlgmr.msra.gmra.mrb[24].mxu1 %vm840_vm4, %v9727_v47 }
  0xf0   : > { %7966 = vmatprep.mubr.msk.bf16.mxu1 %vm840_vm4, %v9771_v36 }
  0xf4   : > { %8013 = vmatmul.mubr.msk.bf16.vlgmr.msra.gmra.mrb[24].mxu0 %vm840_vm4, %v9727_v47  ;;  %v14304_v47 = vld [vmem:[#allocation7_spill] sm:$0xff] }
  0xf5   : > { %8016 = vmatprep.mubr.msk.bf16.mxu0 %vm840_vm4, %v9771_v36 }
  0xf7   : > { %7967 = vmatmul.mubr.msk.bf16.gmra.mrb[28].mxu1 %vm840_vm4, %v9769_v7 }
  0xf8   : > { %7970 = vmatprep.mubr.msk.bf16.mxu1 %vm840_vm4, %v9811_v48 }
  0xfc   : > { %8017 = vmatmul.mubr.msk.bf16.gmra.mrb[28].mxu0 %vm840_vm4, %v9769_v7 }
  0xfd   : > { %8020 = vmatprep.mubr.msk.bf16.mxu0 %vm840_vm4, %v9811_v48 }
  0xff   : > { %7971 = vmatmul.mubr.msk.bf16.gmra.mrb[32].mxu1 %vm840_vm4, %v9809_v9 }
 0x100   : > { %7974 = vmatprep.mubr.msk.bf16.mxu1 %vm840_vm4, %v9851_v25 }
 0x104   : > { %8021 = vmatmul.mubr.msk.bf16.gmra.mrb[32].mxu0 %vm840_vm4, %v9809_v9 }
 0x105   : > { %8024 = vmatprep.mubr.msk.bf16.mxu0 %vm840_vm4, %v9851_v25 }
 0x107   : > { %7975 = vmatmul.mubr.msk.bf16.gmra.mrb[36].mxu1 %vm840_vm4, %v9849_v11 }
 0x108   : > { %7978 = vmatprep.mubr.msk.bf16.mxu1 %vm840_vm4, %v9891_v62 }
 0x10c   : > { %8025 = vmatmul.mubr.msk.bf16.gmra.mrb[36].mxu0 %vm840_vm4, %v9849_v11 }
 0x10d   : > { %8028 = vmatprep.mubr.msk.bf16.mxu0 %vm840_vm4, %v9891_v62 }
 0x10f   : > { %7979 = vmatmul.mubr.msk.bf16.gmra.mrb[40].mxu1 %vm840_vm4, %v9889_v21 }
 0x110   : > { %7982 = vmatprep.mubr.msk.bf16.mxu1 %vm840_vm4, %v825_v39 }
 0x114   : > { %8029 = vmatmul.mubr.msk.bf16.gmra.mrb[40].mxu0 %vm840_vm4, %v9889_v21 }
 0x115   : > { %8032 = vmatprep.mubr.msk.bf16.mxu0 %vm840_vm4, %v825_v39 }
 0x117   : > { %7983 = vmatmul.mubr.msk.bf16.gmra.mrb[44].mxu1 %vm840_vm4, %v826_v12 }
 0x118   : > { %7986 = vmatprep.mubr.msk.bf16.mxu1 %vm840_vm4, %v14304_v47 }
 0x11c   : > { %8033 = vmatmul.mubr.msk.bf16.gmra.mrb[44].mxu0 %vm840_vm4, %v826_v12 }
 0x11d   : > { %8036 = vmatprep.mubr.msk.bf16.mxu0 %vm840_vm4, %v14304_v47 }
 0x11f   : > { %7987 = vmatmul.mubr.msk.bf16.gmra.mrb[48].mxu1 %vm840_vm4, %v9714_v44 }
 0x120   : > { %7990 = vmatprep.mubr.msk.bf16.mxu1 %vm840_vm4, %v9743_v1 }
 0x124   : > { %8037 = vmatmul.mubr.msk.bf16.gmra.mrb[48].mxu0 %vm840_vm4, %v9714_v44 }
 0x125   : > { %8040 = vmatprep.mubr.msk.bf16.mxu0 %vm840_vm4, %v9743_v1 }
 0x127   : > { %7991 = vmatmul.mubr.msk.bf16.gmra.mrb[52].mxu1 %vm840_vm4, %v9753_v63 }
 0x128   : > { %7994 = vmatprep.mubr.msk.bf16.mxu1 %vm840_vm4, %v9783_v4 }
 0x12c   : > { %8041 = vmatmul.mubr.msk.bf16.gmra.mrb[52].mxu0 %vm840_vm4, %v9753_v63 }
 0x12d   : > { %8044 = vmatprep.mubr.msk.bf16.mxu0 %vm840_vm4, %v9783_v4 }
 0x12f   : > { %7995 = vmatmul.mubr.msk.bf16.gmra.mrb[56].mxu1 %vm840_vm4, %v9793_v28 }
 0x130   : > { %7998 = vmatprep.mubr.msk.bf16.mxu1 %vm840_vm4, %v9823_v3 }
 0x134   : > { %8045 = vmatmul.mubr.msk.bf16.gmra.mrb[56].mxu0 %vm840_vm4, %v9793_v28 }
 0x135   : > { %8048 = vmatprep.mubr.msk.bf16.mxu0 %vm840_vm4, %v9823_v3 }
 0x137   : > { %7999 = vmatmul.mubr.msk.bf16.gmra.mrb[60].mxu1 %vm840_vm4, %v9833_v45 }
 0x138   : > { %8002 = vmatprep.mubr.msk.bf16.mxu1 %vm840_vm4, %v9863_v34 }
 0x13c   : > { %8049 = vmatmul.mubr.msk.bf16.gmra.mrb[60].mxu0 %vm840_vm4, %v9833_v45 }
 0x13d   : > { %8052 = vmatprep.mubr.msk.bf16.mxu0 %vm840_vm4, %v9863_v34 }
 0x13f   : > { %8003 = vmatmul.mubr.msk.bf16.gmra.mrb[64].mxu1 %vm840_vm4, %v9873_v10 }
 0x140   : > { %8006 = vmatprep.mubr.msk.bf16.mxu1 %vm840_vm4, %v9903_v33 }
 0x144   : > { %8053 = vmatmul.mubr.msk.bf16.gmra.mrb[64].mxu0 %vm840_vm4, %v9873_v10 }
 0x145   : > { %8056 = vmatprep.mubr.msk.bf16.mxu0 %vm840_vm4, %v9903_v33 }
 0x147   : > { %8007 = vmatmul.mubr.msk.bf16.gmra.mrb[68].mxu1 %vm840_vm4, %v9913_v40 }
 0x14c   : > { %8057 = vmatmul.mubr.msk.bf16.gmra.mrb[68].mxu0 %vm840_vm4, %v9913_v40 }
 0x16a   : > { %v7938_v44 = vpop.f32.mrb[0].mxu1 }
 0x16b   : > { %v10023_v60 = vpop.f32.mrb[1].mxu1 }
 0x16c   : > { %v10025_v1 = vpop.f32.mrb[2].mxu1 }
 0x16d   : > { %v10027_v63 = vpop.f32.mrb[3].mxu1 }
 0x16f   : > { %v7914_v7 = vpop.f32.mrb[0].mxu0 }
 0x170   : > { %v954_v36 = vpop.f32.mrb[1].mxu0 }
 0x171   : > { %v10029_v4 = vpop.f32.mrb[2].mxu0 }
 0x172   : > { %v957_v28 = vpop.f32.mrb[3].mxu0 }
 0x17a   : > { %v10031_v9 = vpop.f32.mrb[4].mxu1 }
 0x17b   : > { %v10033_v48 = vpop.f32.mrb[5].mxu1 }
 0x17c   : > { %v10035_v3 = vpop.f32.mrb[6].mxu1 }
 0x17d   : > { %v1060_v45 = vpop.f32.mrb[7].mxu1 }
 0x17f   : > { %v10037_v11 = vpop.f32.mrb[4].mxu0 }
 0x180   : > { %v10039_v25 = vpop.f32.mrb[5].mxu0 }
 0x181   : > { %v10041_v34 = vpop.f32.mrb[6].mxu0 }
 0x182   : > { %v972_v10 = vpop.f32.mrb[7].mxu0 }
 0x18a   : > { %v10043_v21 = vpop.f32.mrb[8].mxu1 }
 0x18b   : > { %v1072_v62 = vpop.f32.mrb[9].mxu1 }
 0x18c   : > { %v7947_v55 = vpop.f32.mrb[10].mxu1 }
 0x18d   : > { %v10045_v38 = vpop.f32.mrb[11].mxu1 }
 0x18f   : > { %v10047_v54 = vpop.f32.mrb[8].mxu0 }
 0x190   : > { %v984_v6 = vpop.f32.mrb[9].mxu0 }
 0x191   : > { %v7923_v5 = vpop.f32.mrb[10].mxu0 }
 0x192   : > { %v10049_v35 = vpop.f32.mrb[11].mxu0 }
 0x19a   : > { %v7950_v19 = vpop.f32.mrb[12].mxu1 }
 0x19b   : > { %v10051_v18 = vpop.f32.mrb[13].mxu1 }
 0x19c   : > { %v10053_v8 = vpop.f32.mrb[14].mxu1 }
 0x19d   : > { %v10055_v61 = vpop.f32.mrb[15].mxu1 }
 0x19f   : > { %v7926_v20 = vpop.f32.mrb[12].mxu0 }
 0x1a0   : > { %v10057_v29 = vpop.f32.mrb[13].mxu0 }
 0x1a1   : > { %v10059_v24 = vpop.f32.mrb[14].mxu0 }
 0x1a2   : > { %v10061_v53 = vpop.f32.mrb[15].mxu0 }
 0x1aa   : > { %v10063_v33 = vpop.f32.mrb[16].mxu1 }
 0x1ab   : > { %v10065_v17 = vpop.f32.mrb[17].mxu1 }
 0x1ac   : > { %v10067_v30 = vpop.f32.mrb[18].mxu1 }
 0x1ad   : > { %v1104_v27 = vpop.f32.mrb[19].mxu1 }
 0x1af   : > { %v10069_v51 = vpop.f32.mrb[16].mxu0 }
 0x1b0   : > { %v10071_v15 = vpop.f32.mrb[17].mxu0 }
 0x1b1   : > { %v10073_v14 = vpop.f32.mrb[18].mxu0 }
 0x1b2   : > { %v1016_v50 = vpop.f32.mrb[19].mxu0 }
 0x1ba   : > { %v10075_v16 = vpop.f32.mrb[20].mxu1 }
 0x1bb   : > { %v1116_v41 = vpop.f32.mrb[21].mxu1 }
 0x1bc   : > { %v7959_v13 = vpop.f32.mrb[22].mxu1 }
 0x1bd   : > { %v10077_v2 = vpop.f32.mrb[23].mxu1 }
 0x1bf   : > { %v10079_v42 = vpop.f32.mrb[20].mxu0 }
 0x1c0   : > { %v1028_v46 = vpop.f32.mrb[21].mxu0 }
 0x1c1   : > { %v7935_v43 = vpop.f32.mrb[22].mxu0 }
 0x1c2   : > { %v10081_v40 = vpop.f32.mrb[23].mxu0  ;;  %v7964_v37 = vpop.f32.mrb[24].mxu1 }
 0x1c3   : > { %v1168_v0 = vpop.f32.mrb[25].mxu1  ;;  %v1411_v31 = vrot.slane %v7964_v37, 1 }
 0x1c4   : > { %v7965_v32 = vpop.f32.mrb[26].mxu1  ;;  %v1408_v57 = vrot.slane %v1168_v0, 1 }
 0x1c5   : > { %v1171_v59 = vpop.f32.mrb[27].mxu1  ;;  %v1413_v62 = vrot.slane %v7965_v32, 1 }
 0x1c6   : > { %v1409_v23 = vrot.slane %v1171_v59, 1 }
 0x1c7   : > { %v8014_v52 = vpop.f32.mrb[24].mxu0 }
 0x1c8   : > { %v1410_v56 = vsel %vm1407_vm5, %v1408_v57, %v1409_v23  ;;  %v1412_v22 = vsel %vm1407_vm5, %v1409_v23, %v1411_v31  ;;  %v1591_v26 = vpop.f32.mrb[25].mxu0  ;;  %v1834_v44 = vrot.slane %v8014_v52, 2 }
 0x1c9   : > { %v1520_v58 = vadd.f32 %v1410_v56, %v954_v36  ;;  %v1521_v49 = vadd.f32 %v1412_v22, %v957_v28  ;;  %v8015_v12 = vpop.f32.mrb[26].mxu0  ;;  %v1831_v7 = vrot.slane %v1591_v26, 2  ;;  %v10090_v36 = vld [vmem:[%s14204_s2] ss:$0 sm:$0xff] }
 0x1ca   : > { %v7968_v39 = vpop.f32.mrb[28].mxu1  ;;  %v1594_v47 = vpop.f32.mrb[27].mxu0  ;;  %v1836_v52 = vrot.slane %v8015_v12, 2 }
 0x1cb   : > { %v1832_v45 = vrot.slane %v1594_v47, 2  ;;  %v1184_v10 = vpop.f32.mrb[29].mxu1  ;;  %v1418_v5 = vrot.slane %v7968_v39, 1 }
 0x1cc   : > { %v1414_v55 = vrot.slane %v1184_v10, 1  ;;  %v7969_v6 = vpop.f32.mrb[30].mxu1 }
 0x1cd   : > { %v1833_v19 = vsel %vm1830_vm6, %v1831_v7, %v1832_v45  ;;  %v1835_v20 = vsel %vm1830_vm6, %v1832_v45, %v1834_v44  ;;  %v1419_v28 = vrot.slane %v7969_v6, 1  ;;  %v1187_v27 = vpop.f32.mrb[31].mxu1 }
 0x1ce   : > { %v1943_v50 = vadd.f32 %v1833_v19, %v1520_v58  ;;  %v1944_v41 = vadd.f32 %v1835_v20, %v1521_v49  ;;  %v1415_v13 = vsel %vm1407_vm5, %v1413_v62, %v1414_v55  ;;  %v1416_v46 = vrot.slane %v1187_v27, 1 }
 0x1cf   : > { %v1522_v43 = vadd.f32 %v10029_v4, %v1415_v13  ;;  %v1420_v37 = vsel %vm1407_vm5, %v1418_v5, %v1419_v28  ;;  %v8018_v0 = vpop.f32.mrb[28].mxu0 }
 0x1d0   : > { %v10096_v32 = vadd.f32 %v10090_v36, %v1943_v50  ;;  %v10099_v59 = vadd.f32 %v10090_v36, %v1944_v41  ;;  %v1524_v31 = vadd.f32 %v10037_v11, %v1420_v37  ;;  %v1417_v57 = vsel %vm1407_vm5, %v1414_v55, %v1416_v46  ;;  %v1607_v23 = vpop.f32.mrb[29].mxu0 }
 0x1d1   : > { %v1523_v56 = vadd.f32 %v1417_v57, %v10039_v25  ;;  %v1837_v22 = vrot.slane %v1607_v23, 2  ;;  %v8019_v26 = vpop.f32.mrb[30].mxu0  ;;  %v1841_v4 = vrot.slane %v8018_v0, 2 }
 0x1d2   : > { %v1842_v58 = vrot.slane %v8019_v26, 2  ;;  %v7972_v49 = vpop.f32.mrb[32].mxu1  ;;  %v1610_v39 = vpop.f32.mrb[31].mxu0  ;;  %v2015_v47 = vsel %vm2014_vm7, %v10096_v32, 0.0  ;;  %v2016_v11 = vsel %vm2014_vm7, %v10099_v59, 0.0 }
 0x1d3   : > { %v1838_v44 = vsel %vm1830_vm6, %v1836_v52, %v1837_v22  ;;  %v1839_v7 = vrot.slane %v1610_v39, 2  ;;  %v1200_v45 = vpop.f32.mrb[33].mxu1  ;;  %v1424_v6 = vrot.slane %v7972_v49, 1  ;;  %v2017_v46 = vadd.f32 %v2016_v11, %v2015_v47 }
 0x1d4   : > { %v1945_v10 = vadd.f32 %v1838_v44, %v1522_v43  ;;  %v1843_v12 = vsel %vm1830_vm6, %v1841_v4, %v1842_v58  ;;  %v1421_v25 = vrot.slane %v1200_v45, 1  ;;  %v7973_v62 = vpop.f32.mrb[34].mxu1 }
 0x1d5   : > { %v1947_v55 = vadd.f32 %v1843_v12, %v1524_v31  ;;  %v1840_v5 = vsel %vm1830_vm6, %v1837_v22, %v1839_v7  ;;  %v1426_v19 = vrot.slane %v7973_v62, 1  ;;  %v1203_v20 = vpop.f32.mrb[35].mxu1 }
 0x1d6   : > { %v10112_v27 = vadd.f32 %v10090_v36, %v1945_v10  ;;  %v1946_v50 = vadd.f32 %v1840_v5, %v1523_v56  ;;  %v1422_v41 = vsel %vm1407_vm5, %v1419_v28, %v1421_v25  ;;  %v1423_v13 = vrot.slane %v1203_v20, 1 }
 0x1d7   : > { %v1525_v43 = vadd.f32 %v10041_v34, %v1422_v41  ;;  %v1427_v37 = vsel %vm1407_vm5, %v1424_v6, %v1426_v19  ;;  %v8022_v0 = vpop.f32.mrb[32].mxu0  ;;  %v10128_v7 = vadd.f32 %v10090_v36, %v1947_v55 }
 0x1d8   : > { %v2018_v31 = vsel %vm2014_vm7, %v10112_v27, 0.0  ;;  %v10120_v57 = vadd.f32 %v10090_v36, %v1946_v50  ;;  %v1527_v23 = vadd.f32 %v10047_v54, %v1427_v37  ;;  %v1425_v52 = vsel %vm1407_vm5, %v1423_v13, %v1424_v6  ;;  %v1623_v56 = vpop.f32.mrb[33].mxu0 }
 0x1d9   : > { %v2019_v22 = vadd.f32 %v2018_v31, %v2017_v46  ;;  %v1526_v28 = vadd.f32 %v1425_v52, %v10049_v35  ;;  %v8023_v26 = vpop.f32.mrb[34].mxu0  ;;  %v1847_v4 = vrot.slane %v8022_v0, 2  ;;  %v1844_v49 = vrot.slane %v1623_v56, 2 }
 0x1da   : > { %v2020_v34 = vsel %vm2014_vm7, %v10120_v57, 0.0  ;;  %v1849_v39 = vrot.slane %v8023_v26, 2  ;;  %v7976_v47 = vpop.f32.mrb[36].mxu1  ;;  %v1626_v44 = vpop.f32.mrb[35].mxu0  ;;  %v2022_v55 = vsel %vm2014_vm7, %v10128_v7, 0.0 }
 0x1db   : > { %v1846_v45 = vrot.slane %v1626_v44, 2  ;;  %v1216_v54 = vpop.f32.mrb[37].mxu1  ;;  %v2021_v11 = vadd.f32 %v2020_v34, %v2019_v22  ;;  %v1845_v10 = vsel %vm1830_vm6, %v1842_v58, %v1844_v49  ;;  %v1431_v19 = vrot.slane %v7976_v47, 1 }
 0x1dc   : > { %v1850_v12 = vsel %vm1830_vm6, %v1847_v4, %v1849_v39  ;;  %v7977_v35 = vpop.f32.mrb[38].mxu1  ;;  %v1948_v25 = vadd.f32 %v1845_v10, %v1525_v43  ;;  %v1428_v50 = vrot.slane %v1216_v54, 1 }
 0x1dd   : > { %v1950_v62 = vadd.f32 %v1850_v12, %v1527_v23  ;;  %v1848_v6 = vsel %vm1830_vm6, %v1846_v45, %v1847_v4  ;;  %v1219_v5 = vpop.f32.mrb[39].mxu1  ;;  %v2023_v58 = vadd.f32 %v2022_v55, %v2021_v11  ;;  %v1433_v54 = vrot.slane %v7977_v35, 1 }
 0x1de   : > { %v1949_v20 = vadd.f32 %v1848_v6, %v1526_v28  ;;  %v1429_v41 = vrot.slane %v1219_v5, 1  ;;  %v10136_v13 = vadd.f32 %v10090_v36, %v1948_v25 }
 0x1df   : > { %v8026_v46 = vpop.f32.mrb[36].mxu0  ;;  %v10150_v45 = vadd.f32 %v10090_v36, %v1950_v62 }
 0x1e0   : > { %v10139_v37 = vadd.f32 %v10090_v36, %v1949_v20  ;;  %v1430_v43 = vsel %vm1407_vm5, %v1428_v50, %v1429_v41  ;;  %v1432_v0 = vsel %vm1407_vm5, %v1429_v41, %v1431_v19  ;;  %v1639_v31 = vpop.f32.mrb[37].mxu0  ;;  %v2024_v23 = vsel %vm2014_vm7, %v10136_v13, 0.0 }
 0x1e1   : > { %v1528_v52 = vadd.f32 %v1430_v43, %v10057_v29  ;;  %v1529_v56 = vadd.f32 %v1432_v0, %v10061_v53  ;;  %v8027_v22 = vpop.f32.mrb[38].mxu0  ;;  %v2025_v28 = vadd.f32 %v2024_v23, %v2023_v58  ;;  %v1854_v49 = vrot.slane %v8026_v46, 2 }
 0x1e2   : > { %v2026_v26 = vsel %vm2014_vm7, %v10139_v37, 0.0  ;;  %v7980_v34 = vpop.f32.mrb[40].mxu1  ;;  %v1642_v4 = vpop.f32.mrb[39].mxu0  ;;  %v1851_v39 = vrot.slane %v1639_v31, 2  ;;  %v2028_v46 = vsel %vm2014_vm7, %v10150_v45, 0.0  ;;  %v1856_v23 = vrot.slane %v8027_v22, 2 }
 0x1e3   : > { %v1852_v47 = vrot.slane %v1642_v4, 2  ;;  %v1232_v44 = vpop.f32.mrb[41].mxu1  ;;  %v1438_v11 = vrot.slane %v7980_v34, 1  ;;  %v2027_v12 = vadd.f32 %v2026_v26, %v2025_v28 }
 0x1e4   : > { %v1434_v10 = vrot.slane %v1232_v44, 1  ;;  %v7981_v29 = vpop.f32.mrb[42].mxu1 }
 0x1e5   : > { %v1853_v53 = vsel %vm1830_vm6, %v1851_v39, %v1852_v47  ;;  %v1855_v25 = vsel %vm1830_vm6, %v1852_v47, %v1854_v49  ;;  %v1439_v6 = vrot.slane %v7981_v29, 1  ;;  %v1235_v5 = vpop.f32.mrb[43].mxu1 }
 0x1e6   : > { %v1951_v19 = vadd.f32 %v1853_v53, %v1528_v52  ;;  %v1952_v20 = vadd.f32 %v1855_v25, %v1529_v56  ;;  %v1435_v50 = vsel %vm1407_vm5, %v1433_v54, %v1434_v10  ;;  %v1436_v55 = vrot.slane %v1235_v5, 1 }
 0x1e7   : > { %v1530_v41 = vadd.f32 %v10059_v24, %v1435_v50  ;;  %v1440_v62 = vsel %vm1407_vm5, %v1438_v11, %v1439_v6  ;;  %v8030_v35 = vpop.f32.mrb[40].mxu0  ;;  %v2029_v52 = vadd.f32 %v2028_v46, %v2027_v12 }
 0x1e8   : > { %v10160_v58 = vadd.f32 %v10090_v36, %v1951_v19  ;;  %v10163_v43 = vadd.f32 %v10090_v36, %v1952_v20  ;;  %v1532_v0 = vadd.f32 %v10069_v51, %v1440_v62  ;;  %v1655_v31 = vpop.f32.mrb[41].mxu0  ;;  %v1437_v24 = vsel %vm1407_vm5, %v1434_v10, %v1436_v55 }
 0x1e9   : > { %v1857_v56 = vrot.slane %v1655_v31, 2  ;;  %v8031_v28 = vpop.f32.mrb[42].mxu0  ;;  %v1531_v34 = vadd.f32 %v1437_v24, %v10071_v15  ;;  %v1861_v4 = vrot.slane %v8030_v35, 2 }
 0x1ea   : > { %v2030_v26 = vsel %vm2014_vm7, %v10160_v58, 0.0  ;;  %v1862_v49 = vrot.slane %v8031_v28, 2  ;;  %v7984_v39 = vpop.f32.mrb[44].mxu1  ;;  %v1658_v47 = vpop.f32.mrb[43].mxu0  ;;  %v2032_v22 = vsel %vm2014_vm7, %v10163_v43, 0.0 }
 0x1eb   : > { %v2031_v44 = vadd.f32 %v2030_v26, %v2029_v52  ;;  %v1858_v54 = vsel %vm1830_vm6, %v1856_v23, %v1857_v56  ;;  %v1859_v51 = vrot.slane %v1658_v47, 2  ;;  %v1248_v11 = vpop.f32.mrb[45].mxu1  ;;  %v1444_v5 = vrot.slane %v7984_v39, 1 }
 0x1ec   : > { %v1953_v10 = vadd.f32 %v1858_v54, %v1530_v41  ;;  %v1863_v29 = vsel %vm1830_vm6, %v1861_v4, %v1862_v49  ;;  %v1441_v12 = vrot.slane %v1248_v11, 1  ;;  %v7985_v53 = vpop.f32.mrb[46].mxu1 }
 0x1ed   : > { %v1955_v25 = vadd.f32 %v1863_v29, %v1532_v0  ;;  %v1860_v15 = vsel %vm1830_vm6, %v1857_v56, %v1859_v51  ;;  %v1446_v19 = vrot.slane %v7985_v53, 1  ;;  %v1251_v20 = vpop.f32.mrb[47].mxu1  ;;  %v2033_v46 = vadd.f32 %v2032_v22, %v2031_v44 }
 0x1ee   : > { %v10176_v50 = vadd.f32 %v10090_v36, %v1953_v10  ;;  %v1954_v62 = vadd.f32 %v1860_v15, %v1531_v34  ;;  %v1442_v55 = vsel %vm1407_vm5, %v1439_v6, %v1441_v12  ;;  %v1443_v35 = vrot.slane %v1251_v20, 1 }
 0x1ef   : > { %v1533_v41 = vadd.f32 %v10073_v14, %v1442_v55  ;;  %v1447_v31 = vsel %vm1407_vm5, %v1444_v5, %v1446_v19  ;;  %v8034_v23 = vpop.f32.mrb[44].mxu0  ;;  %v10192_v51 = vadd.f32 %v10090_v36, %v1955_v25 }
 0x1f0   : > { %v2034_v0 = vsel %vm2014_vm7, %v10176_v50, 0.0  ;;  %v10184_v52 = vadd.f32 %v10090_v36, %v1954_v62  ;;  %v1535_v24 = vadd.f32 %v10079_v42, %v1447_v31  ;;  %v1445_v56 = vsel %vm1407_vm5, %v1443_v35, %v1444_v5  ;;  %v1671_v28 = vpop.f32.mrb[45].mxu0 }
 0x1f1   : > { %v2035_v26 = vadd.f32 %v2034_v0, %v2033_v46  ;;  %v1534_v6 = vadd.f32 %v1445_v56, %v10081_v40  ;;  %v8035_v34 = vpop.f32.mrb[46].mxu0  ;;  %v1867_v4 = vrot.slane %v8034_v23, 2  ;;  %v1864_v39 = vrot.slane %v1671_v28, 2 }
 0x1f2   : > { %v2036_v14 = vsel %vm2014_vm7, %v10184_v52, 0.0  ;;  %v1869_v47 = vrot.slane %v8035_v34, 2  ;;  %v7988_v44 = vpop.f32.mrb[48].mxu1  ;;  %v1674_v54 = vpop.f32.mrb[47].mxu0  ;;  %v2038_v25 = vsel %vm2014_vm7, %v10192_v51, 0.0 }
 0x1f3   : > { %v1866_v11 = vrot.slane %v1674_v54, 2  ;;  %v1264_v42 = vpop.f32.mrb[49].mxu1  ;;  %v2037_v22 = vadd.f32 %v2036_v14, %v2035_v26  ;;  %v1865_v10 = vsel %vm1830_vm6, %v1862_v49, %v1864_v39  ;;  %v1451_v19 = vrot.slane %v7988_v44, 1 }
 0x1f4   : > { %v1870_v29 = vsel %vm1830_vm6, %v1867_v4, %v1869_v47  ;;  %v7989_v40 = vpop.f32.mrb[50].mxu1  ;;  %v1956_v12 = vadd.f32 %v1865_v10, %v1533_v41  ;;  %v1448_v62 = vrot.slane %v1264_v42, 1 }
 0x1f5   : > { %v1958_v53 = vadd.f32 %v1870_v29, %v1535_v24  ;;  %v1868_v5 = vsel %vm1830_vm6, %v1866_v11, %v1867_v4  ;;  %v1267_v15 = vpop.f32.mrb[51].mxu1  ;;  %v2039_v49 = vadd.f32 %v2038_v25, %v2037_v22  ;;  %v1453_v42 = vrot.slane %v7989_v40, 1 }
 0x1f6   : > { %v1957_v20 = vadd.f32 %v1868_v5, %v1534_v6  ;;  %v1449_v55 = vrot.slane %v1267_v15, 1  ;;  %v10200_v35 = vadd.f32 %v10090_v36, %v1956_v12 }
 0x1f7   : > { %v8038_v46 = vpop.f32.mrb[48].mxu0  ;;  %v10214_v11 = vadd.f32 %v10090_v36, %v1958_v53 }
 0x1f8   : > { %v10203_v31 = vadd.f32 %v10090_v36, %v1957_v20  ;;  %v1450_v41 = vsel %vm1407_vm5, %v1448_v62, %v1449_v55  ;;  %v1452_v23 = vsel %vm1407_vm5, %v1449_v55, %v1451_v19  ;;  %v1687_v0 = vpop.f32.mrb[49].mxu0  ;;  %v2040_v24 = vsel %vm2014_vm7, %v10200_v35, 0.0 }
 0x1f9   : > { %v1536_v56 = vadd.f32 %v1450_v41, %v10023_v60  ;;  %v1537_v28 = vadd.f32 %v1452_v23, %v10027_v63  ;;  %v8039_v26 = vpop.f32.mrb[50].mxu0  ;;  %v2041_v6 = vadd.f32 %v2040_v24, %v2039_v49  ;;  %v1874_v39 = vrot.slane %v8038_v46, 2 }
 0x1fa   : > { %v2042_v34 = vsel %vm2014_vm7, %v10203_v31, 0.0  ;;  %v7992_v14 = vpop.f32.mrb[52].mxu1  ;;  %v1690_v4 = vpop.f32.mrb[51].mxu0  ;;  %v1871_v47 = vrot.slane %v1687_v0, 2  ;;  %v2044_v46 = vsel %vm2014_vm7, %v10214_v11, 0.0  ;;  %v1876_v24 = vrot.slane %v8039_v26, 2 }
 0x1fb   : > { %v1872_v44 = vrot.slane %v1690_v4, 2  ;;  %v1280_v54 = vpop.f32.mrb[53].mxu1  ;;  %v1458_v22 = vrot.slane %v7992_v14, 1  ;;  %v2043_v29 = vadd.f32 %v2042_v34, %v2041_v6 }
 0x1fc   : > { %v1454_v10 = vrot.slane %v1280_v54, 1  ;;  %v7993_v60 = vpop.f32.mrb[54].mxu1 }
 0x1fd   : > { %v1873_v63 = vsel %vm1830_vm6, %v1871_v47, %v1872_v44  ;;  %v1875_v12 = vsel %vm1830_vm6, %v1872_v44, %v1874_v39  ;;  %v1459_v5 = vrot.slane %v7993_v60, 1  ;;  %v1283_v15 = vpop.f32.mrb[55].mxu1 }
 0x1fe   : > { %v1959_v19 = vadd.f32 %v1873_v63, %v1536_v56  ;;  %v1960_v20 = vadd.f32 %v1875_v12, %v1537_v28  ;;  %v1455_v62 = vsel %vm1407_vm5, %v1453_v42, %v1454_v10  ;;  %v1456_v25 = vrot.slane %v1283_v15, 1 }
 0x1ff   : > { %v1538_v55 = vadd.f32 %v10025_v1, %v1455_v62  ;;  %v1460_v53 = vsel %vm1407_vm5, %v1458_v22, %v1459_v5  ;;  %v8042_v40 = vpop.f32.mrb[52].mxu0  ;;  %v2045_v56 = vadd.f32 %v2044_v46, %v2043_v29 }
 0x200   : > { %v10224_v49 = vadd.f32 %v10090_v36, %v1959_v19  ;;  %v10227_v41 = vadd.f32 %v10090_v36, %v1960_v20  ;;  %v1540_v23 = vadd.f32 %v10031_v9, %v1460_v53  ;;  %v1703_v0 = vpop.f32.mrb[53].mxu0  ;;  %v1457_v1 = vsel %vm1407_vm5, %v1454_v10, %v1456_v25 }
 0x201   : > { %v1877_v28 = vrot.slane %v1703_v0, 2  ;;  %v8043_v6 = vpop.f32.mrb[54].mxu0  ;;  %v1539_v14 = vadd.f32 %v1457_v1, %v10033_v48  ;;  %v1881_v4 = vrot.slane %v8042_v40, 2 }
 0x202   : > { %v2046_v34 = vsel %vm2014_vm7, %v10224_v49, 0.0  ;;  %v1882_v39 = vrot.slane %v8043_v6, 2  ;;  %v7996_v47 = vpop.f32.mrb[56].mxu1  ;;  %v1706_v44 = vpop.f32.mrb[55].mxu0  ;;  %v2048_v9 = vsel %vm2014_vm7, %v10227_v41, 0.0 }
 0x203   : > { %v2047_v54 = vadd.f32 %v2046_v34, %v2045_v56  ;;  %v1878_v26 = vsel %vm1830_vm6, %v1876_v24, %v1877_v28  ;;  %v1879_v42 = vrot.slane %v1706_v44, 2  ;;  %v1296_v22 = vpop.f32.mrb[57].mxu1  ;;  %v1464_v29 = vrot.slane %v7996_v47, 1 }
 0x204   : > { %v1961_v10 = vadd.f32 %v1878_v26, %v1538_v55  ;;  %v1883_v60 = vsel %vm1830_vm6, %v1881_v4, %v1882_v39  ;;  %v1461_v63 = vrot.slane %v1296_v22, 1  ;;  %v7997_v12 = vpop.f32.mrb[58].mxu1 }
 0x205   : > { %v2049_v15 = vadd.f32 %v2048_v9, %v2047_v54  ;;  %v1963_v48 = vadd.f32 %v1883_v60, %v1540_v23  ;;  %v1880_v19 = vsel %vm1830_vm6, %v1877_v28, %v1879_v42  ;;  %v1466_v20 = vrot.slane %v7997_v12, 1  ;;  %v1299_v62 = vpop.f32.mrb[59].mxu1 }
 0x206   : > { %v10240_v53 = vadd.f32 %v10090_v36, %v1961_v10  ;;  %v1962_v25 = vadd.f32 %v1880_v19, %v1539_v14  ;;  %v1462_v40 = vsel %vm1407_vm5, %v1459_v5, %v1461_v63  ;;  %v1463_v46 = vrot.slane %v1299_v62, 1 }
 0x207   : > { %v10244_v55 = vadd.f32 %v10090_v36, %v1963_v48  ;;  %v1541_v0 = vadd.f32 %v10035_v3, %v1462_v40  ;;  %v1467_v24 = vsel %vm1407_vm5, %v1464_v29, %v1466_v20  ;;  %v8046_v56 = vpop.f32.mrb[56].mxu0 }
 0x208   : > { %v2050_v23 = vsel %vm2014_vm7, %v10240_v53, 0.0  ;;  %v10251_v1 = vadd.f32 %v10090_v36, %v1962_v25  ;;  %v1543_v28 = vadd.f32 %v10043_v21, %v1467_v24  ;;  %v1465_v6 = vsel %vm1407_vm5, %v1463_v46, %v1464_v29  ;;  %v1719_v5 = vpop.f32.mrb[57].mxu0 }
 0x209   : > { %v2051_v34 = vadd.f32 %v2050_v23, %v2049_v15  ;;  %v1542_v14 = vadd.f32 %v1465_v6, %v10045_v38  ;;  %v8047_v4 = vpop.f32.mrb[58].mxu0  ;;  %v1887_v47 = vrot.slane %v8046_v56, 2  ;;  %v1884_v44 = vrot.slane %v1719_v5, 2 }
 0x20a   : > { %v2052_v3 = vsel %vm2014_vm7, %v10251_v1, 0.0  ;;  %v1889_v54 = vrot.slane %v8047_v4, 2  ;;  %v8000_v9 = vpop.f32.mrb[60].mxu1  ;;  %v1722_v26 = vpop.f32.mrb[59].mxu0  ;;  %v2054_v21 = vsel %vm2014_vm7, %v10244_v55, 0.0 }
 0x20b   : > { %v2053_v42 = vadd.f32 %v2052_v3, %v2051_v34  ;;  %v1886_v22 = vrot.slane %v1722_v26, 2  ;;  %v1312_v10 = vpop.f32.mrb[61].mxu1  ;;  %v1885_v60 = vsel %vm1830_vm6, %v1882_v39, %v1884_v44  ;;  %v1471_v20 = vrot.slane %v8000_v9, 1 }
 0x20c   : > { %v1890_v29 = vsel %vm1830_vm6, %v1887_v47, %v1889_v54  ;;  %v8001_v38 = vpop.f32.mrb[62].mxu1  ;;  %v1964_v63 = vadd.f32 %v1885_v60, %v1541_v0  ;;  %v1468_v25 = vrot.slane %v1312_v10, 1 }
 0x20d   : > { %v2055_v12 = vadd.f32 %v2054_v21, %v2053_v42  ;;  %v1966_v15 = vadd.f32 %v1890_v29, %v1543_v28  ;;  %v1888_v48 = vsel %vm1830_vm6, %v1886_v22, %v1887_v47  ;;  %v1315_v19 = vpop.f32.mrb[63].mxu1  ;;  %v1473_v21 = vrot.slane %v8001_v38, 1 }
 0x20e   : > { %v1965_v62 = vadd.f32 %v1888_v48, %v1542_v14  ;;  %v1469_v40 = vrot.slane %v1315_v19, 1  ;;  %v10264_v46 = vadd.f32 %v10090_v36, %v1964_v63 }
 0x20f   : > { %v8050_v24 = vpop.f32.mrb[60].mxu0  ;;  %v10267_v56 = vadd.f32 %v10090_v36, %v1966_v15 }
 0x210   : > { %v10270_v39 = vadd.f32 %v10090_v36, %v1965_v62  ;;  %v1470_v0 = vsel %vm1407_vm5, %v1468_v25, %v1469_v40  ;;  %v1472_v23 = vsel %vm1407_vm5, %v1469_v40, %v1471_v20  ;;  %v1735_v28 = vpop.f32.mrb[61].mxu0  ;;  %v2056_v6 = vsel %vm2014_vm7, %v10264_v46, 0.0 }
 0x211   : > { %v1544_v5 = vadd.f32 %v1470_v0, %v10051_v18  ;;  %v1545_v34 = vadd.f32 %v1472_v23, %v10055_v61  ;;  %v8051_v14 = vpop.f32.mrb[62].mxu0  ;;  %v2057_v4 = vadd.f32 %v2056_v6, %v2055_v12  ;;  %v1894_v54 = vrot.slane %v8050_v24, 2 }
 0x212   : > { %v2058_v3 = vsel %vm2014_vm7, %v10270_v39, 0.0  ;;  %v8004_v47 = vpop.f32.mrb[64].mxu1  ;;  %v1738_v44 = vpop.f32.mrb[63].mxu0  ;;  %v1891_v9 = vrot.slane %v1735_v28, 2  ;;  %v2060_v22 = vsel %vm2014_vm7, %v10267_v56, 0.0 }
 0x213   : > { %v1892_v26 = vrot.slane %v1738_v44, 2  ;;  %v1328_v42 = vpop.f32.mrb[65].mxu1  ;;  %v2059_v10 = vadd.f32 %v2058_v3, %v2057_v4  ;;  %v1478_v29 = vrot.slane %v8004_v47, 1 }
 0x214   : > { %v1474_v60 = vrot.slane %v1328_v42, 1  ;;  %v8005_v18 = vpop.f32.mrb[66].mxu1 }
 0x215   : > { %v1893_v61 = vsel %vm1830_vm6, %v1891_v9, %v1892_v26  ;;  %v1895_v63 = vsel %vm1830_vm6, %v1892_v26, %v1894_v54  ;;  %v1479_v12 = vrot.slane %v8005_v18, 1  ;;  %v1331_v15 = vpop.f32.mrb[67].mxu1  ;;  %v2061_v20 = vadd.f32 %v2060_v22, %v2059_v10 }
 0x216   : > { %v1967_v48 = vadd.f32 %v1893_v61, %v1544_v5  ;;  %v1968_v19 = vadd.f32 %v1895_v63, %v1545_v34  ;;  %v1475_v62 = vsel %vm1407_vm5, %v1473_v21, %v1474_v60  ;;  %v1476_v24 = vrot.slane %v1331_v15, 1 }
 0x217   : > { %v1546_v25 = vadd.f32 %v10053_v8, %v1475_v62  ;;  %v1480_v40 = vsel %vm1407_vm5, %v1478_v29, %v1479_v12  ;;  %v8054_v38 = vpop.f32.mrb[64].mxu0  ;;  %v1896_v5 = vrot.slane %v8051_v14, 2 }
 0x218   : > { %v10288_v0 = vadd.f32 %v10090_v36, %v1967_v48  ;;  %v10291_v23 = vadd.f32 %v10090_v36, %v1968_v19  ;;  %v1548_v28 = vadd.f32 %v10063_v33, %v1480_v40  ;;  %v1751_v6 = vpop.f32.mrb[65].mxu0  ;;  %v1477_v34 = vsel %vm1407_vm5, %v1474_v60, %v1476_v24 }
 0x219   : > { %v1897_v4 = vrot.slane %v1751_v6, 2  ;;  %v8055_v3 = vpop.f32.mrb[66].mxu0  ;;  %v1547_v47 = vadd.f32 %v1477_v34, %v10065_v17  ;;  %v1901_v44 = vrot.slane %v8054_v38, 2 }
 0x21a   : > { %v2062_v8 = vsel %vm2014_vm7, %v10288_v0, 0.0  ;;  %v1902_v54 = vrot.slane %v8055_v3, 2  ;;  %v8008_v9 = vpop.f32.mrb[68].mxu1  ;;  %v1754_v26 = vpop.f32.mrb[67].mxu0  ;;  %v2064_v22 = vsel %vm2014_vm7, %v10291_v23, 0.0 }
 0x21b   : > { %v2063_v42 = vadd.f32 %v2062_v8, %v2061_v20  ;;  %v1898_v33 = vsel %vm1830_vm6, %v1896_v5, %v1897_v4  ;;  %v1899_v14 = vrot.slane %v1754_v26, 2  ;;  %v1344_v10 = vpop.f32.mrb[69].mxu1  ;;  %v1484_v18 = vrot.slane %v8008_v9, 1 }
 0x21c   : > { %v1969_v21 = vadd.f32 %v1898_v33, %v1546_v25  ;;  %v1903_v60 = vsel %vm1830_vm6, %v1901_v44, %v1902_v54  ;;  %v1481_v29 = vrot.slane %v1344_v10, 1  ;;  %v8009_v61 = vpop.f32.mrb[70].mxu1 }
 0x21d   : > { %v2065_v63 = vadd.f32 %v2064_v22, %v2063_v42  ;;  %v1971_v17 = vadd.f32 %v1903_v60, %v1548_v28  ;;  %v1900_v15 = vsel %vm1830_vm6, %v1897_v4, %v1899_v14  ;;  %v1486_v48 = vrot.slane %v8009_v61, 1  ;;  %v1347_v19 = vpop.f32.mrb[71].mxu1 }
 0x21e   : > { %v2008_v20 = vadd.f32 %v10090_v36, %v1969_v21  ;;  %v1970_v62 = vadd.f32 %v1900_v15, %v1547_v47  ;;  %v1482_v40 = vsel %vm1407_vm5, %v1479_v12, %v1481_v29  ;;  %v1483_v24 = vrot.slane %v1347_v19, 1 }
 0x21f   : > { %v2010_v38 = vadd.f32 %v10090_v36, %v1971_v17  ;;  %v1549_v25 = vadd.f32 %v10067_v30, %v1482_v40  ;;  %v1487_v6 = vsel %vm1407_vm5, %v1484_v18, %v1486_v48  ;;  %v8058_v5 = vpop.f32.mrb[68].mxu0 }
 0x220   : > { %v2066_v34 = vsel %vm2014_vm7, %v2008_v20, 0.0  ;;  %v2009_v28 = vadd.f32 %v10090_v36, %v1970_v62  ;;  %v1551_v4 = vadd.f32 %v10075_v16, %v1487_v6  ;;  %v1485_v3 = vsel %vm1407_vm5, %v1483_v24, %v1484_v18  ;;  %v1767_v8 = vpop.f32.mrb[69].mxu0 }
 0x221   : > { %v2067_v47 = vadd.f32 %v2066_v34, %v2065_v63  ;;  %v1550_v12 = vadd.f32 %v1485_v3, %v10077_v2  ;;  %v8059_v44 = vpop.f32.mrb[70].mxu0  ;;  %v1907_v26 = vrot.slane %v8058_v5, 2  ;;  %v1904_v30 = vrot.slane %v1767_v8, 2 }
 0x222   : > { %v2068_v9 = vsel %vm2014_vm7, %v2009_v28, 0.0  ;;  %v1909_v42 = vrot.slane %v8059_v44, 2  ;;  %v1770_v22 = vpop.f32.mrb[71].mxu0  ;;  %v2070_v10 = vsel %vm2014_vm7, %v2010_v38, 0.0 }
 0x223   : > { %v2069_v33 = vadd.f32 %v2068_v9, %v2067_v47  ;;  %v1906_v14 = vrot.slane %v1770_v22, 2  ;;  %v1905_v21 = vsel %vm1830_vm6, %v1902_v54, %v1904_v30 }
 0x224   : > { %v1910_v16 = vsel %vm1830_vm6, %v1907_v26, %v1909_v42  ;;  %v1972_v60 = vadd.f32 %v1905_v21, %v1549_v25 }
 0x225   : > { %v2071_v18 = vadd.f32 %v2070_v10, %v2069_v33  ;;  %v1974_v29 = vadd.f32 %v1910_v16, %v1551_v4  ;;  %v1908_v2 = vsel %vm1830_vm6, %v1906_v14, %v1907_v26 }
 0x226   : > { %v1973_v61 = vadd.f32 %v1908_v2, %v1550_v12  ;;  %v2011_v63 = vadd.f32 %v10090_v36, %v1972_v60 }
 0x227   : > { %v2013_v48 = vadd.f32 %v10090_v36, %v1974_v29 }
 0x228   : > { %v2012_v17 = vadd.f32 %v10090_v36, %v1973_v61  ;;  %v2072_v15 = vsel %vm2014_vm7, %v2011_v63, 0.0 }
 0x229   : > { %v2073_v19 = vadd.f32 %v2072_v15, %v2071_v18  ;;  %v2076_v40 = vsel %vm2014_vm7, %v2013_v48, 0.0 }
 0x22a   : > { %v2074_v62 = vsel %vm2014_vm7, %v2012_v17, 0.0 }
 0x22b   : > { %v2075_v54 = vadd.f32 %v2074_v62, %v2073_v19 }
 0x22d   : > { %v2077_v24 = vadd.f32 %v2076_v40, %v2075_v54  ;;  %v14216_v40 = vmov 0.0  }
 0x22e   : > { %2618 = vst.msk [vmem:[#allocation2 + $0x2a] sm:$0x3f] %vm2616_vm8, %v14216_v40  ;;  %2617 = vst.msk [vmem:[#allocation2 + $0x12] sm:$0x3f] %vm2616_vm8, %v14216_v40 }
 0x22f   : > { %v2078_v25 = vrot.slane %v2077_v24, 4  ;;  %2619 = vst.msk [vmem:[#allocation2 + $0x42] sm:$0x3f] %vm2616_vm8, %v14216_v40  ;;  %2620 = vst.msk [vmem:[#allocation2 + $0x5a] sm:$0x3f] %vm2616_vm8, %v14216_v40 }
 0x230   : > { %2621 = vst.msk [vmem:[#allocation2 + $0x72] sm:$0x3f] %vm2616_vm8, %v14216_v40  ;;  %2622 = vst.msk [vmem:[#allocation2 + $0x8a] sm:$0x3f] %vm2616_vm8, %v14216_v40 }
 0x231   : > { %v2079_v6 = vadd.f32 %v2078_v25, %v2077_v24  ;;  %2623 = vst.msk [vmem:[#allocation2 + $0xa2] sm:$0x3f] %vm2616_vm8, %v14216_v40  ;;  %2624 = vst.msk [vmem:[#allocation2 + $0xba] sm:$0x3f] %vm2616_vm8, %v14216_v40 }
 0x232   : > { %2625 = vst.msk [vmem:[#allocation2 + $0xd2] sm:$0x3f] %vm2616_vm8, %v14216_v40  ;;  %2626 = vst.msk [vmem:[#allocation2 + $0xea] sm:$0x3f] %vm2616_vm8, %v14216_v40 }
 0x233   : > { %v2080_v5 = vrot.slane %v2079_v6, 2  ;;  %2627 = vst.msk [vmem:[#allocation2 + $0x102] sm:$0x3f] %vm2616_vm8, %v14216_v40  ;;  %2628 = vst.msk [vmem:[#allocation2 + $0x11a] sm:$0x3f] %vm2616_vm8, %v14216_v40 }
 0x234   : > { %2629 = vst.msk [vmem:[#allocation2 + $0x132] sm:$0x3f] %vm2616_vm8, %v14216_v40  ;;  %2630 = vst.msk [vmem:[#allocation2 + $0x14a] sm:$0x3f] %vm2616_vm8, %v14216_v40 }
 0x235   : > { %v2081_v34 = vadd.f32 %v2080_v5, %v2079_v6  ;;  %2631 = vst.msk [vmem:[#allocation2 + $0x162] sm:$0x3f] %vm2616_vm8, %v14216_v40  ;;  %2632 = vst.msk [vmem:[#allocation2 + $0x17a] sm:$0x3f] %vm2616_vm8, %v14216_v40 }
 0x236   : > { %2633 = vst.msk [vmem:[#allocation2 + $0x192] sm:$0x3f] %vm2616_vm8, %v14216_v40  ;;  %2634 = vst.msk [vmem:[#allocation2 + $0x1aa] sm:$0x3f] %vm2616_vm8, %v14216_v40 }
 0x237   : > { %v2082_v4 = vrot.slane %v2081_v34, 1 }
 0x239   : > { %v2083_v3 = vadd.f32 %v2082_v4, %v2081_v34 }
 0x23b   : > { %v10324_v8 = vmul.f32 0.00390625, %v2083_v3 }
 0x23d   : > { %v10328_v47 = vsub.f32 %v10224_v49, %v10324_v8  ;;  %v10332_v36 = vsub.f32 %v10227_v41, %v10324_v8  ;;  %v10336_v12 = vsub.f32 %v10240_v53, %v10324_v8  ;;  %v10340_v44 = vsub.f32 %v10251_v1, %v10324_v8 }
 0x23e   : > { %v10344_v9 = vsub.f32 %v10244_v55, %v10324_v8  ;;  %v10348_v49 = vsub.f32 %v10264_v46, %v10324_v8  ;;  %v10352_v41 = vsub.f32 %v10270_v39, %v10324_v8  ;;  %v10356_v53 = vsub.f32 %v10267_v56, %v10324_v8 }
 0x23f   : > { %v10360_v1 = vsub.f32 %v10288_v0, %v10324_v8  ;;  %v10364_v55 = vsub.f32 %v10291_v23, %v10324_v8  ;;  %v10367_v26 = vsub.f32 %v2008_v20, %v10324_v8  ;;  %v10370_v46 = vsub.f32 %v2009_v28, %v10324_v8 }
 0x240   : > { %v10373_v39 = vsub.f32 %v2010_v38, %v10324_v8  ;;  %v10376_v56 = vsub.f32 %v2011_v63, %v10324_v8  ;;  %v10379_v30 = vsub.f32 %v2012_v17, %v10324_v8  ;;  %v10382_v0 = vsub.f32 %v2013_v48, %v10324_v8 }
 0x241   : > { %v10386_v23 = vsub.f32 %v10096_v32, %v10324_v8  ;;  %v10390_v20 = vsub.f32 %v10099_v59, %v10324_v8  ;;  %v10394_v38 = vsub.f32 %v10112_v27, %v10324_v8  ;;  %v10398_v28 = vsub.f32 %v10120_v57, %v10324_v8 }
 0x242   : > { %v10406_v32 = vsub.f32 %v10128_v7, %v10324_v8  ;;  %v10412_v27 = vsub.f32 %v10136_v13, %v10324_v8  ;;  %v10420_v21 = vsub.f32 %v10139_v37, %v10324_v8  ;;  %v10427_v13 = vsub.f32 %v10150_v45, %v10324_v8 }
 0x243   : > { %v2118_v42 = vmul.f32 %v10386_v23, %v10386_v23  ;;  %v2119_v22 = vmul.f32 %v10390_v20, %v10390_v20  ;;  %v2120_v59 = vmul.f32 %v10394_v38, %v10394_v38  ;;  %v2121_v57 = vmul.f32 %v10398_v28, %v10398_v28 }
 0x244   : > { %v2122_v7 = vmul.f32 %v10406_v32, %v10406_v32  ;;  %v2123_v18 = vmul.f32 %v10412_v27, %v10412_v27  ;;  %v10434_v37 = vsub.f32 %v10160_v58, %v10324_v8  ;;  %v2124_v61 = vmul.f32 %v10420_v21, %v10420_v21 }
 0x245   : > { %v2150_v33 = vsel %vm2014_vm7, %v2118_v42, 0.0  ;;  %v2151_v14 = vsel %vm2014_vm7, %v2119_v22, 0.0  ;;  %v2153_v16 = vsel %vm2014_vm7, %v2120_v59, 0.0  ;;  %v2155_v29 = vsel %vm2014_vm7, %v2121_v57, 0.0 }
 0x246   : > { %v2152_v10 = vadd.f32 %v2151_v14, %v2150_v33  ;;  %v2157_v63 = vsel %vm2014_vm7, %v2122_v7, 0.0  ;;  %v10441_v45 = vsub.f32 %v10163_v43, %v10324_v8  ;;  %v2125_v15 = vmul.f32 %v10427_v13, %v10427_v13 }
 0x247   : > { %v2159_v48 = vsel %vm2014_vm7, %v2123_v18, 0.0  ;;  %v10448_v58 = vsub.f32 %v10176_v50, %v10324_v8  ;;  %v2126_v62 = vmul.f32 %v10434_v37, %v10434_v37  ;;  %v2161_v54 = vsel %vm2014_vm7, %v2124_v61, 0.0 }
 0x248   : > { %v2154_v60 = vadd.f32 %v2153_v16, %v2152_v10  ;;  %v10491_v50 = vsub.f32 %v10184_v52, %v10324_v8  ;;  %v2127_v24 = vmul.f32 %v10441_v45, %v10441_v45  ;;  %v2163_v25 = vsel %vm2014_vm7, %v2125_v15, 0.0 }
 0x249   : > { %v10498_v5 = vsub.f32 %v10192_v51, %v10324_v8  ;;  %v2128_v34 = vmul.f32 %v10448_v58, %v10448_v58  ;;  %v2165_v4 = vsel %vm2014_vm7, %v2126_v62, 0.0  ;;  %v10505_v52 = vsub.f32 %v10200_v35, %v10324_v8 }
 0x24a   : > { %v2156_v2 = vadd.f32 %v2155_v29, %v2154_v60  ;;  %v2129_v42 = vmul.f32 %v10491_v50, %v10491_v50  ;;  %v2167_v22 = vsel %vm2014_vm7, %v2127_v24, 0.0  ;;  %v10512_v51 = vsub.f32 %v10203_v31, %v10324_v8 }
 0x24b   : > { %v2130_v57 = vmul.f32 %v10498_v5, %v10498_v5  ;;  %v2169_v33 = vsel %vm2014_vm7, %v2128_v34, 0.0  ;;  %v10519_v35 = vsub.f32 %v10214_v11, %v10324_v8  ;;  %v2131_v10 = vmul.f32 %v10505_v52, %v10505_v52 }
 0x24c   : > { %v2158_v17 = vadd.f32 %v2157_v63, %v2156_v2  ;;  %v2171_v7 = vsel %vm2014_vm7, %v2129_v42, 0.0  ;;  %v2132_v31 = vmul.f32 %v10512_v51, %v10512_v51  ;;  %v2134_v11 = vmul.f32 %v10328_v47, %v10328_v47 }
 0x24d   : > { %v2173_v60 = vsel %vm2014_vm7, %v2130_v57, 0.0  ;;  %v2133_v29 = vmul.f32 %v10519_v35, %v10519_v35  ;;  %v2175_v2 = vsel %vm2014_vm7, %v2131_v10, 0.0 }
 0x24e   : > { %v2160_v19 = vadd.f32 %v2159_v48, %v2158_v17  ;;  %v2177_v8 = vsel %vm2014_vm7, %v2132_v31, 0.0  ;;  %v2135_v17 = vmul.f32 %v10332_v36, %v10332_v36  ;;  %v2181_v62 = vsel %vm2014_vm7, %v2134_v11, 0.0 }
 0x24f   : > { %v2179_v15 = vsel %vm2014_vm7, %v2133_v29, 0.0 }
 0x250   : > { %v2162_v43 = vadd.f32 %v2161_v54, %v2160_v19  ;;  %v2136_v19 = vmul.f32 %v10336_v12, %v10336_v12  ;;  %v2183_v24 = vsel %vm2014_vm7, %v2135_v17, 0.0 }
 0x252   : > { %v2164_v6 = vadd.f32 %v2163_v25, %v2162_v43  ;;  %v2137_v43 = vmul.f32 %v10340_v44, %v10340_v44  ;;  %v2185_v34 = vsel %vm2014_vm7, %v2136_v19, 0.0 }
 0x254   : > { %v2166_v3 = vadd.f32 %v2165_v4, %v2164_v6  ;;  %v2138_v6 = vmul.f32 %v10344_v9, %v10344_v9  ;;  %v2187_v42 = vsel %vm2014_vm7, %v2137_v43, 0.0 }
 0x256   : > { %v2168_v59 = vadd.f32 %v2167_v22, %v2166_v3  ;;  %v2139_v3 = vmul.f32 %v10348_v49, %v10348_v49  ;;  %v2189_v57 = vsel %vm2014_vm7, %v2138_v6, 0.0 }
 0x258   : > { %v2170_v14 = vadd.f32 %v2169_v33, %v2168_v59  ;;  %v2140_v59 = vmul.f32 %v10352_v41, %v10352_v41  ;;  %v2191_v10 = vsel %vm2014_vm7, %v2139_v3, 0.0 }
 0x25a   : > { %v2172_v16 = vadd.f32 %v2171_v7, %v2170_v14  ;;  %v2141_v14 = vmul.f32 %v10356_v53, %v10356_v53  ;;  %v2193_v31 = vsel %vm2014_vm7, %v2140_v59, 0.0 }
 0x25c   : > { %v2174_v18 = vadd.f32 %v2173_v60, %v2172_v16  ;;  %v2142_v16 = vmul.f32 %v10360_v1, %v10360_v1  ;;  %v2195_v29 = vsel %vm2014_vm7, %v2141_v14, 0.0 }
 0x25e   : > { %v2176_v61 = vadd.f32 %v2175_v2, %v2174_v18  ;;  %v2143_v18 = vmul.f32 %v10364_v55, %v10364_v55  ;;  %v2197_v11 = vsel %vm2014_vm7, %v2142_v16, 0.0 }
 0x260   : > { %v2178_v63 = vadd.f32 %v2177_v8, %v2176_v61  ;;  %v2144_v61 = vmul.f32 %v10367_v26, %v10367_v26  ;;  %v2199_v17 = vsel %vm2014_vm7, %v2143_v18, 0.0 }
 0x262   : > { %v2180_v48 = vadd.f32 %v2179_v15, %v2178_v63  ;;  %v2145_v63 = vmul.f32 %v10370_v46, %v10370_v46  ;;  %v2201_v19 = vsel %vm2014_vm7, %v2144_v61, 0.0 }
 0x264   : > { %v2182_v54 = vadd.f32 %v2181_v62, %v2180_v48  ;;  %v2146_v48 = vmul.f32 %v10373_v39, %v10373_v39  ;;  %v2203_v43 = vsel %vm2014_vm7, %v2145_v63, 0.0 }
 0x266   : > { %v2184_v25 = vadd.f32 %v2183_v24, %v2182_v54  ;;  %v2147_v54 = vmul.f32 %v10376_v56, %v10376_v56  ;;  %v2205_v6 = vsel %vm2014_vm7, %v2146_v48, 0.0 }
 0x268   : > { %v2186_v4 = vadd.f32 %v2185_v34, %v2184_v25  ;;  %v2148_v25 = vmul.f32 %v10379_v30, %v10379_v30  ;;  %v2207_v3 = vsel %vm2014_vm7, %v2147_v54, 0.0 }
 0x26a   : > { %v2188_v22 = vadd.f32 %v2187_v42, %v2186_v4  ;;  %v2149_v4 = vmul.f32 %v10382_v0, %v10382_v0 }
 0x26c   : > { %v2190_v33 = vadd.f32 %v2189_v57, %v2188_v22  ;;  %v2209_v22 = vsel %vm2014_vm7, %v2148_v25, 0.0  ;;  %v9123_v57 = vld [vmem:[%s14205_s3] sm:$0xff]  }
 0x26d   : > { %8060 = vmatprep.subr.bf16.mxu1 %v9123_v57 }
 0x26e   : > { %v2192_v7 = vadd.f32 %v2191_v10, %v2190_v33  ;;  %v2211_v33 = vsel %vm2014_vm7, %v2149_v4, 0.0  ;;  %8061 = vmatpush3.bf16.msra.mxu1 %v9123_v57 }
 0x270   : > { %v2194_v60 = vadd.f32 %v2193_v31, %v2192_v7 }
 0x272   : > { %v2196_v2 = vadd.f32 %v2195_v29, %v2194_v60 }
 0x274   : > { %v2198_v8 = vadd.f32 %v2197_v11, %v2196_v2 }
 0x276   : > { %v2200_v15 = vadd.f32 %v2199_v17, %v2198_v8 }
 0x278   : > { %v2202_v62 = vadd.f32 %v2201_v19, %v2200_v15 }
 0x27a   : > { %v2204_v24 = vadd.f32 %v2203_v43, %v2202_v62 }
 0x27c   : > { %v2206_v34 = vadd.f32 %v2205_v6, %v2204_v24 }
 0x27e   : > { %v2208_v42 = vadd.f32 %v2207_v3, %v2206_v34 }
 0x280   : > { %v2210_v59 = vadd.f32 %v2209_v22, %v2208_v42 }
 0x282   : > { %v2212_v14 = vadd.f32 %v2211_v33, %v2210_v59 }
 0x284   : > { %v2213_v10 = vrot.slane %v2212_v14, 4 }
 0x286   : > { %v2214_v7 = vadd.f32 %v2213_v10, %v2212_v14 }
 0x288   : > { %v2215_v16 = vrot.slane %v2214_v7, 2 }
 0x28a   : > { %v2216_v31 = vadd.f32 %v2215_v16, %v2214_v7 }
 0x28c   : > { %v2217_v60 = vrot.slane %v2216_v31, 1 }
 0x28e   : > { %v2218_v18 = vadd.f32 %v2217_v60, %v2216_v31 }
 0x290   : > { %v2219_v29 = vmul.f32 0.00390625, %v2218_v18 }
 0x292   : > { %v2220_v2 = vadd.f32 1e-05, %v2219_v29 }
 0x294   : > { %9138 = vrsqrt.f32 %v2220_v2 }
 0x29e   : > { %v10583_v61 = vpop.eup %9138 }
 0x29f   : > { %v2252_v11 = vmul.f32 %v10583_v61, %v10379_v30  ;;  %v2223_v17 = vmul.f32 %v10583_v61, %v10390_v20  ;;  %v2224_v48 = vmul.f32 %v10583_v61, %v10394_v38  ;;  %v10593_v24 = vmul.f32 %v10583_v61, %v10386_v23 }
 0x2a0   : > { %v10597_v30 = vmul.f32 %v10583_v61, %v10398_v28  ;;  %v10601_v20 = vmul.f32 %v10583_v61, %v10406_v32  ;;  %v10605_v38 = vmul.f32 %v10583_v61, %v10412_v27  ;;  %v10609_v23 = vmul.f32 %v10583_v61, %v10420_v21 }
 0x2a1   : > { %v2316_v8 = vmul.f32 0.044715, %v2252_v11  ;;  %v2287_v62 = vmul.f32 0.044715, %v2223_v17  ;;  %v2288_v43 = vmul.f32 0.044715, %v2224_v48  ;;  %v10613_v28 = vmul.f32 %v10583_v61, %v10427_v13 }
 0x2a2   : > { %14305 = vst [vmem:[#allocation6_spill] sm:$0xff] %v10605_v38  ;;  %v2284_v34 = vmul.f32 0.5, %v2252_v11  ;;  %14306 = vst [vmem:[#allocation5_spill] sm:$0xff] %v10609_v23  ;;  %v10617_v3 = vmul.f32 %v10583_v61, %v10434_v37  ;;  %v10621_v32 = vmul.f32 %v10583_v61, %v10441_v45  ;;  %v10625_v27 = vmul.f32 %v10583_v61, %v10448_v58 }
 0x2a3   : > { %v2348_v63 = vmul.f32 %v2316_v8, %v2252_v11  ;;  %v2319_v25 = vmul.f32 %v2287_v62, %v2223_v17  ;;  %v2320_v6 = vmul.f32 %v2288_v43, %v2224_v48  ;;  %v10629_v21 = vmul.f32 %v10583_v61, %v10491_v50 }
 0x2a4   : > { %14307 = vst [vmem:[#allocation4_spill] sm:$0xff] %v10625_v27  ;;  %v10633_v13 = vmul.f32 %v10583_v61, %v10498_v5  ;;  %v10637_v37 = vmul.f32 %v10583_v61, %v10505_v52  ;;  %v10641_v45 = vmul.f32 %v10583_v61, %v10512_v51  ;;  %v10645_v58 = vmul.f32 %v10583_v61, %v10519_v35 }
 0x2a5   : > { %v2380_v15 = vmul.f32 %v2348_v63, %v2252_v11  ;;  %v2351_v4 = vmul.f32 %v2319_v25, %v2223_v17  ;;  %v2352_v42 = vmul.f32 %v2320_v6, %v2224_v48  ;;  %v10649_v50 = vmul.f32 %v10583_v61, %v10328_v47 }
 0x2a6   : > { %14308 = vst [vmem:[#allocation7_spill] sm:$0xff] %v10641_v45  ;;  %v10653_v59 = vmul.f32 %v10583_v61, %v10332_v36  ;;  %v10657_v52 = vmul.f32 %v10583_v61, %v10336_v12  ;;  %v10661_v51 = vmul.f32 %v10583_v61, %v10340_v44  ;;  %v10665_v35 = vmul.f32 %v10583_v61, %v10344_v9 }
 0x2a7   : > { %v2412_v19 = vadd.f32 %v2380_v15, %v2252_v11  ;;  %v2383_v22 = vadd.f32 %v2351_v4, %v2223_v17  ;;  %v2384_v5 = vadd.f32 %v2352_v42, %v2224_v48  ;;  %v10669_v47 = vmul.f32 %v10583_v61, %v10348_v49 }
 0x2a8   : > { %v10673_v36 = vmul.f32 %v10583_v61, %v10352_v41  ;;  %v10677_v12 = vmul.f32 %v10583_v61, %v10356_v53  ;;  %v10681_v44 = vmul.f32 %v10583_v61, %v10360_v1  ;;  %v10685_v9 = vmul.f32 %v10583_v61, %v10364_v55 }
 0x2a9   : > { %v2444_v54 = vmul.f32 0.7978846, %v2412_v19  ;;  %v2415_v57 = vmul.f32 0.7978846, %v2383_v22  ;;  %v2416_v33 = vmul.f32 0.7978846, %v2384_v5  ;;  %v10689_v49 = vmul.f32 %v10583_v61, %v10367_v26 }
 0x2aa   : > { %v10693_v41 = vmul.f32 %v10583_v61, %v10370_v46  ;;  %v2286_v53 = vmul.f32 0.044715, %v10593_v24  ;;  %v2255_v14 = vmul.f32 0.5, %v2223_v17  ;;  %v2256_v10 = vmul.f32 0.5, %v2224_v48 }
 0x2ab   : > { %9140 = vtanh.f32 %v2444_v54  ;;  %v10697_v1 = vmul.f32 0.5, %v10593_v24  ;;  %v10700_v55 = vmul.f32 0.5, %v10597_v30  ;;  %v10703_v16 = vmul.f32 0.5, %v10601_v20 }
 0x2ac   : > { %9142 = vtanh.f32 %v2415_v57  ;;  %v10706_v26 = vmul.f32 0.5, %v10605_v38  ;;  %v10709_v46 = vmul.f32 0.5, %v10609_v23  ;;  %v2318_v31 = vmul.f32 %v2286_v53, %v10593_v24 }
 0x2ad   : > { %9144 = vtanh.f32 %v2416_v33  ;;  %14309 = vst [vmem:[#allocation8_spill] sm:$0xff] %v10700_v55  ;;  %14310 = vst [vmem:[#allocation9_spill] sm:$0xff] %v10703_v16  ;;  %v10713_v18 = vmul.f32 0.5, %v10613_v28  ;;  %v10716_v29 = vmul.f32 0.5, %v10617_v3  ;;  %v10719_v2 = vmul.f32 0.5, %v10621_v32 }
 0x2ae   : > { %14311 = vst [vmem:[#allocation10_spill] sm:$0xff] %v10706_v26  ;;  %14312 = vst [vmem:[#allocation11_spill] sm:$0xff] %v10709_v46  ;;  %v10722_v11 = vmul.f32 0.5, %v10625_v27  ;;  %v10725_v8 = vmul.f32 0.5, %v10629_v21  ;;  %v10728_v63 = vmul.f32 0.5, %v10633_v13  ;;  %v2350_v17 = vmul.f32 %v2318_v31, %v10593_v24 }
 0x2af   : > { %14313 = vst [vmem:[#allocation12_spill] sm:$0xff] %v10713_v18  ;;  %14314 = vst [vmem:[#allocation13_spill] sm:$0xff] %v10716_v29  ;;  %v10732_v48 = vmul.f32 0.5, %v10637_v37  ;;  %v10735_v19 = vmul.f32 0.5, %v10641_v45  ;;  %v10738_v62 = vmul.f32 0.5, %v10645_v58  ;;  %v10741_v54 = vmul.f32 0.5, %v10649_v50 }
 0x2b0   : > { %14315 = vst [vmem:[#allocation14_spill] sm:$0xff] %v10719_v2  ;;  %14316 = vst [vmem:[#allocation15_spill] sm:$0xff] %v10722_v11  ;;  %v10744_v43 = vmul.f32 0.5, %v10653_v59  ;;  %v2289_v25 = vmul.f32 0.044715, %v10597_v30  ;;  %v2382_v6 = vadd.f32 %v2350_v17, %v10593_v24  ;;  %v10761_v24 = vmul.f32 %v10583_v61, %v10376_v56 }
 0x2b1   : > { %14317 = vst [vmem:[#allocation16_spill] sm:$0xff] %v10725_v8  ;;  %14318 = vst [vmem:[#allocation17_spill] sm:$0xff] %v10728_v63  ;;  %v2290_v4 = vmul.f32 0.044715, %v10601_v20  ;;  %v2291_v42 = vmul.f32 0.044715, %v10605_v38 }
 0x2b2   : > { %14319 = vst [vmem:[#allocation18_spill] sm:$0xff] %v10732_v48  ;;  %14320 = vst [vmem:[#allocation19_spill] sm:$0xff] %v10735_v19  ;;  %v2292_v22 = vmul.f32 0.044715, %v10609_v23  ;;  %v2293_v5 = vmul.f32 0.044715, %v10613_v28 }
 0x2b3   : > { %14321 = vst [vmem:[#allocation20_spill] sm:$0xff] %v10738_v62  ;;  %14322 = vst [vmem:[#allocation21_spill] sm:$0xff] %v10741_v54  ;;  %v2294_v57 = vmul.f32 0.044715, %v10617_v3  ;;  %v2295_v33 = vmul.f32 0.044715, %v10621_v32  ;;  %v2323_v11 = vmul.f32 %v2291_v42, %v10605_v38 }
 0x2b4   : > { %14323 = vst [vmem:[#allocation22_spill] sm:$0xff] %v10744_v43  ;;  %14324 = vst [vmem:[#allocation23_spill] sm:$0xff] %v10761_v24  ;;  %v2297_v31 = vmul.f32 0.044715, %v10629_v21  ;;  %v2299_v40 = vmul.f32 0.044715, %v10637_v37 }
 0x2b5   : > { %v9141_v7 = vpop.eup %9140  ;;  %v2414_v43 = vmul.f32 0.7978846, %v2382_v6  ;;  %v2300_v62 = vmul.f32 0.044715, %v10641_v45  ;;  %v2302_v48 = vmul.f32 0.044715, %v10649_v50  ;;  %v2326_v46 = vmul.f32 %v2294_v57, %v10617_v3 }
 0x2b6   : > { %v2508_v60 = vadd.f32 1.0, %v9141_v7  ;;  %v9143_v53 = vpop.eup %9142  ;;  %v2296_v7 = vmul.f32 0.044715, %v10625_v27  ;;  %v2303_v63 = vmul.f32 0.044715, %v10653_v59  ;;  %v2327_v16 = vmul.f32 %v2295_v33, %v10621_v32 }
 0x2b7   : > { %v9145_v17 = vpop.eup %9144  ;;  %v2479_v56 = vadd.f32 1.0, %v9143_v53  ;;  %9146 = vtanh.f32 %v2414_v43  ;;  %v2304_v8 = vmul.f32 0.044715, %v10657_v52  ;;  %v2306_v6 = vmul.f32 0.044715, %v10665_v35 }
 0x2b8   : > { %v2540_v15 = vmul.f32 %v2508_v60, %v2284_v34  ;;  %v10754_v34 = vmul.f32 %v10583_v61, %v10373_v39  ;;  %v10768_v39 = vmul.f32 %v10583_v61, %v10382_v0  ;;  %v2298_v60 = vmul.f32 0.044715, %v10633_v13 }
 0x2b9   : > { %v2480_v54 = vadd.f32 1.0, %v9145_v17  ;;  %v2301_v0 = vmul.f32 0.044715, %v10645_v58  ;;  %v2321_v61 = vmul.f32 %v2289_v25, %v10597_v30  ;;  %v2511_v19 = vmul.f32 %v2479_v56, %v2255_v14 }
 0x2ba   : > { %2574 = vst.msk [vmem:[#allocation2 + $0x181] sm:$0xff] %vm2014_vm7, %v2540_v15  ;;  %2576 = vst.msk [vmem:[#allocation2 + $0x199] sm:$0xff] %vm2014_vm7, %v2540_v15  ;;  %v2307_v17 = vmul.f32 0.044715, %v10669_v47  ;;  %v2308_v14 = vmul.f32 0.044715, %v10673_v36  ;;  %v2328_v42 = vmul.f32 %v2296_v7, %v10625_v27  ;;  %v2329_v55 = vmul.f32 %v2297_v31, %v10629_v21 }
 0x2bb   : > { %2595 = vst.msk [vmem:[#allocation2 + $0x180] sm:$0x1] %vm2578_vm9, %v2540_v15  ;;  %2596 = vst.msk [vmem:[#allocation2 + $0x198] sm:$0x1] %vm2578_vm9, %v2540_v15  ;;  %v10774_v15 = vmul.f32 0.5, %v10657_v52  ;;  %v2512_v53 = vmul.f32 %v2480_v54, %v2256_v10  ;;  %v2322_v10 = vmul.f32 %v2290_v4, %v10601_v20  ;;  %v2324_v4 = vmul.f32 %v2292_v22, %v10609_v23 }
 0x2bc   : > { %2545 = vst.msk [vmem:[#allocation2 + $0x21] sm:$0xff] %vm2014_vm7, %v2511_v19  ;;  %v2309_v25 = vmul.f32 0.044715, %v10677_v12  ;;  %2543 = vst.msk [vmem:[#allocation2 + $0x9] sm:$0xff] %vm2014_vm7, %v2511_v19  ;;  %v2310_v54 = vmul.f32 0.044715, %v10681_v44  ;;  %v2353_v26 = vmul.f32 %v2321_v61, %v10597_v30  ;;  %v2331_v22 = vmul.f32 %v2299_v40, %v10637_v37 }
 0x2bd   : > { %14325 = vst [vmem:[#allocation24_spill] sm:$0xff] %v10774_v15  ;;  %v2305_v15 = vmul.f32 0.044715, %v10661_v51  ;;  %2599 = vst.msk [vmem:[#allocation2 + $0x22] sm:$0x80] %vm2597_vm10, %v2511_v19  ;;  %v2354_v38 = vmul.f32 %v2322_v10, %v10601_v20  ;;  %v2332_v23 = vmul.f32 %v2300_v62, %v10641_v45  ;;  %v2333_v57 = vmul.f32 %v2301_v0, %v10645_v58 }
 0x2be   : > { %2598 = vst.msk [vmem:[#allocation2 + $0xa] sm:$0x80] %vm2597_vm10, %v2511_v19  ;;  %v2311_v43 = vmul.f32 0.044715, %v10685_v9  ;;  %v2312_v56 = vmul.f32 0.044715, %v10689_v49  ;;  %v2334_v61 = vmul.f32 %v2302_v48, %v10649_v50  ;;  %v2335_v33 = vmul.f32 %v2303_v63, %v10653_v59 }
 0x2bf   : > { %2546 = vst.msk [vmem:[#allocation2 + $0x31] sm:$0xff] %vm2014_vm7, %v2512_v53  ;;  %v2313_v2 = vmul.f32 0.044715, %v10693_v41  ;;  %v2314_v29 = vmul.f32 0.044715, %v10754_v34  ;;  %v2386_v7 = vadd.f32 %v2354_v38, %v10601_v20  ;;  %v2336_v31 = vmul.f32 %v2304_v8, %v10657_v52 }
 0x2c0   : > { %2581 = vst.msk [vmem:[#allocation2 + $0x30] sm:$0x1] %vm2578_vm9, %v2512_v53  ;;  %v2315_v19 = vmul.f32 0.044715, %v10761_v24  ;;  %v2317_v18 = vmul.f32 0.044715, %v10768_v39  ;;  %v2325_v53 = vmul.f32 %v2293_v5, %v10613_v28  ;;  %v2330_v24 = vmul.f32 %v2298_v60, %v10633_v13 }
 0x2c1   : > { %v2385_v5 = vadd.f32 %v2353_v26, %v10597_v30  ;;  %v2337_v60 = vmul.f32 %v2305_v15, %v10661_v51  ;;  %v2338_v40 = vmul.f32 %v2306_v6, %v10665_v35  ;;  %v9147_v62 = vpop.eup %9146  ;;  %v2339_v30 = vmul.f32 %v2307_v17, %v10669_v47 }
 0x2c2   : > { %v2340_v26 = vmul.f32 %v2308_v14, %v10673_v36  ;;  %v2341_v63 = vmul.f32 %v2309_v25, %v10677_v12  ;;  %v2418_v48 = vmul.f32 0.7978846, %v2386_v7  ;;  %v2478_v38 = vadd.f32 1.0, %v9147_v62  ;;  %v14327_v25 = vld [vmem:[#allocation23_spill] sm:$0xff]  ;;  %v14328_v7 = vld [vmem:[#allocation6_spill] sm:$0xff] }
 0x2c3   : > { %v2417_v10 = vmul.f32 0.7978846, %v2385_v5  ;;  %v2342_v8 = vmul.f32 %v2310_v54, %v10681_v44  ;;  %v2343_v15 = vmul.f32 %v2311_v43, %v10685_v9  ;;  %v2344_v0 = vmul.f32 %v2312_v56, %v10689_v49 }
 0x2c4   : > { %v10819_v27 = vld [vmem:[#allocation2 + $0x28] sm:$0xff]  ;;  %v2345_v6 = vmul.f32 %v2313_v2, %v10693_v41  ;;  %v2510_v17 = vmul.f32 %v2478_v38, %v10697_v1  ;;  %v2346_v14 = vmul.f32 %v2314_v29, %v10754_v34  ;;  %v2347_v5 = vmul.f32 %v2315_v19, %v14327_v25 }
 0x2c5   : > { %14326 = vst [vmem:[#allocation25_spill] sm:$0xff] %v10819_v27  ;;  %9148 = vtanh.f32 %v2417_v10  ;;  %v2355_v62 = vmul.f32 %v2323_v11, %v14328_v7  ;;  %v2349_v54 = vmul.f32 %v2317_v18, %v10768_v39  ;;  %v14329_v10 = vld [vmem:[#allocation5_spill] sm:$0xff]  ;;  %v2357_v56 = vmul.f32 %v2325_v53, %v10613_v28  ;;  %v14330_v18 = vld [vmem:[#allocation4_spill] sm:$0xff] }
 0x2c6   : > { %9150 = vtanh.f32 %v2418_v48  ;;  %v2356_v43 = vmul.f32 %v2324_v4, %v14329_v10  ;;  %v2358_v2 = vmul.f32 %v2326_v46, %v10617_v3  ;;  %v9125_v48 = vld [vmem:[%s14205_s3 + $0xc] sm:$0xff]   ;;  %2544 = vst.msk [vmem:[#allocation2 + $0x19] sm:$0xff] %vm2014_vm7, %v2510_v17  ;;  %2542 = vst.msk [vmem:[#allocation2 + $0x1] sm:$0xff] %vm2014_vm7, %v2510_v17  ;;  %v2359_v1 = vmul.f32 %v2327_v16, %v10621_v32  ;;  %v14331_v4 = vld [vmem:[#allocation7_spill] sm:$0xff] }
 0x2c7   : > { %v10824_v45 = vld [vmem:[#allocation2 + $0x30] sm:$0xff]  ;;  %2580 = vst.msk [vmem:[#allocation2 + $0x18] sm:$0x1] %vm2578_vm9, %v2510_v17  ;;  %2579 = vst.msk [vmem:[#allocation2] sm:$0x1] %vm2578_vm9, %v2510_v17  ;;  %v2360_v29 = vmul.f32 %v2328_v42, %v14330_v18  ;;  %v2361_v11 = vmul.f32 %v2329_v55, %v10629_v21  ;;  %v2362_v46 = vmul.f32 %v2330_v24, %v10633_v13  ;;  %8112 = vmatprep.subr.bf16.mxu0 %v9125_v48 }
 0x2c8   : > { %v8648_v20 = vpack.i.bf16 %v10824_v45, %v10819_v27  ;;  %v2363_v19 = vmul.f32 %v2331_v22, %v10637_v37  ;;  %v2364_v53 = vmul.f32 %v2332_v23, %v14331_v4  ;;  %v2366_v38 = vmul.f32 %v2334_v61, %v10649_v50  ;;  %8113 = vmatpush3.bf16.msra.mxu0 %v9125_v48 }
 0x2c9   : > { %v2367_v27 = vmul.f32 %v2335_v33, %v10653_v59  ;;  %v2368_v17 = vmul.f32 %v2336_v31, %v10657_v52  ;;  %v2369_v16 = vmul.f32 %v2337_v60, %v10661_v51  ;;  %v2387_v42 = vadd.f32 %v2355_v62, %v14328_v7  ;;  %v9124_v60 = vld [vmem:[%s14205_s3 + $0x8] ss:$0 sps:$4 sm:$0xff]  }
 0x2ca   : > { %8649 = vrot.lane.b32.xlu1 %v8648_v20, %s9348_s23  ;;  %v2365_v20 = vmul.f32 %v2333_v57, %v10645_v58  ;;  %v2370_v55 = vmul.f32 %v2338_v40, %v10665_v35  ;;  %v2371_v24 = vmul.f32 %v2339_v30, %v10669_v47  ;;  %v2372_v23 = vmul.f32 %v2340_v26, %v10673_v36 }
 0x2cb   : > { %v2388_v22 = vadd.f32 %v2356_v43, %v14329_v10  ;;  %v2373_v57 = vmul.f32 %v2341_v63, %v10677_v12  ;;  %v2374_v61 = vmul.f32 %v2342_v8, %v10681_v44  ;;  %v2375_v33 = vmul.f32 %v2343_v15, %v10685_v9  ;;  %8380 = vmatprep.subr.msk.bf16.mxu1 %vm3234_vm11, %v9124_v60 }
 0x2cc   : > { %v2389_v31 = vadd.f32 %v2357_v56, %v10613_v28  ;;  %v2376_v40 = vmul.f32 %v2344_v0, %v10689_v49  ;;  %v2377_v30 = vmul.f32 %v2345_v6, %v10693_v41  ;;  %v10877_v26 = vmul.f32 %v2346_v14, %v10754_v34 }
 0x2cd   : > { %v2390_v7 = vadd.f32 %v2358_v2, %v10617_v3  ;;  %v10881_v8 = vmul.f32 %v2347_v5, %v14327_v25  ;;  %v2391_v15 = vadd.f32 %v2359_v1, %v10621_v32  ;;  %v2392_v28 = vadd.f32 %v2360_v29, %v14330_v18  ;;  %v10887_v0 = vld [vmem:[#allocation2 + $0x20] sm:$0xff] }
 0x2ce   : > { %v2419_v62 = vmul.f32 0.7978846, %v2387_v42  ;;  %v10885_v43 = vld [vmem:[#allocation2 + $0x18] sm:$0xff]  ;;  %v2393_v14 = vadd.f32 %v2361_v11, %v10629_v21  ;;  %v2420_v56 = vmul.f32 0.7978846, %v2388_v22  ;;  %v14332_v32 = vld [vmem:[#allocation8_spill] sm:$0xff]  ;;  %v10895_v1 = vmul.f32 %v2349_v54, %v10768_v39 }
 0x2cf   : > { %v9149_v63 = vpop.eup %9148  ;;  %v8643_v3 = vpack.i.bf16 %v10887_v0, %v10885_v43  ;;  %v2421_v2 = vmul.f32 0.7978846, %v2389_v31  ;;  %v2394_v18 = vadd.f32 %v2362_v46, %v10633_v13  ;;  %v2422_v29 = vmul.f32 0.7978846, %v2390_v7  ;;  %v14333_v21 = vld [vmem:[#allocation9_spill] sm:$0xff] }
 0x2d0   : > { %v9151_v10 = vpop.eup %9150  ;;  %v2481_v6 = vadd.f32 1.0, %v9149_v63  ;;  %9152 = vtanh.f32 %v2419_v62  ;;  %v2395_v42 = vadd.f32 %v2363_v19, %v10637_v37  ;;  %v2396_v22 = vadd.f32 %v2364_v53, %v14331_v4 }
 0x2d1   : > { %v2482_v5 = vadd.f32 1.0, %v9151_v10  ;;  %8644 = vrot.lane.b32.xlu0 %v8643_v3, %s9348_s23  ;;  %v2423_v63 = vmul.f32 0.7978846, %v2391_v15  ;;  %v2397_v31 = vadd.f32 %v2365_v20, %v10645_v58  ;;  %v2398_v54 = vadd.f32 %v2366_v38, %v10649_v50 }
 0x2d2   : > { %v2513_v48 = vmul.f32 %v2481_v6, %v14332_v32  ;;  %v2424_v62 = vmul.f32 0.7978846, %v2392_v28  ;;  %9154 = vtanh.f32 %v2420_v56  ;;  %v2399_v13 = vadd.f32 %v2367_v27, %v10653_v59 }
 0x2d3   : > { %v2514_v11 = vmul.f32 %v2482_v5, %v14333_v21  ;;  %v2400_v37 = vadd.f32 %v2368_v17, %v10657_v52  ;;  %v2425_v46 = vmul.f32 0.7978846, %v2393_v14  ;;  %9156 = vtanh.f32 %v2421_v2  ;;  %v14334_v2 = vld [vmem:[#allocation10_spill] sm:$0xff] }
 0x2d4   : > { %2547 = vst.msk [vmem:[#allocation2 + $0x39] sm:$0xff] %vm2014_vm7, %v2513_v48  ;;  %v2401_v19 = vadd.f32 %v2369_v16, %v10661_v51  ;;  %v2402_v4 = vadd.f32 %v2370_v55, %v10665_v35  ;;  %v2426_v53 = vmul.f32 0.7978846, %v2394_v18  ;;  %9158 = vtanh.f32 %v2422_v29  ;;  %v9126_v55 = vld [vmem:[%s14205_s3 + $0x14] ss:$0 sps:$4 sm:$0xff]  }
 0x2d5   : > { %2600 = vst.msk [vmem:[#allocation2 + $0x3a] sm:$0x80] %vm2597_vm10, %v2513_v48  ;;  %v2403_v58 = vadd.f32 %v2371_v24, %v10669_v47  ;;  %v2404_v50 = vadd.f32 %v2372_v23, %v10673_v36  ;;  %v2427_v20 = vmul.f32 0.7978846, %v2395_v42  ;;  %9160 = vtanh.f32 %v2423_v63  ;;  %8381 = vmatprep.subr.msk.bf16.mxu0 %vm3234_vm11, %v9126_v55 }
 0x2d6   : > { %2548 = vst.msk [vmem:[#allocation2 + $0x49] sm:$0xff] %vm2014_vm7, %v2514_v11  ;;  %v2405_v38 = vadd.f32 %v2373_v57, %v10677_v12  ;;  %v2406_v27 = vadd.f32 %v2374_v61, %v10681_v44  ;;  %v2428_v59 = vmul.f32 0.7978846, %v2396_v22  ;;  %9162 = vtanh.f32 %v2424_v62  ;;  %v14335_v62 = vld [vmem:[#allocation11_spill] sm:$0xff] }
 0x2d7   : > { %2582 = vst.msk [vmem:[#allocation2 + $0x48] sm:$0x1] %vm2578_vm9, %v2514_v11  ;;  %v2407_v52 = vadd.f32 %v2375_v33, %v10685_v9  ;;  %v2429_v17 = vmul.f32 0.7978846, %v2397_v31  ;;  %9164 = vtanh.f32 %v2425_v46  ;;  %v3236_v16 = vsel %vm3234_vm11, %v9124_v60, 0  ;;  %v10947_v11 = vld [vmem:[%s14205_s3 + $0x18] sm:$0xff]  }
 0x2d8   : > { %v2408_v24 = vadd.f32 %v2376_v40, %v10689_v49  ;;  %v2409_v23 = vadd.f32 %v2377_v30, %v10693_v41  ;;  %v2430_v7 = vmul.f32 0.7978846, %v2398_v54  ;;  %9166 = vtanh.f32 %v2426_v53  ;;  %8063 = vmatpush3.bf16.msra.mxu1 %v3236_v16 }
 0x2d9   : > { %v2410_v33 = vadd.f32 %v10877_v26, %v10754_v34  ;;  %v2431_v60 = vmul.f32 0.7978846, %v2399_v13  ;;  %9168 = vtanh.f32 %v2427_v20  ;;  %v3461_v28 = vsel %vm3234_vm11, %v9126_v55, 0  ;;  %8164 = vmatprep.subr.bf16.mxu1 %v10947_v11  ;;  %v14338_v55 = vld [vmem:[#allocation14_spill] sm:$0xff] }
 0x2da   : > { %v9153_v57 = vpop.eup %9152  ;;  %v2432_v6 = vmul.f32 0.7978846, %v2400_v37  ;;  %9170 = vtanh.f32 %v2428_v59  ;;  %8115 = vmatpush3.bf16.msra.mxu0 %v3461_v28  ;;  %v2411_v26 = vadd.f32 %v10881_v8, %v14327_v25  ;;  %v2433_v56 = vmul.f32 0.7978846, %v2401_v19  ;;  %v14339_v28 = vld [vmem:[#allocation15_spill] sm:$0xff] }
 0x2db   : > { %v10925_v15 = vld [vmem:[#allocation2 + $0x38] sm:$0xff]  ;;  %v2483_v10 = vadd.f32 1.0, %v9153_v57  ;;  %9172 = vtanh.f32 %v2429_v17  ;;  %v2413_v5 = vadd.f32 %v10895_v1, %v10768_v39  ;;  %v2434_v48 = vmul.f32 0.7978846, %v2402_v4  ;;  %v14336_v4 = vld [vmem:[#allocation12_spill] sm:$0xff] }
 0x2dc   : > { %v10923_v61 = vld [vmem:[#allocation2 + $0x40] sm:$0xff]  ;;  %v8653_v30 = vpack.i.bf16 %v10925_v15, %v10824_v45  ;;  %v9155_v3 = vpop.eup %9154  ;;  %9174 = vtanh.f32 %v2430_v7  ;;  %v2435_v29 = vmul.f32 0.7978846, %v2403_v58  ;;  %v2436_v21 = vmul.f32 0.7978846, %v2404_v50 }
 0x2dd   : > { %v2515_v32 = vmul.f32 %v2483_v10, %v14334_v2  ;;  %v9157_v18 = vpop.eup %9156  ;;  %9176 = vtanh.f32 %v2431_v60  ;;  %v2484_v8 = vadd.f32 1.0, %v9155_v3  ;;  %v2437_v1 = vmul.f32 0.7978846, %v2405_v38 }
 0x2de   : > { %v10931_v40 = vld [vmem:[#allocation2 + $0x48] sm:$0xff]  ;;  %8654 = vrot.lane.b32.xlu0 %v8653_v30, %s9349_s10  ;;  %v9159_v42 = vpop.eup %9158  ;;  %v8663_v22 = vpack.i.bf16 %v10923_v61, %v10925_v15  ;;  %9178 = vtanh.f32 %v2432_v6  ;;  %v2485_v63 = vadd.f32 1.0, %v9157_v18  ;;  %v2438_v54 = vmul.f32 0.7978846, %v2406_v27 }
 0x2df   : > { %v8658_v14 = vpack.i.bf16 %v10931_v40, %v10923_v61  ;;  %2549 = vst.msk [vmem:[#allocation2 + $0x51] sm:$0xff] %vm2014_vm7, %v2515_v32  ;;  %v9161_v31 = vpop.eup %9160  ;;  %9180 = vtanh.f32 %v2433_v56  ;;  %v2516_v13 = vmul.f32 %v2484_v8, %v14335_v62  ;;  %v2486_v37 = vadd.f32 1.0, %v9159_v42  ;;  %v14337_v27 = vld [vmem:[#allocation13_spill] sm:$0xff] }
 0x2e0   : > { %2601 = vst.msk [vmem:[#allocation2 + $0x52] sm:$0x80] %vm2597_vm10, %v2515_v32  ;;  %v9163_v46 = vpop.eup %9162  ;;  %v2439_v19 = vmul.f32 0.7978846, %v2407_v52  ;;  %9182 = vtanh.f32 %v2434_v48  ;;  %v2517_v53 = vmul.f32 %v2485_v63, %v14336_v4  ;;  %v2487_v58 = vadd.f32 1.0, %v9161_v31  ;;  %v14341_v18 = vld [vmem:[#allocation17_spill] sm:$0xff] }
 0x2e1   : > { %8659 = vrot.lane.b32.xlu1 %v8658_v14, %s9349_s10  ;;  %v9165_v50 = vpop.eup %9164  ;;  %v2440_v20 = vmul.f32 0.7978846, %v2408_v24  ;;  %9184 = vtanh.f32 %v2435_v29  ;;  %2550 = vst.msk [vmem:[#allocation2 + $0x61] sm:$0xff] %vm2014_vm7, %v2516_v13  ;;  %v2488_v38 = vadd.f32 1.0, %v9163_v46  ;;  %v2518_v59 = vmul.f32 %v2486_v37, %v14337_v27  ;;  %v14340_v14 = vld [vmem:[#allocation16_spill] sm:$0xff]  ;;  %v14343_v31 = vld [vmem:[#allocation19_spill] sm:$0xff] }
 0x2e2   : > { %8664 = vrot.lane.b32.xlu0 %v8663_v22, %s9348_s23  ;;  %2583 = vst.msk [vmem:[#allocation2 + $0x60] sm:$0x1] %vm2578_vm9, %v2516_v13  ;;  %v9167_v17 = vpop.eup %9166  ;;  %v2441_v16 = vmul.f32 0.7978846, %v2409_v23  ;;  %9186 = vtanh.f32 %v2436_v21  ;;  %v2489_v52 = vadd.f32 1.0, %v9165_v50  ;;  %v2519_v7 = vmul.f32 %v2487_v58, %v14338_v55  ;;  %v14342_v22 = vld [vmem:[#allocation18_spill] sm:$0xff] }
 0x2e3   : > { %2551 = vst.msk [vmem:[#allocation2 + $0x69] sm:$0xff] %vm2014_vm7, %v2517_v53  ;;  %v9169_v57 = vpop.eup %9168  ;;  %v2442_v24 = vmul.f32 0.7978846, %v2410_v33  ;;  %9188 = vtanh.f32 %v2437_v1  ;;  %v2490_v60 = vadd.f32 1.0, %v9167_v17  ;;  %v2520_v30 = vmul.f32 %v2488_v38, %v14339_v28  ;;  %2552 = vst.msk [vmem:[#allocation2 + $0x79] sm:$0xff] %vm2014_vm7, %v2518_v59 }
 0x2e4   : > { %2602 = vst.msk [vmem:[#allocation2 + $0x6a] sm:$0x80] %vm2597_vm10, %v2517_v53  ;;  %v9171_v10 = vpop.eup %9170  ;;  %v2443_v23 = vmul.f32 0.7978846, %v2411_v26  ;;  %9190 = vtanh.f32 %v2438_v54  ;;  %v2491_v6 = vadd.f32 1.0, %v9169_v57  ;;  %v2521_v56 = vmul.f32 %v2489_v52, %v14340_v14 }
 0x2e5   : > { %2584 = vst.msk [vmem:[#allocation2 + $0x78] sm:$0x1] %vm2578_vm9, %v2518_v59  ;;  %v9173_v3 = vpop.eup %9172  ;;  %v2445_v2 = vmul.f32 0.7978846, %v2413_v5  ;;  %9192 = vtanh.f32 %v2439_v19  ;;  %v2492_v32 = vadd.f32 1.0, %v9171_v10  ;;  %v2522_v29 = vmul.f32 %v2490_v60, %v14341_v18  ;;  %v14344_v19 = vld [vmem:[#allocation20_spill] sm:$0xff] }
 0x2e6   : > { %2553 = vst.msk [vmem:[#allocation2 + $0x81] sm:$0xff] %vm2014_vm7, %v2519_v7  ;;  %v10969_v33 = vld [vmem:[#allocation2 + $0x50] sm:$0xff]  ;;  %2554 = vst.msk [vmem:[#allocation2 + $0x91] sm:$0xff] %vm2014_vm7, %v2520_v30  ;;  %v9175_v26 = vpop.eup %9174  ;;  %9194 = vtanh.f32 %v2440_v20  ;;  %v2493_v8 = vadd.f32 1.0, %v9173_v3  ;;  %v2523_v63 = vmul.f32 %v2491_v6, %v14342_v22  ;;  %v2273_v13 = vmul.f32 0.5, %v10661_v51  ;;  %v14345_v20 = vld [vmem:[#allocation21_spill] sm:$0xff] }
 0x2e7   : > { %2603 = vst.msk [vmem:[#allocation2 + $0x82] sm:$0x80] %vm2597_vm10, %v2519_v7  ;;  %v10971_v48 = vld [vmem:[#allocation2 + $0x58] sm:$0xff]  ;;  %v8668_v21 = vpack.i.bf16 %v10969_v33, %v10931_v40  ;;  %2604 = vst.msk [vmem:[#allocation2 + $0x9a] sm:$0x80] %vm2597_vm10, %v2521_v56  ;;  %v9177_v5 = vpop.eup %9176  ;;  %9196 = vtanh.f32 %v2441_v16  ;;  %v2494_v1 = vadd.f32 1.0, %v9175_v26  ;;  %v2524_v54 = vmul.f32 %v2492_v32, %v14343_v31 }
 0x2e8   : > { %2585 = vst.msk [vmem:[#allocation2 + $0x90] sm:$0x1] %vm2578_vm9, %v2520_v30  ;;  %v8673_v42 = vpack.i.bf16 %v10971_v48, %v10969_v33  ;;  %2586 = vst.msk [vmem:[#allocation2 + $0xa8] sm:$0x1] %vm2578_vm9, %v2522_v29  ;;  %v9179_v62 = vpop.eup %9178  ;;  %9198 = vtanh.f32 %v2442_v24  ;;  %v2495_v46 = vadd.f32 1.0, %v9177_v5  ;;  %v2525_v4 = vmul.f32 %v2493_v8, %v14344_v19  ;;  %v14346_v16 = vld [vmem:[#allocation22_spill] sm:$0xff] }
 0x2e9   : > { %2555 = vst.msk [vmem:[#allocation2 + $0x99] sm:$0xff] %vm2014_vm7, %v2521_v56  ;;  %2556 = vst.msk [vmem:[#allocation2 + $0xa9] sm:$0xff] %vm2014_vm7, %v2522_v29  ;;  %8669 = vrot.lane.b32.xlu1 %v8668_v21, %s9348_s23  ;;  %v10988_v37 = vld [vmem:[#allocation2 + $0x60] sm:$0xff]  ;;  %v9181_v53 = vpop.eup %9180  ;;  %9200 = vtanh.f32 %v2443_v23  ;;  %v2496_v50 = vadd.f32 1.0, %v9179_v62  ;;  %v2526_v38 = vmul.f32 %v2494_v1, %v14345_v20  ;;  %v2274_v7 = vmul.f32 0.5, %v10665_v35 }
 0x2ea   : > { %8674 = vrot.lane.b32.xlu0 %v8673_v42, %s9349_s10  ;;  %v10992_v58 = vld [vmem:[#allocation2 + $0x68] sm:$0xff]  ;;  %2557 = vst.msk [vmem:[#allocation2 + $0xb1] sm:$0xff] %vm2014_vm7, %v2523_v63  ;;  %2558 = vst.msk [vmem:[#allocation2 + $0xc1] sm:$0xff] %vm2014_vm7, %v2524_v54  ;;  %v8683_v51 = vpack.i.bf16 %v10988_v37, %v10971_v48  ;;  %v9183_v27 = vpop.eup %9182  ;;  %9202 = vtanh.f32 %v2445_v2  ;;  %v2497_v17 = vadd.f32 1.0, %v9181_v53  ;;  %v2527_v52 = vmul.f32 %v2495_v46, %v14346_v16  ;;  %v14347_v24 = vld [vmem:[#allocation24_spill] sm:$0xff] }
 0x2eb   : > { %2587 = vst.msk [vmem:[#allocation2 + $0xc0] sm:$0x1] %vm2578_vm9, %v2524_v54  ;;  %v8678_v59 = vpack.i.bf16 %v10992_v58, %v10988_v37  ;;  %v9185_v55 = vpop.eup %9184  ;;  %v2498_v57 = vadd.f32 1.0, %v9183_v27  ;;  %v2528_v60 = vmul.f32 %v2496_v50, %v14347_v24  ;;  %v11008_v28 = vld [vmem:[#allocation2 + $0x70] sm:$0xff]  ;;  %2588 = vst.msk [vmem:[#allocation2 + $0xd8] sm:$0x1] %vm2578_vm9, %v2526_v38 }
 0x2ec   : > { %2605 = vst.msk [vmem:[#allocation2 + $0xb2] sm:$0x80] %vm2597_vm10, %v2523_v63  ;;  %2606 = vst.msk [vmem:[#allocation2 + $0xca] sm:$0x80] %vm2597_vm10, %v2525_v4  ;;  %v11012_v30 = vld [vmem:[#allocation2 + $0x78] sm:$0xff]  ;;  %v9187_v10 = vpop.eup %9186  ;;  %v2275_v23 = vmul.f32 0.5, %v10669_v47  ;;  %v2529_v14 = vmul.f32 %v2497_v17, %v2273_v13  ;;  %v8688_v26 = vpack.i.bf16 %v11008_v28, %v10992_v58 }
 0x2ed   : > { %2559 = vst.msk [vmem:[#allocation2 + $0xc9] sm:$0xff] %vm2014_vm7, %v2525_v4  ;;  %2560 = vst.msk [vmem:[#allocation2 + $0xd9] sm:$0xff] %vm2014_vm7, %v2526_v38  ;;  %8679 = vrot.lane.b32.xlu1 %v8678_v59, %s9349_s10  ;;  %v2499_v6 = vadd.f32 1.0, %v9185_v55  ;;  %v9189_v35 = vpop.eup %9188  ;;  %v2276_v56 = vmul.f32 0.5, %v10673_v36  ;;  %v2277_v3 = vmul.f32 0.5, %v10677_v12  ;;  %v2500_v2 = vadd.f32 1.0, %v9187_v10 }
 0x2ee   : > { %2561 = vst.msk [vmem:[#allocation2 + $0xe1] sm:$0xff] %vm2014_vm7, %v2527_v52  ;;  %8684 = vrot.lane.b32.xlu0 %v8683_v51, %s9348_s23  ;;  %v2530_v32 = vmul.f32 %v2498_v57, %v2274_v7  ;;  %2562 = vst.msk [vmem:[#allocation2 + $0xf1] sm:$0xff] %vm2014_vm7, %v2528_v60  ;;  %v9191_v47 = vpop.eup %9190  ;;  %v2501_v18 = vadd.f32 1.0, %v9189_v35  ;;  %v8693_v36 = vpack.i.bf16 %v11012_v30, %v11008_v28  ;;  %v2278_v21 = vmul.f32 0.5, %v10681_v44  ;;  %v11032_v5 = vld [vmem:[#allocation2 + $0x80] sm:$0xff]  ;;  %v11034_v1 = vld [vmem:[#allocation2 + $0x88] sm:$0xff] }
 0x2ef   : > { %2607 = vst.msk [vmem:[#allocation2 + $0xe2] sm:$0x80] %vm2597_vm10, %v2527_v52  ;;  %v2531_v29 = vmul.f32 %v2499_v6, %v2275_v23  ;;  %2608 = vst.msk [vmem:[#allocation2 + $0xfa] sm:$0x80] %vm2597_vm10, %v2529_v14  ;;  %v9193_v12 = vpop.eup %9192  ;;  %v2502_v8 = vadd.f32 1.0, %v9191_v47  ;;  %v2532_v42 = vmul.f32 %v2500_v2, %v2276_v56  ;;  %v2279_v63 = vmul.f32 0.5, %v10685_v9 }
 0x2f0   : > { %2589 = vst.msk [vmem:[#allocation2 + $0xf0] sm:$0x1] %vm2578_vm9, %v2528_v60  ;;  %2590 = vst.msk [vmem:[#allocation2 + $0x108] sm:$0x1] %vm2578_vm9, %v2530_v32  ;;  %v9195_v22 = vpop.eup %9194  ;;  %v2503_v31 = vadd.f32 1.0, %v9193_v12  ;;  %v2533_v54 = vmul.f32 %v2501_v18, %v2277_v3  ;;  %v2280_v62 = vmul.f32 0.5, %v10689_v49  ;;  %v8698_v50 = vpack.i.bf16 %v11034_v1, %v11032_v5 }
 0x2f1   : > { %2563 = vst.msk [vmem:[#allocation2 + $0xf9] sm:$0xff] %vm2014_vm7, %v2529_v14  ;;  %2564 = vst.msk [vmem:[#allocation2 + $0x109] sm:$0xff] %vm2014_vm7, %v2530_v32  ;;  %8689 = vrot.lane.b32.xlu1 %v8688_v26, %s9348_s23  ;;  %v9197_v44 = vpop.eup %9196  ;;  %v2281_v13 = vmul.f32 0.5, %v10693_v41  ;;  %v2504_v46 = vadd.f32 1.0, %v9195_v22  ;;  %v2534_v19 = vmul.f32 %v2502_v8, %v2278_v21  ;;  %v8703_v49 = vpack.i.bf16 %v11032_v5, %v11012_v30  ;;  %v11054_v27 = vld [vmem:[#allocation2 + $0x90] sm:$0xff]  ;;  %v11056_v59 = vld [vmem:[#allocation2 + $0x98] sm:$0xff] }
 0x2f2   : > { %2565 = vst.msk [vmem:[#allocation2 + $0x111] sm:$0xff] %vm2014_vm7, %v2531_v29  ;;  %8694 = vrot.lane.b32.xlu0 %v8693_v36, %s9349_s10  ;;  %2566 = vst.msk [vmem:[#allocation2 + $0x121] sm:$0xff] %vm2014_vm7, %v2532_v42  ;;  %v9199_v9 = vpop.eup %9198  ;;  %v2505_v4 = vadd.f32 1.0, %v9197_v44  ;;  %v2535_v53 = vmul.f32 %v2503_v31, %v2279_v63  ;;  %v2282_v20 = vmul.f32 0.5, %v10754_v34  ;;  %v2283_v16 = vmul.f32 0.5, %v14327_v25  ;;  %v11076_v23 = vld [vmem:[#allocation2 + $0xa8] sm:$0xff] }
 0x2f3   : > { %2609 = vst.msk [vmem:[#allocation2 + $0x112] sm:$0x80] %vm2597_vm10, %v2531_v29  ;;  %2610 = vst.msk [vmem:[#allocation2 + $0x12a] sm:$0x80] %vm2597_vm10, %v2533_v54  ;;  %v9201_v41 = vpop.eup %9200  ;;  %v2506_v38 = vadd.f32 1.0, %v9199_v9  ;;  %v2536_v51 = vmul.f32 %v2504_v46, %v2280_v62  ;;  %v2285_v34 = vmul.f32 0.5, %v10768_v39  ;;  %v8708_v25 = vpack.i.bf16 %v11054_v27, %v11034_v1 }
 0x2f4   : > { %2591 = vst.msk [vmem:[#allocation2 + $0x120] sm:$0x1] %vm2578_vm9, %v2532_v42  ;;  %2592 = vst.msk [vmem:[#allocation2 + $0x138] sm:$0x1] %vm2578_vm9, %v2534_v19  ;;  %v9203_v17 = vpop.eup %9202  ;;  %v2507_v52 = vadd.f32 1.0, %v9201_v41  ;;  %v2537_v55 = vmul.f32 %v2505_v4, %v2281_v13  ;;  %v8713_v60 = vpack.i.bf16 %v11056_v59, %v11054_v27  ;;  %v11074_v39 = vld [vmem:[#allocation2 + $0xa0] sm:$0xff] }
 0x2f5   : > { %2567 = vst.msk [vmem:[#allocation2 + $0x129] sm:$0xff] %vm2014_vm7, %v2533_v54  ;;  %2568 = vst.msk [vmem:[#allocation2 + $0x139] sm:$0xff] %vm2014_vm7, %v2534_v19  ;;  %8699 = vrot.lane.b32.xlu1 %v8698_v50, %s9349_s10  ;;  %v2509_v7 = vadd.f32 1.0, %v9203_v17  ;;  %v2538_v57 = vmul.f32 %v2506_v38, %v2282_v20  ;;  %v8718_v6 = vpack.i.bf16 %v11076_v23, %v11074_v39  ;;  %v11090_v35 = vld [vmem:[#allocation2 + $0xb0] sm:$0xff]  ;;  %v11092_v56 = vld [vmem:[#allocation2 + $0xb8] sm:$0xff] }
 0x2f6   : > { %2569 = vst.msk [vmem:[#allocation2 + $0x141] sm:$0xff] %vm2014_vm7, %v2535_v53  ;;  %8704 = vrot.lane.b32.xlu0 %v8703_v49, %s9348_s23  ;;  %2570 = vst.msk [vmem:[#allocation2 + $0x151] sm:$0xff] %vm2014_vm7, %v2536_v51  ;;  %v2539_v24 = vmul.f32 %v2507_v52, %v2283_v16  ;;  %v8723_v14 = vpack.i.bf16 %v11074_v39, %v11056_v59  ;;  %v8728_v3 = vpack.i.bf16 %v11090_v35, %v11076_v23  ;;  %v11100_v32 = vld [vmem:[#allocation2 + $0xc0] sm:$0xff]  ;;  %v11102_v47 = vld [vmem:[#allocation2 + $0xc8] sm:$0xff] }
 0x2f7   : > { %2611 = vst.msk [vmem:[#allocation2 + $0x142] sm:$0x80] %vm2597_vm10, %v2535_v53  ;;  %2612 = vst.msk [vmem:[#allocation2 + $0x15a] sm:$0x80] %vm2597_vm10, %v2537_v55  ;;  %v2541_v10 = vmul.f32 %v2509_v7, %v2285_v34  ;;  %v8733_v2 = vpack.i.bf16 %v11092_v56, %v11090_v35  ;;  %v8738_v18 = vpack.i.bf16 %v11102_v47, %v11100_v32  ;;  %v11110_v26 = vld [vmem:[#allocation2 + $0xd0] sm:$0xff]  ;;  %v11112_v36 = vld [vmem:[#allocation2 + $0xd8] sm:$0xff] }
 0x2f8   : > { %2593 = vst.msk [vmem:[#allocation2 + $0x150] sm:$0x1] %vm2578_vm9, %v2536_v51  ;;  %2594 = vst.msk [vmem:[#allocation2 + $0x168] sm:$0x1] %vm2578_vm9, %v2538_v57  ;;  %v8743_v29 = vpack.i.bf16 %v11100_v32, %v11092_v56  ;;  %v8748_v12 = vpack.i.bf16 %v11110_v26, %v11102_v47  ;;  %v8753_v21 = vpack.i.bf16 %v11112_v36, %v11110_v26  ;;  %v11120_v8 = vld [vmem:[#allocation2 + $0xe0] sm:$0xff]  ;;  %v11122_v42 = vld [vmem:[#allocation2 + $0xe8] sm:$0xff] }
 0x2f9   : > { %2571 = vst.msk [vmem:[#allocation2 + $0x159] sm:$0xff] %vm2014_vm7, %v2537_v55  ;;  %2572 = vst.msk [vmem:[#allocation2 + $0x169] sm:$0xff] %vm2014_vm7, %v2538_v57  ;;  %8709 = vrot.lane.b32.xlu1 %v8708_v25, %s9348_s23  ;;  %v8758_v22 = vpack.i.bf16 %v11122_v42, %v11120_v8  ;;  %v8763_v63 = vpack.i.bf16 %v11120_v8, %v11112_v36  ;;  %v11130_v31 = vld [vmem:[#allocation2 + $0xf0] sm:$0xff]  ;;  %v11132_v54 = vld [vmem:[#allocation2 + $0xf8] sm:$0xff] }
 0x2fa   : > { %2573 = vst.msk [vmem:[#allocation2 + $0x171] sm:$0xff] %vm2014_vm7, %v2539_v24  ;;  %8714 = vrot.lane.b32.xlu0 %v8713_v60, %s9349_s10  ;;  %2575 = vst.msk [vmem:[#allocation2 + $0x189] sm:$0xff] %vm2014_vm7, %v2541_v10  ;;  %v8768_v44 = vpack.i.bf16 %v11130_v31, %v11122_v42  ;;  %v8773_v62 = vpack.i.bf16 %v11132_v54, %v11130_v31  ;;  %v11140_v13 = vld [vmem:[#allocation2 + $0x100] sm:$0xff]  ;;  %v11142_v46 = vld [vmem:[#allocation2 + $0x108] sm:$0xff] }
 0x2fb   : > { %2613 = vst.msk [vmem:[#allocation2 + $0x172] sm:$0x80] %vm2597_vm10, %v2539_v24  ;;  %2614 = vst.msk [vmem:[#allocation2 + $0x18a] sm:$0x80] %vm2597_vm10, %v2541_v10  ;;  %v8778_v19 = vpack.i.bf16 %v11142_v46, %v11140_v13  ;;  %v8783_v9 = vpack.i.bf16 %v11140_v13, %v11132_v54  ;;  %v11150_v4 = vld [vmem:[#allocation2 + $0x110] sm:$0xff]  ;;  %v11152_v53 = vld [vmem:[#allocation2 + $0x118] sm:$0xff] }
 0x2fc   : > { %2577 = vst.msk [vmem:[#allocation2 + $0x1a1] sm:$0xff] %vm2014_vm7, %v2541_v10  ;;  %v8788_v50 = vpack.i.bf16 %v11150_v4, %v11142_v46  ;;  %v8793_v49 = vpack.i.bf16 %v11152_v53, %v11150_v4  ;;  %v11160_v41 = vld [vmem:[#allocation2 + $0x120] sm:$0xff]  ;;  %v11162_v20 = vld [vmem:[#allocation2 + $0x128] sm:$0xff]  ;;  %v11170_v17 = vld [vmem:[#allocation2 + $0x130] sm:$0xff] }
 0x2fd   : > { %2615 = vst.msk [vmem:[#allocation2 + $0x1a2] sm:$0x80] %vm2597_vm10, %v2541_v10  ;;  %8719 = vrot.lane.b32.xlu1 %v8718_v6, %s9349_s10  ;;  %v8798_v38 = vpack.i.bf16 %v11162_v20, %v11160_v41  ;;  %v8803_v51 = vpack.i.bf16 %v11160_v41, %v11152_v53  ;;  %v11172_v16 = vld [vmem:[#allocation2 + $0x138] sm:$0xff]  ;;  %v8808_v52 = vpack.i.bf16 %v11170_v17, %v11162_v20  ;;  %v11180_v34 = vld [vmem:[#allocation2 + $0x140] sm:$0xff] }
 0x2fe   : > { %8724 = vrot.lane.b32.xlu0 %v8723_v14, %s9348_s23  ;;  %v8813_v55 = vpack.i.bf16 %v11172_v16, %v11170_v17  ;;  %v11182_v7 = vld [vmem:[#allocation2 + $0x148] sm:$0xff]  ;;  %v8823_v24 = vpack.i.bf16 %v11180_v34, %v11172_v16 }
 0x2ff   : > { %v8818_v57 = vpack.i.bf16 %v11182_v7, %v11180_v34  ;;  %v11190_v25 = vld [vmem:[#allocation2 + $0x150] sm:$0xff] }
 0x300   : > { %v11192_v60 = vld [vmem:[#allocation2 + $0x158] sm:$0xff]  ;;  %v8828_v10 = vpack.i.bf16 %v11190_v25, %v11182_v7  ;;  %v11200_v14 = vld [vmem:[#allocation2 + $0x160] sm:$0xff] }
 0x301   : > { %8729 = vrot.lane.b32.xlu1 %v8728_v3, %s9348_s23  ;;  %v8833_v6 = vpack.i.bf16 %v11192_v60, %v11190_v25  ;;  %v11202_v3 = vld [vmem:[#allocation2 + $0x168] sm:$0xff] }
 0x302   : > { %8734 = vrot.lane.b32.xlu0 %v8733_v2, %s9349_s10  ;;  %v8838_v2 = vpack.i.bf16 %v11202_v3, %v11200_v14 }
 0x305   : > { %8739 = vrot.lane.b32.xlu1 %v8738_v18, %s9349_s10  ;;  %v8843_v18 = vpack.i.bf16 %v11200_v14, %v11192_v60 }
 0x306   : > { %8744 = vrot.lane.b32.xlu0 %v8743_v29, %s9348_s23  ;;  %v11210_v29 = vld [vmem:[#allocation2 + $0x170] sm:$0xff] }
 0x307   : > { %14348 = vst [vmem:[#allocation23_spill] sm:$0xff] %v11210_v29 }
 0x309   : > { %8749 = vrot.lane.b32.xlu1 %v8748_v12, %s9348_s23  ;;  %v11212_v12 = vld [vmem:[#allocation2 + $0x178] sm:$0xff] }
 0x30a   : > { %8754 = vrot.lane.b32.xlu0 %v8753_v21, %s9349_s10  ;;  %14349 = vst [vmem:[#allocation6_spill] sm:$0xff] %v11212_v12  ;;  %v8848_v21 = vpack.i.bf16 %v11210_v29, %v11202_v3 }
 0x30d   : > { %8759 = vrot.lane.b32.xlu1 %v8758_v22, %s9349_s10  ;;  %v8853_v22 = vpack.i.bf16 %v11212_v12, %v11210_v29 }
 0x30e   : > { %8764 = vrot.lane.b32.xlu0 %v8763_v63, %s9348_s23  ;;  %v2683_v63 = vld [vmem:[#allocation2 + $0x180] sm:$0xff] }
 0x311   : > { %8769 = vrot.lane.b32.xlu1 %v8768_v44, %s9348_s23  ;;  %v2684_v44 = vld [vmem:[#allocation2 + $0x188] sm:$0xff] }
 0x312   : > { %8774 = vrot.lane.b32.xlu0 %v8773_v62, %s9349_s10  ;;  %v8858_v62 = vpack.i.bf16 %v2684_v44, %v2683_v63 }
 0x315   : > { %8779 = vrot.lane.b32.xlu1 %v8778_v19, %s9349_s10  ;;  %v8863_v19 = vpack.i.bf16 %v2683_v63, %v11212_v12  ;;  %v2636_v63 = vld [vmem:[#allocation2 + $0x8] sm:$0xff] }
 0x316   : > { %8784 = vrot.lane.b32.xlu0 %v8783_v9, %s9348_s23  ;;  %v2685_v9 = vld [vmem:[#allocation2 + $0x190] sm:$0xff] }
 0x319   : > { %8789 = vrot.lane.b32.xlu1 %v8788_v50, %s9348_s23  ;;  %v2686_v50 = vld [vmem:[#allocation2 + $0x198] sm:$0xff] }
 0x31a   : > { %8794 = vrot.lane.b32.xlu0 %v8793_v49, %s9349_s10  ;;  %v8868_v49 = vpack.i.bf16 %v2685_v9, %v2684_v44 }
 0x31d   : > { %8799 = vrot.lane.b32.xlu1 %v8798_v38, %s9349_s10  ;;  %v8873_v38 = vpack.i.bf16 %v2686_v50, %v2685_v9  ;;  %v2637_v9 = vld [vmem:[#allocation2 + $0x10] sm:$0xff] }
 0x31e   : > { %8804 = vrot.lane.b32.xlu0 %v8803_v51, %s9348_s23  ;;  %v2687_v51 = vld [vmem:[#allocation2 + $0x1a0] sm:$0xff] }
 0x321   : > { %8809 = vrot.lane.b32.xlu1 %v8808_v52, %s9348_s23  ;;  %v2688_v52 = vld [vmem:[#allocation2 + $0x1a8] sm:$0xff] }
 0x322   : > { %8814 = vrot.lane.b32.xlu0 %v8813_v55, %s9349_s10  ;;  %v8878_v55 = vpack.i.bf16 %v2688_v52, %v2687_v51 }
 0x325   : > { %8819 = vrot.lane.b32.xlu1 %v8818_v57, %s9349_s10 }
 0x326   : > { %8824 = vrot.lane.b32.xlu0 %v8823_v24, %s9348_s23 }
 0x329   : > { %8829 = vrot.lane.b32.xlu1 %v8828_v10, %s9348_s23 }
 0x32a   : > { %8834 = vrot.lane.b32.xlu0 %v8833_v6, %s9349_s10 }
 0x32d   : > { %8839 = vrot.lane.b32.xlu1 %v8838_v2, %s9349_s10 }
 0x32e   : > { %8844 = vrot.lane.b32.xlu0 %v8843_v18, %s9348_s23 }
 0x331   : > { %8849 = vrot.lane.b32.xlu1 %v8848_v21, %s9348_s23 }
 0x332   : > { %8854 = vrot.lane.b32.xlu0 %v8853_v22, %s9349_s10  ;;  %v2635_v22 = vld [vmem:[#allocation2] sm:$0xff] }
 0x335   : > { %8859 = vrot.lane.b32.xlu1 %v8858_v62, %s9349_s10 }
 0x336   : > { %8864 = vrot.lane.b32.xlu0 %v8863_v19, %s9348_s23 }
 0x339   : > { %8869 = vrot.lane.b32.xlu1 %v8868_v49, %s9348_s23  ;;  %s7675_s23 = sshll.u32 %s14533_s28, 8 }
 0x33a   : > { %8874 = vrot.lane.b32.xlu0 %v8873_v38, %s9349_s10 }
 0x33c   : > { %v8650_v24 = vpop.permute.xlu1 %8649 }
 0x33d   : > { %8879 = vrot.lane.b32.xlu1 %v8878_v55, %s9349_s10  ;;  %v8652_v2 = vunpack.i.h.bf16 %v8650_v24  ;;  %v8651_v18 = vunpack.i.l.bf16 %v8650_v24  ;;  %s9351_s10 = smov 24  }
 0x33f   : > { %v3030_v52 = vsel %vm2014_vm7, %v2637_v9, %v8651_v18  ;;  %v3031_v55 = vsel %vm2014_vm7, %v10885_v43, %v8652_v2 }
 0x343   : > { %v8645_v57 = vpop.permute.xlu0 %8644 }
 0x344   : > { %v8647_v10 = vunpack.i.h.bf16 %v8645_v57  ;;  %v8646_v6 = vunpack.i.l.bf16 %v8645_v57 }
 0x346   : > { %v3028_v50 = vsel %vm2014_vm7, %v2635_v22, %v8646_v6  ;;  %v3029_v49 = vsel %vm2014_vm7, %v2636_v63, %v8647_v10  ;;  %v9128_v10 = vld [vmem:[%s14205_s3 + $0x20] ss:$0 sps:$4 sm:$0xff]  }
 0x347   : > { %v3894_v43 = vsel %vm3234_vm11, %v9128_v10, 0 }
 0x350   : > { %v8655_v21 = vpop.permute.xlu0 %8654 }
 0x351   : > { %v8657_v62 = vunpack.i.h.bf16 %v8655_v21  ;;  %v8656_v19 = vunpack.i.l.bf16 %v8655_v21 }
 0x353   : > { %v8660_v44 = vpop.permute.xlu1 %8659  ;;  %v3077_v57 = vsel %vm3076_vm12, %v3028_v50, %v8656_v19  ;;  %v3078_v24 = vsel %vm3076_vm12, %v3029_v49, %v8657_v62  ;;  %v14350_v50 = vld [vmem:[#allocation25_spill] sm:$0xff] }
 0x354   : > { %v8662_v38 = vunpack.i.h.bf16 %v8660_v44  ;;  %v8661_v51 = vunpack.i.l.bf16 %v8660_v44  ;;  %v11237_v12 = vpack.c.bf16 %v3078_v24, %v3077_v57  ;;  %v8665_v18 = vpop.permute.xlu0 %8664 }
 0x355   : > { %v8666_v2 = vunpack.i.l.bf16 %v8665_v18 }
 0x356   : > { %v3079_v29 = vsel %vm3076_vm12, %v3030_v52, %v8661_v51  ;;  %v3080_v21 = vsel %vm3076_vm12, %v3031_v55, %v8662_v38  ;;  %8064 = vmatprep.mubr.msk.bf16.mxu1 %vm3161_vm13, %v11237_v12  ;;  %8116 = vmatprep.mubr.msk.bf16.mxu0 %vm3161_vm13, %v11237_v12 }
 0x357   : > { %v11239_v6 = vpack.c.bf16 %v3080_v21, %v3079_v29  ;;  %v8667_v29 = vunpack.i.h.bf16 %v8665_v18  ;;  %v3032_v38 = vsel %vm2014_vm7, %v10887_v0, %v8666_v2 }
 0x359   : > { %8065 = vmatmul.mubr.msk.bf16.vlgmr.msra.gmra.mrb[72].mxu1 %vm3161_vm13, %v11239_v6  ;;  %8117 = vmatmul.mubr.msk.bf16.vlgmr.msra.gmra.mrb[72].mxu0 %vm3161_vm13, %v11239_v6  ;;  %v3033_v49 = vsel %vm2014_vm7, %v14350_v50, %v8667_v29 }
 0x35a   : > { %8165 = vmatpush3.bf16.msra.mxu1 %v10947_v11 }
 0x35b   : > { %8382 = vmatprep.subr.msk.bf16.mxu1 %vm3234_vm11, %v9128_v10  ;;  %v8670_v22 = vpop.permute.xlu1 %8669 }
 0x35c   : > { %v8675_v63 = vpop.permute.xlu0 %8674  ;;  %v8672_v19 = vunpack.i.h.bf16 %v8670_v22  ;;  %v8671_v9 = vunpack.i.l.bf16 %v8670_v22 }
 0x35d   : > { %v8677_v44 = vunpack.i.h.bf16 %v8675_v63  ;;  %v8676_v62 = vunpack.i.l.bf16 %v8675_v63 }
 0x35e   : > { %8167 = vmatpush3.bf16.msra.mxu1 %v3894_v43  ;;  %v3035_v10 = vsel %vm2014_vm7, %v10925_v15, %v8672_v19  ;;  %v3034_v18 = vsel %vm2014_vm7, %v10824_v45, %v8671_v9 }
 0x35f   : > { %v3081_v11 = vsel %vm3076_vm12, %v3032_v38, %v8676_v62  ;;  %v3082_v51 = vsel %vm3076_vm12, %v3033_v49, %v8677_v44  ;;  %v8680_v52 = vpop.permute.xlu1 %8679 }
 0x360   : > { %v11261_v55 = vpack.c.bf16 %v3082_v51, %v3081_v11  ;;  %v8685_v57 = vpop.permute.xlu0 %8684  ;;  %v8682_v24 = vunpack.i.h.bf16 %v8680_v52  ;;  %v8681_v21 = vunpack.i.l.bf16 %v8680_v52 }
 0x361   : > { %v8687_v43 = vunpack.i.h.bf16 %v8685_v57  ;;  %v8686_v29 = vunpack.i.l.bf16 %v8685_v57 }
 0x362   : > { %8068 = vmatprep.mubr.msk.bf16.mxu1 %vm3161_vm13, %v11261_v55  ;;  %8120 = vmatprep.mubr.msk.bf16.mxu0 %vm3161_vm13, %v11261_v55  ;;  %v3083_v0 = vsel %vm3076_vm12, %v3034_v18, %v8681_v21  ;;  %v3084_v2 = vsel %vm3076_vm12, %v3035_v10, %v8682_v24 }
 0x363   : > { %v11273_v22 = vpack.c.bf16 %v3084_v2, %v3083_v0  ;;  %v8690_v63 = vpop.permute.xlu1 %8689  ;;  %v3037_v9 = vsel %vm2014_vm7, %v10931_v40, %v8687_v43  ;;  %v3036_v50 = vsel %vm2014_vm7, %v10923_v61, %v8686_v29 }
 0x364   : > { %v8695_v44 = vpop.permute.xlu0 %8694  ;;  %v8692_v19 = vunpack.i.h.bf16 %v8690_v63  ;;  %v8691_v45 = vunpack.i.l.bf16 %v8690_v63 }
 0x365   : > { %v8697_v15 = vunpack.i.h.bf16 %v8695_v44  ;;  %v8696_v62 = vunpack.i.l.bf16 %v8695_v44  ;;  %8069 = vmatmul.mubr.msk.bf16.gmra.mrb[76].mxu1 %vm3161_vm13, %v11273_v22  ;;  %8121 = vmatmul.mubr.msk.bf16.gmra.mrb[76].mxu0 %vm3161_vm13, %v11273_v22 }
 0x366   : > { %v3039_v40 = vsel %vm2014_vm7, %v10971_v48, %v8692_v19  ;;  %v3038_v61 = vsel %vm2014_vm7, %v10969_v33, %v8691_v45 }
 0x367   : > { %v3085_v49 = vsel %vm3076_vm12, %v3036_v50, %v8696_v62  ;;  %v3086_v38 = vsel %vm3076_vm12, %v3037_v9, %v8697_v15  ;;  %v8700_v11 = vpop.permute.xlu1 %8699 }
 0x368   : > { %v11285_v51 = vpack.c.bf16 %v3086_v38, %v3085_v49  ;;  %v8705_v52 = vpop.permute.xlu0 %8704  ;;  %v8702_v57 = vunpack.i.h.bf16 %v8700_v11  ;;  %v8701_v24 = vunpack.i.l.bf16 %v8700_v11 }
 0x369   : > { %v8707_v21 = vunpack.i.h.bf16 %v8705_v52  ;;  %v8706_v10 = vunpack.i.l.bf16 %v8705_v52 }
 0x36a   : > { %8072 = vmatprep.mubr.msk.bf16.mxu1 %vm3161_vm13, %v11285_v51  ;;  %8124 = vmatprep.mubr.msk.bf16.mxu0 %vm3161_vm13, %v11285_v51  ;;  %v3087_v18 = vsel %vm3076_vm12, %v3038_v61, %v8701_v24  ;;  %v3088_v43 = vsel %vm3076_vm12, %v3039_v40, %v8702_v57 }
 0x36b   : > { %v11297_v29 = vpack.c.bf16 %v3088_v43, %v3087_v18  ;;  %v8710_v0 = vpop.permute.xlu1 %8709  ;;  %v3041_v15 = vsel %vm2014_vm7, %v10992_v58, %v8707_v21  ;;  %v3040_v62 = vsel %vm2014_vm7, %v10988_v37, %v8706_v10 }
 0x36c   : > { %v8715_v2 = vpop.permute.xlu0 %8714  ;;  %v8712_v44 = vunpack.i.h.bf16 %v8710_v0  ;;  %v8711_v33 = vunpack.i.l.bf16 %v8710_v0 }
 0x36d   : > { %v8717_v48 = vunpack.i.h.bf16 %v8715_v2  ;;  %v8716_v63 = vunpack.i.l.bf16 %v8715_v2  ;;  %8073 = vmatmul.mubr.msk.bf16.gmra.mrb[80].mxu1 %vm3161_vm13, %v11297_v29  ;;  %8125 = vmatmul.mubr.msk.bf16.gmra.mrb[80].mxu0 %vm3161_vm13, %v11297_v29 }
 0x36e   : > { %v3043_v58 = vsel %vm2014_vm7, %v11012_v30, %v8712_v44  ;;  %v3042_v37 = vsel %vm2014_vm7, %v11008_v28, %v8711_v33 }
 0x36f   : > { %v3089_v19 = vsel %vm3076_vm12, %v3040_v62, %v8716_v63  ;;  %v3090_v45 = vsel %vm3076_vm12, %v3041_v15, %v8717_v48  ;;  %v8720_v9 = vpop.permute.xlu1 %8719 }
 0x370   : > { %v11309_v50 = vpack.c.bf16 %v3090_v45, %v3089_v19  ;;  %v8725_v49 = vpop.permute.xlu0 %8724  ;;  %v8722_v38 = vunpack.i.h.bf16 %v8720_v9  ;;  %v8721_v11 = vunpack.i.l.bf16 %v8720_v9 }
 0x371   : > { %v8727_v52 = vunpack.i.h.bf16 %v8725_v49  ;;  %v8726_v57 = vunpack.i.l.bf16 %v8725_v49 }
 0x372   : > { %8076 = vmatprep.mubr.msk.bf16.mxu1 %vm3161_vm13, %v11309_v50  ;;  %8128 = vmatprep.mubr.msk.bf16.mxu0 %vm3161_vm13, %v11309_v50  ;;  %v3091_v24 = vsel %vm3076_vm12, %v3042_v37, %v8721_v11  ;;  %v3092_v40 = vsel %vm3076_vm12, %v3043_v58, %v8722_v38 }
 0x373   : > { %v11321_v61 = vpack.c.bf16 %v3092_v40, %v3091_v24  ;;  %v8730_v21 = vpop.permute.xlu1 %8729  ;;  %v3045_v0 = vsel %vm2014_vm7, %v11034_v1, %v8727_v52  ;;  %v3044_v2 = vsel %vm2014_vm7, %v11032_v5, %v8726_v57 }
 0x374   : > { %v8735_v10 = vpop.permute.xlu0 %8734  ;;  %v8732_v43 = vunpack.i.h.bf16 %v8730_v21  ;;  %v8731_v28 = vunpack.i.l.bf16 %v8730_v21 }
 0x375   : > { %v8737_v30 = vunpack.i.h.bf16 %v8735_v10  ;;  %v8736_v18 = vunpack.i.l.bf16 %v8735_v10  ;;  %8077 = vmatmul.mubr.msk.bf16.gmra.mrb[84].mxu1 %vm3161_vm13, %v11321_v61  ;;  %8129 = vmatmul.mubr.msk.bf16.gmra.mrb[84].mxu0 %vm3161_vm13, %v11321_v61 }
 0x376   : > { %v3047_v1 = vsel %vm2014_vm7, %v11056_v59, %v8732_v43  ;;  %v3046_v5 = vsel %vm2014_vm7, %v11054_v27, %v8731_v28 }
 0x377   : > { %v3093_v48 = vsel %vm3076_vm12, %v3044_v2, %v8736_v18  ;;  %v3094_v63 = vsel %vm3076_vm12, %v3045_v0, %v8737_v30  ;;  %v8740_v44 = vpop.permute.xlu1 %8739 }
 0x378   : > { %v11333_v33 = vpack.c.bf16 %v3094_v63, %v3093_v48  ;;  %v8745_v15 = vpop.permute.xlu0 %8744  ;;  %v8742_v62 = vunpack.i.h.bf16 %v8740_v44  ;;  %v8741_v19 = vunpack.i.l.bf16 %v8740_v44 }
 0x379   : > { %v8747_v45 = vunpack.i.h.bf16 %v8745_v15  ;;  %v8746_v9 = vunpack.i.l.bf16 %v8745_v15 }
 0x37a   : > { %8080 = vmatprep.mubr.msk.bf16.mxu1 %vm3161_vm13, %v11333_v33  ;;  %8132 = vmatprep.mubr.msk.bf16.mxu0 %vm3161_vm13, %v11333_v33  ;;  %v3095_v49 = vsel %vm3076_vm12, %v3046_v5, %v8741_v19  ;;  %v3096_v38 = vsel %vm3076_vm12, %v3047_v1, %v8742_v62 }
 0x37b   : > { %v11345_v11 = vpack.c.bf16 %v3096_v38, %v3095_v49  ;;  %v8750_v58 = vpop.permute.xlu1 %8749  ;;  %v3049_v24 = vsel %vm2014_vm7, %v11076_v23, %v8747_v45  ;;  %v3048_v40 = vsel %vm2014_vm7, %v11074_v39, %v8746_v9 }
 0x37c   : > { %v8755_v37 = vpop.permute.xlu0 %8754  ;;  %v8752_v57 = vunpack.i.h.bf16 %v8750_v58  ;;  %v8751_v27 = vunpack.i.l.bf16 %v8750_v58 }
 0x37d   : > { %v8757_v59 = vunpack.i.h.bf16 %v8755_v37  ;;  %v8756_v52 = vunpack.i.l.bf16 %v8755_v37  ;;  %8081 = vmatmul.mubr.msk.bf16.gmra.mrb[88].mxu1 %vm3161_vm13, %v11345_v11  ;;  %8133 = vmatmul.mubr.msk.bf16.gmra.mrb[88].mxu0 %vm3161_vm13, %v11345_v11 }
 0x37e   : > { %v3051_v23 = vsel %vm2014_vm7, %v11092_v56, %v8752_v57  ;;  %v3050_v39 = vsel %vm2014_vm7, %v11090_v35, %v8751_v27 }
 0x37f   : > { %v3097_v21 = vsel %vm3076_vm12, %v3048_v40, %v8756_v52  ;;  %v3098_v10 = vsel %vm3076_vm12, %v3049_v24, %v8757_v59  ;;  %v8760_v30 = vpop.permute.xlu1 %8759 }
 0x380   : > { %v11357_v18 = vpack.c.bf16 %v3098_v10, %v3097_v21  ;;  %v8765_v43 = vpop.permute.xlu0 %8764  ;;  %v8762_v28 = vunpack.i.h.bf16 %v8760_v30  ;;  %v8761_v0 = vunpack.i.l.bf16 %v8760_v30 }
 0x381   : > { %v8767_v2 = vunpack.i.h.bf16 %v8765_v43  ;;  %v8766_v48 = vunpack.i.l.bf16 %v8765_v43 }
 0x382   : > { %8084 = vmatprep.mubr.msk.bf16.mxu1 %vm3161_vm13, %v11357_v18  ;;  %8136 = vmatprep.mubr.msk.bf16.mxu0 %vm3161_vm13, %v11357_v18  ;;  %v3099_v63 = vsel %vm3076_vm12, %v3050_v39, %v8761_v0  ;;  %v3100_v44 = vsel %vm3076_vm12, %v3051_v23, %v8762_v28 }
 0x383   : > { %v11369_v15 = vpack.c.bf16 %v3100_v44, %v3099_v63  ;;  %v8770_v62 = vpop.permute.xlu1 %8769  ;;  %v3053_v45 = vsel %vm2014_vm7, %v11102_v47, %v8767_v2  ;;  %v3052_v9 = vsel %vm2014_vm7, %v11100_v32, %v8766_v48 }
 0x384   : > { %v8775_v19 = vpop.permute.xlu0 %8774  ;;  %v8772_v5 = vunpack.i.h.bf16 %v8770_v62  ;;  %v8771_v35 = vunpack.i.l.bf16 %v8770_v62 }
 0x385   : > { %v8777_v56 = vunpack.i.h.bf16 %v8775_v19  ;;  %v8776_v1 = vunpack.i.l.bf16 %v8775_v19  ;;  %8085 = vmatmul.mubr.msk.bf16.gmra.mrb[92].mxu1 %vm3161_vm13, %v11369_v15  ;;  %8137 = vmatmul.mubr.msk.bf16.gmra.mrb[92].mxu0 %vm3161_vm13, %v11369_v15 }
 0x386   : > { %v3055_v47 = vsel %vm2014_vm7, %v11112_v36, %v8772_v5  ;;  %v3054_v32 = vsel %vm2014_vm7, %v11110_v26, %v8771_v35 }
 0x387   : > { %v3101_v49 = vsel %vm3076_vm12, %v3052_v9, %v8776_v1  ;;  %v3102_v38 = vsel %vm3076_vm12, %v3053_v45, %v8777_v56  ;;  %v8780_v58 = vpop.permute.xlu1 %8779 }
 0x388   : > { %v11381_v37 = vpack.c.bf16 %v3102_v38, %v3101_v49  ;;  %v8785_v59 = vpop.permute.xlu0 %8784  ;;  %v8782_v52 = vunpack.i.h.bf16 %v8780_v58  ;;  %v8781_v57 = vunpack.i.l.bf16 %v8780_v58 }
 0x389   : > { %v8787_v27 = vunpack.i.h.bf16 %v8785_v59  ;;  %v8786_v24 = vunpack.i.l.bf16 %v8785_v59 }
 0x38a   : > { %8088 = vmatprep.mubr.msk.bf16.mxu1 %vm3161_vm13, %v11381_v37  ;;  %8140 = vmatprep.mubr.msk.bf16.mxu0 %vm3161_vm13, %v11381_v37  ;;  %v3103_v40 = vsel %vm3076_vm12, %v3054_v32, %v8781_v57  ;;  %v3104_v21 = vsel %vm3076_vm12, %v3055_v47, %v8782_v52 }
 0x38b   : > { %v11393_v10 = vpack.c.bf16 %v3104_v21, %v3103_v40  ;;  %v8790_v30 = vpop.permute.xlu1 %8789  ;;  %v3057_v23 = vsel %vm2014_vm7, %v11122_v42, %v8787_v27  ;;  %v3056_v39 = vsel %vm2014_vm7, %v11120_v8, %v8786_v24 }
 0x38c   : > { %v8795_v43 = vpop.permute.xlu0 %8794  ;;  %v8792_v0 = vunpack.i.h.bf16 %v8790_v30  ;;  %v8791_v26 = vunpack.i.l.bf16 %v8790_v30 }
 0x38d   : > { %v8797_v36 = vunpack.i.h.bf16 %v8795_v43  ;;  %v8796_v28 = vunpack.i.l.bf16 %v8795_v43  ;;  %8089 = vmatmul.mubr.msk.bf16.gmra.mrb[96].mxu1 %vm3161_vm13, %v11393_v10  ;;  %8141 = vmatmul.mubr.msk.bf16.gmra.mrb[96].mxu0 %vm3161_vm13, %v11393_v10 }
 0x38e   : > { %v3059_v42 = vsel %vm2014_vm7, %v11132_v54, %v8792_v0  ;;  %v3058_v8 = vsel %vm2014_vm7, %v11130_v31, %v8791_v26 }
 0x38f   : > { %v3105_v2 = vsel %vm3076_vm12, %v3056_v39, %v8796_v28  ;;  %v3106_v48 = vsel %vm3076_vm12, %v3057_v23, %v8797_v36  ;;  %v8800_v63 = vpop.permute.xlu1 %8799 }
 0x390   : > { %v11405_v44 = vpack.c.bf16 %v3106_v48, %v3105_v2  ;;  %v8805_v62 = vpop.permute.xlu0 %8804  ;;  %v8802_v19 = vunpack.i.h.bf16 %v8800_v63  ;;  %v8801_v56 = vunpack.i.l.bf16 %v8800_v63 }
 0x391   : > { %v8807_v1 = vunpack.i.h.bf16 %v8805_v62  ;;  %v8806_v5 = vunpack.i.l.bf16 %v8805_v62 }
 0x392   : > { %8092 = vmatprep.mubr.msk.bf16.mxu1 %vm3161_vm13, %v11405_v44  ;;  %8144 = vmatprep.mubr.msk.bf16.mxu0 %vm3161_vm13, %v11405_v44  ;;  %v3107_v35 = vsel %vm3076_vm12, %v3058_v8, %v8801_v56  ;;  %v3108_v45 = vsel %vm3076_vm12, %v3059_v42, %v8802_v19 }
 0x393   : > { %v11417_v9 = vpack.c.bf16 %v3108_v45, %v3107_v35  ;;  %v8810_v49 = vpop.permute.xlu1 %8809  ;;  %v3061_v52 = vsel %vm2014_vm7, %v11142_v46, %v8807_v1  ;;  %v3060_v57 = vsel %vm2014_vm7, %v11140_v13, %v8806_v5 }
 0x394   : > { %v8815_v38 = vpop.permute.xlu0 %8814  ;;  %v8812_v59 = vunpack.i.h.bf16 %v8810_v49  ;;  %v8811_v31 = vunpack.i.l.bf16 %v8810_v49 }
 0x395   : > { %v8817_v54 = vunpack.i.h.bf16 %v8815_v38  ;;  %v8816_v58 = vunpack.i.l.bf16 %v8815_v38  ;;  %8093 = vmatmul.mubr.msk.bf16.gmra.mrb[100].mxu1 %vm3161_vm13, %v11417_v9  ;;  %8145 = vmatmul.mubr.msk.bf16.gmra.mrb[100].mxu0 %vm3161_vm13, %v11417_v9 }
 0x396   : > { %v3063_v46 = vsel %vm2014_vm7, %v11152_v53, %v8812_v59  ;;  %v3062_v13 = vsel %vm2014_vm7, %v11150_v4, %v8811_v31 }
 0x397   : > { %v3109_v47 = vsel %vm3076_vm12, %v3060_v57, %v8816_v58  ;;  %v3110_v32 = vsel %vm3076_vm12, %v3061_v52, %v8817_v54  ;;  %v8820_v27 = vpop.permute.xlu1 %8819 }
 0x398   : > { %v11429_v24 = vpack.c.bf16 %v3110_v32, %v3109_v47  ;;  %v8825_v40 = vpop.permute.xlu0 %8824  ;;  %v8822_v21 = vunpack.i.h.bf16 %v8820_v27  ;;  %v8821_v30 = vunpack.i.l.bf16 %v8820_v27 }
 0x399   : > { %v8827_v43 = vunpack.i.h.bf16 %v8825_v40  ;;  %v8826_v36 = vunpack.i.l.bf16 %v8825_v40 }
 0x39a   : > { %8096 = vmatprep.mubr.msk.bf16.mxu1 %vm3161_vm13, %v11429_v24  ;;  %8148 = vmatprep.mubr.msk.bf16.mxu0 %vm3161_vm13, %v11429_v24  ;;  %v3111_v28 = vsel %vm3076_vm12, %v3062_v13, %v8821_v30  ;;  %v3112_v0 = vsel %vm3076_vm12, %v3063_v46, %v8822_v21 }
 0x39b   : > { %v11441_v26 = vpack.c.bf16 %v3112_v0, %v3111_v28  ;;  %v8830_v23 = vpop.permute.xlu1 %8829  ;;  %v3065_v63 = vsel %vm2014_vm7, %v11162_v20, %v8827_v43  ;;  %v3064_v62 = vsel %vm2014_vm7, %v11160_v41, %v8826_v36 }
 0x39c   : > { %v8835_v39 = vpop.permute.xlu0 %8834  ;;  %v8832_v48 = vunpack.i.h.bf16 %v8830_v23  ;;  %v8831_v4 = vunpack.i.l.bf16 %v8830_v23 }
 0x39d   : > { %v8837_v53 = vunpack.i.h.bf16 %v8835_v39  ;;  %v8836_v2 = vunpack.i.l.bf16 %v8835_v39  ;;  %8097 = vmatmul.mubr.msk.bf16.gmra.mrb[104].mxu1 %vm3161_vm13, %v11441_v26  ;;  %8149 = vmatmul.mubr.msk.bf16.gmra.mrb[104].mxu0 %vm3161_vm13, %v11441_v26 }
 0x39e   : > { %v3067_v20 = vsel %vm2014_vm7, %v11172_v16, %v8832_v48  ;;  %v3066_v41 = vsel %vm2014_vm7, %v11170_v17, %v8831_v4 }
 0x39f   : > { %v3113_v19 = vsel %vm3076_vm12, %v3064_v62, %v8836_v2  ;;  %v3114_v56 = vsel %vm3076_vm12, %v3065_v63, %v8837_v53  ;;  %v8840_v42 = vpop.permute.xlu1 %8839 }
 0x3a0   : > { %v11453_v8 = vpack.c.bf16 %v3114_v56, %v3113_v19  ;;  %v8845_v1 = vpop.permute.xlu0 %8844  ;;  %v8842_v5 = vunpack.i.h.bf16 %v8840_v42  ;;  %v8841_v35 = vunpack.i.l.bf16 %v8840_v42 }
 0x3a1   : > { %v8847_v45 = vunpack.i.h.bf16 %v8845_v1  ;;  %v8846_v49 = vunpack.i.l.bf16 %v8845_v1 }
 0x3a2   : > { %8100 = vmatprep.mubr.msk.bf16.mxu1 %vm3161_vm13, %v11453_v8  ;;  %8152 = vmatprep.mubr.msk.bf16.mxu0 %vm3161_vm13, %v11453_v8  ;;  %v3115_v38 = vsel %vm3076_vm12, %v3066_v41, %v8841_v35  ;;  %v3116_v54 = vsel %vm3076_vm12, %v3067_v20, %v8842_v5  ;;  %v14351_v20 = vld [vmem:[#allocation6_spill] sm:$0xff] }
 0x3a3   : > { %v11465_v58 = vpack.c.bf16 %v3116_v54, %v3115_v38  ;;  %v8850_v59 = vpop.permute.xlu1 %8849  ;;  %v3069_v47 = vsel %vm2014_vm7, %v11182_v7, %v8847_v45  ;;  %v3068_v32 = vsel %vm2014_vm7, %v11180_v34, %v8846_v49  ;;  %v14352_v45 = vld [vmem:[#allocation23_spill] sm:$0xff] }
 0x3a4   : > { %v8855_v31 = vpop.permute.xlu0 %8854  ;;  %v8852_v57 = vunpack.i.h.bf16 %v8850_v59  ;;  %v8851_v17 = vunpack.i.l.bf16 %v8850_v59 }
 0x3a5   : > { %v8857_v16 = vunpack.i.h.bf16 %v8855_v31  ;;  %v8856_v52 = vunpack.i.l.bf16 %v8855_v31  ;;  %8101 = vmatmul.mubr.msk.bf16.gmra.mrb[108].mxu1 %vm3161_vm13, %v11465_v58  ;;  %8153 = vmatmul.mubr.msk.bf16.gmra.mrb[108].mxu0 %vm3161_vm13, %v11465_v58 }
 0x3a6   : > { %v3071_v7 = vsel %vm2014_vm7, %v11192_v60, %v8852_v57  ;;  %v3070_v34 = vsel %vm2014_vm7, %v11190_v25, %v8851_v17 }
 0x3a7   : > { %v3117_v27 = vsel %vm3076_vm12, %v3068_v32, %v8856_v52  ;;  %v3118_v40 = vsel %vm3076_vm12, %v3069_v47, %v8857_v16  ;;  %v8860_v21 = vpop.permute.xlu1 %8859 }
 0x3a8   : > { %v3145_v30 = vpack.c.bf16 %v3118_v40, %v3117_v27  ;;  %v8865_v46 = vpop.permute.xlu0 %8864  ;;  %v8862_v13 = vunpack.i.h.bf16 %v8860_v21  ;;  %v8861_v43 = vunpack.i.l.bf16 %v8860_v21 }
 0x3a9   : > { %v8867_v36 = vunpack.i.h.bf16 %v8865_v46  ;;  %v8866_v28 = vunpack.i.l.bf16 %v8865_v46 }
 0x3aa   : > { %8104 = vmatprep.mubr.msk.bf16.mxu1 %vm3161_vm13, %v3145_v30  ;;  %8156 = vmatprep.mubr.msk.bf16.mxu0 %vm3161_vm13, %v3145_v30  ;;  %v3119_v0 = vsel %vm3076_vm12, %v3070_v34, %v8861_v43  ;;  %v3120_v23 = vsel %vm3076_vm12, %v3071_v7, %v8862_v13 }
 0x3ab   : > { %v3146_v39 = vpack.c.bf16 %v3120_v23, %v3119_v0  ;;  %v8870_v53 = vpop.permute.xlu1 %8869  ;;  %v3073_v25 = vsel %vm2014_vm7, %v11202_v3, %v8867_v36  ;;  %v3072_v62 = vsel %vm2014_vm7, %v11200_v14, %v8866_v28 }
 0x3ac   : > { %v8875_v2 = vpop.permute.xlu0 %8874  ;;  %v8872_v63 = vunpack.i.h.bf16 %v8870_v53  ;;  %v8871_v60 = vunpack.i.l.bf16 %v8870_v53 }
 0x3ad   : > { %v8877_v48 = vunpack.i.h.bf16 %v8875_v2  ;;  %v8876_v4 = vunpack.i.l.bf16 %v8875_v2  ;;  %8105 = vmatmul.mubr.msk.bf16.gmra.mrb[112].mxu1 %vm3161_vm13, %v3146_v39  ;;  %8157 = vmatmul.mubr.msk.bf16.gmra.mrb[112].mxu0 %vm3161_vm13, %v3146_v39 }
 0x3ae   : > { %v3075_v41 = vsel %vm2014_vm7, %v14351_v20, %v8872_v63  ;;  %v3074_v3 = vsel %vm2014_vm7, %v14352_v45, %v8871_v60 }
 0x3af   : > { %v3121_v19 = vsel %vm3076_vm12, %v3072_v62, %v8876_v4  ;;  %v3122_v56 = vsel %vm3076_vm12, %v3073_v25, %v8877_v48  ;;  %v8880_v42 = vpop.permute.xlu1 %8879 }
 0x3b0   : > { %v3147_v1 = vpack.c.bf16 %v3122_v56, %v3121_v19  ;;  %v8882_v5 = vunpack.i.h.bf16 %v8880_v42  ;;  %v8881_v35 = vunpack.i.l.bf16 %v8880_v42 }
 0x3b2   : > { %8108 = vmatprep.mubr.msk.bf16.mxu1 %vm3161_vm13, %v3147_v1  ;;  %8160 = vmatprep.mubr.msk.bf16.mxu0 %vm3161_vm13, %v3147_v1  ;;  %v3123_v14 = vsel %vm3076_vm12, %v3074_v3, %v8881_v35  ;;  %v3124_v49 = vsel %vm3076_vm12, %v3075_v41, %v8882_v5 }
 0x3b3   : > { %v3148_v38 = vpack.c.bf16 %v3124_v49, %v3123_v14 }
 0x3b5   : > { %8109 = vmatmul.mubr.msk.bf16.gmra.mrb[116].mxu1 %vm3161_vm13, %v3148_v38  ;;  %8161 = vmatmul.mubr.msk.bf16.gmra.mrb[116].mxu0 %vm3161_vm13, %v3148_v38 }
 0x3b6   : > { %8168 = vmatprep.mubr.msk.bf16.mxu1 %vm3161_vm13, %v11237_v12 }
 0x3bd   : > { %8169 = vmatmul.mubr.msk.bf16.vlgmr.msra.gmra.mrb[120].mxu1 %vm3161_vm13, %v11239_v6 }
 0x3be   : > { %8172 = vmatprep.mubr.msk.bf16.mxu1 %vm3161_vm13, %v11261_v55 }
 0x3c5   : > { %8173 = vmatmul.mubr.msk.bf16.gmra.mrb[124].mxu1 %vm3161_vm13, %v11273_v22 }
 0x3c6   : > { %8176 = vmatprep.mubr.msk.bf16.mxu1 %vm3161_vm13, %v11285_v51 }
 0x3cd   : > { %8177 = vmatmul.mubr.msk.bf16.gmra.mrb[128].mxu1 %vm3161_vm13, %v11297_v29 }
 0x3ce   : > { %8180 = vmatprep.mubr.msk.bf16.mxu1 %vm3161_vm13, %v11309_v50 }
 0x3d5   : > { %8181 = vmatmul.mubr.msk.bf16.gmra.mrb[132].mxu1 %vm3161_vm13, %v11321_v61 }
 0x3d6   : > { %8184 = vmatprep.mubr.msk.bf16.mxu1 %vm3161_vm13, %v11333_v33 }
 0x3dd   : > { %8185 = vmatmul.mubr.msk.bf16.gmra.mrb[136].mxu1 %vm3161_vm13, %v11345_v11 }
 0x3de   : > { %8188 = vmatprep.mubr.msk.bf16.mxu1 %vm3161_vm13, %v11357_v18 }
 0x3e5   : > { %8189 = vmatmul.mubr.msk.bf16.gmra.mrb[140].mxu1 %vm3161_vm13, %v11369_v15 }
 0x3e6   : > { %8192 = vmatprep.mubr.msk.bf16.mxu1 %vm3161_vm13, %v11381_v37 }
 0x3ed   : > { %8193 = vmatmul.mubr.msk.bf16.gmra.mrb[144].mxu1 %vm3161_vm13, %v11393_v10 }
 0x3ee   : > { %8196 = vmatprep.mubr.msk.bf16.mxu1 %vm3161_vm13, %v11405_v44 }
 0x3f5   : > { %8197 = vmatmul.mubr.msk.bf16.gmra.mrb[148].mxu1 %vm3161_vm13, %v11417_v9 }
 0x3f6   : > { %8200 = vmatprep.mubr.msk.bf16.mxu1 %vm3161_vm13, %v11429_v24 }
 0x3fd   : > { %8201 = vmatmul.mubr.msk.bf16.gmra.mrb[152].mxu1 %vm3161_vm13, %v11441_v26 }
 0x3fe   : > { %8204 = vmatprep.mubr.msk.bf16.mxu1 %vm3161_vm13, %v11453_v8 }
 0x405   : > { %8205 = vmatmul.mubr.msk.bf16.gmra.mrb[156].mxu1 %vm3161_vm13, %v11465_v58 }
 0x406   : > { %8208 = vmatprep.mubr.msk.bf16.mxu1 %vm3161_vm13, %v3145_v30 }
 0x40d   : > { %8209 = vmatmul.mubr.msk.bf16.gmra.mrb[160].mxu1 %vm3161_vm13, %v3146_v39 }
 0x40e   : > { %8212 = vmatprep.mubr.msk.bf16.mxu1 %vm3161_vm13, %v3147_v1 }
 0x415   : > { %8213 = vmatmul.mubr.msk.bf16.gmra.mrb[164].mxu1 %vm3161_vm13, %v3148_v38 }
 0x42c   : > { %v8066_v12 = vpop.f32.mrb[72].mxu1  ;;  %v8118_v6 = vpop.f32.mrb[72].mxu0 }
 0x42d   : > { %v3272_v55 = vpop.f32.mrb[73].mxu1  ;;  %v3497_v22 = vpop.f32.mrb[73].mxu0  ;;  %v3739_v33 = vrot.slane %v8118_v6, 1 }
 0x42e   : > { %v8067_v51 = vpop.f32.mrb[74].mxu1  ;;  %v8119_v29 = vpop.f32.mrb[74].mxu0  ;;  %v3736_v11 = vrot.slane %v3497_v22, 1 }
 0x42f   : > { %v3275_v50 = vpop.f32.mrb[75].mxu1  ;;  %v3500_v61 = vpop.f32.mrb[75].mxu0  ;;  %v3741_v54 = vrot.slane %v8119_v29, 1 }
 0x430   : > { %v3737_v18 = vrot.slane %v3500_v61, 1 }
 0x432   : > { %v3738_v15 = vsel %vm1407_vm5, %v3736_v11, %v3737_v18  ;;  %v3740_v37 = vsel %vm1407_vm5, %v3737_v18, %v3739_v33 }
 0x433   : > { %v11549_v10 = vadd.f32 %v3738_v15, %v3272_v55  ;;  %v11551_v44 = vadd.f32 %v3740_v37, %v3275_v50 }
 0x438   : > { %v8070_v9 = vpop.f32.mrb[76].mxu1  ;;  %v8122_v24 = vpop.f32.mrb[76].mxu0 }
 0x439   : > { %v3287_v26 = vpop.f32.mrb[77].mxu1  ;;  %v3513_v8 = vpop.f32.mrb[77].mxu0  ;;  %v3746_v16 = vrot.slane %v8122_v24, 1 }
 0x43a   : > { %v3742_v58 = vrot.slane %v3513_v8, 1  ;;  %v8071_v59 = vpop.f32.mrb[78].mxu1  ;;  %v8123_v31 = vpop.f32.mrb[78].mxu0 }
 0x43b   : > { %v3747_v52 = vrot.slane %v8123_v31, 1  ;;  %v3290_v57 = vpop.f32.mrb[79].mxu1  ;;  %v3516_v17 = vpop.f32.mrb[79].mxu0 }
 0x43c   : > { %v3743_v47 = vsel %vm1407_vm5, %v3741_v54, %v3742_v58  ;;  %v3744_v32 = vrot.slane %v3516_v17, 1 }
 0x43d   : > { %v11554_v27 = vadd.f32 %v8067_v51, %v3743_v47  ;;  %v3748_v40 = vsel %vm1407_vm5, %v3746_v16, %v3747_v52 }
 0x43e   : > { %v11557_v21 = vadd.f32 %v8070_v9, %v3748_v40  ;;  %v3745_v30 = vsel %vm1407_vm5, %v3742_v58, %v3744_v32 }
 0x43f   : > { %v11560_v46 = vadd.f32 %v3745_v30, %v3287_v26 }
 0x440   : > { %v8074_v13 = vpop.f32.mrb[80].mxu1  ;;  %v8126_v43 = vpop.f32.mrb[80].mxu0 }
 0x441   : > { %v3302_v7 = vpop.f32.mrb[81].mxu1  ;;  %v3529_v34 = vpop.f32.mrb[81].mxu0  ;;  %v3752_v23 = vrot.slane %v8126_v43, 1 }
 0x442   : > { %v3749_v36 = vrot.slane %v3529_v34, 1  ;;  %v8075_v28 = vpop.f32.mrb[82].mxu1  ;;  %v8127_v0 = vpop.f32.mrb[82].mxu0 }
 0x443   : > { %v3754_v39 = vrot.slane %v8127_v0, 1  ;;  %v3304_v53 = vpop.f32.mrb[83].mxu1  ;;  %v3532_v2 = vpop.f32.mrb[83].mxu0 }
 0x444   : > { %v3750_v48 = vsel %vm1407_vm5, %v3747_v52, %v3749_v36  ;;  %v3751_v4 = vrot.slane %v3532_v2, 1 }
 0x445   : > { %v11563_v63 = vadd.f32 %v8071_v59, %v3750_v48  ;;  %v3755_v60 = vsel %vm1407_vm5, %v3752_v23, %v3754_v39 }
 0x446   : > { %v11566_v25 = vadd.f32 %v8074_v13, %v3755_v60  ;;  %v3753_v62 = vsel %vm1407_vm5, %v3751_v4, %v3752_v23 }
 0x447   : > { %v11569_v19 = vadd.f32 %v3753_v62, %v3304_v53 }
 0x448   : > { %v8078_v56 = vpop.f32.mrb[84].mxu1  ;;  %v8130_v42 = vpop.f32.mrb[84].mxu0 }
 0x449   : > { %v3316_v1 = vpop.f32.mrb[85].mxu1  ;;  %v3545_v5 = vpop.f32.mrb[85].mxu0  ;;  %v3759_v3 = vrot.slane %v8130_v42, 1 }
 0x44a   : > { %v8079_v35 = vpop.f32.mrb[86].mxu1  ;;  %v8131_v20 = vpop.f32.mrb[86].mxu0  ;;  %v3756_v14 = vrot.slane %v3545_v5, 1 }
 0x44b   : > { %v3319_v41 = vpop.f32.mrb[87].mxu1  ;;  %v3548_v45 = vpop.f32.mrb[87].mxu0  ;;  %v3761_v61 = vrot.slane %v8131_v20, 1 }
 0x44c   : > { %v3757_v49 = vrot.slane %v3548_v45, 1 }
 0x44e   : > { %v3758_v38 = vsel %vm1407_vm5, %v3756_v14, %v3757_v49  ;;  %v3760_v12 = vsel %vm1407_vm5, %v3757_v49, %v3759_v3 }
 0x44f   : > { %v11573_v6 = vadd.f32 %v3758_v38, %v3316_v1  ;;  %v11575_v55 = vadd.f32 %v3760_v12, %v3319_v41 }
 0x450   : > { %v8082_v22 = vpop.f32.mrb[88].mxu1  ;;  %v8134_v51 = vpop.f32.mrb[88].mxu0 }
 0x451   : > { %v3331_v29 = vpop.f32.mrb[89].mxu1  ;;  %v3561_v50 = vpop.f32.mrb[89].mxu0  ;;  %v3766_v15 = vrot.slane %v8134_v51, 1 }
 0x452   : > { %v3762_v33 = vrot.slane %v3561_v50, 1  ;;  %v8083_v11 = vpop.f32.mrb[90].mxu1  ;;  %v8135_v18 = vpop.f32.mrb[90].mxu0 }
 0x453   : > { %v3767_v37 = vrot.slane %v8135_v18, 1  ;;  %v3334_v9 = vpop.f32.mrb[91].mxu1  ;;  %v3564_v24 = vpop.f32.mrb[91].mxu0 }
 0x454   : > { %v3763_v26 = vsel %vm1407_vm5, %v3761_v61, %v3762_v33  ;;  %v3764_v8 = vrot.slane %v3564_v24, 1 }
 0x455   : > { %v11578_v54 = vadd.f32 %v8079_v35, %v3763_v26  ;;  %v3768_v58 = vsel %vm1407_vm5, %v3766_v15, %v3767_v37 }
 0x456   : > { %v11581_v59 = vadd.f32 %v8082_v22, %v3768_v58  ;;  %v3765_v31 = vsel %vm1407_vm5, %v3762_v33, %v3764_v8 }
 0x457   : > { %v11584_v16 = vadd.f32 %v3765_v31, %v3331_v29 }
 0x458   : > { %v8086_v52 = vpop.f32.mrb[92].mxu1  ;;  %v8138_v57 = vpop.f32.mrb[92].mxu0 }
 0x459   : > { %v3346_v17 = vpop.f32.mrb[93].mxu1  ;;  %v3577_v47 = vpop.f32.mrb[93].mxu0  ;;  %v3772_v13 = vrot.slane %v8138_v57, 1 }
 0x45a   : > { %v3769_v32 = vrot.slane %v3577_v47, 1  ;;  %v8087_v40 = vpop.f32.mrb[94].mxu1  ;;  %v8139_v30 = vpop.f32.mrb[94].mxu0 }
 0x45b   : > { %v3774_v43 = vrot.slane %v8139_v30, 1  ;;  %v3348_v7 = vpop.f32.mrb[95].mxu1  ;;  %v3580_v34 = vpop.f32.mrb[95].mxu0 }
 0x45c   : > { %v3770_v36 = vsel %vm1407_vm5, %v3767_v37, %v3769_v32  ;;  %v3771_v28 = vrot.slane %v3580_v34, 1 }
 0x45d   : > { %v11587_v0 = vadd.f32 %v8083_v11, %v3770_v36  ;;  %v3775_v23 = vsel %vm1407_vm5, %v3772_v13, %v3774_v43 }
 0x45e   : > { %v11590_v39 = vadd.f32 %v8086_v52, %v3775_v23  ;;  %v3773_v53 = vsel %vm1407_vm5, %v3771_v28, %v3772_v13 }
 0x45f   : > { %v11593_v2 = vadd.f32 %v3773_v53, %v3348_v7 }
 0x460   : > { %v8090_v48 = vpop.f32.mrb[96].mxu1  ;;  %v8142_v4 = vpop.f32.mrb[96].mxu0 }
 0x461   : > { %v3360_v60 = vpop.f32.mrb[97].mxu1  ;;  %v3593_v62 = vpop.f32.mrb[97].mxu0  ;;  %v3779_v35 = vrot.slane %v8142_v4, 1 }
 0x462   : > { %v8091_v56 = vpop.f32.mrb[98].mxu1  ;;  %v8143_v42 = vpop.f32.mrb[98].mxu0  ;;  %v3776_v20 = vrot.slane %v3593_v62, 1 }
 0x463   : > { %v3363_v1 = vpop.f32.mrb[99].mxu1  ;;  %v3596_v5 = vpop.f32.mrb[99].mxu0  ;;  %v3781_v29 = vrot.slane %v8143_v42, 1 }
 0x464   : > { %v3777_v41 = vrot.slane %v3596_v5, 1 }
 0x466   : > { %v3778_v45 = vsel %vm1407_vm5, %v3776_v20, %v3777_v41  ;;  %v3780_v3 = vsel %vm1407_vm5, %v3777_v41, %v3779_v35 }
 0x467   : > { %v11597_v14 = vadd.f32 %v3778_v45, %v3360_v60  ;;  %v11599_v49 = vadd.f32 %v3780_v3, %v3363_v1 }
 0x468   : > { %v8094_v38 = vpop.f32.mrb[100].mxu1  ;;  %v8146_v12 = vpop.f32.mrb[100].mxu0 }
 0x469   : > { %v3375_v22 = vpop.f32.mrb[101].mxu1  ;;  %v3609_v51 = vpop.f32.mrb[101].mxu0  ;;  %v3786_v11 = vrot.slane %v8146_v12, 1 }
 0x46a   : > { %v3782_v50 = vrot.slane %v3609_v51, 1  ;;  %v8095_v61 = vpop.f32.mrb[102].mxu1  ;;  %v8147_v33 = vpop.f32.mrb[102].mxu0 }
 0x46b   : > { %v3787_v18 = vrot.slane %v8147_v33, 1  ;;  %v3378_v15 = vpop.f32.mrb[103].mxu1  ;;  %v3612_v37 = vpop.f32.mrb[103].mxu0 }
 0x46c   : > { %v3783_v9 = vsel %vm1407_vm5, %v3781_v29, %v3782_v50  ;;  %v3784_v24 = vrot.slane %v3612_v37, 1 }
 0x46d   : > { %v11602_v26 = vadd.f32 %v8091_v56, %v3783_v9  ;;  %v3788_v8 = vsel %vm1407_vm5, %v3786_v11, %v3787_v18 }
 0x46e   : > { %v11605_v58 = vadd.f32 %v8094_v38, %v3788_v8  ;;  %v3785_v31 = vsel %vm1407_vm5, %v3782_v50, %v3784_v24 }
 0x46f   : > { %v11608_v52 = vadd.f32 %v3785_v31, %v3375_v22 }
 0x470   : > { %v8098_v57 = vpop.f32.mrb[104].mxu1  ;;  %v8150_v17 = vpop.f32.mrb[104].mxu0 }
 0x471   : > { %v3390_v47 = vpop.f32.mrb[105].mxu1  ;;  %v3625_v32 = vpop.f32.mrb[105].mxu0  ;;  %v3792_v43 = vrot.slane %v8150_v17, 1 }
 0x472   : > { %v3789_v40 = vrot.slane %v3625_v32, 1  ;;  %v8099_v30 = vpop.f32.mrb[106].mxu1  ;;  %v8151_v13 = vpop.f32.mrb[106].mxu0 }
 0x473   : > { %v3794_v7 = vrot.slane %v8151_v13, 1  ;;  %v3392_v34 = vpop.f32.mrb[107].mxu1  ;;  %v3628_v36 = vpop.f32.mrb[107].mxu0 }
 0x474   : > { %v3790_v28 = vsel %vm1407_vm5, %v3787_v18, %v3789_v40  ;;  %v3791_v23 = vrot.slane %v3628_v36, 1 }
 0x475   : > { %v11611_v53 = vadd.f32 %v8095_v61, %v3790_v28  ;;  %v3795_v48 = vsel %vm1407_vm5, %v3792_v43, %v3794_v7 }
 0x476   : > { %v11614_v4 = vadd.f32 %v8098_v57, %v3795_v48  ;;  %v3793_v60 = vsel %vm1407_vm5, %v3791_v23, %v3792_v43 }
 0x477   : > { %v11617_v62 = vadd.f32 %v3793_v60, %v3392_v34 }
 0x478   : > { %v8102_v56 = vpop.f32.mrb[108].mxu1  ;;  %v8154_v42 = vpop.f32.mrb[108].mxu0 }
 0x479   : > { %v3404_v1 = vpop.f32.mrb[109].mxu1  ;;  %v3641_v5 = vpop.f32.mrb[109].mxu0  ;;  %v3799_v3 = vrot.slane %v8154_v42, 1 }
 0x47a   : > { %v8103_v35 = vpop.f32.mrb[110].mxu1  ;;  %v8155_v20 = vpop.f32.mrb[110].mxu0  ;;  %v3796_v38 = vrot.slane %v3641_v5, 1 }
 0x47b   : > { %v3407_v41 = vpop.f32.mrb[111].mxu1  ;;  %v3644_v45 = vpop.f32.mrb[111].mxu0  ;;  %v3801_v15 = vrot.slane %v8155_v20, 1 }
 0x47c   : > { %v3797_v12 = vrot.slane %v3644_v45, 1 }
 0x47e   : > { %v3798_v22 = vsel %vm1407_vm5, %v3796_v38, %v3797_v12  ;;  %v3800_v51 = vsel %vm1407_vm5, %v3797_v12, %v3799_v3 }
 0x47f   : > { %v11621_v29 = vadd.f32 %v3798_v22, %v3404_v1  ;;  %v11623_v50 = vadd.f32 %v3800_v51, %v3407_v41 }
 0x480   : > { %v8106_v61 = vpop.f32.mrb[112].mxu1  ;;  %v8158_v33 = vpop.f32.mrb[112].mxu0 }
 0x481   : > { %v3419_v11 = vpop.f32.mrb[113].mxu1  ;;  %v3657_v18 = vpop.f32.mrb[113].mxu0  ;;  %v3806_v8 = vrot.slane %v8158_v33, 1 }
 0x482   : > { %v3802_v37 = vrot.slane %v3657_v18, 1  ;;  %v8107_v9 = vpop.f32.mrb[114].mxu1  ;;  %v8159_v24 = vpop.f32.mrb[114].mxu0 }
 0x483   : > { %v3807_v31 = vrot.slane %v8159_v24, 1  ;;  %v3422_v57 = vpop.f32.mrb[115].mxu1  ;;  %v3660_v17 = vpop.f32.mrb[115].mxu0 }
 0x484   : > { %v3803_v47 = vsel %vm1407_vm5, %v3801_v15, %v3802_v37  ;;  %v3804_v32 = vrot.slane %v3660_v17, 1 }
 0x485   : > { %v11626_v40 = vadd.f32 %v8103_v35, %v3803_v47  ;;  %v3808_v30 = vsel %vm1407_vm5, %v3806_v8, %v3807_v31  ;;  %v11648_v8 = vld [vmem:[%s14206_s4] ss:$0 sm:$0xff] }
 0x486   : > { %v11629_v13 = vadd.f32 %v8106_v61, %v3808_v30  ;;  %v3805_v43 = vsel %vm1407_vm5, %v3802_v37, %v3804_v32 }
 0x487   : > { %v11632_v7 = vadd.f32 %v3805_v43, %v3419_v11 }
 0x488   : > { %v8110_v34 = vpop.f32.mrb[116].mxu1  ;;  %v8162_v36 = vpop.f32.mrb[116].mxu0 }
 0x489   : > { %v3434_v28 = vpop.f32.mrb[117].mxu1  ;;  %v3673_v23 = vpop.f32.mrb[117].mxu0  ;;  %v3812_v42 = vrot.slane %v8162_v36, 1 }
 0x48a   : > { %v3809_v48 = vrot.slane %v3673_v23, 1  ;;  %v8111_v60 = vpop.f32.mrb[118].mxu1  ;;  %v8163_v56 = vpop.f32.mrb[118].mxu0 }
 0x48b   : > { %v3814_v1 = vrot.slane %v8163_v56, 1  ;;  %v3436_v5 = vpop.f32.mrb[119].mxu1  ;;  %v3676_v35 = vpop.f32.mrb[119].mxu0 }
 0x48c   : > { %v3810_v20 = vsel %vm1407_vm5, %v3807_v31, %v3809_v48  ;;  %v3811_v41 = vrot.slane %v3676_v35, 1 }
 0x48d   : > { %v11635_v45 = vadd.f32 %v8107_v9, %v3810_v20  ;;  %v3815_v3 = vsel %vm1407_vm5, %v3812_v42, %v3814_v1 }
 0x48e   : > { %v11638_v38 = vadd.f32 %v8110_v34, %v3815_v3  ;;  %v3813_v12 = vsel %vm1407_vm5, %v3811_v41, %v3812_v42 }
 0x48f   : > { %v11641_v22 = vadd.f32 %v3813_v12, %v3436_v5 }
 0x490   : > { %v8170_v51 = vpop.f32.mrb[120].mxu1 }
 0x491   : > { %v3930_v61 = vpop.f32.mrb[121].mxu1  ;;  %v4172_v18 = vrot.slane %v8170_v51, 2 }
 0x492   : > { %v8171_v33 = vpop.f32.mrb[122].mxu1  ;;  %v4169_v15 = vrot.slane %v3930_v61, 2 }
 0x493   : > { %v3933_v11 = vpop.f32.mrb[123].mxu1  ;;  %v4174_v43 = vrot.slane %v8171_v33, 2 }
 0x494   : > { %v4170_v37 = vrot.slane %v3933_v11, 2 }
 0x496   : > { %v4171_v24 = vsel %vm1830_vm6, %v4169_v15, %v4170_v37  ;;  %v4173_v9 = vsel %vm1830_vm6, %v4170_v37, %v4172_v18 }
 0x497   : > { %v4281_v31 = vadd.f32 %v4171_v24, %v11549_v10  ;;  %v4282_v57 = vadd.f32 %v4173_v9, %v11551_v44 }
 0x498   : > { %v8174_v17 = vpop.f32.mrb[124].mxu1 }
 0x499   : > { %v11653_v47 = vadd.f32 %v11648_v8, %v4281_v31  ;;  %v11656_v32 = vadd.f32 %v11648_v8, %v4282_v57  ;;  %v3946_v30 = vpop.f32.mrb[125].mxu1  ;;  %v4179_v28 = vrot.slane %v8174_v17, 2 }
 0x49a   : > { %v4175_v34 = vrot.slane %v3946_v30, 2  ;;  %v8175_v36 = vpop.f32.mrb[126].mxu1 }
 0x49b   : > { %v4180_v23 = vrot.slane %v8175_v36, 2  ;;  %v3949_v48 = vpop.f32.mrb[127].mxu1  ;;  %v4353_v44 = vsel %vm4352_vm14, %v11653_v47, 0.0  ;;  %v4354_v56 = vsel %vm4352_vm14, %v11656_v32, 0.0 }
 0x49c   : > { %v4176_v60 = vsel %vm1830_vm6, %v4174_v43, %v4175_v34  ;;  %v4177_v10 = vrot.slane %v3949_v48, 2  ;;  %v4355_v3 = vadd.f32 %v4354_v56, %v4353_v44 }
 0x49d   : > { %v4283_v42 = vadd.f32 %v4176_v60, %v11554_v27  ;;  %v4181_v1 = vsel %vm1830_vm6, %v4179_v28, %v4180_v23 }
 0x49e   : > { %v4285_v5 = vadd.f32 %v4181_v1, %v11557_v21  ;;  %v4178_v35 = vsel %vm1830_vm6, %v4175_v34, %v4177_v10 }
 0x49f   : > { %v11668_v20 = vadd.f32 %v11648_v8, %v4283_v42  ;;  %v4284_v41 = vadd.f32 %v4178_v35, %v11560_v46 }
 0x4a0   : > { %v8178_v12 = vpop.f32.mrb[128].mxu1  ;;  %v11677_v21 = vadd.f32 %v11648_v8, %v4285_v5 }
 0x4a1   : > { %v4356_v51 = vsel %vm4352_vm14, %v11668_v20, 0.0  ;;  %v11674_v61 = vadd.f32 %v11648_v8, %v4284_v41  ;;  %v3962_v27 = vpop.f32.mrb[129].mxu1  ;;  %v4185_v37 = vrot.slane %v8178_v12, 2 }
 0x4a2   : > { %v4357_v33 = vadd.f32 %v4356_v51, %v4355_v3  ;;  %v4182_v11 = vrot.slane %v3962_v27, 2  ;;  %v8179_v18 = vpop.f32.mrb[130].mxu1  ;;  %v4360_v36 = vsel %vm4352_vm14, %v11677_v21, 0.0 }
 0x4a3   : > { %v4358_v15 = vsel %vm4352_vm14, %v11674_v61, 0.0  ;;  %v4187_v46 = vrot.slane %v8179_v18, 2  ;;  %v3965_v24 = vpop.f32.mrb[131].mxu1 }
 0x4a4   : > { %v4359_v9 = vadd.f32 %v4358_v15, %v4357_v33  ;;  %v4183_v31 = vsel %vm1830_vm6, %v4180_v23, %v4182_v11  ;;  %v4184_v57 = vrot.slane %v3965_v24, 2 }
 0x4a5   : > { %v4286_v17 = vadd.f32 %v4183_v31, %v11563_v63  ;;  %v4188_v30 = vsel %vm1830_vm6, %v4185_v37, %v4187_v46 }
 0x4a6   : > { %v4288_v43 = vadd.f32 %v4188_v30, %v11566_v25  ;;  %v4186_v34 = vsel %vm1830_vm6, %v4184_v57, %v4185_v37  ;;  %v4361_v60 = vadd.f32 %v4360_v36, %v4359_v9 }
 0x4a7   : > { %v11689_v28 = vadd.f32 %v11648_v8, %v4286_v17  ;;  %v4287_v48 = vadd.f32 %v4186_v34, %v11569_v19 }
 0x4a8   : > { %v8182_v10 = vpop.f32.mrb[132].mxu1  ;;  %v11700_v19 = vadd.f32 %v11648_v8, %v4288_v43 }
 0x4a9   : > { %v4362_v23 = vsel %vm4352_vm14, %v11689_v28, 0.0  ;;  %v11695_v63 = vadd.f32 %v11648_v8, %v4287_v48  ;;  %v3978_v44 = vpop.f32.mrb[133].mxu1  ;;  %v4192_v5 = vrot.slane %v8182_v10, 2 }
 0x4aa   : > { %v4363_v25 = vadd.f32 %v4362_v23, %v4361_v60  ;;  %v8183_v56 = vpop.f32.mrb[134].mxu1  ;;  %v4189_v35 = vrot.slane %v3978_v44, 2  ;;  %v4366_v18 = vsel %vm4352_vm14, %v11700_v19, 0.0 }
 0x4ab   : > { %v4364_v42 = vsel %vm4352_vm14, %v11695_v63, 0.0  ;;  %v3981_v1 = vpop.f32.mrb[135].mxu1  ;;  %v4194_v46 = vrot.slane %v8183_v56, 2 }
 0x4ac   : > { %v4190_v41 = vrot.slane %v3981_v1, 2  ;;  %v4365_v3 = vadd.f32 %v4364_v42, %v4363_v25 }
 0x4ae   : > { %v4191_v12 = vsel %vm1830_vm6, %v4189_v35, %v4190_v41  ;;  %v4193_v51 = vsel %vm1830_vm6, %v4190_v41, %v4192_v5  ;;  %v4367_v24 = vadd.f32 %v4366_v18, %v4365_v3 }
 0x4af   : > { %v4289_v27 = vadd.f32 %v4191_v12, %v11573_v6  ;;  %v4290_v33 = vadd.f32 %v4193_v51, %v11575_v55 }
 0x4b0   : > { %v8186_v11 = vpop.f32.mrb[136].mxu1 }
 0x4b1   : > { %v11709_v15 = vadd.f32 %v11648_v8, %v4289_v27  ;;  %v3994_v37 = vpop.f32.mrb[137].mxu1  ;;  %v11712_v57 = vadd.f32 %v11648_v8, %v4290_v33  ;;  %v4199_v17 = vrot.slane %v8186_v11, 2 }
 0x4b2   : > { %v4195_v9 = vrot.slane %v3994_v37, 2  ;;  %v8187_v31 = vpop.f32.mrb[138].mxu1 }
 0x4b3   : > { %v4368_v6 = vsel %vm4352_vm14, %v11709_v15, 0.0  ;;  %v4200_v55 = vrot.slane %v8187_v31, 2  ;;  %v3997_v30 = vpop.f32.mrb[139].mxu1  ;;  %v4370_v44 = vsel %vm4352_vm14, %v11712_v57, 0.0 }
 0x4b4   : > { %v4369_v43 = vadd.f32 %v4368_v6, %v4367_v24  ;;  %v4196_v34 = vsel %vm1830_vm6, %v4194_v46, %v4195_v9  ;;  %v4197_v36 = vrot.slane %v3997_v30, 2 }
 0x4b5   : > { %v4291_v48 = vadd.f32 %v4196_v34, %v11578_v54  ;;  %v4201_v60 = vsel %vm1830_vm6, %v4199_v17, %v4200_v55 }
 0x4b6   : > { %v4293_v10 = vadd.f32 %v4201_v60, %v11581_v59  ;;  %v4198_v23 = vsel %vm1830_vm6, %v4195_v9, %v4197_v36  ;;  %v4371_v42 = vadd.f32 %v4370_v44, %v4369_v43 }
 0x4b7   : > { %v11724_v25 = vadd.f32 %v11648_v8, %v4291_v48  ;;  %v4292_v56 = vadd.f32 %v4198_v23, %v11584_v16 }
 0x4b8   : > { %v8190_v1 = vpop.f32.mrb[140].mxu1  ;;  %v11733_v12 = vadd.f32 %v11648_v8, %v4293_v10 }
 0x4b9   : > { %v4372_v5 = vsel %vm4352_vm14, %v11724_v25, 0.0  ;;  %v11730_v54 = vadd.f32 %v11648_v8, %v4292_v56  ;;  %v4010_v35 = vpop.f32.mrb[141].mxu1  ;;  %v4205_v27 = vrot.slane %v8190_v1, 2 }
 0x4ba   : > { %v4373_v59 = vadd.f32 %v4372_v5, %v4371_v42  ;;  %v4202_v41 = vrot.slane %v4010_v35, 2  ;;  %v8191_v3 = vpop.f32.mrb[142].mxu1  ;;  %v4376_v6 = vsel %vm4352_vm14, %v11733_v12, 0.0 }
 0x4bb   : > { %v4374_v51 = vsel %vm4352_vm14, %v11730_v54, 0.0  ;;  %v4207_v16 = vrot.slane %v8191_v3, 2  ;;  %v4013_v33 = vpop.f32.mrb[143].mxu1 }
 0x4bc   : > { %v4375_v11 = vadd.f32 %v4374_v51, %v4373_v59  ;;  %v4203_v18 = vsel %vm1830_vm6, %v4200_v55, %v4202_v41  ;;  %v4204_v37 = vrot.slane %v4013_v33, 2 }
 0x4bd   : > { %v4294_v46 = vadd.f32 %v4203_v18, %v11587_v0  ;;  %v4208_v24 = vsel %vm1830_vm6, %v4205_v27, %v4207_v16 }
 0x4be   : > { %v4296_v9 = vadd.f32 %v4208_v24, %v11590_v39  ;;  %v4206_v31 = vsel %vm1830_vm6, %v4204_v37, %v4205_v27  ;;  %v4377_v43 = vadd.f32 %v4376_v6, %v4375_v11 }
 0x4bf   : > { %v11745_v17 = vadd.f32 %v11648_v8, %v4294_v46  ;;  %v4295_v30 = vadd.f32 %v4206_v31, %v11593_v2 }
 0x4c0   : > { %v8194_v34 = vpop.f32.mrb[144].mxu1  ;;  %v11756_v2 = vadd.f32 %v11648_v8, %v4296_v9 }
 0x4c1   : > { %v4378_v55 = vsel %vm4352_vm14, %v11745_v17, 0.0  ;;  %v11751_v0 = vadd.f32 %v11648_v8, %v4295_v30  ;;  %v4026_v36 = vpop.f32.mrb[145].mxu1  ;;  %v4212_v23 = vrot.slane %v8194_v34, 2 }
 0x4c2   : > { %v4379_v39 = vadd.f32 %v4378_v55, %v4377_v43  ;;  %v8195_v48 = vpop.f32.mrb[146].mxu1  ;;  %v4209_v44 = vrot.slane %v4026_v36, 2  ;;  %v4382_v3 = vsel %vm4352_vm14, %v11756_v2, 0.0 }
 0x4c3   : > { %v4380_v60 = vsel %vm4352_vm14, %v11751_v0, 0.0  ;;  %v4029_v10 = vpop.f32.mrb[147].mxu1  ;;  %v4214_v33 = vrot.slane %v8195_v48, 2 }
 0x4c4   : > { %v4210_v56 = vrot.slane %v4029_v10, 2  ;;  %v4381_v42 = vadd.f32 %v4380_v60, %v4379_v39 }
 0x4c6   : > { %v4211_v1 = vsel %vm1830_vm6, %v4209_v44, %v4210_v56  ;;  %v4213_v5 = vsel %vm1830_vm6, %v4210_v56, %v4212_v23  ;;  %v4383_v11 = vadd.f32 %v4382_v3, %v4381_v42 }
 0x4c7   : > { %v4297_v35 = vadd.f32 %v4211_v1, %v11597_v14  ;;  %v4298_v59 = vadd.f32 %v4213_v5, %v11599_v49 }
 0x4c8   : > { %v8198_v41 = vpop.f32.mrb[148].mxu1 }
 0x4c9   : > { %v11765_v51 = vadd.f32 %v11648_v8, %v4297_v35  ;;  %v11768_v27 = vadd.f32 %v11648_v8, %v4298_v59  ;;  %v4042_v16 = vpop.f32.mrb[149].mxu1  ;;  %v4219_v46 = vrot.slane %v8198_v41, 2 }
 0x4ca   : > { %v4215_v18 = vrot.slane %v4042_v16, 2  ;;  %v8199_v37 = vpop.f32.mrb[150].mxu1 }
 0x4cb   : > { %v4384_v14 = vsel %vm4352_vm14, %v11765_v51, 0.0  ;;  %v4220_v49 = vrot.slane %v8199_v37, 2  ;;  %v4045_v24 = vpop.f32.mrb[151].mxu1  ;;  %v4386_v30 = vsel %vm4352_vm14, %v11768_v27, 0.0 }
 0x4cc   : > { %v4385_v9 = vadd.f32 %v4384_v14, %v4383_v11  ;;  %v4216_v31 = vsel %vm1830_vm6, %v4214_v33, %v4215_v18  ;;  %v4217_v6 = vrot.slane %v4045_v24, 2 }
 0x4cd   : > { %v4299_v43 = vadd.f32 %v4216_v31, %v11602_v26  ;;  %v4221_v34 = vsel %vm1830_vm6, %v4219_v46, %v4220_v49 }
 0x4ce   : > { %v4387_v55 = vadd.f32 %v4386_v30, %v4385_v9  ;;  %v4301_v36 = vadd.f32 %v4221_v34, %v11605_v58  ;;  %v4218_v39 = vsel %vm1830_vm6, %v4215_v18, %v4217_v6 }
 0x4cf   : > { %v11780_v48 = vadd.f32 %v11648_v8, %v4299_v43  ;;  %v4300_v60 = vadd.f32 %v4218_v39, %v11608_v52 }
 0x4d0   : > { %v8202_v10 = vpop.f32.mrb[152].mxu1  ;;  %v11786_v44 = vadd.f32 %v11648_v8, %v4301_v36 }
 0x4d1   : > { %v4388_v23 = vsel %vm4352_vm14, %v11780_v48, 0.0  ;;  %v11789_v26 = vadd.f32 %v11648_v8, %v4300_v60  ;;  %v4058_v56 = vpop.f32.mrb[153].mxu1  ;;  %v4225_v35 = vrot.slane %v8202_v10, 2 }
 0x4d2   : > { %v4389_v42 = vadd.f32 %v4388_v23, %v4387_v55  ;;  %v4222_v58 = vrot.slane %v4058_v56, 2  ;;  %v8203_v1 = vpop.f32.mrb[154].mxu1  ;;  %v4392_v33 = vsel %vm4352_vm14, %v11786_v44, 0.0 }
 0x4d3   : > { %v4390_v5 = vsel %vm4352_vm14, %v11789_v26, 0.0  ;;  %v4227_v59 = vrot.slane %v8203_v1, 2  ;;  %v4061_v52 = vpop.f32.mrb[155].mxu1 }
 0x4d4   : > { %v4391_v41 = vadd.f32 %v4390_v5, %v4389_v42  ;;  %v4223_v3 = vsel %vm1830_vm6, %v4220_v49, %v4222_v58  ;;  %v4224_v16 = vrot.slane %v4061_v52, 2 }
 0x4d5   : > { %v4302_v11 = vadd.f32 %v4223_v3, %v11611_v53  ;;  %v4228_v18 = vsel %vm1830_vm6, %v4225_v35, %v4227_v59 }
 0x4d6   : > { %v4393_v37 = vadd.f32 %v4392_v33, %v4391_v41  ;;  %v4304_v14 = vadd.f32 %v4228_v18, %v11614_v4  ;;  %v4226_v46 = vsel %vm1830_vm6, %v4224_v16, %v4225_v35 }
 0x4d7   : > { %v11801_v24 = vadd.f32 %v11648_v8, %v4302_v11  ;;  %v4303_v9 = vadd.f32 %v4226_v46, %v11617_v62 }
 0x4d8   : > { %v8206_v31 = vpop.f32.mrb[156].mxu1  ;;  %v11807_v6 = vadd.f32 %v11648_v8, %v4304_v14 }
 0x4d9   : > { %v4394_v49 = vsel %vm4352_vm14, %v11801_v24, 0.0  ;;  %v11810_v53 = vadd.f32 %v11648_v8, %v4303_v9  ;;  %v4074_v30 = vpop.f32.mrb[157].mxu1  ;;  %v4232_v39 = vrot.slane %v8206_v31, 2 }
 0x4da   : > { %v4395_v43 = vadd.f32 %v4394_v49, %v4393_v37  ;;  %v8207_v4 = vpop.f32.mrb[158].mxu1  ;;  %v4229_v62 = vrot.slane %v4074_v30, 2  ;;  %v4398_v10 = vsel %vm4352_vm14, %v11807_v6, 0.0 }
 0x4db   : > { %v4396_v34 = vsel %vm4352_vm14, %v11810_v53, 0.0  ;;  %v4077_v55 = vpop.f32.mrb[159].mxu1  ;;  %v4234_v41 = vrot.slane %v8207_v4, 2 }
 0x4dc   : > { %v4397_v36 = vadd.f32 %v4396_v34, %v4395_v43  ;;  %v4230_v60 = vrot.slane %v4077_v55, 2 }
 0x4de   : > { %v4231_v23 = vsel %vm1830_vm6, %v4229_v62, %v4230_v60  ;;  %v4233_v56 = vsel %vm1830_vm6, %v4230_v60, %v4232_v39  ;;  %v4399_v42 = vadd.f32 %v4398_v10, %v4397_v36 }
 0x4df   : > { %v4305_v58 = vadd.f32 %v4231_v23, %v11621_v29  ;;  %v4306_v1 = vadd.f32 %v4233_v56, %v11623_v50 }
 0x4e0   : > { %v8210_v5 = vpop.f32.mrb[160].mxu1 }
 0x4e1   : > { %v11821_v35 = vadd.f32 %v11648_v8, %v4305_v58  ;;  %v11824_v59 = vadd.f32 %v11648_v8, %v4306_v1  ;;  %v4090_v52 = vpop.f32.mrb[161].mxu1  ;;  %v4239_v11 = vrot.slane %v8210_v5, 2 }
 0x4e2   : > { %v4235_v3 = vrot.slane %v4090_v52, 2  ;;  %v8211_v16 = vpop.f32.mrb[162].mxu1 }
 0x4e3   : > { %v4400_v33 = vsel %vm4352_vm14, %v11821_v35, 0.0  ;;  %v4240_v18 = vrot.slane %v8211_v16, 2  ;;  %v4093_v37 = vpop.f32.mrb[163].mxu1  ;;  %v4402_v46 = vsel %vm4352_vm14, %v11824_v59, 0.0 }
 0x4e4   : > { %v4401_v29 = vadd.f32 %v4400_v33, %v4399_v42  ;;  %v4236_v50 = vsel %vm1830_vm6, %v4234_v41, %v4235_v3  ;;  %v4237_v14 = vrot.slane %v4093_v37, 2 }
 0x4e5   : > { %v4307_v9 = vadd.f32 %v4236_v50, %v11626_v40  ;;  %v4241_v31 = vsel %vm1830_vm6, %v4239_v11, %v4240_v18 }
 0x4e6   : > { %v4403_v49 = vadd.f32 %v4402_v46, %v4401_v29  ;;  %v4309_v30 = vadd.f32 %v4241_v31, %v11629_v13  ;;  %v4238_v43 = vsel %vm1830_vm6, %v4235_v3, %v4237_v14 }
 0x4e7   : > { %v4346_v4 = vadd.f32 %v11648_v8, %v4307_v9  ;;  %v4308_v34 = vadd.f32 %v4238_v43, %v11632_v7 }
 0x4e8   : > { %v8214_v55 = vpop.f32.mrb[164].mxu1  ;;  %v4348_v39 = vadd.f32 %v11648_v8, %v4309_v30 }
 0x4e9   : > { %v4404_v36 = vsel %vm4352_vm14, %v4346_v4, 0.0  ;;  %v4347_v62 = vadd.f32 %v11648_v8, %v4308_v34  ;;  %v4106_v60 = vpop.f32.mrb[165].mxu1  ;;  %v4245_v13 = vrot.slane %v8214_v55, 2 }
 0x4ea   : > { %v4405_v40 = vadd.f32 %v4404_v36, %v4403_v49  ;;  %v4242_v10 = vrot.slane %v4106_v60, 2  ;;  %v8215_v23 = vpop.f32.mrb[166].mxu1  ;;  %v4408_v52 = vsel %vm4352_vm14, %v4348_v39, 0.0 }
 0x4eb   : > { %v4406_v56 = vsel %vm4352_vm14, %v4347_v62, 0.0  ;;  %v4247_v42 = vrot.slane %v8215_v23, 2  ;;  %v4109_v58 = vpop.f32.mrb[167].mxu1 }
 0x4ec   : > { %v4407_v1 = vadd.f32 %v4406_v56, %v4405_v40  ;;  %v4243_v5 = vsel %vm1830_vm6, %v4240_v18, %v4242_v10  ;;  %v4244_v7 = vrot.slane %v4109_v58, 2 }
 0x4ed   : > { %v4310_v41 = vadd.f32 %v4243_v5, %v11635_v45  ;;  %v4248_v3 = vsel %vm1830_vm6, %v4245_v13, %v4247_v42 }
 0x4ee   : > { %v4409_v16 = vadd.f32 %v4408_v52, %v4407_v1  ;;  %v4312_v33 = vadd.f32 %v4248_v3, %v11638_v38  ;;  %v4246_v11 = vsel %vm1830_vm6, %v4244_v7, %v4245_v13 }
 0x4ef   : > { %v4349_v37 = vadd.f32 %v11648_v8, %v4310_v41  ;;  %v4311_v29 = vadd.f32 %v4246_v11, %v11641_v22 }
 0x4f0   : > { %v4351_v18 = vadd.f32 %v11648_v8, %v4312_v33 }
 0x4f1   : > { %v4410_v50 = vsel %vm4352_vm14, %v4349_v37, 0.0  ;;  %v4350_v14 = vadd.f32 %v11648_v8, %v4311_v29 }
 0x4f2   : > { %v4411_v46 = vadd.f32 %v4410_v50, %v4409_v16  ;;  %v4414_v31 = vsel %vm4352_vm14, %v4351_v18, 0.0 }
 0x4f3   : > { %v4412_v45 = vsel %vm4352_vm14, %v4350_v14, 0.0 }
 0x4f4   : > { %v4413_v9 = vadd.f32 %v4412_v45, %v4411_v46 }
 0x4f6   : > { %v4415_v49 = vadd.f32 %v4414_v31, %v4413_v9  ;;  %v14353_v31 = vmov 0.0  }
 0x4f7   : > { %4955 = vst.msk [vmem:[#allocation3 + $0x2a] sm:$0x3f] %vm4953_vm15, %v14353_v31  ;;  %4954 = vst.msk [vmem:[#allocation3 + $0x12] sm:$0x3f] %vm4953_vm15, %v14353_v31 }
 0x4f8   : > { %v4416_v38 = vrot.slane %v4415_v49, 4  ;;  %4956 = vst.msk [vmem:[#allocation3 + $0x42] sm:$0x3f] %vm4953_vm15, %v14353_v31  ;;  %4957 = vst.msk [vmem:[#allocation3 + $0x5a] sm:$0x3f] %vm4953_vm15, %v14353_v31 }
 0x4f9   : > { %4958 = vst.msk [vmem:[#allocation3 + $0x72] sm:$0x3f] %vm4953_vm15, %v14353_v31  ;;  %4959 = vst.msk [vmem:[#allocation3 + $0x8a] sm:$0x3f] %vm4953_vm15, %v14353_v31 }
 0x4fa   : > { %v4417_v30 = vadd.f32 %v4416_v38, %v4415_v49  ;;  %4960 = vst.msk [vmem:[#allocation3 + $0xa2] sm:$0x3f] %vm4953_vm15, %v14353_v31  ;;  %4961 = vst.msk [vmem:[#allocation3 + $0xba] sm:$0x3f] %vm4953_vm15, %v14353_v31 }
 0x4fb   : > { %4962 = vst.msk [vmem:[#allocation3 + $0xd2] sm:$0x3f] %vm4953_vm15, %v14353_v31  ;;  %4963 = vst.msk [vmem:[#allocation3 + $0xea] sm:$0x3f] %vm4953_vm15, %v14353_v31 }
 0x4fc   : > { %v4418_v43 = vrot.slane %v4417_v30, 2  ;;  %4964 = vst.msk [vmem:[#allocation3 + $0x102] sm:$0x3f] %vm4953_vm15, %v14353_v31  ;;  %4965 = vst.msk [vmem:[#allocation3 + $0x11a] sm:$0x3f] %vm4953_vm15, %v14353_v31 }
 0x4fd   : > { %4966 = vst.msk [vmem:[#allocation3 + $0x132] sm:$0x3f] %vm4953_vm15, %v14353_v31  ;;  %4967 = vst.msk [vmem:[#allocation3 + $0x14a] sm:$0x3f] %vm4953_vm15, %v14353_v31 }
 0x4fe   : > { %v4419_v34 = vadd.f32 %v4418_v43, %v4417_v30  ;;  %4968 = vst.msk [vmem:[#allocation3 + $0x162] sm:$0x3f] %vm4953_vm15, %v14353_v31  ;;  %4969 = vst.msk [vmem:[#allocation3 + $0x17a] sm:$0x3f] %vm4953_vm15, %v14353_v31 }
 0x4ff   : > { %4970 = vst.msk [vmem:[#allocation3 + $0x192] sm:$0x3f] %vm4953_vm15, %v14353_v31  ;;  %4971 = vst.msk [vmem:[#allocation3 + $0x1aa] sm:$0x3f] %vm4953_vm15, %v14353_v31 }
 0x500   : > { %v4420_v55 = vrot.slane %v4419_v34, 1 }
 0x502   : > { %v4421_v36 = vadd.f32 %v4420_v55, %v4419_v34 }
 0x504   : > { %v11854_v22 = vmul.f32 0.00390625, %v4421_v36 }
 0x506   : > { %v11858_v60 = vsub.f32 %v11765_v51, %v11854_v22  ;;  %v11862_v8 = vsub.f32 %v11768_v27, %v11854_v22  ;;  %v11866_v40 = vsub.f32 %v11780_v48, %v11854_v22  ;;  %v11870_v10 = vsub.f32 %v11789_v26, %v11854_v22 }
 0x507   : > { %v11874_v23 = vsub.f32 %v11786_v44, %v11854_v22  ;;  %v11878_v51 = vsub.f32 %v11801_v24, %v11854_v22  ;;  %v11882_v27 = vsub.f32 %v11810_v53, %v11854_v22  ;;  %v11886_v48 = vsub.f32 %v11807_v6, %v11854_v22 }
 0x508   : > { %v11890_v26 = vsub.f32 %v11821_v35, %v11854_v22  ;;  %v11894_v44 = vsub.f32 %v11824_v59, %v11854_v22  ;;  %v11897_v56 = vsub.f32 %v4346_v4, %v11854_v22  ;;  %v11900_v24 = vsub.f32 %v4347_v62, %v11854_v22 }
 0x509   : > { %v11903_v53 = vsub.f32 %v4348_v39, %v11854_v22  ;;  %v11906_v6 = vsub.f32 %v4349_v37, %v11854_v22  ;;  %v11909_v13 = vsub.f32 %v4350_v14, %v11854_v22  ;;  %v11912_v35 = vsub.f32 %v4351_v18, %v11854_v22 }
 0x50a   : > { %v11916_v59 = vsub.f32 %v11653_v47, %v11854_v22  ;;  %v11920_v4 = vsub.f32 %v11656_v32, %v11854_v22  ;;  %v11924_v39 = vsub.f32 %v11668_v20, %v11854_v22  ;;  %v11928_v62 = vsub.f32 %v11674_v61, %v11854_v22 }
 0x50b   : > { %v11936_v47 = vsub.f32 %v11677_v21, %v11854_v22  ;;  %v11942_v20 = vsub.f32 %v11689_v28, %v11854_v22  ;;  %v11950_v52 = vsub.f32 %v11695_v63, %v11854_v22  ;;  %v11957_v28 = vsub.f32 %v11700_v19, %v11854_v22 }
 0x50c   : > { %v4455_v42 = vmul.f32 %v11916_v59, %v11916_v59  ;;  %v4456_v58 = vmul.f32 %v11920_v4, %v11920_v4  ;;  %v4457_v32 = vmul.f32 %v11924_v39, %v11924_v39  ;;  %v4458_v61 = vmul.f32 %v11928_v62, %v11928_v62 }
 0x50d   : > { %v4459_v21 = vmul.f32 %v11936_v47, %v11936_v47  ;;  %v4460_v16 = vmul.f32 %v11942_v20, %v11942_v20  ;;  %v11964_v63 = vsub.f32 %v11709_v15, %v11854_v22  ;;  %v4461_v37 = vmul.f32 %v11950_v52, %v11950_v52 }
 0x50e   : > { %v4487_v1 = vsel %vm4352_vm14, %v4455_v42, 0.0  ;;  %v4488_v5 = vsel %vm4352_vm14, %v4456_v58, 0.0  ;;  %v4490_v41 = vsel %vm4352_vm14, %v4457_v32, 0.0  ;;  %v4492_v33 = vsel %vm4352_vm14, %v4458_v61, 0.0 }
 0x50f   : > { %v4489_v7 = vadd.f32 %v4488_v5, %v4487_v1  ;;  %v4494_v29 = vsel %vm4352_vm14, %v4459_v21, 0.0  ;;  %v11971_v19 = vsub.f32 %v11712_v57, %v11854_v22  ;;  %v4462_v18 = vmul.f32 %v11957_v28, %v11957_v28 }
 0x510   : > { %v4496_v14 = vsel %vm4352_vm14, %v4460_v16, 0.0  ;;  %v11978_v15 = vsub.f32 %v11724_v25, %v11854_v22  ;;  %v4463_v45 = vmul.f32 %v11964_v63, %v11964_v63  ;;  %v4498_v9 = vsel %vm4352_vm14, %v4461_v37, 0.0 }
 0x511   : > { %v4491_v3 = vadd.f32 %v4490_v41, %v4489_v7  ;;  %v12021_v25 = vsub.f32 %v11730_v54, %v11854_v22  ;;  %v4464_v49 = vmul.f32 %v11971_v19, %v11971_v19  ;;  %v4500_v38 = vsel %vm4352_vm14, %v4462_v18, 0.0 }
 0x512   : > { %v12028_v43 = vsub.f32 %v11733_v12, %v11854_v22  ;;  %v4465_v34 = vmul.f32 %v11978_v15, %v11978_v15  ;;  %v4502_v55 = vsel %vm4352_vm14, %v4463_v45, 0.0  ;;  %v12035_v54 = vsub.f32 %v11745_v17, %v11854_v22 }
 0x513   : > { %v4493_v11 = vadd.f32 %v4492_v33, %v4491_v3  ;;  %v4466_v42 = vmul.f32 %v12021_v25, %v12021_v25  ;;  %v4504_v58 = vsel %vm4352_vm14, %v4464_v49, 0.0  ;;  %v12042_v12 = vsub.f32 %v11751_v0, %v11854_v22 }
 0x514   : > { %v4467_v61 = vmul.f32 %v12028_v43, %v12028_v43  ;;  %v4506_v1 = vsel %vm4352_vm14, %v4465_v34, 0.0  ;;  %v12049_v17 = vsub.f32 %v11756_v2, %v11854_v22  ;;  %v4468_v7 = vmul.f32 %v12035_v54, %v12035_v54 }
 0x515   : > { %v4495_v50 = vadd.f32 %v4494_v29, %v4493_v11  ;;  %v4508_v21 = vsel %vm4352_vm14, %v4466_v42, 0.0  ;;  %v4469_v0 = vmul.f32 %v12042_v12, %v12042_v12  ;;  %v4471_v2 = vmul.f32 %v11858_v60, %v11858_v60 }
 0x516   : > { %v4510_v3 = vsel %vm4352_vm14, %v4467_v61, 0.0  ;;  %v4470_v33 = vmul.f32 %v12049_v17, %v12049_v17  ;;  %v4512_v11 = vsel %vm4352_vm14, %v4468_v7, 0.0  ;;  %v4474_v31 = vmul.f32 %v11870_v10, %v11870_v10 }
 0x517   : > { %v4497_v46 = vadd.f32 %v4496_v14, %v4495_v50  ;;  %v4514_v22 = vsel %vm4352_vm14, %v4469_v0, 0.0  ;;  %v4472_v50 = vmul.f32 %v11862_v8, %v11862_v8  ;;  %v4518_v45 = vsel %vm4352_vm14, %v4471_v2, 0.0 }
 0x518   : > { %v4516_v18 = vsel %vm4352_vm14, %v4470_v33, 0.0 }
 0x519   : > { %v4499_v57 = vadd.f32 %v4498_v9, %v4497_v46  ;;  %v4473_v46 = vmul.f32 %v11866_v40, %v11866_v40 }
 0x51b   : > { %v4501_v30 = vadd.f32 %v4500_v38, %v4499_v57  ;;  %v4520_v57 = vsel %vm4352_vm14, %v4472_v50, 0.0  ;;  %v4475_v38 = vmul.f32 %v11874_v23, %v11874_v23 }
 0x51d   : > { %v4503_v36 = vadd.f32 %v4502_v55, %v4501_v30  ;;  %v4522_v30 = vsel %vm4352_vm14, %v4473_v46, 0.0  ;;  %v4476_v55 = vmul.f32 %v11878_v51, %v11878_v51 }
 0x51f   : > { %v4505_v32 = vadd.f32 %v4504_v58, %v4503_v36  ;;  %v4524_v36 = vsel %vm4352_vm14, %v4474_v31, 0.0  ;;  %v4477_v58 = vmul.f32 %v11882_v27, %v11882_v27 }
 0x521   : > { %v4507_v5 = vadd.f32 %v4506_v1, %v4505_v32  ;;  %v4526_v32 = vsel %vm4352_vm14, %v4475_v38, 0.0  ;;  %v4478_v1 = vmul.f32 %v11886_v48, %v11886_v48 }
 0x523   : > { %v4509_v41 = vadd.f32 %v4508_v21, %v4507_v5  ;;  %v4528_v5 = vsel %vm4352_vm14, %v4476_v55, 0.0  ;;  %v4479_v21 = vmul.f32 %v11890_v26, %v11890_v26 }
 0x525   : > { %v4511_v16 = vadd.f32 %v4510_v3, %v4509_v41  ;;  %v4530_v41 = vsel %vm4352_vm14, %v4477_v58, 0.0  ;;  %v4480_v3 = vmul.f32 %v11894_v44, %v11894_v44  ;;  %v9129_v58 = vld [vmem:[%s14207_s5] sm:$0xff]  }
 0x526   : > { %8216 = vmatprep.subr.bf16.mxu0 %v9129_v58 }
 0x527   : > { %v4513_v37 = vadd.f32 %v4512_v11, %v4511_v16  ;;  %v4532_v16 = vsel %vm4352_vm14, %v4478_v1, 0.0  ;;  %v4481_v11 = vmul.f32 %v11897_v56, %v11897_v56  ;;  %8217 = vmatpush3.bf16.msra.mxu0 %v9129_v58 }
 0x529   : > { %v4515_v29 = vadd.f32 %v4514_v22, %v4513_v37  ;;  %v4534_v37 = vsel %vm4352_vm14, %v4479_v21, 0.0  ;;  %v4482_v22 = vmul.f32 %v11900_v24, %v11900_v24 }
 0x52b   : > { %v4517_v14 = vadd.f32 %v4516_v18, %v4515_v29  ;;  %v4536_v29 = vsel %vm4352_vm14, %v4480_v3, 0.0  ;;  %v4483_v18 = vmul.f32 %v11903_v53, %v11903_v53 }
 0x52d   : > { %v4519_v9 = vadd.f32 %v4518_v45, %v4517_v14  ;;  %v4538_v14 = vsel %vm4352_vm14, %v4481_v11, 0.0  ;;  %v4484_v45 = vmul.f32 %v11906_v6, %v11906_v6 }
 0x52f   : > { %v4521_v49 = vadd.f32 %v4520_v57, %v4519_v9  ;;  %v4540_v9 = vsel %vm4352_vm14, %v4482_v22, 0.0  ;;  %v4485_v57 = vmul.f32 %v11909_v13, %v11909_v13 }
 0x531   : > { %v4523_v34 = vadd.f32 %v4522_v30, %v4521_v49  ;;  %v4542_v49 = vsel %vm4352_vm14, %v4483_v18, 0.0  ;;  %v4486_v30 = vmul.f32 %v11912_v35, %v11912_v35 }
 0x533   : > { %v4525_v42 = vadd.f32 %v4524_v36, %v4523_v34  ;;  %v4544_v34 = vsel %vm4352_vm14, %v4484_v45, 0.0  ;;  %v4546_v36 = vsel %vm4352_vm14, %v4485_v57, 0.0 }
 0x535   : > { %v4527_v61 = vadd.f32 %v4526_v32, %v4525_v42  ;;  %v4548_v32 = vsel %vm4352_vm14, %v4486_v30, 0.0 }
 0x537   : > { %v4529_v7 = vadd.f32 %v4528_v5, %v4527_v61 }
 0x539   : > { %v4531_v0 = vadd.f32 %v4530_v41, %v4529_v7 }
 0x53b   : > { %v4533_v33 = vadd.f32 %v4532_v16, %v4531_v0 }
 0x53d   : > { %v4535_v2 = vadd.f32 %v4534_v37, %v4533_v33  ;;  %v9130_v37 = vld [vmem:[%s14207_s5 + $0x8] sm:$0xff]  }
 0x53e   : > { %8218 = vmatprep.subr.bf16.mxu0 %v9130_v37 }
 0x53f   : > { %v4537_v50 = vadd.f32 %v4536_v29, %v4535_v2  ;;  %8219 = vmatpush3.bf16.msra.mxu0 %v9130_v37 }
 0x541   : > { %v4539_v46 = vadd.f32 %v4538_v14, %v4537_v50 }
 0x543   : > { %v4541_v31 = vadd.f32 %v4540_v9, %v4539_v46 }
 0x545   : > { %v4543_v38 = vadd.f32 %v4542_v49, %v4541_v31 }
 0x547   : > { %v4545_v55 = vadd.f32 %v4544_v34, %v4543_v38 }
 0x549   : > { %v4547_v42 = vadd.f32 %v4546_v36, %v4545_v55 }
 0x54b   : > { %v4549_v61 = vadd.f32 %v4548_v32, %v4547_v42 }
 0x54d   : > { %v4550_v1 = vrot.slane %v4549_v61, 4 }
 0x54f   : > { %v4551_v5 = vadd.f32 %v4550_v1, %v4549_v61 }
 0x551   : > { %v4552_v7 = vrot.slane %v4551_v5, 2 }
 0x553   : > { %v4553_v21 = vadd.f32 %v4552_v7, %v4551_v5 }
 0x555   : > { %v4554_v41 = vrot.slane %v4553_v21, 1 }
 0x557   : > { %v4555_v0 = vadd.f32 %v4554_v41, %v4553_v21 }
 0x559   : > { %v4556_v3 = vmul.f32 0.00390625, %v4555_v0 }
 0x55b   : > { %v4557_v16 = vadd.f32 1e-05, %v4556_v3 }
 0x55d   : > { %9204 = vrsqrt.f32 %v4557_v16 }
 0x567   : > { %v12113_v33 = vpop.eup %9204 }
 0x568   : > { %v4589_v11 = vmul.f32 %v12113_v33, %v11909_v13  ;;  %v4560_v29 = vmul.f32 %v12113_v33, %v11920_v4  ;;  %v4561_v18 = vmul.f32 %v12113_v33, %v11924_v39  ;;  %v12126_v13 = vmul.f32 %v12113_v33, %v11916_v59 }
 0x569   : > { %v12130_v31 = vmul.f32 %v12113_v33, %v11928_v62  ;;  %v12134_v4 = vmul.f32 %v12113_v33, %v11936_v47  ;;  %v12138_v39 = vmul.f32 %v12113_v33, %v11942_v20  ;;  %v12142_v59 = vmul.f32 %v12113_v33, %v11950_v52 }
 0x56a   : > { %v4653_v2 = vmul.f32 0.044715, %v4589_v11  ;;  %v4624_v46 = vmul.f32 0.044715, %v4560_v29  ;;  %v4625_v9 = vmul.f32 0.044715, %v4561_v18  ;;  %v12146_v62 = vmul.f32 %v12113_v33, %v11957_v28 }
 0x56b   : > { %14354 = vst [vmem:[#allocation5_spill] sm:$0xff] %v12138_v39  ;;  %v4621_v38 = vmul.f32 0.5, %v4589_v11  ;;  %v12150_v34 = vmul.f32 %v12113_v33, %v11964_v63  ;;  %v12154_v47 = vmul.f32 %v12113_v33, %v11971_v19  ;;  %v12158_v20 = vmul.f32 %v12113_v33, %v11978_v15 }
 0x56c   : > { %v4685_v22 = vmul.f32 %v4653_v2, %v4589_v11  ;;  %v4656_v57 = vmul.f32 %v4624_v46, %v4560_v29  ;;  %v4657_v49 = vmul.f32 %v4625_v9, %v4561_v18  ;;  %v12162_v52 = vmul.f32 %v12113_v33, %v12021_v25 }
 0x56d   : > { %v12166_v28 = vmul.f32 %v12113_v33, %v12028_v43  ;;  %v12170_v63 = vmul.f32 %v12113_v33, %v12035_v54  ;;  %v12174_v19 = vmul.f32 %v12113_v33, %v12042_v12  ;;  %v12178_v15 = vmul.f32 %v12113_v33, %v12049_v17 }
 0x56e   : > { %v4717_v50 = vmul.f32 %v4685_v22, %v4589_v11  ;;  %v4688_v30 = vmul.f32 %v4656_v57, %v4560_v29  ;;  %v4689_v55 = vmul.f32 %v4657_v49, %v4561_v18  ;;  %v12182_v25 = vmul.f32 %v12113_v33, %v11858_v60 }
 0x56f   : > { %14355 = vst [vmem:[#allocation4_spill] sm:$0xff] %v12170_v63  ;;  %v12186_v42 = vmul.f32 %v12113_v33, %v11862_v8  ;;  %v12190_v54 = vmul.f32 %v12113_v33, %v11866_v40  ;;  %v12194_v12 = vmul.f32 %v12113_v33, %v11870_v10  ;;  %v12198_v17 = vmul.f32 %v12113_v33, %v11874_v23 }
 0x570   : > { %v4749_v14 = vadd.f32 %v4717_v50, %v4589_v11  ;;  %v4720_v36 = vadd.f32 %v4688_v30, %v4560_v29  ;;  %v4721_v43 = vadd.f32 %v4689_v55, %v4561_v18  ;;  %v12202_v60 = vmul.f32 %v12113_v33, %v11878_v51 }
 0x571   : > { %v12206_v8 = vmul.f32 %v12113_v33, %v11882_v27  ;;  %v12210_v40 = vmul.f32 %v12113_v33, %v11886_v48  ;;  %v12214_v10 = vmul.f32 %v12113_v33, %v11890_v26  ;;  %v12218_v23 = vmul.f32 %v12113_v33, %v11894_v44 }
 0x572   : > { %v4781_v45 = vmul.f32 0.7978846, %v4749_v14  ;;  %v4752_v58 = vmul.f32 0.7978846, %v4720_v36  ;;  %v4753_v32 = vmul.f32 0.7978846, %v4721_v43  ;;  %v12222_v51 = vmul.f32 %v12113_v33, %v11897_v56 }
 0x573   : > { %v12226_v27 = vmul.f32 %v12113_v33, %v11900_v24  ;;  %v4623_v48 = vmul.f32 0.044715, %v12126_v13  ;;  %v4592_v61 = vmul.f32 0.5, %v4560_v29  ;;  %v4593_v1 = vmul.f32 0.5, %v4561_v18 }
 0x574   : > { %9206 = vtanh.f32 %v4781_v45  ;;  %v12230_v26 = vmul.f32 0.5, %v12126_v13  ;;  %v12233_v44 = vmul.f32 0.5, %v12130_v31  ;;  %v12236_v7 = vmul.f32 0.5, %v12134_v4 }
 0x575   : > { %9208 = vtanh.f32 %v4752_v58  ;;  %v12239_v56 = vmul.f32 0.5, %v12138_v39  ;;  %v12242_v24 = vmul.f32 0.5, %v12142_v59  ;;  %v4655_v21 = vmul.f32 %v4623_v48, %v12126_v13 }
 0x576   : > { %9210 = vtanh.f32 %v4753_v32  ;;  %14356 = vst [vmem:[#allocation7_spill] sm:$0xff] %v12233_v44  ;;  %14357 = vst [vmem:[#allocation8_spill] sm:$0xff] %v12236_v7  ;;  %v12246_v0 = vmul.f32 0.5, %v12146_v62  ;;  %v12249_v3 = vmul.f32 0.5, %v12150_v34  ;;  %v12252_v16 = vmul.f32 0.5, %v12154_v47 }
 0x577   : > { %14358 = vst [vmem:[#allocation9_spill] sm:$0xff] %v12239_v56  ;;  %14359 = vst [vmem:[#allocation10_spill] sm:$0xff] %v12242_v24  ;;  %v12255_v11 = vmul.f32 0.5, %v12158_v20  ;;  %v12258_v37 = vmul.f32 0.5, %v12162_v52  ;;  %v12261_v2 = vmul.f32 0.5, %v12166_v28  ;;  %v4687_v22 = vmul.f32 %v4655_v21, %v12126_v13  ;;  %v9132_v24 = vld [vmem:[%s14207_s5 + $0x14] sm:$0xff]  }
 0x578   : > { %14360 = vst [vmem:[#allocation11_spill] sm:$0xff] %v12246_v0  ;;  %14361 = vst [vmem:[#allocation12_spill] sm:$0xff] %v12249_v3  ;;  %v12265_v50 = vmul.f32 0.5, %v12170_v63  ;;  %v12268_v18 = vmul.f32 0.5, %v12174_v19  ;;  %v12271_v14 = vmul.f32 0.5, %v12178_v15  ;;  %v12283_v49 = vmul.f32 %v12113_v33, %v11903_v53  ;;  %8270 = vmatprep.subr.bf16.mxu1 %v9132_v24 }
 0x579   : > { %14362 = vst [vmem:[#allocation13_spill] sm:$0xff] %v12252_v16  ;;  %14363 = vst [vmem:[#allocation14_spill] sm:$0xff] %v12255_v11  ;;  %v4626_v46 = vmul.f32 0.044715, %v12130_v31  ;;  %v4627_v45 = vmul.f32 0.044715, %v12134_v4  ;;  %v4719_v57 = vadd.f32 %v4687_v22, %v12126_v13  ;;  %v12290_v13 = vmul.f32 %v12113_v33, %v11906_v6  ;;  %8271 = vmatpush3.bf16.msra.mxu1 %v9132_v24 }
 0x57a   : > { %14364 = vst [vmem:[#allocation15_spill] sm:$0xff] %v12258_v37  ;;  %14365 = vst [vmem:[#allocation16_spill] sm:$0xff] %v12261_v2  ;;  %v4628_v9 = vmul.f32 0.044715, %v12138_v39  ;;  %v4630_v30 = vmul.f32 0.044715, %v12146_v62  ;;  %v12297_v53 = vmul.f32 %v12113_v33, %v11912_v35 }
 0x57b   : > { %14366 = vst [vmem:[#allocation17_spill] sm:$0xff] %v12265_v50  ;;  %14367 = vst [vmem:[#allocation18_spill] sm:$0xff] %v12268_v18  ;;  %v4631_v55 = vmul.f32 0.044715, %v12150_v34  ;;  %v4632_v36 = vmul.f32 0.044715, %v12154_v47 }
 0x57c   : > { %14368 = vst [vmem:[#allocation19_spill] sm:$0xff] %v12271_v14  ;;  %14369 = vst [vmem:[#allocation20_spill] sm:$0xff] %v12283_v49  ;;  %v4633_v43 = vmul.f32 0.044715, %v12158_v20  ;;  %v4634_v58 = vmul.f32 0.044715, %v12162_v52  ;;  %v4660_v0 = vmul.f32 %v4628_v9, %v12138_v39  ;;  %v4662_v7 = vmul.f32 %v4630_v30, %v12146_v62 }
 0x57d   : > { %14370 = vst [vmem:[#allocation21_spill] sm:$0xff] %v12290_v13  ;;  %14371 = vst [vmem:[#allocation22_spill] sm:$0xff] %v12297_v53  ;;  %v4635_v48 = vmul.f32 0.044715, %v12166_v28  ;;  %v4637_v21 = vmul.f32 0.044715, %v12174_v19 }
 0x57e   : > { %v9207_v5 = vpop.eup %9206  ;;  %v12303_v22 = vmul.f32 0.5, %v12182_v25  ;;  %v4751_v14 = vmul.f32 0.7978846, %v4719_v57  ;;  %v12307_v50 = vmul.f32 0.5, %v12186_v42  ;;  %v4639_v35 = vmul.f32 0.044715, %v12182_v25 }
 0x57f   : > { %v4845_v41 = vadd.f32 1.0, %v9207_v5  ;;  %v9209_v32 = vpop.eup %9208  ;;  %v4636_v5 = vmul.f32 0.044715, %v12170_v63  ;;  %v4640_v33 = vmul.f32 0.044715, %v12186_v42  ;;  %v12337_v3 = vmul.f32 0.5, %v12190_v54 }
 0x580   : > { %v4816_v6 = vadd.f32 1.0, %v9209_v32  ;;  %14372 = vst [vmem:[#allocation24_spill] sm:$0xff] %v12303_v22  ;;  %14373 = vst [vmem:[#allocation25_spill] sm:$0xff] %v12307_v50  ;;  %v4641_v37 = vmul.f32 0.044715, %v12190_v54  ;;  %9212 = vtanh.f32 %v4751_v14  ;;  %v4658_v32 = vmul.f32 %v4626_v46, %v12130_v31 }
 0x581   : > { %v4877_v29 = vmul.f32 %v4845_v41, %v4621_v38  ;;  %v4629_v38 = vmul.f32 0.044715, %v12142_v59  ;;  %v9211_v41 = vpop.eup %9210  ;;  %v12316_v22 = vld [vmem:[%s14207_s5 + $0x10] ss:$0 sps:$4 sm:$0x33]   ;;  %14375 = vst [vmem:[#allocation23_spill] sm:$0xff] %v12337_v3  ;;  %v4663_v3 = vmul.f32 %v4631_v55, %v12150_v34  ;;  %v4666_v39 = vmul.f32 %v4634_v58, %v12162_v52 }
 0x582   : > { %v4817_v18 = vadd.f32 1.0, %v9211_v41  ;;  %v4848_v2 = vmul.f32 %v4816_v6, %v4592_v61  ;;  %14374 = vst [vmem:[#allocation6_spill] sm:$0xff] %v12316_v22  ;;  %v4642_v41 = vmul.f32 0.044715, %v12194_v12  ;;  %v4643_v50 = vmul.f32 0.044715, %v12198_v17  ;;  %8383 = vmatprep.subr.msk.bf16.mxu0 %vm914_vm1, %v12316_v22 }
 0x583   : > { %4911 = vst.msk [vmem:[#allocation3 + $0x181] sm:$0xff] %vm4352_vm14, %v4877_v29  ;;  %4913 = vst.msk [vmem:[#allocation3 + $0x199] sm:$0xff] %vm4352_vm14, %v4877_v29  ;;  %v4644_v11 = vmul.f32 0.044715, %v12202_v60  ;;  %v4645_v61 = vmul.f32 0.044715, %v12206_v8  ;;  %v4661_v56 = vmul.f32 %v4629_v38, %v12142_v59  ;;  %v4690_v44 = vmul.f32 %v4658_v32, %v12130_v31 }
 0x584   : > { %4932 = vst.msk [vmem:[#allocation3 + $0x180] sm:$0x1] %vm4915_vm0, %v4877_v29  ;;  %4933 = vst.msk [vmem:[#allocation3 + $0x198] sm:$0x1] %vm4915_vm0, %v4877_v29  ;;  %v4638_v29 = vmul.f32 0.044715, %v12178_v15  ;;  %v4849_v57 = vmul.f32 %v4817_v18, %v4593_v1  ;;  %v4659_v1 = vmul.f32 %v4627_v45, %v12134_v4  ;;  %v4664_v22 = vmul.f32 %v4632_v36, %v12154_v47 }
 0x585   : > { %4882 = vst.msk [vmem:[#allocation3 + $0x21] sm:$0xff] %vm4352_vm14, %v4848_v2  ;;  %v4646_v14 = vmul.f32 0.044715, %v12210_v40  ;;  %v4647_v46 = vmul.f32 0.044715, %v12214_v10  ;;  %4880 = vst.msk [vmem:[#allocation3 + $0x9] sm:$0xff] %vm4352_vm14, %v4848_v2  ;;  %v4722_v38 = vadd.f32 %v4690_v44, %v12130_v31  ;;  %v4669_v30 = vmul.f32 %v4637_v21, %v12174_v19 }
 0x586   : > { %4936 = vst.msk [vmem:[#allocation3 + $0x22] sm:$0x80] %vm4934_vm2, %v4848_v2  ;;  %4935 = vst.msk [vmem:[#allocation3 + $0xa] sm:$0x80] %vm4934_vm2, %v4848_v2  ;;  %v4648_v18 = vmul.f32 0.044715, %v12218_v23  ;;  %v4691_v9 = vmul.f32 %v4659_v1, %v12134_v4  ;;  %v4670_v55 = vmul.f32 %v4638_v29, %v12178_v15  ;;  %v4671_v36 = vmul.f32 %v4639_v35, %v12182_v25 }
 0x587   : > { %4883 = vst.msk [vmem:[#allocation3 + $0x31] sm:$0xff] %vm4352_vm14, %v4849_v57  ;;  %v4649_v6 = vmul.f32 0.044715, %v12222_v51  ;;  %v4650_v16 = vmul.f32 0.044715, %v12226_v27  ;;  %v4672_v1 = vmul.f32 %v4640_v33, %v12186_v42  ;;  %v4673_v58 = vmul.f32 %v4641_v37, %v12190_v54 }
 0x588   : > { %4918 = vst.msk [vmem:[#allocation3 + $0x30] sm:$0x1] %vm4915_vm0, %v4849_v57  ;;  %v4651_v2 = vmul.f32 0.044715, %v12283_v49  ;;  %v4652_v45 = vmul.f32 0.044715, %v12290_v13  ;;  %v4665_v13 = vmul.f32 %v4633_v43, %v12158_v20  ;;  %v4667_v49 = vmul.f32 %v4635_v48, %v12166_v28 }
 0x589   : > { %v4654_v57 = vmul.f32 0.044715, %v12297_v53  ;;  %v4668_v53 = vmul.f32 %v4636_v5, %v12170_v63  ;;  %v4723_v43 = vadd.f32 %v4691_v9, %v12134_v4  ;;  %v4674_v48 = vmul.f32 %v4642_v41, %v12194_v12 }
 0x58a   : > { %v4754_v5 = vmul.f32 0.7978846, %v4722_v38  ;;  %v9213_v63 = vpop.eup %9212  ;;  %v4675_v44 = vmul.f32 %v4643_v50, %v12198_v17  ;;  %v4676_v24 = vmul.f32 %v4644_v11, %v12202_v60  ;;  %v4677_v21 = vmul.f32 %v4645_v61, %v12206_v8  ;;  %v14377_v61 = vld [vmem:[#allocation20_spill] sm:$0xff] }
 0x58b   : > { %v4755_v29 = vmul.f32 0.7978846, %v4723_v43  ;;  %v4815_v35 = vadd.f32 1.0, %v9213_v63  ;;  %v4678_v33 = vmul.f32 %v4646_v14, %v12210_v40  ;;  %v4679_v37 = vmul.f32 %v4647_v46, %v12214_v10  ;;  %v14378_v63 = vld [vmem:[#allocation5_spill] sm:$0xff] }
 0x58c   : > { %9214 = vtanh.f32 %v4754_v5  ;;  %v4680_v41 = vmul.f32 %v4648_v18, %v12218_v23  ;;  %v4681_v9 = vmul.f32 %v4649_v6, %v12222_v51  ;;  %v4682_v50 = vmul.f32 %v4650_v16, %v12226_v27  ;;  %v14379_v14 = vld [vmem:[#allocation21_spill] sm:$0xff] }
 0x58d   : > { %v12361_v32 = vld [vmem:[#allocation3 + $0x28] sm:$0xff]  ;;  %9216 = vtanh.f32 %v4755_v29  ;;  %v4847_v11 = vmul.f32 %v4815_v35, %v12230_v26  ;;  %v4683_v38 = vmul.f32 %v4651_v2, %v14377_v61  ;;  %v4692_v43 = vmul.f32 %v4660_v0, %v14378_v63  ;;  %v14381_v2 = vld [vmem:[#allocation4_spill] sm:$0xff] }
 0x58e   : > { %14376 = vst [vmem:[#allocation26_spill] sm:$0xff] %v12361_v32  ;;  %v4684_v5 = vmul.f32 %v4652_v45, %v14379_v14  ;;  %v4693_v18 = vmul.f32 %v4661_v56, %v12142_v59  ;;  %v4694_v6 = vmul.f32 %v4662_v7, %v12146_v62  ;;  %v9133_v29 = vld [vmem:[%s14207_s5 + $0x1c] sm:$0xff]   ;;  %v4695_v26 = vmul.f32 %v4663_v3, %v12150_v34 }
 0x58f   : > { %v12366_v31 = vld [vmem:[#allocation3 + $0x30] sm:$0xff]  ;;  %4881 = vst.msk [vmem:[#allocation3 + $0x19] sm:$0xff] %vm4352_vm14, %v4847_v11  ;;  %4879 = vst.msk [vmem:[#allocation3 + $0x1] sm:$0xff] %vm4352_vm14, %v4847_v11  ;;  %v4696_v0 = vmul.f32 %v4664_v22, %v12154_v47  ;;  %v4697_v56 = vmul.f32 %v4665_v13, %v12158_v20  ;;  %v4698_v7 = vmul.f32 %v4666_v39, %v12162_v52  ;;  %8272 = vmatprep.subr.bf16.mxu1 %v9133_v29 }
 0x590   : > { %v8888_v4 = vpack.i.bf16 %v12366_v31, %v12361_v32  ;;  %v14380_v32 = vld [vmem:[#allocation22_spill] sm:$0xff]  ;;  %4917 = vst.msk [vmem:[#allocation3 + $0x18] sm:$0x1] %vm4915_vm0, %v4847_v11  ;;  %4916 = vst.msk [vmem:[#allocation3] sm:$0x1] %vm4915_vm0, %v4847_v11  ;;  %v4699_v16 = vmul.f32 %v4667_v49, %v12166_v28  ;;  %v4700_v45 = vmul.f32 %v4668_v53, %v14381_v2  ;;  %8273 = vmatpush3.bf16.msra.mxu1 %v9133_v29 }
 0x591   : > { %v4686_v46 = vmul.f32 %v4654_v57, %v14380_v32  ;;  %v4701_v57 = vmul.f32 %v4669_v30, %v12174_v19  ;;  %v4703_v35 = vmul.f32 %v4671_v36, %v12182_v25  ;;  %v4704_v11 = vmul.f32 %v4672_v1, %v12186_v42 }
 0x592   : > { %8889 = vrot.lane.b32.xlu1 %v8888_v4, %s9350_s25  ;;  %v4702_v4 = vmul.f32 %v4670_v55, %v12178_v15  ;;  %v4705_v3 = vmul.f32 %v4673_v58, %v12190_v54  ;;  %v4724_v22 = vadd.f32 %v4692_v43, %v14378_v63  ;;  %v4706_v39 = vmul.f32 %v4674_v48, %v12194_v12 }
 0x593   : > { %v4707_v49 = vmul.f32 %v4675_v44, %v12198_v17  ;;  %v4708_v13 = vmul.f32 %v4676_v24, %v12202_v60  ;;  %v4725_v53 = vadd.f32 %v4693_v18, %v12142_v59  ;;  %v4709_v30 = vmul.f32 %v4677_v21, %v12206_v8 }
 0x594   : > { %v4710_v55 = vmul.f32 %v4678_v33, %v12210_v40  ;;  %v4711_v36 = vmul.f32 %v4679_v37, %v12214_v10  ;;  %v4726_v1 = vadd.f32 %v4694_v6, %v12146_v62  ;;  %v4712_v58 = vmul.f32 %v4680_v41, %v12218_v23 }
 0x595   : > { %v4713_v63 = vmul.f32 %v4681_v9, %v12222_v51  ;;  %v4714_v48 = vmul.f32 %v4682_v50, %v12226_v27  ;;  %v4727_v44 = vadd.f32 %v4695_v26, %v12150_v34  ;;  %v4715_v24 = vmul.f32 %v4683_v38, %v14377_v61  ;;  %v14382_v50 = vld [vmem:[#allocation6_spill] sm:$0xff] }
 0x596   : > { %v9215_v43 = vpop.eup %9214  ;;  %v4728_v59 = vadd.f32 %v4696_v0, %v12154_v47  ;;  %v4729_v21 = vadd.f32 %v4697_v56, %v12158_v20  ;;  %v4756_v33 = vmul.f32 0.7978846, %v4724_v22  ;;  %v12422_v62 = vld [vmem:[#allocation3 + $0x20] sm:$0xff]  ;;  %v4730_v9 = vadd.f32 %v4698_v7, %v12162_v52  ;;  %v14383_v20 = vld [vmem:[#allocation7_spill] sm:$0xff]  ;;  %v14384_v52 = vld [vmem:[#allocation8_spill] sm:$0xff] }
 0x597   : > { %v9217_v18 = vpop.eup %9216  ;;  %v12420_v37 = vld [vmem:[#allocation3 + $0x18] sm:$0xff]  ;;  %v4818_v41 = vadd.f32 1.0, %v9215_v43  ;;  %v4757_v6 = vmul.f32 0.7978846, %v4725_v53  ;;  %v5579_v34 = vsel %vm914_vm1, %v14382_v50, 0  ;;  %v4716_v0 = vmul.f32 %v4684_v5, %v14379_v14 }
 0x598   : > { %v8883_v38 = vpack.i.bf16 %v12422_v62, %v12420_v37  ;;  %v4819_v29 = vadd.f32 1.0, %v9217_v18  ;;  %9218 = vtanh.f32 %v4756_v33  ;;  %v4758_v47 = vmul.f32 0.7978846, %v4726_v1  ;;  %8221 = vmatpush3.bf16.msra.mxu0 %v5579_v34 }
 0x599   : > { %v4850_v26 = vmul.f32 %v4818_v41, %v14383_v20  ;;  %v4731_v56 = vadd.f32 %v4699_v16, %v12166_v28  ;;  %v4759_v22 = vmul.f32 0.7978846, %v4727_v44  ;;  %v4718_v53 = vmul.f32 %v4686_v46, %v14380_v32 }
 0x59a   : > { %8884 = vrot.lane.b32.xlu0 %v8883_v38, %s9350_s25  ;;  %v4851_v7 = vmul.f32 %v4819_v29, %v14384_v52  ;;  %v4732_v43 = vadd.f32 %v4700_v45, %v14381_v2  ;;  %v4760_v50 = vmul.f32 0.7978846, %v4728_v59  ;;  %v4733_v1 = vadd.f32 %v4701_v57, %v12174_v19  ;;  %v14385_v29 = vld [vmem:[#allocation9_spill] sm:$0xff] }
 0x59b   : > { %4884 = vst.msk [vmem:[#allocation3 + $0x39] sm:$0xff] %vm4352_vm14, %v4850_v26  ;;  %v4734_v5 = vadd.f32 %v4702_v4, %v12178_v15  ;;  %v4761_v33 = vmul.f32 0.7978846, %v4729_v21  ;;  %9220 = vtanh.f32 %v4757_v6  ;;  %v4735_v28 = vadd.f32 %v4703_v35, %v12182_v25 }
 0x59c   : > { %4937 = vst.msk [vmem:[#allocation3 + $0x3a] sm:$0x80] %vm4934_vm2, %v4850_v26  ;;  %v4736_v46 = vadd.f32 %v4704_v11, %v12186_v42  ;;  %v4762_v16 = vmul.f32 0.7978846, %v4730_v9  ;;  %9222 = vtanh.f32 %v4758_v47  ;;  %v4737_v2 = vadd.f32 %v4705_v3, %v12190_v54 }
 0x59d   : > { %4885 = vst.msk [vmem:[#allocation3 + $0x49] sm:$0xff] %vm4352_vm14, %v4851_v7  ;;  %v4738_v45 = vadd.f32 %v4706_v39, %v12194_v12  ;;  %v4763_v44 = vmul.f32 0.7978846, %v4731_v56  ;;  %9224 = vtanh.f32 %v4759_v22  ;;  %v4739_v19 = vadd.f32 %v4707_v49, %v12198_v17  ;;  %v9134_v3 = vld [vmem:[%s14207_s5 + $0x24] ss:$0 sps:$4 sm:$0x33]  }
 0x59e   : > { %4919 = vst.msk [vmem:[#allocation3 + $0x48] sm:$0x1] %vm4915_vm0, %v4851_v7  ;;  %v4740_v15 = vadd.f32 %v4708_v13, %v12202_v60  ;;  %v4764_v57 = vmul.f32 0.7978846, %v4732_v43  ;;  %9226 = vtanh.f32 %v4760_v50  ;;  %v4741_v4 = vadd.f32 %v4709_v30, %v12206_v8  ;;  %8384 = vmatprep.subr.msk.bf16.mxu1 %vm914_vm1, %v9134_v3 }
 0x59f   : > { %v4742_v25 = vadd.f32 %v4710_v55, %v12210_v40  ;;  %v4765_v35 = vmul.f32 0.7978846, %v4733_v1  ;;  %9228 = vtanh.f32 %v4761_v33  ;;  %v4743_v42 = vadd.f32 %v4711_v36, %v12214_v10  ;;  %v14386_v33 = vld [vmem:[#allocation10_spill] sm:$0xff] }
 0x5a0   : > { %v4744_v54 = vadd.f32 %v4712_v58, %v12218_v23  ;;  %v4766_v11 = vmul.f32 0.7978846, %v4734_v5  ;;  %9230 = vtanh.f32 %v4762_v16  ;;  %v4745_v39 = vadd.f32 %v4713_v63, %v12222_v51 }
 0x5a1   : > { %v4746_v49 = vadd.f32 %v4714_v48, %v12226_v27  ;;  %v4767_v13 = vmul.f32 0.7978846, %v4735_v28  ;;  %9232 = vtanh.f32 %v4763_v44  ;;  %v4747_v36 = vadd.f32 %v4715_v24, %v14377_v61 }
 0x5a2   : > { %v9219_v30 = vpop.eup %9218  ;;  %v12459_v59 = vld [vmem:[#allocation3 + $0x38] sm:$0xff]  ;;  %v4768_v58 = vmul.f32 0.7978846, %v4736_v46  ;;  %9234 = vtanh.f32 %v4764_v57  ;;  %v5812_v21 = vsel %vm914_vm1, %v9134_v3, 0  ;;  %v4769_v41 = vmul.f32 0.7978846, %v4737_v2 }
 0x5a3   : > { %v12457_v55 = vld [vmem:[#allocation3 + $0x40] sm:$0xff]  ;;  %v8893_v63 = vpack.i.bf16 %v12459_v59, %v12366_v31  ;;  %v4820_v48 = vadd.f32 1.0, %v9219_v30  ;;  %9236 = vtanh.f32 %v4765_v35  ;;  %8275 = vmatpush3.bf16.msra.mxu1 %v5812_v21  ;;  %v4748_v24 = vadd.f32 %v4716_v0, %v14379_v14  ;;  %v12478_v0 = vld [vmem:[%s14207_s5 + $0x28] sm:$0xff]  }
 0x5a4   : > { %v4770_v6 = vmul.f32 0.7978846, %v4738_v45  ;;  %9238 = vtanh.f32 %v4766_v11  ;;  %v4750_v38 = vadd.f32 %v4718_v53, %v14380_v32  ;;  %v4771_v20 = vmul.f32 0.7978846, %v4739_v19  ;;  %8324 = vmatprep.subr.bf16.mxu0 %v12478_v0  ;;  %v14387_v45 = vld [vmem:[#allocation11_spill] sm:$0xff]  ;;  %v14389_v3 = vld [vmem:[#allocation13_spill] sm:$0xff] }
 0x5a5   : > { %v12464_v18 = vld [vmem:[#allocation3 + $0x48] sm:$0xff]  ;;  %v9221_v34 = vpop.eup %9220  ;;  %8894 = vrot.lane.b32.xlu0 %v8893_v63, %s9351_s10  ;;  %v4852_v47 = vmul.f32 %v4820_v48, %v14385_v29  ;;  %9240 = vtanh.f32 %v4767_v13  ;;  %v4772_v56 = vmul.f32 0.7978846, %v4740_v15  ;;  %v4773_v22 = vmul.f32 0.7978846, %v4741_v4  ;;  %v14390_v21 = vld [vmem:[#allocation14_spill] sm:$0xff] }
 0x5a6   : > { %v8898_v9 = vpack.i.bf16 %v12464_v18, %v12457_v55  ;;  %v9223_v26 = vpop.eup %9222  ;;  %9242 = vtanh.f32 %v4768_v58  ;;  %v4821_v52 = vadd.f32 1.0, %v9221_v34  ;;  %v4774_v53 = vmul.f32 0.7978846, %v4742_v25  ;;  %v14388_v25 = vld [vmem:[#allocation12_spill] sm:$0xff] }
 0x5a7   : > { %v9225_v7 = vpop.eup %9224  ;;  %4886 = vst.msk [vmem:[#allocation3 + $0x51] sm:$0xff] %vm4352_vm14, %v4852_v47  ;;  %v8903_v43 = vpack.i.bf16 %v12457_v55, %v12459_v59  ;;  %9244 = vtanh.f32 %v4769_v41  ;;  %v4822_v50 = vadd.f32 1.0, %v9223_v26  ;;  %v4775_v5 = vmul.f32 0.7978846, %v4743_v42  ;;  %v14392_v26 = vld [vmem:[#allocation16_spill] sm:$0xff] }
 0x5a8   : > { %8899 = vrot.lane.b32.xlu1 %v8898_v9, %s9351_s10  ;;  %4938 = vst.msk [vmem:[#allocation3 + $0x52] sm:$0x80] %vm4934_vm2, %v4852_v47  ;;  %v9227_v1 = vpop.eup %9226  ;;  %9246 = vtanh.f32 %v4770_v6  ;;  %v4853_v28 = vmul.f32 %v4821_v52, %v14386_v33  ;;  %v4823_v46 = vadd.f32 1.0, %v9225_v7  ;;  %v4776_v2 = vmul.f32 0.7978846, %v4744_v54  ;;  %v14391_v9 = vld [vmem:[#allocation15_spill] sm:$0xff] }
 0x5a9   : > { %v9229_v16 = vpop.eup %9228  ;;  %8904 = vrot.lane.b32.xlu0 %v8903_v43, %s9350_s25  ;;  %9248 = vtanh.f32 %v4771_v20  ;;  %v4854_v44 = vmul.f32 %v4822_v50, %v14387_v45  ;;  %v4824_v19 = vadd.f32 1.0, %v9227_v1  ;;  %v4777_v57 = vmul.f32 0.7978846, %v4745_v39  ;;  %v14393_v43 = vld [vmem:[#allocation17_spill] sm:$0xff]  ;;  %v14394_v1 = vld [vmem:[#allocation18_spill] sm:$0xff] }
 0x5aa   : > { %v9231_v15 = vpop.eup %9230  ;;  %9250 = vtanh.f32 %v4772_v56  ;;  %4887 = vst.msk [vmem:[#allocation3 + $0x61] sm:$0xff] %vm4352_vm14, %v4853_v28  ;;  %v4825_v4 = vadd.f32 1.0, %v9229_v16  ;;  %v4855_v35 = vmul.f32 %v4823_v46, %v14388_v25  ;;  %v4778_v11 = vmul.f32 0.7978846, %v4746_v49 }
 0x5ab   : > { %4920 = vst.msk [vmem:[#allocation3 + $0x60] sm:$0x1] %vm4915_vm0, %v4853_v28  ;;  %v9233_v42 = vpop.eup %9232  ;;  %9252 = vtanh.f32 %v4773_v22  ;;  %v4826_v54 = vadd.f32 1.0, %v9231_v15  ;;  %v4856_v13 = vmul.f32 %v4824_v19, %v14389_v3  ;;  %v4779_v39 = vmul.f32 0.7978846, %v4747_v36 }
 0x5ac   : > { %4888 = vst.msk [vmem:[#allocation3 + $0x69] sm:$0xff] %vm4352_vm14, %v4854_v44  ;;  %v9235_v30 = vpop.eup %9234  ;;  %9254 = vtanh.f32 %v4774_v53  ;;  %v4827_v58 = vadd.f32 1.0, %v9233_v42  ;;  %v4857_v63 = vmul.f32 %v4825_v4, %v14390_v21  ;;  %4889 = vst.msk [vmem:[#allocation3 + $0x79] sm:$0xff] %vm4352_vm14, %v4855_v35  ;;  %v4780_v49 = vmul.f32 0.7978846, %v4748_v24 }
 0x5ad   : > { %4939 = vst.msk [vmem:[#allocation3 + $0x6a] sm:$0x80] %vm4934_vm2, %v4854_v44  ;;  %v9237_v48 = vpop.eup %9236  ;;  %9256 = vtanh.f32 %v4775_v5  ;;  %v4828_v41 = vadd.f32 1.0, %v9235_v30  ;;  %v4858_v6 = vmul.f32 %v4826_v54, %v14391_v9  ;;  %4940 = vst.msk [vmem:[#allocation3 + $0x82] sm:$0x80] %vm4934_vm2, %v4856_v13  ;;  %v4610_v28 = vmul.f32 0.5, %v12194_v12 }
 0x5ae   : > { %4921 = vst.msk [vmem:[#allocation3 + $0x78] sm:$0x1] %vm4915_vm0, %v4855_v35  ;;  %v9239_v34 = vpop.eup %9238  ;;  %v12500_v36 = vld [vmem:[#allocation3 + $0x50] sm:$0xff]  ;;  %v4782_v29 = vmul.f32 0.7978846, %v4750_v38  ;;  %9258 = vtanh.f32 %v4776_v2  ;;  %v4829_v47 = vadd.f32 1.0, %v9237_v48  ;;  %v4859_v56 = vmul.f32 %v4827_v58, %v14392_v26 }
 0x5af   : > { %4890 = vst.msk [vmem:[#allocation3 + $0x81] sm:$0xff] %vm4352_vm14, %v4856_v13  ;;  %v12502_v20 = vld [vmem:[#allocation3 + $0x58] sm:$0xff]  ;;  %4891 = vst.msk [vmem:[#allocation3 + $0x91] sm:$0xff] %vm4352_vm14, %v4857_v63  ;;  %v9241_v24 = vpop.eup %9240  ;;  %v8908_v22 = vpack.i.bf16 %v12500_v36, %v12464_v18  ;;  %9260 = vtanh.f32 %v4777_v57  ;;  %v4830_v52 = vadd.f32 1.0, %v9239_v34  ;;  %v4860_v50 = vmul.f32 %v4828_v41, %v14393_v43  ;;  %v14395_v2 = vld [vmem:[#allocation19_spill] sm:$0xff] }
 0x5b0   : > { %4922 = vst.msk [vmem:[#allocation3 + $0x90] sm:$0x1] %vm4915_vm0, %v4857_v63  ;;  %v8913_v7 = vpack.i.bf16 %v12502_v20, %v12500_v36  ;;  %v9243_v38 = vpop.eup %9242  ;;  %9262 = vtanh.f32 %v4778_v11  ;;  %v4831_v53 = vadd.f32 1.0, %v9241_v24  ;;  %v4861_v5 = vmul.f32 %v4829_v47, %v14394_v1  ;;  %4923 = vst.msk [vmem:[#allocation3 + $0xa8] sm:$0x1] %vm4915_vm0, %v4859_v56  ;;  %v14396_v57 = vld [vmem:[#allocation24_spill] sm:$0xff] }
 0x5b1   : > { %4892 = vst.msk [vmem:[#allocation3 + $0x99] sm:$0xff] %vm4352_vm14, %v4858_v6  ;;  %4893 = vst.msk [vmem:[#allocation3 + $0xa9] sm:$0xff] %vm4352_vm14, %v4859_v56  ;;  %v9245_v33 = vpop.eup %9244  ;;  %8909 = vrot.lane.b32.xlu1 %v8908_v22, %s9350_s25  ;;  %9264 = vtanh.f32 %v4779_v39  ;;  %v4832_v16 = vadd.f32 1.0, %v9243_v38  ;;  %v4862_v45 = vmul.f32 %v4830_v52, %v14395_v2  ;;  %v14397_v11 = vld [vmem:[#allocation25_spill] sm:$0xff]  ;;  %v4611_v13 = vmul.f32 0.5, %v12198_v17  ;;  %v14398_v39 = vld [vmem:[#allocation23_spill] sm:$0xff] }
 0x5b2   : > { %4941 = vst.msk [vmem:[#allocation3 + $0x9a] sm:$0x80] %vm4934_vm2, %v4858_v6  ;;  %v12519_v46 = vld [vmem:[#allocation3 + $0x60] sm:$0xff]  ;;  %8914 = vrot.lane.b32.xlu0 %v8913_v7, %s9351_s10  ;;  %v9247_v44 = vpop.eup %9246  ;;  %9266 = vtanh.f32 %v4780_v49  ;;  %v4833_v15 = vadd.f32 1.0, %v9245_v33  ;;  %v4863_v4 = vmul.f32 %v4831_v53, %v14396_v57  ;;  %4942 = vst.msk [vmem:[#allocation3 + $0xb2] sm:$0x80] %vm4934_vm2, %v4860_v50 }
 0x5b3   : > { %v12523_v19 = vld [vmem:[#allocation3 + $0x68] sm:$0xff]  ;;  %4894 = vst.msk [vmem:[#allocation3 + $0xb1] sm:$0xff] %vm4352_vm14, %v4860_v50  ;;  %4895 = vst.msk [vmem:[#allocation3 + $0xc1] sm:$0xff] %vm4352_vm14, %v4861_v5  ;;  %v8923_v12 = vpack.i.bf16 %v12519_v46, %v12502_v20  ;;  %v9249_v25 = vpop.eup %9248  ;;  %9268 = vtanh.f32 %v4782_v29  ;;  %v4834_v42 = vadd.f32 1.0, %v9247_v44  ;;  %v4864_v54 = vmul.f32 %v4832_v16, %v14397_v11 }
 0x5b4   : > { %4924 = vst.msk [vmem:[#allocation3 + $0xc0] sm:$0x1] %vm4915_vm0, %v4861_v5  ;;  %v8918_v35 = vpack.i.bf16 %v12523_v19, %v12519_v46  ;;  %v9251_v3 = vpop.eup %9250  ;;  %v4835_v30 = vadd.f32 1.0, %v9249_v25  ;;  %v4865_v58 = vmul.f32 %v4833_v15, %v14398_v39  ;;  %v12539_v21 = vld [vmem:[#allocation3 + $0x70] sm:$0xff]  ;;  %4925 = vst.msk [vmem:[#allocation3 + $0xd8] sm:$0x1] %vm4915_vm0, %v4863_v4 }
 0x5b5   : > { %4896 = vst.msk [vmem:[#allocation3 + $0xc9] sm:$0xff] %vm4352_vm14, %v4862_v45  ;;  %4897 = vst.msk [vmem:[#allocation3 + $0xd9] sm:$0xff] %vm4352_vm14, %v4863_v4  ;;  %v12543_v63 = vld [vmem:[#allocation3 + $0x78] sm:$0xff]  ;;  %v9253_v48 = vpop.eup %9252  ;;  %v4612_v49 = vmul.f32 0.5, %v12202_v60  ;;  %v4836_v41 = vadd.f32 1.0, %v9251_v3  ;;  %v4866_v9 = vmul.f32 %v4834_v42, %v4610_v28  ;;  %v4613_v6 = vmul.f32 0.5, %v12206_v8 }
 0x5b6   : > { %4943 = vst.msk [vmem:[#allocation3 + $0xca] sm:$0x80] %vm4934_vm2, %v4862_v45  ;;  %8919 = vrot.lane.b32.xlu1 %v8918_v35, %s9351_s10  ;;  %4944 = vst.msk [vmem:[#allocation3 + $0xe2] sm:$0x80] %vm4934_vm2, %v4864_v54  ;;  %8924 = vrot.lane.b32.xlu0 %v8923_v12, %s9350_s25  ;;  %v9255_v17 = vpop.eup %9254  ;;  %v4614_v34 = vmul.f32 0.5, %v12210_v40  ;;  %v4837_v29 = vadd.f32 1.0, %v9253_v48  ;;  %v4867_v47 = vmul.f32 %v4835_v30, %v4611_v13 }
 0x5b7   : > { %4898 = vst.msk [vmem:[#allocation3 + $0xe1] sm:$0xff] %vm4352_vm14, %v4864_v54  ;;  %4899 = vst.msk [vmem:[#allocation3 + $0xf1] sm:$0xff] %vm4352_vm14, %v4865_v58  ;;  %v9257_v60 = vpop.eup %9256  ;;  %v4838_v26 = vadd.f32 1.0, %v9255_v17  ;;  %v4868_v56 = vmul.f32 %v4836_v41, %v4612_v49  ;;  %v8928_v24 = vpack.i.bf16 %v12539_v21, %v12523_v19  ;;  %v8933_v8 = vpack.i.bf16 %v12543_v63, %v12539_v21  ;;  %v12563_v38 = vld [vmem:[#allocation3 + $0x80] sm:$0xff]  ;;  %v12565_v53 = vld [vmem:[#allocation3 + $0x88] sm:$0xff] }
 0x5b8   : > { %4926 = vst.msk [vmem:[#allocation3 + $0xf0] sm:$0x1] %vm4915_vm0, %v4865_v58  ;;  %v9259_v40 = vpop.eup %9258  ;;  %v4615_v22 = vmul.f32 0.5, %v12214_v10  ;;  %v4839_v52 = vadd.f32 1.0, %v9257_v60  ;;  %v4869_v7 = vmul.f32 %v4837_v29, %v4613_v6  ;;  %4927 = vst.msk [vmem:[#allocation3 + $0x108] sm:$0x1] %vm4915_vm0, %v4867_v47  ;;  %v8938_v15 = vpack.i.bf16 %v12565_v53, %v12563_v38 }
 0x5b9   : > { %4900 = vst.msk [vmem:[#allocation3 + $0xf9] sm:$0xff] %vm4352_vm14, %v4866_v9  ;;  %4901 = vst.msk [vmem:[#allocation3 + $0x109] sm:$0xff] %vm4352_vm14, %v4867_v47  ;;  %v9261_v43 = vpop.eup %9260  ;;  %v4616_v50 = vmul.f32 0.5, %v12218_v23  ;;  %v4840_v1 = vadd.f32 1.0, %v9259_v40  ;;  %v4870_v5 = vmul.f32 %v4838_v26, %v4614_v34  ;;  %v4617_v33 = vmul.f32 0.5, %v12222_v51  ;;  %v12585_v25 = vld [vmem:[#allocation3 + $0x90] sm:$0xff] }
 0x5ba   : > { %4945 = vst.msk [vmem:[#allocation3 + $0xfa] sm:$0x80] %vm4934_vm2, %v4866_v9  ;;  %8929 = vrot.lane.b32.xlu1 %v8928_v24, %s9350_s25  ;;  %4946 = vst.msk [vmem:[#allocation3 + $0x112] sm:$0x80] %vm4934_vm2, %v4868_v56  ;;  %8934 = vrot.lane.b32.xlu0 %v8933_v8, %s9351_s10  ;;  %v9263_v10 = vpop.eup %9262  ;;  %v4618_v28 = vmul.f32 0.5, %v12226_v27  ;;  %v4841_v16 = vadd.f32 1.0, %v9261_v43  ;;  %v4871_v2 = vmul.f32 %v4839_v52, %v4615_v22 }
 0x5bb   : > { %4902 = vst.msk [vmem:[#allocation3 + $0x111] sm:$0xff] %vm4352_vm14, %v4868_v56  ;;  %4903 = vst.msk [vmem:[#allocation3 + $0x121] sm:$0xff] %vm4352_vm14, %v4869_v7  ;;  %v9265_v23 = vpop.eup %9264  ;;  %v4842_v45 = vadd.f32 1.0, %v9263_v10  ;;  %v4872_v44 = vmul.f32 %v4840_v1, %v4616_v50  ;;  %v8943_v51 = vpack.i.bf16 %v12563_v38, %v12543_v63  ;;  %v4619_v57 = vmul.f32 0.5, %v14377_v61  ;;  %v12587_v35 = vld [vmem:[#allocation3 + $0x98] sm:$0xff]  ;;  %v12607_v49 = vld [vmem:[#allocation3 + $0xa8] sm:$0xff] }
 0x5bc   : > { %4928 = vst.msk [vmem:[#allocation3 + $0x120] sm:$0x1] %vm4915_vm0, %v4869_v7  ;;  %v9267_v27 = vpop.eup %9266  ;;  %v4843_v4 = vadd.f32 1.0, %v9265_v23  ;;  %v4873_v12 = vmul.f32 %v4841_v16, %v4617_v33  ;;  %4929 = vst.msk [vmem:[#allocation3 + $0x138] sm:$0x1] %vm4915_vm0, %v4871_v2  ;;  %v4620_v11 = vmul.f32 0.5, %v14379_v14  ;;  %v8948_v14 = vpack.i.bf16 %v12585_v25, %v12565_v53 }
 0x5bd   : > { %4904 = vst.msk [vmem:[#allocation3 + $0x129] sm:$0xff] %vm4352_vm14, %v4870_v5  ;;  %4905 = vst.msk [vmem:[#allocation3 + $0x139] sm:$0xff] %vm4352_vm14, %v4871_v2  ;;  %v9269_v42 = vpop.eup %9268  ;;  %v4844_v54 = vadd.f32 1.0, %v9267_v27  ;;  %v4874_v3 = vmul.f32 %v4842_v45, %v4618_v28  ;;  %v4622_v61 = vmul.f32 0.5, %v14380_v32  ;;  %v8953_v58 = vpack.i.bf16 %v12587_v35, %v12585_v25  ;;  %v12605_v32 = vld [vmem:[#allocation3 + $0xa0] sm:$0xff]  ;;  %v12621_v17 = vld [vmem:[#allocation3 + $0xb0] sm:$0xff] }
 0x5be   : > { %4947 = vst.msk [vmem:[#allocation3 + $0x12a] sm:$0x80] %vm4934_vm2, %v4870_v5  ;;  %4948 = vst.msk [vmem:[#allocation3 + $0x142] sm:$0x80] %vm4934_vm2, %v4872_v44  ;;  %8939 = vrot.lane.b32.xlu1 %v8938_v15, %s9351_s10  ;;  %8944 = vrot.lane.b32.xlu0 %v8943_v51, %s9350_s25  ;;  %v4846_v13 = vadd.f32 1.0, %v9269_v42  ;;  %v4875_v30 = vmul.f32 %v4843_v4, %v4619_v57  ;;  %v8958_v41 = vpack.i.bf16 %v12607_v49, %v12605_v32  ;;  %v12623_v6 = vld [vmem:[#allocation3 + $0xb8] sm:$0xff] }
 0x5bf   : > { %4906 = vst.msk [vmem:[#allocation3 + $0x141] sm:$0xff] %vm4352_vm14, %v4872_v44  ;;  %4907 = vst.msk [vmem:[#allocation3 + $0x151] sm:$0xff] %vm4352_vm14, %v4873_v12  ;;  %v4876_v39 = vmul.f32 %v4844_v54, %v4620_v11  ;;  %v8963_v9 = vpack.i.bf16 %v12605_v32, %v12587_v35  ;;  %v8968_v34 = vpack.i.bf16 %v12621_v17, %v12607_v49  ;;  %v12631_v47 = vld [vmem:[#allocation3 + $0xc0] sm:$0xff]  ;;  %v12633_v60 = vld [vmem:[#allocation3 + $0xc8] sm:$0xff] }
 0x5c0   : > { %4930 = vst.msk [vmem:[#allocation3 + $0x150] sm:$0x1] %vm4915_vm0, %v4873_v12  ;;  %v4878_v48 = vmul.f32 %v4846_v13, %v4622_v61  ;;  %4931 = vst.msk [vmem:[#allocation3 + $0x168] sm:$0x1] %vm4915_vm0, %v4875_v30  ;;  %v8973_v29 = vpack.i.bf16 %v12623_v6, %v12621_v17  ;;  %v8978_v26 = vpack.i.bf16 %v12633_v60, %v12631_v47  ;;  %v12641_v24 = vld [vmem:[#allocation3 + $0xd0] sm:$0xff]  ;;  %v12643_v8 = vld [vmem:[#allocation3 + $0xd8] sm:$0xff] }
 0x5c1   : > { %4908 = vst.msk [vmem:[#allocation3 + $0x159] sm:$0xff] %vm4352_vm14, %v4874_v3  ;;  %4909 = vst.msk [vmem:[#allocation3 + $0x169] sm:$0xff] %vm4352_vm14, %v4875_v30  ;;  %v8983_v56 = vpack.i.bf16 %v12631_v47, %v12623_v6  ;;  %v8988_v40 = vpack.i.bf16 %v12641_v24, %v12633_v60  ;;  %v8993_v22 = vpack.i.bf16 %v12643_v8, %v12641_v24  ;;  %v12651_v52 = vld [vmem:[#allocation3 + $0xe0] sm:$0xff]  ;;  %v12653_v7 = vld [vmem:[#allocation3 + $0xe8] sm:$0xff] }
 0x5c2   : > { %4949 = vst.msk [vmem:[#allocation3 + $0x15a] sm:$0x80] %vm4934_vm2, %v4874_v3  ;;  %4950 = vst.msk [vmem:[#allocation3 + $0x172] sm:$0x80] %vm4934_vm2, %v4876_v39  ;;  %8949 = vrot.lane.b32.xlu1 %v8948_v14, %s9350_s25  ;;  %8954 = vrot.lane.b32.xlu0 %v8953_v58, %s9351_s10  ;;  %v8998_v43 = vpack.i.bf16 %v12653_v7, %v12651_v52  ;;  %v9003_v50 = vpack.i.bf16 %v12651_v52, %v12643_v8  ;;  %v12661_v1 = vld [vmem:[#allocation3 + $0xf0] sm:$0xff]  ;;  %v12663_v5 = vld [vmem:[#allocation3 + $0xf8] sm:$0xff] }
 0x5c3   : > { %4910 = vst.msk [vmem:[#allocation3 + $0x171] sm:$0xff] %vm4352_vm14, %v4876_v39  ;;  %4912 = vst.msk [vmem:[#allocation3 + $0x189] sm:$0xff] %vm4352_vm14, %v4878_v48  ;;  %v9008_v10 = vpack.i.bf16 %v12661_v1, %v12653_v7  ;;  %v9013_v33 = vpack.i.bf16 %v12663_v5, %v12661_v1  ;;  %v12671_v28 = vld [vmem:[#allocation3 + $0x100] sm:$0xff]  ;;  %v12673_v16 = vld [vmem:[#allocation3 + $0x108] sm:$0xff] }
 0x5c4   : > { %4914 = vst.msk [vmem:[#allocation3 + $0x1a1] sm:$0xff] %vm4352_vm14, %v4878_v48  ;;  %v9018_v2 = vpack.i.bf16 %v12673_v16, %v12671_v28  ;;  %v9023_v23 = vpack.i.bf16 %v12671_v28, %v12663_v5  ;;  %v12681_v45 = vld [vmem:[#allocation3 + $0x110] sm:$0xff]  ;;  %v12683_v44 = vld [vmem:[#allocation3 + $0x118] sm:$0xff]  ;;  %v12691_v27 = vld [vmem:[#allocation3 + $0x120] sm:$0xff] }
 0x5c5   : > { %4951 = vst.msk [vmem:[#allocation3 + $0x18a] sm:$0x80] %vm4934_vm2, %v4878_v48  ;;  %4952 = vst.msk [vmem:[#allocation3 + $0x1a2] sm:$0x80] %vm4934_vm2, %v4878_v48  ;;  %v9028_v15 = vpack.i.bf16 %v12681_v45, %v12673_v16  ;;  %v9033_v51 = vpack.i.bf16 %v12683_v44, %v12681_v45  ;;  %v12693_v57 = vld [vmem:[#allocation3 + $0x128] sm:$0xff]  ;;  %v9043_v12 = vpack.i.bf16 %v12691_v27, %v12683_v44  ;;  %v12701_v42 = vld [vmem:[#allocation3 + $0x130] sm:$0xff] }
 0x5c6   : > { %8959 = vrot.lane.b32.xlu1 %v8958_v41, %s9351_s10  ;;  %8964 = vrot.lane.b32.xlu0 %v8963_v9, %s9350_s25  ;;  %v9038_v4 = vpack.i.bf16 %v12693_v57, %v12691_v27  ;;  %v12703_v11 = vld [vmem:[#allocation3 + $0x138] sm:$0xff]  ;;  %v9048_v54 = vpack.i.bf16 %v12701_v42, %v12693_v57  ;;  %v12711_v61 = vld [vmem:[#allocation3 + $0x140] sm:$0xff]  ;;  %v12713_v13 = vld [vmem:[#allocation3 + $0x148] sm:$0xff] }
 0x5c7   : > { %v9053_v3 = vpack.i.bf16 %v12703_v11, %v12701_v42  ;;  %v9058_v30 = vpack.i.bf16 %v12713_v13, %v12711_v61  ;;  %v9063_v39 = vpack.i.bf16 %v12711_v61, %v12703_v11  ;;  %v12721_v14 = vld [vmem:[#allocation3 + $0x150] sm:$0xff] }
 0x5c8   : > { %v12723_v58 = vld [vmem:[#allocation3 + $0x158] sm:$0xff]  ;;  %v9068_v48 = vpack.i.bf16 %v12721_v14, %v12713_v13 }
 0x5c9   : > { %v9073_v41 = vpack.i.bf16 %v12723_v58, %v12721_v14  ;;  %v12731_v9 = vld [vmem:[#allocation3 + $0x160] sm:$0xff] }
 0x5ca   : > { %8969 = vrot.lane.b32.xlu1 %v8968_v34, %s9350_s25  ;;  %8974 = vrot.lane.b32.xlu0 %v8973_v29, %s9351_s10  ;;  %v12733_v34 = vld [vmem:[#allocation3 + $0x168] sm:$0xff] }
 0x5cb   : > { %v9078_v29 = vpack.i.bf16 %v12733_v34, %v12731_v9 }
 0x5ce   : > { %8979 = vrot.lane.b32.xlu1 %v8978_v26, %s9351_s10  ;;  %8984 = vrot.lane.b32.xlu0 %v8983_v56, %s9350_s25  ;;  %v9083_v26 = vpack.i.bf16 %v12731_v9, %v12723_v58  ;;  %v12741_v56 = vld [vmem:[#allocation3 + $0x170] sm:$0xff] }
 0x5cf   : > { %14399 = vst [vmem:[#allocation20_spill] sm:$0xff] %v12741_v56 }
 0x5d2   : > { %8989 = vrot.lane.b32.xlu1 %v8988_v40, %s9350_s25  ;;  %8994 = vrot.lane.b32.xlu0 %v8993_v22, %s9351_s10  ;;  %v12743_v40 = vld [vmem:[#allocation3 + $0x178] sm:$0xff]  ;;  %v9088_v22 = vpack.i.bf16 %v12741_v56, %v12733_v34 }
 0x5d3   : > { %14400 = vst [vmem:[#allocation5_spill] sm:$0xff] %v12743_v40 }
 0x5d6   : > { %8999 = vrot.lane.b32.xlu1 %v8998_v43, %s9351_s10  ;;  %9004 = vrot.lane.b32.xlu0 %v9003_v50, %s9350_s25  ;;  %v9093_v43 = vpack.i.bf16 %v12743_v40, %v12741_v56  ;;  %v5020_v50 = vld [vmem:[#allocation3 + $0x180] sm:$0xff] }
 0x5da   : > { %9009 = vrot.lane.b32.xlu1 %v9008_v10, %s9350_s25  ;;  %9014 = vrot.lane.b32.xlu0 %v9013_v33, %s9351_s10  ;;  %v5021_v10 = vld [vmem:[#allocation3 + $0x188] sm:$0xff] }
 0x5db   : > { %v9098_v33 = vpack.i.bf16 %v5021_v10, %v5020_v50 }
 0x5de   : > { %9019 = vrot.lane.b32.xlu1 %v9018_v2, %s9351_s10  ;;  %9024 = vrot.lane.b32.xlu0 %v9023_v23, %s9350_s25  ;;  %v9103_v2 = vpack.i.bf16 %v5020_v50, %v12743_v40  ;;  %v5022_v23 = vld [vmem:[#allocation3 + $0x190] sm:$0xff]  ;;  %v4973_v50 = vld [vmem:[#allocation3 + $0x8] sm:$0xff] }
 0x5e2   : > { %9029 = vrot.lane.b32.xlu1 %v9028_v15, %s9350_s25  ;;  %9034 = vrot.lane.b32.xlu0 %v9033_v51, %s9351_s10  ;;  %v5023_v15 = vld [vmem:[#allocation3 + $0x198] sm:$0xff]  ;;  %v9108_v51 = vpack.i.bf16 %v5022_v23, %v5021_v10 }
 0x5e6   : > { %9039 = vrot.lane.b32.xlu1 %v9038_v4, %s9351_s10  ;;  %9044 = vrot.lane.b32.xlu0 %v9043_v12, %s9350_s25  ;;  %v9113_v4 = vpack.i.bf16 %v5023_v15, %v5022_v23  ;;  %v5024_v12 = vld [vmem:[#allocation3 + $0x1a0] sm:$0xff]  ;;  %v4974_v23 = vld [vmem:[#allocation3 + $0x10] sm:$0xff] }
 0x5ea   : > { %9049 = vrot.lane.b32.xlu1 %v9048_v54, %s9350_s25  ;;  %9054 = vrot.lane.b32.xlu0 %v9053_v3, %s9351_s10  ;;  %v5025_v54 = vld [vmem:[#allocation3 + $0x1a8] sm:$0xff] }
 0x5eb   : > { %v9118_v3 = vpack.i.bf16 %v5025_v54, %v5024_v12 }
 0x5ee   : > { %9059 = vrot.lane.b32.xlu1 %v9058_v30, %s9351_s10  ;;  %9064 = vrot.lane.b32.xlu0 %v9063_v39, %s9350_s25 }
 0x5f2   : > { %9069 = vrot.lane.b32.xlu1 %v9068_v48, %s9350_s25  ;;  %9074 = vrot.lane.b32.xlu0 %v9073_v41, %s9351_s10 }
 0x5f6   : > { %9079 = vrot.lane.b32.xlu1 %v9078_v29, %s9351_s10  ;;  %9084 = vrot.lane.b32.xlu0 %v9083_v26, %s9350_s25 }
 0x5fa   : > { %9089 = vrot.lane.b32.xlu1 %v9088_v22, %s9350_s25  ;;  %9094 = vrot.lane.b32.xlu0 %v9093_v43, %s9351_s10  ;;  %v4972_v43 = vld [vmem:[#allocation3] sm:$0xff] }
 0x5fe   : > { %9099 = vrot.lane.b32.xlu1 %v9098_v33, %s9351_s10  ;;  %9104 = vrot.lane.b32.xlu0 %v9103_v2, %s9350_s25 }
 0x602   : > { %9109 = vrot.lane.b32.xlu1 %v9108_v51, %s9350_s25  ;;  %9114 = vrot.lane.b32.xlu0 %v9113_v4, %s9351_s10  ;;  %s14039_s25 = scalar_lea.vmem %s14210_s8, %s7675_s23 }
 0x604   : > { %v8890_v39 = vpop.permute.xlu1 %8889 }
 0x605   : > { %v8892_v29 = vunpack.i.h.bf16 %v8890_v39  ;;  %v8891_v26 = vunpack.i.l.bf16 %v8890_v39 }
 0x606   : > { %9119 = vrot.lane.b32.xlu1 %v9118_v3, %s9351_s10 }
 0x607   : > { %v5367_v54 = vsel %vm4352_vm14, %v4974_v23, %v8891_v26  ;;  %v5368_v3 = vsel %vm4352_vm14, %v12420_v37, %v8892_v29  ;;  %v9137_v37 = vld [vmem:[%s14207_s5 + $0x38] ss:$0 sps:$4 sm:$0x33]  }
 0x60c   : > { %v8885_v30 = vpop.permute.xlu0 %8884 }
 0x60d   : > { %v8887_v48 = vunpack.i.h.bf16 %v8885_v30  ;;  %v8886_v41 = vunpack.i.l.bf16 %v8885_v30 }
 0x60f   : > { %v5365_v15 = vsel %vm4352_vm14, %v4972_v43, %v8886_v41  ;;  %v5366_v51 = vsel %vm4352_vm14, %v4973_v50, %v8887_v48  ;;  %v9136_v48 = vld [vmem:[%s14207_s5 + $0x30] sm:$0xff]  }
 0x617   : > { %v8895_v22 = vpop.permute.xlu0 %8894 }
 0x618   : > { %v8897_v33 = vunpack.i.h.bf16 %v8895_v22  ;;  %v8896_v2 = vunpack.i.l.bf16 %v8895_v22 }
 0x61a   : > { %v8900_v10 = vpop.permute.xlu1 %8899  ;;  %v5413_v30 = vsel %vm3161_vm13, %v5365_v15, %v8896_v2  ;;  %v5414_v39 = vsel %vm3161_vm13, %v5366_v51, %v8897_v33  ;;  %v6253_v2 = vsel %vm914_vm1, %v9137_v37, 0  ;;  %v14401_v51 = vld [vmem:[#allocation26_spill] sm:$0xff] }
 0x61b   : > { %v8902_v4 = vunpack.i.h.bf16 %v8900_v10  ;;  %v8901_v12 = vunpack.i.l.bf16 %v8900_v10  ;;  %v12768_v40 = vpack.c.bf16 %v5414_v39, %v5413_v30  ;;  %v8905_v26 = vpop.permute.xlu0 %8904 }
 0x61c   : > { %v8906_v29 = vunpack.i.l.bf16 %v8905_v26 }
 0x61d   : > { %v5415_v56 = vsel %vm3161_vm13, %v5367_v54, %v8901_v12  ;;  %v5416_v22 = vsel %vm3161_vm13, %v5368_v3, %v8902_v4  ;;  %8222 = vmatprep.mubr.msk.bf16.mxu0 %vm5505_vm3, %v12768_v40  ;;  %8276 = vmatprep.mubr.msk.bf16.mxu1 %vm5505_vm3, %v12768_v40 }
 0x61e   : > { %v12770_v41 = vpack.c.bf16 %v5416_v22, %v5415_v56  ;;  %v8907_v56 = vunpack.i.h.bf16 %v8905_v26  ;;  %v5369_v4 = vsel %vm4352_vm14, %v12422_v62, %v8906_v29 }
 0x620   : > { %8223 = vmatmul.mubr.msk.bf16.vlgmr.msra.gmra.mrb[120].mxu0 %vm5505_vm3, %v12770_v41  ;;  %8277 = vmatmul.mubr.msk.bf16.vlgmr.msra.gmra.mrb[168].mxu1 %vm5505_vm3, %v12770_v41 }
 0x621   : > { %8325 = vmatpush3.bf16.msra.mxu0 %v12478_v0  ;;  %v5370_v0 = vsel %vm4352_vm14, %v14401_v51, %v8907_v56 }
 0x622   : > { %8326 = vmatprep.subr.bf16.mxu0 %v9136_v48 }
 0x623   : > { %v8910_v43 = vpop.permute.xlu1 %8909 }
 0x624   : > { %v8915_v50 = vpop.permute.xlu0 %8914  ;;  %v8912_v23 = vunpack.i.h.bf16 %v8910_v43  ;;  %v8911_v15 = vunpack.i.l.bf16 %v8910_v43 }
 0x625   : > { %8327 = vmatpush3.bf16.msra.mxu0 %v9136_v48  ;;  %v8917_v10 = vunpack.i.h.bf16 %v8915_v50  ;;  %v8916_v33 = vunpack.i.l.bf16 %v8915_v50 }
 0x626   : > { %8385 = vmatprep.subr.msk.bf16.mxu0 %vm914_vm1, %v9137_v37  ;;  %v5372_v26 = vsel %vm4352_vm14, %v12459_v59, %v8912_v23  ;;  %v5371_v37 = vsel %vm4352_vm14, %v12366_v31, %v8911_v15 }
 0x627   : > { %v5417_v12 = vsel %vm3161_vm13, %v5369_v4, %v8916_v33  ;;  %v5418_v54 = vsel %vm3161_vm13, %v5370_v0, %v8917_v10 }
 0x628   : > { %v8920_v3 = vpop.permute.xlu1 %8919  ;;  %v12795_v30 = vpack.c.bf16 %v5418_v54, %v5417_v12  ;;  %v8925_v39 = vpop.permute.xlu0 %8924 }
 0x629   : > { %8329 = vmatpush3.bf16.msra.mxu0 %v6253_v2  ;;  %v8922_v22 = vunpack.i.h.bf16 %v8920_v3  ;;  %v8921_v48 = vunpack.i.l.bf16 %v8920_v3  ;;  %v8927_v56 = vunpack.i.h.bf16 %v8925_v39  ;;  %v8926_v43 = vunpack.i.l.bf16 %v8925_v39 }
 0x62a   : > { %8226 = vmatprep.mubr.msk.bf16.mxu0 %vm5505_vm3, %v12795_v30  ;;  %8280 = vmatprep.mubr.msk.bf16.mxu1 %vm5505_vm3, %v12795_v30 }
 0x62b   : > { %v5419_v62 = vsel %vm3161_vm13, %v5371_v37, %v8921_v48  ;;  %v5420_v29 = vsel %vm3161_vm13, %v5372_v26, %v8922_v22  ;;  %v5374_v15 = vsel %vm4352_vm14, %v12464_v18, %v8927_v56  ;;  %v5373_v51 = vsel %vm4352_vm14, %v12457_v55, %v8926_v43 }
 0x62c   : > { %v12807_v50 = vpack.c.bf16 %v5420_v29, %v5419_v62  ;;  %v8930_v10 = vpop.permute.xlu1 %8929  ;;  %v8935_v33 = vpop.permute.xlu0 %8934 }
 0x62d   : > { %v8937_v59 = vunpack.i.h.bf16 %v8935_v33  ;;  %v8936_v2 = vunpack.i.l.bf16 %v8935_v33  ;;  %v8932_v23 = vunpack.i.h.bf16 %v8930_v10  ;;  %v8931_v31 = vunpack.i.l.bf16 %v8930_v10 }
 0x62e   : > { %8227 = vmatmul.mubr.msk.bf16.gmra.mrb[124].mxu0 %vm5505_vm3, %v12807_v50  ;;  %8281 = vmatmul.mubr.msk.bf16.gmra.mrb[172].mxu1 %vm5505_vm3, %v12807_v50 }
 0x62f   : > { %v5421_v0 = vsel %vm3161_vm13, %v5373_v51, %v8936_v2  ;;  %v5422_v4 = vsel %vm3161_vm13, %v5374_v15, %v8937_v59  ;;  %v5376_v18 = vsel %vm4352_vm14, %v12502_v20, %v8932_v23  ;;  %v5375_v55 = vsel %vm4352_vm14, %v12500_v36, %v8931_v31 }
 0x630   : > { %v8940_v12 = vpop.permute.xlu1 %8939  ;;  %v12819_v54 = vpack.c.bf16 %v5422_v4, %v5421_v0  ;;  %v8945_v3 = vpop.permute.xlu0 %8944 }
 0x631   : > { %v8942_v39 = vunpack.i.h.bf16 %v8940_v12  ;;  %v8941_v22 = vunpack.i.l.bf16 %v8940_v12  ;;  %v8947_v48 = vunpack.i.h.bf16 %v8945_v3  ;;  %v8946_v26 = vunpack.i.l.bf16 %v8945_v3 }
 0x632   : > { %8230 = vmatprep.mubr.msk.bf16.mxu0 %vm5505_vm3, %v12819_v54  ;;  %8284 = vmatprep.mubr.msk.bf16.mxu1 %vm5505_vm3, %v12819_v54 }
 0x633   : > { %v5423_v37 = vsel %vm3161_vm13, %v5375_v55, %v8941_v22  ;;  %v5424_v56 = vsel %vm3161_vm13, %v5376_v18, %v8942_v39  ;;  %v5378_v59 = vsel %vm4352_vm14, %v12523_v19, %v8947_v48  ;;  %v5377_v2 = vsel %vm4352_vm14, %v12519_v46, %v8946_v26 }
 0x634   : > { %v12831_v43 = vpack.c.bf16 %v5424_v56, %v5423_v37  ;;  %v8950_v62 = vpop.permute.xlu1 %8949  ;;  %v8955_v29 = vpop.permute.xlu0 %8954 }
 0x635   : > { %v8957_v20 = vunpack.i.h.bf16 %v8955_v29  ;;  %v8956_v10 = vunpack.i.l.bf16 %v8955_v29  ;;  %v8952_v33 = vunpack.i.h.bf16 %v8950_v62  ;;  %v8951_v36 = vunpack.i.l.bf16 %v8950_v62 }
 0x636   : > { %8231 = vmatmul.mubr.msk.bf16.gmra.mrb[128].mxu0 %vm5505_vm3, %v12831_v43  ;;  %8285 = vmatmul.mubr.msk.bf16.gmra.mrb[176].mxu1 %vm5505_vm3, %v12831_v43 }
 0x637   : > { %v5425_v23 = vsel %vm3161_vm13, %v5377_v2, %v8956_v10  ;;  %v5426_v31 = vsel %vm3161_vm13, %v5378_v59, %v8957_v20  ;;  %v5380_v19 = vsel %vm4352_vm14, %v12543_v63, %v8952_v33  ;;  %v5379_v46 = vsel %vm4352_vm14, %v12539_v21, %v8951_v36 }
 0x638   : > { %v8960_v15 = vpop.permute.xlu1 %8959  ;;  %v12843_v51 = vpack.c.bf16 %v5426_v31, %v5425_v23  ;;  %v8965_v0 = vpop.permute.xlu0 %8964 }
 0x639   : > { %v8962_v4 = vunpack.i.h.bf16 %v8960_v15  ;;  %v8961_v12 = vunpack.i.l.bf16 %v8960_v15  ;;  %v8967_v3 = vunpack.i.h.bf16 %v8965_v0  ;;  %v8966_v39 = vunpack.i.l.bf16 %v8965_v0 }
 0x63a   : > { %8234 = vmatprep.mubr.msk.bf16.mxu0 %vm5505_vm3, %v12843_v51  ;;  %8288 = vmatprep.mubr.msk.bf16.mxu1 %vm5505_vm3, %v12843_v51 }
 0x63b   : > { %v5427_v22 = vsel %vm3161_vm13, %v5379_v46, %v8961_v12  ;;  %v5428_v18 = vsel %vm3161_vm13, %v5380_v19, %v8962_v4  ;;  %v5382_v62 = vsel %vm4352_vm14, %v12565_v53, %v8967_v3  ;;  %v5381_v29 = vsel %vm4352_vm14, %v12563_v38, %v8966_v39 }
 0x63c   : > { %v12855_v55 = vpack.c.bf16 %v5428_v18, %v5427_v22  ;;  %v8970_v48 = vpop.permute.xlu1 %8969  ;;  %v8975_v26 = vpop.permute.xlu0 %8974 }
 0x63d   : > { %v8977_v63 = vunpack.i.h.bf16 %v8975_v26  ;;  %v8976_v37 = vunpack.i.l.bf16 %v8975_v26  ;;  %v8972_v56 = vunpack.i.h.bf16 %v8970_v48  ;;  %v8971_v21 = vunpack.i.l.bf16 %v8970_v48 }
 0x63e   : > { %8235 = vmatmul.mubr.msk.bf16.gmra.mrb[132].mxu0 %vm5505_vm3, %v12855_v55  ;;  %8289 = vmatmul.mubr.msk.bf16.gmra.mrb[180].mxu1 %vm5505_vm3, %v12855_v55 }
 0x63f   : > { %v5429_v20 = vsel %vm3161_vm13, %v5381_v29, %v8976_v37  ;;  %v5430_v10 = vsel %vm3161_vm13, %v5382_v62, %v8977_v63  ;;  %v5384_v53 = vsel %vm4352_vm14, %v12587_v35, %v8972_v56  ;;  %v5383_v38 = vsel %vm4352_vm14, %v12585_v25, %v8971_v21 }
 0x640   : > { %v8980_v33 = vpop.permute.xlu1 %8979  ;;  %v12867_v36 = vpack.c.bf16 %v5430_v10, %v5429_v20  ;;  %v8985_v59 = vpop.permute.xlu0 %8984 }
 0x641   : > { %v8982_v2 = vunpack.i.h.bf16 %v8980_v33  ;;  %v8981_v23 = vunpack.i.l.bf16 %v8980_v33  ;;  %v8987_v31 = vunpack.i.h.bf16 %v8985_v59  ;;  %v8986_v15 = vunpack.i.l.bf16 %v8985_v59 }
 0x642   : > { %8238 = vmatprep.mubr.msk.bf16.mxu0 %vm5505_vm3, %v12867_v36  ;;  %8292 = vmatprep.mubr.msk.bf16.mxu1 %vm5505_vm3, %v12867_v36 }
 0x643   : > { %v5431_v0 = vsel %vm3161_vm13, %v5383_v38, %v8981_v23  ;;  %v5432_v4 = vsel %vm3161_vm13, %v5384_v53, %v8982_v2  ;;  %v5386_v22 = vsel %vm4352_vm14, %v12607_v49, %v8987_v31  ;;  %v5385_v18 = vsel %vm4352_vm14, %v12605_v32, %v8986_v15 }
 0x644   : > { %v12879_v12 = vpack.c.bf16 %v5432_v4, %v5431_v0  ;;  %v8990_v19 = vpop.permute.xlu1 %8989  ;;  %v8995_v46 = vpop.permute.xlu0 %8994 }
 0x645   : > { %v8997_v35 = vunpack.i.h.bf16 %v8995_v46  ;;  %v8996_v3 = vunpack.i.l.bf16 %v8995_v46  ;;  %v8992_v39 = vunpack.i.h.bf16 %v8990_v19  ;;  %v8991_v25 = vunpack.i.l.bf16 %v8990_v19 }
 0x646   : > { %8239 = vmatmul.mubr.msk.bf16.gmra.mrb[136].mxu0 %vm5505_vm3, %v12879_v12  ;;  %8293 = vmatmul.mubr.msk.bf16.gmra.mrb[184].mxu1 %vm5505_vm3, %v12879_v12 }
 0x647   : > { %v5433_v48 = vsel %vm3161_vm13, %v5385_v18, %v8996_v3  ;;  %v5434_v26 = vsel %vm3161_vm13, %v5386_v22, %v8997_v35  ;;  %v5388_v49 = vsel %vm4352_vm14, %v12623_v6, %v8992_v39  ;;  %v5387_v32 = vsel %vm4352_vm14, %v12621_v17, %v8991_v25 }
 0x648   : > { %v9000_v63 = vpop.permute.xlu1 %8999  ;;  %v12891_v37 = vpack.c.bf16 %v5434_v26, %v5433_v48  ;;  %v9005_v56 = vpop.permute.xlu0 %9004 }
 0x649   : > { %v9002_v21 = vunpack.i.h.bf16 %v9000_v63  ;;  %v9001_v62 = vunpack.i.l.bf16 %v9000_v63  ;;  %v9007_v29 = vunpack.i.h.bf16 %v9005_v56  ;;  %v9006_v20 = vunpack.i.l.bf16 %v9005_v56 }
 0x64a   : > { %8242 = vmatprep.mubr.msk.bf16.mxu0 %vm5505_vm3, %v12891_v37  ;;  %8296 = vmatprep.mubr.msk.bf16.mxu1 %vm5505_vm3, %v12891_v37 }
 0x64b   : > { %v5435_v10 = vsel %vm3161_vm13, %v5387_v32, %v9001_v62  ;;  %v5436_v33 = vsel %vm3161_vm13, %v5388_v49, %v9002_v21  ;;  %v5390_v31 = vsel %vm4352_vm14, %v12633_v60, %v9007_v29  ;;  %v5389_v15 = vsel %vm4352_vm14, %v12631_v47, %v9006_v20 }
 0x64c   : > { %v12903_v59 = vpack.c.bf16 %v5436_v33, %v5435_v10  ;;  %v9010_v2 = vpop.permute.xlu1 %9009  ;;  %v9015_v23 = vpop.permute.xlu0 %9014 }
 0x64d   : > { %v9017_v6 = vunpack.i.h.bf16 %v9015_v23  ;;  %v9016_v53 = vunpack.i.l.bf16 %v9015_v23  ;;  %v9012_v38 = vunpack.i.h.bf16 %v9010_v2  ;;  %v9011_v17 = vunpack.i.l.bf16 %v9010_v2 }
 0x64e   : > { %8243 = vmatmul.mubr.msk.bf16.gmra.mrb[140].mxu0 %vm5505_vm3, %v12903_v59  ;;  %8297 = vmatmul.mubr.msk.bf16.gmra.mrb[188].mxu1 %vm5505_vm3, %v12903_v59 }
 0x64f   : > { %v5437_v0 = vsel %vm3161_vm13, %v5389_v15, %v9016_v53  ;;  %v5438_v4 = vsel %vm3161_vm13, %v5390_v31, %v9017_v6  ;;  %v5392_v60 = vsel %vm4352_vm14, %v12643_v8, %v9012_v38  ;;  %v5391_v47 = vsel %vm4352_vm14, %v12641_v24, %v9011_v17 }
 0x650   : > { %v9020_v19 = vpop.permute.xlu1 %9019  ;;  %v12915_v46 = vpack.c.bf16 %v5438_v4, %v5437_v0  ;;  %v9025_v35 = vpop.permute.xlu0 %9024 }
 0x651   : > { %v9022_v3 = vunpack.i.h.bf16 %v9020_v19  ;;  %v9021_v39 = vunpack.i.l.bf16 %v9020_v19  ;;  %v9027_v25 = vunpack.i.h.bf16 %v9025_v35  ;;  %v9026_v22 = vunpack.i.l.bf16 %v9025_v35 }
 0x652   : > { %8246 = vmatprep.mubr.msk.bf16.mxu0 %vm5505_vm3, %v12915_v46  ;;  %8300 = vmatprep.mubr.msk.bf16.mxu1 %vm5505_vm3, %v12915_v46 }
 0x653   : > { %v5439_v18 = vsel %vm3161_vm13, %v5391_v47, %v9021_v39  ;;  %v5440_v48 = vsel %vm3161_vm13, %v5392_v60, %v9022_v3  ;;  %v5394_v49 = vsel %vm4352_vm14, %v12653_v7, %v9027_v25  ;;  %v5393_v32 = vsel %vm4352_vm14, %v12651_v52, %v9026_v22 }
 0x654   : > { %v12927_v26 = vpack.c.bf16 %v5440_v48, %v5439_v18  ;;  %v9030_v63 = vpop.permute.xlu1 %9029  ;;  %v9035_v56 = vpop.permute.xlu0 %9034 }
 0x655   : > { %v9037_v8 = vunpack.i.h.bf16 %v9035_v56  ;;  %v9036_v21 = vunpack.i.l.bf16 %v9035_v56  ;;  %v9032_v62 = vunpack.i.h.bf16 %v9030_v63  ;;  %v9031_v24 = vunpack.i.l.bf16 %v9030_v63 }
 0x656   : > { %8247 = vmatmul.mubr.msk.bf16.gmra.mrb[144].mxu0 %vm5505_vm3, %v12927_v26  ;;  %8301 = vmatmul.mubr.msk.bf16.gmra.mrb[192].mxu1 %vm5505_vm3, %v12927_v26 }
 0x657   : > { %v5441_v29 = vsel %vm3161_vm13, %v5393_v32, %v9036_v21  ;;  %v5442_v20 = vsel %vm3161_vm13, %v5394_v49, %v9037_v8  ;;  %v5396_v7 = vsel %vm4352_vm14, %v12663_v5, %v9032_v62  ;;  %v5395_v52 = vsel %vm4352_vm14, %v12661_v1, %v9031_v24 }
 0x658   : > { %v9040_v10 = vpop.permute.xlu1 %9039  ;;  %v12939_v33 = vpack.c.bf16 %v5442_v20, %v5441_v29  ;;  %v9045_v2 = vpop.permute.xlu0 %9044 }
 0x659   : > { %v9042_v23 = vunpack.i.h.bf16 %v9040_v10  ;;  %v9041_v6 = vunpack.i.l.bf16 %v9040_v10  ;;  %v9047_v53 = vunpack.i.h.bf16 %v9045_v2  ;;  %v9046_v38 = vunpack.i.l.bf16 %v9045_v2 }
 0x65a   : > { %8250 = vmatprep.mubr.msk.bf16.mxu0 %vm5505_vm3, %v12939_v33  ;;  %8304 = vmatprep.mubr.msk.bf16.mxu1 %vm5505_vm3, %v12939_v33 }
 0x65b   : > { %v5443_v17 = vsel %vm3161_vm13, %v5395_v52, %v9041_v6  ;;  %v5444_v31 = vsel %vm3161_vm13, %v5396_v7, %v9042_v23  ;;  %v5398_v3 = vsel %vm4352_vm14, %v12673_v16, %v9047_v53  ;;  %v5397_v39 = vsel %vm4352_vm14, %v12671_v28, %v9046_v38 }
 0x65c   : > { %v12951_v15 = vpack.c.bf16 %v5444_v31, %v5443_v17  ;;  %v9050_v0 = vpop.permute.xlu1 %9049  ;;  %v9055_v4 = vpop.permute.xlu0 %9054 }
 0x65d   : > { %v9057_v5 = vunpack.i.h.bf16 %v9055_v4  ;;  %v9056_v19 = vunpack.i.l.bf16 %v9055_v4  ;;  %v9052_v35 = vunpack.i.h.bf16 %v9050_v0  ;;  %v9051_v1 = vunpack.i.l.bf16 %v9050_v0 }
 0x65e   : > { %8251 = vmatmul.mubr.msk.bf16.gmra.mrb[148].mxu0 %vm5505_vm3, %v12951_v15  ;;  %8305 = vmatmul.mubr.msk.bf16.gmra.mrb[196].mxu1 %vm5505_vm3, %v12951_v15 }
 0x65f   : > { %v5445_v60 = vsel %vm3161_vm13, %v5397_v39, %v9056_v19  ;;  %v5446_v47 = vsel %vm3161_vm13, %v5398_v3, %v9057_v5  ;;  %v5400_v16 = vsel %vm4352_vm14, %v12683_v44, %v9052_v35  ;;  %v5399_v28 = vsel %vm4352_vm14, %v12681_v45, %v9051_v1 }
 0x660   : > { %v9060_v25 = vpop.permute.xlu1 %9059  ;;  %v12963_v22 = vpack.c.bf16 %v5446_v47, %v5445_v60  ;;  %v9065_v18 = vpop.permute.xlu0 %9064 }
 0x661   : > { %v9062_v48 = vunpack.i.h.bf16 %v9060_v25  ;;  %v9061_v63 = vunpack.i.l.bf16 %v9060_v25  ;;  %v9067_v56 = vunpack.i.h.bf16 %v9065_v18  ;;  %v9066_v8 = vunpack.i.l.bf16 %v9065_v18 }
 0x662   : > { %8254 = vmatprep.mubr.msk.bf16.mxu0 %vm5505_vm3, %v12963_v22  ;;  %8308 = vmatprep.mubr.msk.bf16.mxu1 %vm5505_vm3, %v12963_v22 }
 0x663   : > { %v5447_v21 = vsel %vm3161_vm13, %v5399_v28, %v9061_v63  ;;  %v5448_v62 = vsel %vm3161_vm13, %v5400_v16, %v9062_v48  ;;  %v5402_v10 = vsel %vm4352_vm14, %v12693_v57, %v9067_v56  ;;  %v5401_v2 = vsel %vm4352_vm14, %v12691_v27, %v9066_v8 }
 0x664   : > { %v12975_v24 = vpack.c.bf16 %v5448_v62, %v5447_v21  ;;  %v9070_v49 = vpop.permute.xlu1 %9069  ;;  %v9075_v32 = vpop.permute.xlu0 %9074 }
 0x665   : > { %v9077_v44 = vunpack.i.h.bf16 %v9075_v32  ;;  %v9076_v29 = vunpack.i.l.bf16 %v9075_v32  ;;  %v9072_v20 = vunpack.i.h.bf16 %v9070_v49  ;;  %v9071_v45 = vunpack.i.l.bf16 %v9070_v49 }
 0x666   : > { %8255 = vmatmul.mubr.msk.bf16.gmra.mrb[152].mxu0 %vm5505_vm3, %v12975_v24  ;;  %8309 = vmatmul.mubr.msk.bf16.gmra.mrb[200].mxu1 %vm5505_vm3, %v12975_v24 }
 0x667   : > { %v5449_v23 = vsel %vm3161_vm13, %v5401_v2, %v9076_v29  ;;  %v5450_v6 = vsel %vm3161_vm13, %v5402_v10, %v9077_v44  ;;  %v5404_v57 = vsel %vm4352_vm14, %v12703_v11, %v9072_v20  ;;  %v5403_v27 = vsel %vm4352_vm14, %v12701_v42, %v9071_v45 }
 0x668   : > { %v9080_v7 = vpop.permute.xlu1 %9079  ;;  %v12987_v52 = vpack.c.bf16 %v5450_v6, %v5449_v23  ;;  %v9085_v53 = vpop.permute.xlu0 %9084 }
 0x669   : > { %v9082_v38 = vunpack.i.h.bf16 %v9080_v7  ;;  %v9081_v17 = vunpack.i.l.bf16 %v9080_v7  ;;  %v9087_v31 = vunpack.i.h.bf16 %v9085_v53  ;;  %v9086_v0 = vunpack.i.l.bf16 %v9085_v53 }
 0x66a   : > { %8258 = vmatprep.mubr.msk.bf16.mxu0 %vm5505_vm3, %v12987_v52  ;;  %8312 = vmatprep.mubr.msk.bf16.mxu1 %vm5505_vm3, %v12987_v52 }
 0x66b   : > { %v5451_v4 = vsel %vm3161_vm13, %v5403_v27, %v9081_v17  ;;  %v5452_v5 = vsel %vm3161_vm13, %v5404_v57, %v9082_v38  ;;  %v5406_v60 = vsel %vm4352_vm14, %v12713_v13, %v9087_v31  ;;  %v5405_v47 = vsel %vm4352_vm14, %v12711_v61, %v9086_v0  ;;  %v14402_v57 = vld [vmem:[#allocation5_spill] sm:$0xff]  ;;  %v14403_v31 = vld [vmem:[#allocation20_spill] sm:$0xff] }
 0x66c   : > { %v12999_v19 = vpack.c.bf16 %v5452_v5, %v5451_v4  ;;  %v9090_v35 = vpop.permute.xlu1 %9089  ;;  %v9095_v1 = vpop.permute.xlu0 %9094 }
 0x66d   : > { %v9097_v11 = vunpack.i.h.bf16 %v9095_v1  ;;  %v9096_v3 = vunpack.i.l.bf16 %v9095_v1  ;;  %v9092_v39 = vunpack.i.h.bf16 %v9090_v35  ;;  %v9091_v42 = vunpack.i.l.bf16 %v9090_v35 }
 0x66e   : > { %8259 = vmatmul.mubr.msk.bf16.gmra.mrb[156].mxu0 %vm5505_vm3, %v12999_v19  ;;  %8313 = vmatmul.mubr.msk.bf16.gmra.mrb[204].mxu1 %vm5505_vm3, %v12999_v19 }
 0x66f   : > { %v5453_v25 = vsel %vm3161_vm13, %v5405_v47, %v9096_v3  ;;  %v5454_v18 = vsel %vm3161_vm13, %v5406_v60, %v9097_v11  ;;  %v5408_v13 = vsel %vm4352_vm14, %v12723_v58, %v9092_v39  ;;  %v5407_v61 = vsel %vm4352_vm14, %v12721_v14, %v9091_v42 }
 0x670   : > { %v9100_v48 = vpop.permute.xlu1 %9099  ;;  %v5481_v63 = vpack.c.bf16 %v5454_v18, %v5453_v25  ;;  %v9105_v16 = vpop.permute.xlu0 %9104 }
 0x671   : > { %v9102_v28 = vunpack.i.h.bf16 %v9100_v48  ;;  %v9101_v56 = vunpack.i.l.bf16 %v9100_v48  ;;  %v9107_v8 = vunpack.i.h.bf16 %v9105_v16  ;;  %v9106_v21 = vunpack.i.l.bf16 %v9105_v16 }
 0x672   : > { %8262 = vmatprep.mubr.msk.bf16.mxu0 %vm5505_vm3, %v5481_v63  ;;  %8316 = vmatprep.mubr.msk.bf16.mxu1 %vm5505_vm3, %v5481_v63 }
 0x673   : > { %v5455_v62 = vsel %vm3161_vm13, %v5407_v61, %v9101_v56  ;;  %v5456_v49 = vsel %vm3161_vm13, %v5408_v13, %v9102_v28  ;;  %v5410_v14 = vsel %vm4352_vm14, %v12733_v34, %v9107_v8  ;;  %v5409_v2 = vsel %vm4352_vm14, %v12731_v9, %v9106_v21 }
 0x674   : > { %v5482_v32 = vpack.c.bf16 %v5456_v49, %v5455_v62  ;;  %v9110_v44 = vpop.permute.xlu1 %9109  ;;  %v9115_v29 = vpop.permute.xlu0 %9114 }
 0x675   : > { %v9117_v20 = vunpack.i.h.bf16 %v9115_v29  ;;  %v9116_v45 = vunpack.i.l.bf16 %v9115_v29  ;;  %v9112_v10 = vunpack.i.h.bf16 %v9110_v44  ;;  %v9111_v58 = vunpack.i.l.bf16 %v9110_v44 }
 0x676   : > { %8263 = vmatmul.mubr.msk.bf16.gmra.mrb[160].mxu0 %vm5505_vm3, %v5482_v32  ;;  %8317 = vmatmul.mubr.msk.bf16.gmra.mrb[208].mxu1 %vm5505_vm3, %v5482_v32 }
 0x677   : > { %v5457_v23 = vsel %vm3161_vm13, %v5409_v2, %v9116_v45  ;;  %v5458_v6 = vsel %vm3161_vm13, %v5410_v14, %v9117_v20  ;;  %v5412_v27 = vsel %vm4352_vm14, %v14402_v57, %v9112_v10  ;;  %v5411_v34 = vsel %vm4352_vm14, %v14403_v31, %v9111_v58 }
 0x678   : > { %v9120_v7 = vpop.permute.xlu1 %9119  ;;  %v5483_v53 = vpack.c.bf16 %v5458_v6, %v5457_v23 }
 0x679   : > { %v9122_v38 = vunpack.i.h.bf16 %v9120_v7  ;;  %v9121_v17 = vunpack.i.l.bf16 %v9120_v7 }
 0x67a   : > { %8266 = vmatprep.mubr.msk.bf16.mxu0 %vm5505_vm3, %v5483_v53  ;;  %8320 = vmatprep.mubr.msk.bf16.mxu1 %vm5505_vm3, %v5483_v53 }
 0x67b   : > { %v5459_v9 = vsel %vm3161_vm13, %v5411_v34, %v9121_v17  ;;  %v5460_v0 = vsel %vm3161_vm13, %v5412_v27, %v9122_v38 }
 0x67c   : > { %v5484_v4 = vpack.c.bf16 %v5460_v0, %v5459_v9 }
 0x67e   : > { %8267 = vmatmul.mubr.msk.bf16.gmra.mrb[164].mxu0 %vm5505_vm3, %v5484_v4  ;;  %8321 = vmatmul.mubr.msk.bf16.gmra.mrb[212].mxu1 %vm5505_vm3, %v5484_v4 }
 0x67f   : > { %8330 = vmatprep.mubr.msk.bf16.mxu0 %vm5505_vm3, %v12768_v40 }
 0x686   : > { %8331 = vmatmul.mubr.msk.bf16.vlgmr.msra.gmra.mrb[168].mxu0 %vm5505_vm3, %v12770_v41 }
 0x687   : > { %8334 = vmatprep.mubr.msk.bf16.mxu0 %vm5505_vm3, %v12795_v30 }
 0x68e   : > { %8335 = vmatmul.mubr.msk.bf16.gmra.mrb[172].mxu0 %vm5505_vm3, %v12807_v50 }
 0x68f   : > { %8338 = vmatprep.mubr.msk.bf16.mxu0 %vm5505_vm3, %v12819_v54 }
 0x696   : > { %8339 = vmatmul.mubr.msk.bf16.gmra.mrb[176].mxu0 %vm5505_vm3, %v12831_v43 }
 0x697   : > { %8342 = vmatprep.mubr.msk.bf16.mxu0 %vm5505_vm3, %v12843_v51 }
 0x69e   : > { %8343 = vmatmul.mubr.msk.bf16.gmra.mrb[180].mxu0 %vm5505_vm3, %v12855_v55 }
 0x69f   : > { %8346 = vmatprep.mubr.msk.bf16.mxu0 %vm5505_vm3, %v12867_v36 }
 0x6a6   : > { %8347 = vmatmul.mubr.msk.bf16.gmra.mrb[184].mxu0 %vm5505_vm3, %v12879_v12 }
 0x6a7   : > { %8350 = vmatprep.mubr.msk.bf16.mxu0 %vm5505_vm3, %v12891_v37 }
 0x6ae   : > { %8351 = vmatmul.mubr.msk.bf16.gmra.mrb[188].mxu0 %vm5505_vm3, %v12903_v59 }
 0x6af   : > { %8354 = vmatprep.mubr.msk.bf16.mxu0 %vm5505_vm3, %v12915_v46 }
 0x6b6   : > { %8355 = vmatmul.mubr.msk.bf16.gmra.mrb[192].mxu0 %vm5505_vm3, %v12927_v26 }
 0x6b7   : > { %8358 = vmatprep.mubr.msk.bf16.mxu0 %vm5505_vm3, %v12939_v33 }
 0x6be   : > { %8359 = vmatmul.mubr.msk.bf16.gmra.mrb[196].mxu0 %vm5505_vm3, %v12951_v15 }
 0x6bf   : > { %8362 = vmatprep.mubr.msk.bf16.mxu0 %vm5505_vm3, %v12963_v22 }
 0x6c6   : > { %8363 = vmatmul.mubr.msk.bf16.gmra.mrb[200].mxu0 %vm5505_vm3, %v12975_v24 }
 0x6c7   : > { %8366 = vmatprep.mubr.msk.bf16.mxu0 %vm5505_vm3, %v12987_v52 }
 0x6ce   : > { %8367 = vmatmul.mubr.msk.bf16.gmra.mrb[204].mxu0 %vm5505_vm3, %v12999_v19 }
 0x6cf   : > { %8370 = vmatprep.mubr.msk.bf16.mxu0 %vm5505_vm3, %v5481_v63 }
 0x6d6   : > { %8371 = vmatmul.mubr.msk.bf16.gmra.mrb[208].mxu0 %vm5505_vm3, %v5482_v32 }
 0x6d7   : > { %8374 = vmatprep.mubr.msk.bf16.mxu0 %vm5505_vm3, %v5483_v53 }
 0x6de   : > { %8375 = vmatmul.mubr.msk.bf16.gmra.mrb[212].mxu0 %vm5505_vm3, %v5484_v4 }
 0x6f3   : > { %v8224_v40 = vpop.f32.mrb[120].mxu0  ;;  %v8278_v41 = vpop.f32.mrb[168].mxu1 }
 0x6f4   : > { %v5615_v30 = vpop.f32.mrb[121].mxu0  ;;  %v5848_v50 = vpop.f32.mrb[169].mxu1  ;;  %v6090_v36 = vrot.slane %v8278_v41, 1 }
 0x6f5   : > { %v8225_v54 = vpop.f32.mrb[122].mxu0  ;;  %v8279_v43 = vpop.f32.mrb[170].mxu1  ;;  %v6087_v12 = vrot.slane %v5848_v50, 1 }
 0x6f6   : > { %v5618_v51 = vpop.f32.mrb[123].mxu0  ;;  %v5851_v55 = vpop.f32.mrb[171].mxu1  ;;  %v6092_v5 = vrot.slane %v8279_v43, 1 }
 0x6f7   : > { %v6088_v37 = vrot.slane %v5851_v55, 1 }
 0x6f9   : > { %v6089_v59 = vsel %vm1407_vm5, %v6087_v12, %v6088_v37  ;;  %v6091_v46 = vsel %vm1407_vm5, %v6088_v37, %v6090_v36 }
 0x6fa   : > { %v13083_v26 = vadd.f32 %v6089_v59, %v5615_v30  ;;  %v13085_v33 = vadd.f32 %v6091_v46, %v5618_v51 }
 0x701   : > { %v8228_v15 = vpop.f32.mrb[124].mxu0  ;;  %v8282_v22 = vpop.f32.mrb[172].mxu1 }
 0x702   : > { %v5630_v24 = vpop.f32.mrb[125].mxu0  ;;  %v5864_v52 = vpop.f32.mrb[173].mxu1  ;;  %v6097_v11 = vrot.slane %v8282_v22, 1 }
 0x703   : > { %v6093_v19 = vrot.slane %v5864_v52, 1  ;;  %v8229_v35 = vpop.f32.mrb[126].mxu0  ;;  %v8283_v1 = vpop.f32.mrb[174].mxu1 }
 0x704   : > { %v6098_v3 = vrot.slane %v8283_v1, 1  ;;  %v5633_v39 = vpop.f32.mrb[127].mxu0  ;;  %v5867_v42 = vpop.f32.mrb[175].mxu1 }
 0x705   : > { %v6094_v60 = vsel %vm1407_vm5, %v6092_v5, %v6093_v19  ;;  %v6095_v47 = vrot.slane %v5867_v42, 1 }
 0x706   : > { %v13088_v25 = vadd.f32 %v8225_v54, %v6094_v60  ;;  %v6099_v18 = vsel %vm1407_vm5, %v6097_v11, %v6098_v3 }
 0x707   : > { %v13091_v48 = vadd.f32 %v8228_v15, %v6099_v18  ;;  %v6096_v63 = vsel %vm1407_vm5, %v6093_v19, %v6095_v47 }
 0x708   : > { %v13094_v16 = vadd.f32 %v6096_v63, %v5630_v24 }
 0x709   : > { %v8232_v28 = vpop.f32.mrb[128].mxu0  ;;  %v8286_v56 = vpop.f32.mrb[176].mxu1 }
 0x70a   : > { %v5645_v13 = vpop.f32.mrb[129].mxu0  ;;  %v5880_v61 = vpop.f32.mrb[177].mxu1  ;;  %v6103_v49 = vrot.slane %v8286_v56, 1 }
 0x70b   : > { %v6100_v8 = vrot.slane %v5880_v61, 1  ;;  %v8233_v21 = vpop.f32.mrb[130].mxu0  ;;  %v8287_v62 = vpop.f32.mrb[178].mxu1 }
 0x70c   : > { %v6105_v32 = vrot.slane %v8287_v62, 1  ;;  %v5647_v44 = vpop.f32.mrb[131].mxu0  ;;  %v5883_v29 = vpop.f32.mrb[179].mxu1 }
 0x70d   : > { %v6101_v20 = vsel %vm1407_vm5, %v6098_v3, %v6100_v8  ;;  %v6102_v45 = vrot.slane %v5883_v29, 1 }
 0x70e   : > { %v13097_v10 = vadd.f32 %v8229_v35, %v6101_v20  ;;  %v6106_v58 = vsel %vm1407_vm5, %v6103_v49, %v6105_v32 }
 0x70f   : > { %v13100_v14 = vadd.f32 %v8232_v28, %v6106_v58  ;;  %v6104_v2 = vsel %vm1407_vm5, %v6102_v45, %v6103_v49 }
 0x710   : > { %v13103_v23 = vadd.f32 %v6104_v2, %v5647_v44 }
 0x711   : > { %v8236_v6 = vpop.f32.mrb[132].mxu0  ;;  %v8290_v7 = vpop.f32.mrb[180].mxu1 }
 0x712   : > { %v5659_v53 = vpop.f32.mrb[133].mxu0  ;;  %v5896_v38 = vpop.f32.mrb[181].mxu1  ;;  %v6110_v34 = vrot.slane %v8290_v7, 1 }
 0x713   : > { %v8237_v17 = vpop.f32.mrb[134].mxu0  ;;  %v8291_v57 = vpop.f32.mrb[182].mxu1  ;;  %v6107_v9 = vrot.slane %v5896_v38, 1 }
 0x714   : > { %v5662_v27 = vpop.f32.mrb[135].mxu0  ;;  %v5899_v31 = vpop.f32.mrb[183].mxu1  ;;  %v6112_v55 = vrot.slane %v8291_v57, 1 }
 0x715   : > { %v6108_v0 = vrot.slane %v5899_v31, 1 }
 0x717   : > { %v6109_v4 = vsel %vm1407_vm5, %v6107_v9, %v6108_v0  ;;  %v6111_v40 = vsel %vm1407_vm5, %v6108_v0, %v6110_v34 }
 0x718   : > { %v13107_v41 = vadd.f32 %v6109_v4, %v5659_v53  ;;  %v13109_v30 = vadd.f32 %v6111_v40, %v5662_v27 }
 0x719   : > { %v8240_v50 = vpop.f32.mrb[136].mxu0  ;;  %v8294_v54 = vpop.f32.mrb[184].mxu1 }
 0x71a   : > { %v5674_v43 = vpop.f32.mrb[137].mxu0  ;;  %v5912_v51 = vpop.f32.mrb[185].mxu1  ;;  %v6117_v59 = vrot.slane %v8294_v54, 1 }
 0x71b   : > { %v6113_v36 = vrot.slane %v5912_v51, 1  ;;  %v8241_v12 = vpop.f32.mrb[138].mxu0  ;;  %v8295_v37 = vpop.f32.mrb[186].mxu1 }
 0x71c   : > { %v6118_v46 = vrot.slane %v8295_v37, 1  ;;  %v5677_v15 = vpop.f32.mrb[139].mxu0  ;;  %v5915_v22 = vpop.f32.mrb[187].mxu1 }
 0x71d   : > { %v6114_v24 = vsel %vm1407_vm5, %v6112_v55, %v6113_v36  ;;  %v6115_v52 = vrot.slane %v5915_v22, 1 }
 0x71e   : > { %v13112_v5 = vadd.f32 %v8237_v17, %v6114_v24  ;;  %v6119_v19 = vsel %vm1407_vm5, %v6117_v59, %v6118_v46 }
 0x71f   : > { %v13115_v35 = vadd.f32 %v8240_v50, %v6119_v19  ;;  %v6116_v1 = vsel %vm1407_vm5, %v6113_v36, %v6115_v52 }
 0x720   : > { %v13118_v11 = vadd.f32 %v6116_v1, %v5674_v43 }
 0x721   : > { %v8244_v3 = vpop.f32.mrb[140].mxu0  ;;  %v8298_v39 = vpop.f32.mrb[188].mxu1 }
 0x722   : > { %v5689_v42 = vpop.f32.mrb[141].mxu0  ;;  %v5928_v60 = vpop.f32.mrb[189].mxu1  ;;  %v6123_v28 = vrot.slane %v8298_v39, 1 }
 0x723   : > { %v6120_v47 = vrot.slane %v5928_v60, 1  ;;  %v8245_v18 = vpop.f32.mrb[142].mxu0  ;;  %v8299_v63 = vpop.f32.mrb[190].mxu1 }
 0x724   : > { %v6125_v56 = vrot.slane %v8299_v63, 1  ;;  %v5691_v13 = vpop.f32.mrb[143].mxu0  ;;  %v5931_v61 = vpop.f32.mrb[191].mxu1 }
 0x725   : > { %v6121_v8 = vsel %vm1407_vm5, %v6118_v46, %v6120_v47  ;;  %v6122_v21 = vrot.slane %v5931_v61, 1 }
 0x726   : > { %v13121_v62 = vadd.f32 %v8241_v12, %v6121_v8  ;;  %v6126_v49 = vsel %vm1407_vm5, %v6123_v28, %v6125_v56 }
 0x727   : > { %v13124_v32 = vadd.f32 %v8244_v3, %v6126_v49  ;;  %v6124_v44 = vsel %vm1407_vm5, %v6122_v21, %v6123_v28 }
 0x728   : > { %v13127_v29 = vadd.f32 %v6124_v44, %v5691_v13 }
 0x729   : > { %v8248_v20 = vpop.f32.mrb[144].mxu0  ;;  %v8302_v45 = vpop.f32.mrb[192].mxu1 }
 0x72a   : > { %v5703_v58 = vpop.f32.mrb[145].mxu0  ;;  %v5944_v2 = vpop.f32.mrb[193].mxu1  ;;  %v6130_v17 = vrot.slane %v8302_v45, 1 }
 0x72b   : > { %v8249_v6 = vpop.f32.mrb[146].mxu0  ;;  %v8303_v7 = vpop.f32.mrb[194].mxu1  ;;  %v6127_v57 = vrot.slane %v5944_v2, 1 }
 0x72c   : > { %v5706_v53 = vpop.f32.mrb[147].mxu0  ;;  %v5947_v38 = vpop.f32.mrb[195].mxu1  ;;  %v6132_v43 = vrot.slane %v8303_v7, 1 }
 0x72d   : > { %v6128_v27 = vrot.slane %v5947_v38, 1 }
 0x72f   : > { %v6129_v31 = vsel %vm1407_vm5, %v6127_v57, %v6128_v27  ;;  %v6131_v34 = vsel %vm1407_vm5, %v6128_v27, %v6130_v17 }
 0x730   : > { %v13131_v9 = vadd.f32 %v6129_v31, %v5703_v58  ;;  %v13133_v0 = vadd.f32 %v6131_v34, %v5706_v53 }
 0x731   : > { %v8252_v4 = vpop.f32.mrb[148].mxu0  ;;  %v8306_v40 = vpop.f32.mrb[196].mxu1 }
 0x732   : > { %v5718_v50 = vpop.f32.mrb[149].mxu0  ;;  %v5960_v54 = vpop.f32.mrb[197].mxu1  ;;  %v6137_v12 = vrot.slane %v8306_v40, 1 }
 0x733   : > { %v6133_v51 = vrot.slane %v5960_v54, 1  ;;  %v8253_v55 = vpop.f32.mrb[150].mxu0  ;;  %v8307_v36 = vpop.f32.mrb[198].mxu1 }
 0x734   : > { %v6138_v37 = vrot.slane %v8307_v36, 1  ;;  %v5721_v59 = vpop.f32.mrb[151].mxu0  ;;  %v5963_v46 = vpop.f32.mrb[199].mxu1 }
 0x735   : > { %v6134_v15 = vsel %vm1407_vm5, %v6132_v43, %v6133_v51  ;;  %v6135_v22 = vrot.slane %v5963_v46, 1 }
 0x736   : > { %v13136_v24 = vadd.f32 %v8249_v6, %v6134_v15  ;;  %v6139_v52 = vsel %vm1407_vm5, %v6137_v12, %v6138_v37 }
 0x737   : > { %v13139_v19 = vadd.f32 %v8252_v4, %v6139_v52  ;;  %v6136_v1 = vsel %vm1407_vm5, %v6133_v51, %v6135_v22 }
 0x738   : > { %v13142_v3 = vadd.f32 %v6136_v1, %v5718_v50 }
 0x739   : > { %v8256_v39 = vpop.f32.mrb[152].mxu0  ;;  %v8310_v42 = vpop.f32.mrb[200].mxu1 }
 0x73a   : > { %v5733_v60 = vpop.f32.mrb[153].mxu0  ;;  %v5976_v47 = vpop.f32.mrb[201].mxu1  ;;  %v6143_v56 = vrot.slane %v8310_v42, 1 }
 0x73b   : > { %v6140_v18 = vrot.slane %v5976_v47, 1  ;;  %v8257_v63 = vpop.f32.mrb[154].mxu0  ;;  %v8311_v28 = vpop.f32.mrb[202].mxu1 }
 0x73c   : > { %v6145_v13 = vrot.slane %v8311_v28, 1  ;;  %v5735_v61 = vpop.f32.mrb[155].mxu0  ;;  %v5979_v8 = vpop.f32.mrb[203].mxu1 }
 0x73d   : > { %v6141_v21 = vsel %vm1407_vm5, %v6138_v37, %v6140_v18  ;;  %v6142_v49 = vrot.slane %v5979_v8, 1 }
 0x73e   : > { %v13145_v44 = vadd.f32 %v8253_v55, %v6141_v21  ;;  %v6146_v20 = vsel %vm1407_vm5, %v6143_v56, %v6145_v13 }
 0x73f   : > { %v13148_v45 = vadd.f32 %v8256_v39, %v6146_v20  ;;  %v6144_v58 = vsel %vm1407_vm5, %v6142_v49, %v6143_v56 }
 0x740   : > { %v13151_v2 = vadd.f32 %v6144_v58, %v5735_v61 }
 0x741   : > { %v8260_v6 = vpop.f32.mrb[156].mxu0  ;;  %v8314_v7 = vpop.f32.mrb[204].mxu1 }
 0x742   : > { %v5747_v53 = vpop.f32.mrb[157].mxu0  ;;  %v5992_v38 = vpop.f32.mrb[205].mxu1  ;;  %v6150_v34 = vrot.slane %v8314_v7, 1 }
 0x743   : > { %v8261_v17 = vpop.f32.mrb[158].mxu0  ;;  %v8315_v57 = vpop.f32.mrb[206].mxu1  ;;  %v6147_v4 = vrot.slane %v5992_v38, 1 }
 0x744   : > { %v5750_v27 = vpop.f32.mrb[159].mxu0  ;;  %v5995_v31 = vpop.f32.mrb[207].mxu1  ;;  %v6152_v59 = vrot.slane %v8315_v57, 1 }
 0x745   : > { %v6148_v40 = vrot.slane %v5995_v31, 1 }
 0x747   : > { %v6149_v50 = vsel %vm1407_vm5, %v6147_v4, %v6148_v40  ;;  %v6151_v54 = vsel %vm1407_vm5, %v6148_v40, %v6150_v34 }
 0x748   : > { %v13155_v43 = vadd.f32 %v6149_v50, %v5747_v53  ;;  %v13157_v51 = vadd.f32 %v6151_v54, %v5750_v27 }
 0x749   : > { %v8264_v55 = vpop.f32.mrb[160].mxu0  ;;  %v8318_v36 = vpop.f32.mrb[208].mxu1 }
 0x74a   : > { %v5762_v12 = vpop.f32.mrb[161].mxu0  ;;  %v6008_v37 = vpop.f32.mrb[209].mxu1  ;;  %v6157_v52 = vrot.slane %v8318_v36, 1 }
 0x74b   : > { %v6153_v46 = vrot.slane %v6008_v37, 1  ;;  %v8265_v15 = vpop.f32.mrb[162].mxu0  ;;  %v8319_v22 = vpop.f32.mrb[210].mxu1 }
 0x74c   : > { %v6158_v1 = vrot.slane %v8319_v22, 1  ;;  %v5765_v39 = vpop.f32.mrb[163].mxu0  ;;  %v6011_v42 = vpop.f32.mrb[211].mxu1 }
 0x74d   : > { %v6154_v60 = vsel %vm1407_vm5, %v6152_v59, %v6153_v46  ;;  %v6155_v47 = vrot.slane %v6011_v42, 1 }
 0x74e   : > { %v13160_v18 = vadd.f32 %v8261_v17, %v6154_v60  ;;  %v6159_v63 = vsel %vm1407_vm5, %v6157_v52, %v6158_v1  ;;  %v13182_v52 = vld [vmem:[%s14208_s6] ss:$0 sm:$0xff] }
 0x74f   : > { %v13163_v28 = vadd.f32 %v8264_v55, %v6159_v63  ;;  %v6156_v56 = vsel %vm1407_vm5, %v6153_v46, %v6155_v47 }
 0x750   : > { %v13166_v13 = vadd.f32 %v6156_v56, %v5762_v12 }
 0x751   : > { %v8268_v61 = vpop.f32.mrb[164].mxu0  ;;  %v8322_v8 = vpop.f32.mrb[212].mxu1 }
 0x752   : > { %v5777_v21 = vpop.f32.mrb[165].mxu0  ;;  %v6024_v49 = vpop.f32.mrb[213].mxu1  ;;  %v6163_v7 = vrot.slane %v8322_v8, 1 }
 0x753   : > { %v6160_v20 = vrot.slane %v6024_v49, 1  ;;  %v8269_v58 = vpop.f32.mrb[166].mxu0  ;;  %v8323_v6 = vpop.f32.mrb[214].mxu1 }
 0x754   : > { %v6165_v53 = vrot.slane %v8323_v6, 1  ;;  %v5779_v38 = vpop.f32.mrb[167].mxu0  ;;  %v6027_v17 = vpop.f32.mrb[215].mxu1 }
 0x755   : > { %v6161_v57 = vsel %vm1407_vm5, %v6158_v1, %v6160_v20  ;;  %v6162_v27 = vrot.slane %v6027_v17, 1 }
 0x756   : > { %v13169_v31 = vadd.f32 %v8265_v15, %v6161_v57  ;;  %v6166_v34 = vsel %vm1407_vm5, %v6163_v7, %v6165_v53 }
 0x757   : > { %v13172_v4 = vadd.f32 %v8268_v61, %v6166_v34  ;;  %v6164_v40 = vsel %vm1407_vm5, %v6162_v27, %v6163_v7 }
 0x758   : > { %v13175_v50 = vadd.f32 %v6164_v40, %v5779_v38 }
 0x759   : > { %v8332_v54 = vpop.f32.mrb[168].mxu0 }
 0x75a   : > { %v6289_v55 = vpop.f32.mrb[169].mxu0  ;;  %v6531_v37 = vrot.slane %v8332_v54, 2 }
 0x75b   : > { %v8333_v36 = vpop.f32.mrb[170].mxu0  ;;  %v6528_v59 = vrot.slane %v6289_v55, 2 }
 0x75c   : > { %v6292_v12 = vpop.f32.mrb[171].mxu0  ;;  %v6533_v56 = vrot.slane %v8333_v36, 2 }
 0x75d   : > { %v6529_v46 = vrot.slane %v6292_v12, 2 }
 0x75f   : > { %v6530_v22 = vsel %vm1830_vm6, %v6528_v59, %v6529_v46  ;;  %v6532_v15 = vsel %vm1830_vm6, %v6529_v46, %v6531_v37 }
 0x760   : > { %v6640_v1 = vadd.f32 %v6530_v22, %v13083_v26  ;;  %v6641_v39 = vadd.f32 %v6532_v15, %v13085_v33 }
 0x761   : > { %v8336_v42 = vpop.f32.mrb[172].mxu0 }
 0x762   : > { %v13187_v60 = vadd.f32 %v13182_v52, %v6640_v1  ;;  %v13190_v47 = vadd.f32 %v13182_v52, %v6641_v39  ;;  %v6305_v63 = vpop.f32.mrb[173].mxu0  ;;  %v6538_v21 = vrot.slane %v8336_v42, 2 }
 0x763   : > { %v6534_v61 = vrot.slane %v6305_v63, 2  ;;  %v8337_v8 = vpop.f32.mrb[174].mxu0 }
 0x764   : > { %v6539_v49 = vrot.slane %v8337_v8, 2  ;;  %v6308_v20 = vpop.f32.mrb[175].mxu0  ;;  %v6711_v26 = vsel %vm3076_vm12, %v13187_v60, 0.0  ;;  %v6712_v33 = vsel %vm3076_vm12, %v13190_v47, 0.0 }
 0x765   : > { %v6535_v58 = vsel %vm1830_vm6, %v6533_v56, %v6534_v61  ;;  %v6536_v6 = vrot.slane %v6308_v20, 2  ;;  %v6713_v34 = vadd.f32 %v6712_v33, %v6711_v26 }
 0x766   : > { %v6642_v7 = vadd.f32 %v6535_v58, %v13088_v25  ;;  %v6540_v53 = vsel %vm1830_vm6, %v6538_v21, %v6539_v49 }
 0x767   : > { %v6644_v38 = vadd.f32 %v6540_v53, %v13091_v48  ;;  %v6537_v17 = vsel %vm1830_vm6, %v6534_v61, %v6536_v6 }
 0x768   : > { %v13202_v57 = vadd.f32 %v13182_v52, %v6642_v7  ;;  %v6643_v27 = vadd.f32 %v6537_v17, %v13094_v16 }
 0x769   : > { %v8340_v40 = vpop.f32.mrb[176].mxu0  ;;  %v13211_v48 = vadd.f32 %v13182_v52, %v6644_v38 }
 0x76a   : > { %v6714_v54 = vsel %vm3076_vm12, %v13202_v57, 0.0  ;;  %v13208_v55 = vadd.f32 %v13182_v52, %v6643_v27  ;;  %v6321_v25 = vpop.f32.mrb[177].mxu0  ;;  %v6544_v46 = vrot.slane %v8340_v40, 2 }
 0x76b   : > { %v6715_v36 = vadd.f32 %v6714_v54, %v6713_v34  ;;  %v6541_v12 = vrot.slane %v6321_v25, 2  ;;  %v8341_v37 = vpop.f32.mrb[178].mxu0  ;;  %v6718_v8 = vsel %vm3076_vm12, %v13211_v48, 0.0 }
 0x76c   : > { %v6716_v59 = vsel %vm3076_vm12, %v13208_v55, 0.0  ;;  %v6546_v16 = vrot.slane %v8341_v37, 2  ;;  %v6324_v22 = vpop.f32.mrb[179].mxu0 }
 0x76d   : > { %v6717_v15 = vadd.f32 %v6716_v59, %v6715_v36  ;;  %v6542_v1 = vsel %vm1830_vm6, %v6539_v49, %v6541_v12  ;;  %v6543_v39 = vrot.slane %v6324_v22, 2 }
 0x76e   : > { %v6645_v42 = vadd.f32 %v6542_v1, %v13097_v10  ;;  %v6547_v63 = vsel %vm1830_vm6, %v6544_v46, %v6546_v16 }
 0x76f   : > { %v6647_v56 = vadd.f32 %v6547_v63, %v13100_v14  ;;  %v6545_v61 = vsel %vm1830_vm6, %v6543_v39, %v6544_v46  ;;  %v6719_v58 = vadd.f32 %v6718_v8, %v6717_v15 }
 0x770   : > { %v13223_v21 = vadd.f32 %v13182_v52, %v6645_v42  ;;  %v6646_v20 = vadd.f32 %v6545_v61, %v13103_v23 }
 0x771   : > { %v8344_v6 = vpop.f32.mrb[180].mxu0  ;;  %v13234_v23 = vadd.f32 %v13182_v52, %v6647_v56 }
 0x772   : > { %v6720_v49 = vsel %vm3076_vm12, %v13223_v21, 0.0  ;;  %v13229_v10 = vadd.f32 %v13182_v52, %v6646_v20  ;;  %v6337_v26 = vpop.f32.mrb[181].mxu0  ;;  %v6551_v38 = vrot.slane %v8344_v6, 2 }
 0x773   : > { %v6721_v14 = vadd.f32 %v6720_v49, %v6719_v58  ;;  %v8345_v33 = vpop.f32.mrb[182].mxu0  ;;  %v6548_v17 = vrot.slane %v6337_v26, 2  ;;  %v6724_v37 = vsel %vm3076_vm12, %v13234_v23, 0.0 }
 0x774   : > { %v6722_v7 = vsel %vm3076_vm12, %v13229_v10, 0.0  ;;  %v6340_v53 = vpop.f32.mrb[183].mxu0  ;;  %v6553_v16 = vrot.slane %v8345_v33, 2 }
 0x775   : > { %v6549_v27 = vrot.slane %v6340_v53, 2  ;;  %v6723_v34 = vadd.f32 %v6722_v7, %v6721_v14 }
 0x777   : > { %v6550_v40 = vsel %vm1830_vm6, %v6548_v17, %v6549_v27  ;;  %v6552_v54 = vsel %vm1830_vm6, %v6549_v27, %v6551_v38  ;;  %v6725_v22 = vadd.f32 %v6724_v37, %v6723_v34 }
 0x778   : > { %v6648_v25 = vadd.f32 %v6550_v40, %v13107_v41  ;;  %v6649_v36 = vadd.f32 %v6552_v54, %v13109_v30 }
 0x779   : > { %v8348_v12 = vpop.f32.mrb[184].mxu0 }
 0x77a   : > { %v13243_v59 = vadd.f32 %v13182_v52, %v6648_v25  ;;  %v6353_v46 = vpop.f32.mrb[185].mxu0  ;;  %v13246_v39 = vadd.f32 %v13182_v52, %v6649_v36  ;;  %v6558_v42 = vrot.slane %v8348_v12, 2 }
 0x77b   : > { %v6554_v15 = vrot.slane %v6353_v46, 2  ;;  %v8349_v1 = vpop.f32.mrb[186].mxu0 }
 0x77c   : > { %v6726_v41 = vsel %vm3076_vm12, %v13243_v59, 0.0  ;;  %v6559_v30 = vrot.slane %v8349_v1, 2  ;;  %v6356_v63 = vpop.f32.mrb[187].mxu0  ;;  %v6728_v26 = vsel %vm3076_vm12, %v13246_v39, 0.0 }
 0x77d   : > { %v6727_v56 = vadd.f32 %v6726_v41, %v6725_v22  ;;  %v6555_v61 = vsel %vm1830_vm6, %v6553_v16, %v6554_v15  ;;  %v6556_v8 = vrot.slane %v6356_v63, 2 }
 0x77e   : > { %v6650_v20 = vadd.f32 %v6555_v61, %v13112_v5  ;;  %v6560_v58 = vsel %vm1830_vm6, %v6558_v42, %v6559_v30 }
 0x77f   : > { %v6652_v6 = vadd.f32 %v6560_v58, %v13115_v35  ;;  %v6557_v49 = vsel %vm1830_vm6, %v6554_v15, %v6556_v8  ;;  %v6729_v7 = vadd.f32 %v6728_v26, %v6727_v56 }
 0x780   : > { %v13258_v14 = vadd.f32 %v13182_v52, %v6650_v20  ;;  %v6651_v33 = vadd.f32 %v6557_v49, %v13118_v11 }
 0x781   : > { %v8352_v53 = vpop.f32.mrb[188].mxu0  ;;  %v13267_v40 = vadd.f32 %v13182_v52, %v6652_v6 }
 0x782   : > { %v6730_v38 = vsel %vm3076_vm12, %v13258_v14, 0.0  ;;  %v13264_v5 = vadd.f32 %v13182_v52, %v6651_v33  ;;  %v6369_v17 = vpop.f32.mrb[189].mxu0  ;;  %v6564_v25 = vrot.slane %v8352_v53, 2 }
 0x783   : > { %v6731_v35 = vadd.f32 %v6730_v38, %v6729_v7  ;;  %v6561_v27 = vrot.slane %v6369_v17, 2  ;;  %v8353_v34 = vpop.f32.mrb[190].mxu0  ;;  %v6734_v41 = vsel %vm3076_vm12, %v13267_v40, 0.0 }
 0x784   : > { %v6732_v54 = vsel %vm3076_vm12, %v13264_v5, 0.0  ;;  %v6566_v11 = vrot.slane %v8353_v34, 2  ;;  %v6372_v36 = vpop.f32.mrb[191].mxu0 }
 0x785   : > { %v6733_v12 = vadd.f32 %v6732_v54, %v6731_v35  ;;  %v6562_v37 = vsel %vm1830_vm6, %v6559_v30, %v6561_v27  ;;  %v6563_v46 = vrot.slane %v6372_v36, 2 }
 0x786   : > { %v6653_v16 = vadd.f32 %v6562_v37, %v13121_v62  ;;  %v6567_v22 = vsel %vm1830_vm6, %v6564_v25, %v6566_v11 }
 0x787   : > { %v6655_v15 = vadd.f32 %v6567_v22, %v13124_v32  ;;  %v6565_v1 = vsel %vm1830_vm6, %v6563_v46, %v6564_v25  ;;  %v6735_v56 = vadd.f32 %v6734_v41, %v6733_v12 }
 0x788   : > { %v13279_v42 = vadd.f32 %v13182_v52, %v6653_v16  ;;  %v6654_v63 = vadd.f32 %v6565_v1, %v13127_v29 }
 0x789   : > { %v8356_v61 = vpop.f32.mrb[192].mxu0  ;;  %v13290_v29 = vadd.f32 %v13182_v52, %v6655_v15 }
 0x78a   : > { %v6736_v30 = vsel %vm3076_vm12, %v13279_v42, 0.0  ;;  %v13285_v62 = vadd.f32 %v13182_v52, %v6654_v63  ;;  %v6385_v8 = vpop.f32.mrb[193].mxu0  ;;  %v6571_v49 = vrot.slane %v8356_v61, 2 }
 0x78b   : > { %v6737_v32 = vadd.f32 %v6736_v30, %v6735_v56  ;;  %v8357_v20 = vpop.f32.mrb[194].mxu0  ;;  %v6568_v26 = vrot.slane %v6385_v8, 2  ;;  %v6740_v34 = vsel %vm3076_vm12, %v13290_v29, 0.0 }
 0x78c   : > { %v6738_v58 = vsel %vm3076_vm12, %v13285_v62, 0.0  ;;  %v6388_v6 = vpop.f32.mrb[195].mxu0  ;;  %v6573_v36 = vrot.slane %v8357_v20, 2 }
 0x78d   : > { %v6569_v33 = vrot.slane %v6388_v6, 2  ;;  %v6739_v7 = vadd.f32 %v6738_v58, %v6737_v32 }
 0x78f   : > { %v6570_v53 = vsel %vm1830_vm6, %v6568_v26, %v6569_v33  ;;  %v6572_v38 = vsel %vm1830_vm6, %v6569_v33, %v6571_v49  ;;  %v6741_v12 = vadd.f32 %v6740_v34, %v6739_v7 }
 0x790   : > { %v6656_v17 = vadd.f32 %v6570_v53, %v13131_v9  ;;  %v6657_v35 = vadd.f32 %v6572_v38, %v13133_v0 }
 0x791   : > { %v8360_v27 = vpop.f32.mrb[196].mxu0 }
 0x792   : > { %v13299_v54 = vadd.f32 %v13182_v52, %v6656_v17  ;;  %v13302_v25 = vadd.f32 %v13182_v52, %v6657_v35  ;;  %v6401_v11 = vpop.f32.mrb[197].mxu0  ;;  %v6578_v16 = vrot.slane %v8360_v27, 2 }
 0x793   : > { %v6574_v37 = vrot.slane %v6401_v11, 2  ;;  %v8361_v46 = vpop.f32.mrb[198].mxu0 }
 0x794   : > { %v6742_v9 = vsel %vm3076_vm12, %v13299_v54, 0.0  ;;  %v6579_v0 = vrot.slane %v8361_v46, 2  ;;  %v6404_v22 = vpop.f32.mrb[199].mxu0  ;;  %v6744_v63 = vsel %vm3076_vm12, %v13302_v25, 0.0 }
 0x795   : > { %v6743_v15 = vadd.f32 %v6742_v9, %v6741_v12  ;;  %v6575_v1 = vsel %vm1830_vm6, %v6573_v36, %v6574_v37  ;;  %v6576_v41 = vrot.slane %v6404_v22, 2 }
 0x796   : > { %v6658_v56 = vadd.f32 %v6575_v1, %v13136_v24  ;;  %v6580_v61 = vsel %vm1830_vm6, %v6578_v16, %v6579_v0 }
 0x797   : > { %v6745_v30 = vadd.f32 %v6744_v63, %v6743_v15  ;;  %v6660_v8 = vadd.f32 %v6580_v61, %v13139_v19  ;;  %v6577_v32 = vsel %vm1830_vm6, %v6574_v37, %v6576_v41 }
 0x798   : > { %v13314_v20 = vadd.f32 %v13182_v52, %v6658_v56  ;;  %v6659_v58 = vadd.f32 %v6577_v32, %v13142_v3 }
 0x799   : > { %v8364_v6 = vpop.f32.mrb[200].mxu0  ;;  %v13320_v26 = vadd.f32 %v13182_v52, %v6660_v8 }
 0x79a   : > { %v6746_v49 = vsel %vm3076_vm12, %v13314_v20, 0.0  ;;  %v13323_v24 = vadd.f32 %v13182_v52, %v6659_v58  ;;  %v6417_v33 = vpop.f32.mrb[201].mxu0  ;;  %v6584_v17 = vrot.slane %v8364_v6, 2 }
 0x79b   : > { %v6747_v7 = vadd.f32 %v6746_v49, %v6745_v30  ;;  %v6581_v19 = vrot.slane %v6417_v33, 2  ;;  %v8365_v53 = vpop.f32.mrb[202].mxu0  ;;  %v6750_v36 = vsel %vm3076_vm12, %v13320_v26, 0.0 }
 0x79c   : > { %v6748_v38 = vsel %vm3076_vm12, %v13323_v24, 0.0  ;;  %v6586_v35 = vrot.slane %v8365_v53, 2  ;;  %v6420_v3 = vpop.f32.mrb[203].mxu0 }
 0x79d   : > { %v6749_v27 = vadd.f32 %v6748_v38, %v6747_v7  ;;  %v6582_v34 = vsel %vm1830_vm6, %v6579_v0, %v6581_v19  ;;  %v6583_v11 = vrot.slane %v6420_v3, 2 }
 0x79e   : > { %v6661_v12 = vadd.f32 %v6582_v34, %v13145_v44  ;;  %v6587_v37 = vsel %vm1830_vm6, %v6584_v17, %v6586_v35 }
 0x79f   : > { %v6751_v46 = vadd.f32 %v6750_v36, %v6749_v27  ;;  %v6663_v9 = vadd.f32 %v6587_v37, %v13148_v45  ;;  %v6585_v16 = vsel %vm1830_vm6, %v6583_v11, %v6584_v17 }
 0x7a0   : > { %v13335_v22 = vadd.f32 %v13182_v52, %v6661_v12  ;;  %v6662_v15 = vadd.f32 %v6585_v16, %v13151_v2 }
 0x7a1   : > { %v8368_v1 = vpop.f32.mrb[204].mxu0  ;;  %v13341_v41 = vadd.f32 %v13182_v52, %v6663_v9 }
 0x7a2   : > { %v6752_v0 = vsel %vm3076_vm12, %v13335_v22, 0.0  ;;  %v13344_v44 = vadd.f32 %v13182_v52, %v6662_v15  ;;  %v6433_v63 = vpop.f32.mrb[205].mxu0  ;;  %v6591_v32 = vrot.slane %v8368_v1, 2 }
 0x7a3   : > { %v6753_v56 = vadd.f32 %v6752_v0, %v6751_v46  ;;  %v8369_v45 = vpop.f32.mrb[206].mxu0  ;;  %v6588_v2 = vrot.slane %v6433_v63, 2  ;;  %v6756_v6 = vsel %vm3076_vm12, %v13341_v41, 0.0 }
 0x7a4   : > { %v6754_v61 = vsel %vm3076_vm12, %v13344_v44, 0.0  ;;  %v6436_v30 = vpop.f32.mrb[207].mxu0  ;;  %v6593_v27 = vrot.slane %v8369_v45, 2 }
 0x7a5   : > { %v6755_v8 = vadd.f32 %v6754_v61, %v6753_v56  ;;  %v6589_v58 = vrot.slane %v6436_v30, 2 }
 0x7a7   : > { %v6590_v49 = vsel %vm1830_vm6, %v6588_v2, %v6589_v58  ;;  %v6592_v33 = vsel %vm1830_vm6, %v6589_v58, %v6591_v32  ;;  %v6757_v7 = vadd.f32 %v6756_v6, %v6755_v8 }
 0x7a8   : > { %v6664_v19 = vadd.f32 %v6590_v49, %v13155_v43  ;;  %v6665_v53 = vadd.f32 %v6592_v33, %v13157_v51 }
 0x7a9   : > { %v8372_v38 = vpop.f32.mrb[208].mxu0 }
 0x7aa   : > { %v13355_v17 = vadd.f32 %v13182_v52, %v6664_v19  ;;  %v13358_v35 = vadd.f32 %v13182_v52, %v6665_v53  ;;  %v6449_v3 = vpop.f32.mrb[209].mxu0  ;;  %v6598_v12 = vrot.slane %v8372_v38, 2 }
 0x7ab   : > { %v6594_v34 = vrot.slane %v6449_v3, 2  ;;  %v8373_v11 = vpop.f32.mrb[210].mxu0 }
 0x7ac   : > { %v6758_v36 = vsel %vm3076_vm12, %v13355_v17, 0.0  ;;  %v6599_v37 = vrot.slane %v8373_v11, 2  ;;  %v6452_v46 = vpop.f32.mrb[211].mxu0  ;;  %v6760_v16 = vsel %vm3076_vm12, %v13358_v35, 0.0 }
 0x7ad   : > { %v6759_v43 = vadd.f32 %v6758_v36, %v6757_v7  ;;  %v6595_v51 = vsel %vm1830_vm6, %v6593_v27, %v6594_v34  ;;  %v6596_v9 = vrot.slane %v6452_v46, 2 }
 0x7ae   : > { %v6666_v15 = vadd.f32 %v6595_v51, %v13160_v18  ;;  %v6600_v1 = vsel %vm1830_vm6, %v6598_v12, %v6599_v37 }
 0x7af   : > { %v6761_v0 = vadd.f32 %v6760_v16, %v6759_v43  ;;  %v6668_v63 = vadd.f32 %v6600_v1, %v13163_v28  ;;  %v6597_v56 = vsel %vm1830_vm6, %v6594_v34, %v6596_v9 }
 0x7b0   : > { %v6705_v45 = vadd.f32 %v13182_v52, %v6666_v15  ;;  %v6667_v61 = vadd.f32 %v6597_v56, %v13166_v13 }
 0x7b1   : > { %v8376_v30 = vpop.f32.mrb[212].mxu0  ;;  %v6707_v32 = vadd.f32 %v13182_v52, %v6668_v63 }
 0x7b2   : > { %v6762_v8 = vsel %vm3076_vm12, %v6705_v45, 0.0  ;;  %v6706_v2 = vadd.f32 %v13182_v52, %v6667_v61  ;;  %v6465_v58 = vpop.f32.mrb[213].mxu0  ;;  %v6604_v28 = vrot.slane %v8376_v30, 2 }
 0x7b3   : > { %v6763_v18 = vadd.f32 %v6762_v8, %v6761_v0  ;;  %v6601_v6 = vrot.slane %v6465_v58, 2  ;;  %v8377_v49 = vpop.f32.mrb[214].mxu0  ;;  %v6766_v3 = vsel %vm3076_vm12, %v6707_v32, 0.0 }
 0x7b4   : > { %v6764_v33 = vsel %vm3076_vm12, %v6706_v2, 0.0  ;;  %v6606_v7 = vrot.slane %v8377_v49, 2  ;;  %v6468_v19 = vpop.f32.mrb[215].mxu0 }
 0x7b5   : > { %v6765_v53 = vadd.f32 %v6764_v33, %v6763_v18  ;;  %v6602_v38 = vsel %vm1830_vm6, %v6599_v37, %v6601_v6  ;;  %v6603_v13 = vrot.slane %v6468_v19, 2 }
 0x7b6   : > { %v6669_v27 = vadd.f32 %v6602_v38, %v13169_v31  ;;  %v6607_v34 = vsel %vm1830_vm6, %v6604_v28, %v6606_v7 }
 0x7b7   : > { %v6767_v11 = vadd.f32 %v6766_v3, %v6765_v53  ;;  %v6671_v36 = vadd.f32 %v6607_v34, %v13172_v4  ;;  %v6605_v12 = vsel %vm1830_vm6, %v6603_v13, %v6604_v28 }
 0x7b8   : > { %v6708_v46 = vadd.f32 %v13182_v52, %v6669_v27  ;;  %v6670_v43 = vadd.f32 %v6605_v12, %v13175_v50 }
 0x7b9   : > { %v6710_v37 = vadd.f32 %v13182_v52, %v6671_v36 }
 0x7ba   : > { %v6768_v51 = vsel %vm3076_vm12, %v6708_v46, 0.0  ;;  %v6709_v9 = vadd.f32 %v13182_v52, %v6670_v43 }
 0x7bb   : > { %v6769_v16 = vadd.f32 %v6768_v51, %v6767_v11  ;;  %v6772_v1 = vsel %vm3076_vm12, %v6710_v37, 0.0 }
 0x7bc   : > { %v6770_v31 = vsel %vm3076_vm12, %v6709_v9, 0.0 }
 0x7bd   : > { %v6771_v15 = vadd.f32 %v6770_v31, %v6769_v16 }
 0x7bf   : > { %v6773_v0 = vadd.f32 %v6772_v1, %v6771_v15 }
 0x7c1   : > { %v6774_v4 = vrot.slane %v6773_v0, 4 }
 0x7c3   : > { %v6775_v63 = vadd.f32 %v6774_v4, %v6773_v0 }
 0x7c5   : > { %v6776_v56 = vrot.slane %v6775_v63, 2 }
 0x7c7   : > { %v6777_v61 = vadd.f32 %v6776_v56, %v6775_v63 }
 0x7c9   : > { %v6778_v30 = vrot.slane %v6777_v61, 1 }
 0x7cb   : > { %v6779_v8 = vadd.f32 %v6778_v30, %v6777_v61 }
 0x7cd   : > { %v13388_v50 = vmul.f32 0.00390625, %v6779_v8 }
 0x7cf   : > { %v13392_v58 = vsub.f32 %v13299_v54, %v13388_v50  ;;  %v13396_v52 = vsub.f32 %v13302_v25, %v13388_v50  ;;  %v13400_v18 = vsub.f32 %v13314_v20, %v13388_v50  ;;  %v13404_v6 = vsub.f32 %v13323_v24, %v13388_v50 }
 0x7d0   : > { %v13408_v49 = vsub.f32 %v13320_v26, %v13388_v50  ;;  %v13412_v54 = vsub.f32 %v13335_v22, %v13388_v50  ;;  %v13416_v25 = vsub.f32 %v13344_v44, %v13388_v50  ;;  %v13420_v20 = vsub.f32 %v13341_v41, %v13388_v50 }
 0x7d1   : > { %v13424_v24 = vsub.f32 %v13355_v17, %v13388_v50  ;;  %v13428_v26 = vsub.f32 %v13358_v35, %v13388_v50  ;;  %v13431_v33 = vsub.f32 %v6705_v45, %v13388_v50  ;;  %v13434_v22 = vsub.f32 %v6706_v2, %v13388_v50 }
 0x7d2   : > { %v13437_v44 = vsub.f32 %v6707_v32, %v13388_v50  ;;  %v13440_v41 = vsub.f32 %v6708_v46, %v13388_v50  ;;  %v13443_v28 = vsub.f32 %v6709_v9, %v13388_v50  ;;  %v13446_v17 = vsub.f32 %v6710_v37, %v13388_v50 }
 0x7d3   : > { %v13450_v35 = vsub.f32 %v13187_v60, %v13388_v50  ;;  %v13454_v45 = vsub.f32 %v13190_v47, %v13388_v50  ;;  %v13458_v32 = vsub.f32 %v13202_v57, %v13388_v50  ;;  %v13462_v2 = vsub.f32 %v13208_v55, %v13388_v50 }
 0x7d4   : > { %v13470_v60 = vsub.f32 %v13211_v48, %v13388_v50  ;;  %v13476_v57 = vsub.f32 %v13223_v21, %v13388_v50  ;;  %v13484_v3 = vsub.f32 %v13229_v10, %v13388_v50  ;;  %v13491_v21 = vsub.f32 %v13234_v23, %v13388_v50 }
 0x7d5   : > { %v6813_v7 = vmul.f32 %v13450_v35, %v13450_v35  ;;  %v6814_v19 = vmul.f32 %v13454_v45, %v13454_v45  ;;  %v6815_v47 = vmul.f32 %v13458_v32, %v13458_v32  ;;  %v6816_v55 = vmul.f32 %v13462_v2, %v13462_v2 }
 0x7d6   : > { %v6817_v48 = vmul.f32 %v13470_v60, %v13470_v60  ;;  %v6818_v11 = vmul.f32 %v13476_v57, %v13476_v57  ;;  %v13498_v10 = vsub.f32 %v13243_v59, %v13388_v50  ;;  %v6819_v46 = vmul.f32 %v13484_v3, %v13484_v3 }
 0x7d7   : > { %v6845_v53 = vsel %vm3076_vm12, %v6813_v7, 0.0  ;;  %v6846_v38 = vsel %vm3076_vm12, %v6814_v19, 0.0  ;;  %v6848_v27 = vsel %vm3076_vm12, %v6815_v47, 0.0  ;;  %v6850_v36 = vsel %vm3076_vm12, %v6816_v55, 0.0 }
 0x7d8   : > { %v6847_v13 = vadd.f32 %v6846_v38, %v6845_v53  ;;  %v6852_v43 = vsel %vm3076_vm12, %v6817_v48, 0.0  ;;  %v13505_v23 = vsub.f32 %v13246_v39, %v13388_v50  ;;  %v6820_v37 = vmul.f32 %v13491_v21, %v13491_v21 }
 0x7d9   : > { %v6854_v9 = vsel %vm3076_vm12, %v6818_v11, 0.0  ;;  %v13512_v59 = vsub.f32 %v13258_v14, %v13388_v50  ;;  %v6821_v31 = vmul.f32 %v13498_v10, %v13498_v10  ;;  %v6856_v15 = vsel %vm3076_vm12, %v6819_v46, 0.0 }
 0x7da   : > { %v6849_v34 = vadd.f32 %v6848_v27, %v6847_v13  ;;  %v13519_v39 = vsub.f32 %v13264_v5, %v13388_v50  ;;  %v6822_v0 = vmul.f32 %v13505_v23, %v13505_v23  ;;  %v6858_v4 = vsel %vm3076_vm12, %v6820_v37, 0.0 }
 0x7db   : > { %v13526_v14 = vsub.f32 %v13267_v40, %v13388_v50  ;;  %v6823_v56 = vmul.f32 %v13512_v59, %v13512_v59  ;;  %v6860_v61 = vsel %vm3076_vm12, %v6821_v31, 0.0  ;;  %v13533_v5 = vsub.f32 %v13279_v42, %v13388_v50 }
 0x7dc   : > { %v6851_v12 = vadd.f32 %v6850_v36, %v6849_v34  ;;  %v6824_v8 = vmul.f32 %v13519_v39, %v13519_v39  ;;  %v6862_v7 = vsel %vm3076_vm12, %v6822_v0, 0.0  ;;  %v13540_v40 = vsub.f32 %v13285_v62, %v13388_v50 }
 0x7dd   : > { %v6825_v47 = vmul.f32 %v13526_v14, %v13526_v14  ;;  %v6864_v55 = vsel %vm3076_vm12, %v6823_v56, 0.0  ;;  %v13547_v42 = vsub.f32 %v13290_v29, %v13388_v50  ;;  %v6826_v38 = vmul.f32 %v13533_v5, %v13533_v5 }
 0x7de   : > { %v6853_v51 = vadd.f32 %v6852_v43, %v6851_v12  ;;  %v6866_v13 = vsel %vm3076_vm12, %v6824_v8, 0.0  ;;  %v6827_v62 = vmul.f32 %v13540_v40, %v13540_v40  ;;  %v6829_v29 = vmul.f32 %v13392_v58, %v13392_v58 }
 0x7df   : > { %v6868_v27 = vsel %vm3076_vm12, %v6825_v47, 0.0  ;;  %v6828_v11 = vmul.f32 %v13547_v42, %v13547_v42  ;;  %v6870_v36 = vsel %vm3076_vm12, %v6826_v38, 0.0  ;;  %v6830_v43 = vmul.f32 %v13396_v52, %v13396_v52 }
 0x7e0   : > { %v6855_v16 = vadd.f32 %v6854_v9, %v6853_v51  ;;  %v6872_v50 = vsel %vm3076_vm12, %v6827_v62, 0.0  ;;  %v6831_v9 = vmul.f32 %v13400_v18, %v13400_v18 }
 0x7e1   : > { %v6874_v51 = vsel %vm3076_vm12, %v6828_v11, 0.0 }
 0x7e2   : > { %v6857_v1 = vadd.f32 %v6856_v15, %v6855_v16  ;;  %v6876_v16 = vsel %vm3076_vm12, %v6829_v29, 0.0  ;;  %v6832_v15 = vmul.f32 %v13404_v6, %v13404_v6 }
 0x7e4   : > { %v6859_v63 = vadd.f32 %v6858_v4, %v6857_v1  ;;  %v6878_v1 = vsel %vm3076_vm12, %v6830_v43, 0.0  ;;  %v6833_v4 = vmul.f32 %v13408_v49, %v13408_v49 }
 0x7e6   : > { %v6861_v30 = vadd.f32 %v6860_v61, %v6859_v63  ;;  %v6880_v63 = vsel %vm3076_vm12, %v6831_v9, 0.0  ;;  %v6834_v61 = vmul.f32 %v13412_v54, %v13412_v54 }
 0x7e8   : > { %v6863_v19 = vadd.f32 %v6862_v7, %v6861_v30  ;;  %v6882_v30 = vsel %vm3076_vm12, %v6832_v15, 0.0  ;;  %v6835_v7 = vmul.f32 %v13416_v25, %v13416_v25 }
 0x7ea   : > { %v6865_v53 = vadd.f32 %v6864_v55, %v6863_v19  ;;  %v6884_v19 = vsel %vm3076_vm12, %v6833_v4, 0.0  ;;  %v6836_v55 = vmul.f32 %v13420_v20, %v13420_v20 }
 0x7ec   : > { %v6867_v48 = vadd.f32 %v6866_v13, %v6865_v53  ;;  %v6886_v53 = vsel %vm3076_vm12, %v6834_v61, 0.0  ;;  %v6837_v13 = vmul.f32 %v13424_v24, %v13424_v24 }
 0x7ee   : > { %v6869_v34 = vadd.f32 %v6868_v27, %v6867_v48  ;;  %v6888_v48 = vsel %vm3076_vm12, %v6835_v7, 0.0  ;;  %v6838_v27 = vmul.f32 %v13428_v26, %v13428_v26 }
 0x7f0   : > { %v6871_v12 = vadd.f32 %v6870_v36, %v6869_v34  ;;  %v6890_v34 = vsel %vm3076_vm12, %v6836_v55, 0.0  ;;  %v6839_v36 = vmul.f32 %v13431_v33, %v13431_v33 }
 0x7f2   : > { %v6873_v46 = vadd.f32 %v6872_v50, %v6871_v12  ;;  %v6892_v12 = vsel %vm3076_vm12, %v6837_v13, 0.0  ;;  %v6840_v50 = vmul.f32 %v13434_v22, %v13434_v22 }
 0x7f4   : > { %v6875_v37 = vadd.f32 %v6874_v51, %v6873_v46  ;;  %v6894_v46 = vsel %vm3076_vm12, %v6838_v27, 0.0  ;;  %v6841_v51 = vmul.f32 %v13437_v44, %v13437_v44 }
 0x7f6   : > { %v6877_v31 = vadd.f32 %v6876_v16, %v6875_v37  ;;  %v6896_v37 = vsel %vm3076_vm12, %v6839_v36, 0.0  ;;  %v6842_v16 = vmul.f32 %v13440_v41, %v13440_v41 }
 0x7f8   : > { %v6879_v0 = vadd.f32 %v6878_v1, %v6877_v31  ;;  %v6898_v31 = vsel %vm3076_vm12, %v6840_v50, 0.0  ;;  %v6843_v1 = vmul.f32 %v13443_v28, %v13443_v28 }
 0x7fa   : > { %v6881_v56 = vadd.f32 %v6880_v63, %v6879_v0  ;;  %v6900_v0 = vsel %vm3076_vm12, %v6841_v51, 0.0  ;;  %v6844_v63 = vmul.f32 %v13446_v17, %v13446_v17 }
 0x7fc   : > { %v6883_v8 = vadd.f32 %v6882_v30, %v6881_v56  ;;  %v6902_v56 = vsel %vm3076_vm12, %v6842_v16, 0.0  ;;  %v6904_v30 = vsel %vm3076_vm12, %v6843_v1, 0.0  ;;  %v6906_v7 = vsel %vm3076_vm12, %v6844_v63, 0.0 }
 0x7fe   : > { %v6885_v47 = vadd.f32 %v6884_v19, %v6883_v8 }
 0x800   : > { %v6887_v38 = vadd.f32 %v6886_v53, %v6885_v47 }
 0x802   : > { %v6889_v62 = vadd.f32 %v6888_v48, %v6887_v38 }
 0x804   : > { %v6891_v11 = vadd.f32 %v6890_v34, %v6889_v62 }
 0x806   : > { %v6893_v29 = vadd.f32 %v6892_v12, %v6891_v11 }
 0x808   : > { %v6895_v43 = vadd.f32 %v6894_v46, %v6893_v29 }
 0x80a   : > { %v6897_v9 = vadd.f32 %v6896_v37, %v6895_v43 }
 0x80c   : > { %v6899_v15 = vadd.f32 %v6898_v31, %v6897_v9 }
 0x80e   : > { %v6901_v4 = vadd.f32 %v6900_v0, %v6899_v15 }
 0x810   : > { %v6903_v61 = vadd.f32 %v6902_v56, %v6901_v4 }
 0x812   : > { %v6905_v8 = vadd.f32 %v6904_v30, %v6903_v61 }
 0x814   : > { %v6907_v19 = vadd.f32 %v6906_v7, %v6905_v8 }
 0x816   : > { %v6908_v47 = vrot.slane %v6907_v19, 4 }
 0x818   : > { %v6909_v55 = vadd.f32 %v6908_v47, %v6907_v19 }
 0x81a   : > { %v6910_v53 = vrot.slane %v6909_v55, 2 }
 0x81c   : > { %v6911_v38 = vadd.f32 %v6910_v53, %v6909_v55 }
 0x81e   : > { %v6912_v13 = vrot.slane %v6911_v38, 1 }
 0x820   : > { %v6913_v48 = vadd.f32 %v6912_v13, %v6911_v38 }
 0x822   : > { %v6914_v62 = vmul.f32 0.00390625, %v6913_v48 }
 0x824   : > { %v6915_v27 = vadd.f32 1e-05, %v6914_v62 }
 0x826   : > { %9270 = vrsqrt.f32 %v6915_v27 }
 0x830   : > { %v9271_v34 = vpop.eup %9270 }
 0x831   : > { %v13609_v11 = vmul.f32 %v9271_v34, %v13450_v35  ;;  %v13612_v36 = vmul.f32 %v9271_v34, %v13454_v45  ;;  %v13615_v12 = vmul.f32 %v9271_v34, %v13458_v32  ;;  %v13618_v29 = vmul.f32 %v9271_v34, %v13462_v2 }
 0x832   : > { %v13621_v50 = vmul.f32 %v9271_v34, %v13470_v60  ;;  %v13624_v46 = vmul.f32 %v9271_v34, %v13476_v57  ;;  %v13627_v43 = vmul.f32 %v9271_v34, %v13484_v3  ;;  %v13630_v35 = vmul.f32 %v9271_v34, %v13491_v21 }
 0x833   : > { %14404 = vst [vmem:[#allocation21_spill] sm:$0xff] %v13609_v11  ;;  %14405 = vst [vmem:[#allocation22_spill] sm:$0xff] %v13612_v36  ;;  %v13633_v45 = vmul.f32 %v9271_v34, %v13498_v10  ;;  %v13636_v32 = vmul.f32 %v9271_v34, %v13505_v23  ;;  %v13639_v2 = vmul.f32 %v9271_v34, %v13420_v20  ;;  %v6981_v27 = vmul.f32 0.044715, %v13609_v11 }
 0x834   : > { %14406 = vst [vmem:[#allocation4_spill] sm:$0xff] %v13615_v12  ;;  %14407 = vst [vmem:[#allocation6_spill] sm:$0xff] %v13618_v29  ;;  %v13642_v60 = vmul.f32 %v9271_v34, %v13424_v24  ;;  %v13645_v57 = vmul.f32 %v9271_v34, %v13428_v26  ;;  %v13648_v3 = vmul.f32 %v9271_v34, %v13431_v33  ;;  %v13726_v51 = vmul.f32 0.5, %v13630_v35 }
 0x835   : > { %14408 = vst [vmem:[#allocation7_spill] sm:$0xff] %v13621_v50  ;;  %14409 = vst [vmem:[#allocation8_spill] sm:$0xff] %v13624_v46  ;;  %v13651_v21 = vmul.f32 %v9271_v34, %v13434_v22  ;;  %v13654_v10 = vmul.f32 %v9271_v34, %v13437_v44  ;;  %v13657_v23 = vmul.f32 %v9271_v34, %v13440_v41  ;;  %v13729_v37 = vmul.f32 0.5, %v13633_v45 }
 0x836   : > { %14410 = vst [vmem:[#allocation9_spill] sm:$0xff] %v13627_v43  ;;  %14411 = vst [vmem:[#allocation10_spill] sm:$0xff] %v13630_v35  ;;  %v13660_v20 = vmul.f32 %v9271_v34, %v13443_v28  ;;  %v13663_v24 = vmul.f32 %v9271_v34, %v13446_v17  ;;  %v13666_v26 = vmul.f32 %v9271_v34, %v13512_v59  ;;  %v13732_v9 = vmul.f32 0.5, %v13636_v32 }
 0x837   : > { %14412 = vst [vmem:[#allocation11_spill] sm:$0xff] %v13636_v32  ;;  %14413 = vst [vmem:[#allocation12_spill] sm:$0xff] %v13639_v2  ;;  %v13669_v33 = vmul.f32 %v9271_v34, %v13519_v39  ;;  %v13672_v22 = vmul.f32 %v9271_v34, %v13526_v14  ;;  %v13675_v44 = vmul.f32 %v9271_v34, %v13533_v5  ;;  %v13774_v47 = vmul.f32 0.5, %v13639_v2 }
 0x838   : > { %14414 = vst [vmem:[#allocation13_spill] sm:$0xff] %v13642_v60  ;;  %14415 = vst [vmem:[#allocation14_spill] sm:$0xff] %v13645_v57  ;;  %v13678_v41 = vmul.f32 %v9271_v34, %v13540_v40  ;;  %v13681_v28 = vmul.f32 %v9271_v34, %v13547_v42  ;;  %v13684_v17 = vmul.f32 %v9271_v34, %v13392_v58  ;;  %v13705_v58 = vmul.f32 0.5, %v13609_v11 }
 0x839   : > { %14416 = vst [vmem:[#allocation15_spill] sm:$0xff] %v13648_v3  ;;  %14417 = vst [vmem:[#allocation16_spill] sm:$0xff] %v13651_v21  ;;  %v13687_v59 = vmul.f32 %v9271_v34, %v13396_v52  ;;  %v13690_v39 = vmul.f32 %v9271_v34, %v13400_v18  ;;  %v13693_v14 = vmul.f32 %v9271_v34, %v13404_v6  ;;  %v13708_v52 = vmul.f32 0.5, %v13612_v36 }
 0x83a   : > { %14418 = vst [vmem:[#allocation17_spill] sm:$0xff] %v13654_v10  ;;  %14419 = vst [vmem:[#allocation18_spill] sm:$0xff] %v13657_v23  ;;  %v13696_v5 = vmul.f32 %v9271_v34, %v13408_v49  ;;  %v13699_v40 = vmul.f32 %v9271_v34, %v13412_v54  ;;  %v13702_v42 = vmul.f32 %v9271_v34, %v13416_v25  ;;  %v13711_v18 = vmul.f32 0.5, %v13615_v12 }
 0x83b   : > { %14420 = vst [vmem:[#allocation19_spill] sm:$0xff] %v13660_v20  ;;  %14421 = vst [vmem:[#allocation24_spill] sm:$0xff] %v13663_v24  ;;  %v13714_v6 = vmul.f32 0.5, %v13618_v29  ;;  %v13717_v49 = vmul.f32 0.5, %v13621_v50  ;;  %v13720_v54 = vmul.f32 0.5, %v13624_v46  ;;  %v13723_v25 = vmul.f32 0.5, %v13627_v43 }
 0x83c   : > { %14422 = vst [vmem:[#allocation25_spill] sm:$0xff] %v13666_v26  ;;  %14423 = vst [vmem:[#allocation23_spill] sm:$0xff] %v13669_v33  ;;  %v13735_v16 = vmul.f32 0.5, %v13666_v26  ;;  %v13738_v31 = vmul.f32 0.5, %v13669_v33  ;;  %v13741_v15 = vmul.f32 0.5, %v13672_v22  ;;  %v13744_v1 = vmul.f32 0.5, %v13675_v44 }
 0x83d   : > { %14424 = vst [vmem:[#allocation26_spill] sm:$0xff] %v13672_v22  ;;  %14425 = vst [vmem:[#allocation5_spill] sm:$0xff] %v13675_v44  ;;  %v13747_v0 = vmul.f32 0.5, %v13678_v41  ;;  %v13750_v4 = vmul.f32 0.5, %v13681_v28  ;;  %v13753_v63 = vmul.f32 0.5, %v13684_v17  ;;  %v13756_v56 = vmul.f32 0.5, %v13687_v59 }
 0x83e   : > { %14426 = vst [vmem:[#allocation20_spill] sm:$0xff] %v13678_v41  ;;  %14427 = vst [vmem:[#allocation27_spill] sm:$0xff] %v13681_v28  ;;  %v13759_v61 = vmul.f32 0.5, %v13690_v39  ;;  %v13762_v30 = vmul.f32 0.5, %v13693_v14  ;;  %v13765_v8 = vmul.f32 0.5, %v13696_v5  ;;  %v13768_v7 = vmul.f32 0.5, %v13699_v40 }
 0x83f   : > { %14428 = vst [vmem:[#allocation28_spill] sm:$0xff] %v13684_v17  ;;  %14429 = vst [vmem:[#allocation29_spill] sm:$0xff] %v13687_v59  ;;  %v13771_v19 = vmul.f32 0.5, %v13702_v42  ;;  %v13777_v55 = vmul.f32 0.5, %v13642_v60  ;;  %v13780_v53 = vmul.f32 0.5, %v13645_v57  ;;  %v13783_v38 = vmul.f32 0.5, %v13648_v3 }
 0x840   : > { %14430 = vst [vmem:[#allocation30_spill] sm:$0xff] %v13690_v39  ;;  %14431 = vst [vmem:[#allocation31_spill] sm:$0xff] %v13696_v5  ;;  %v13786_v13 = vmul.f32 0.5, %v13651_v21  ;;  %v13789_v48 = vmul.f32 0.5, %v13654_v10  ;;  %v13792_v62 = vmul.f32 0.5, %v13657_v23  ;;  %v13796_v34 = vmul.f32 0.5, %v13660_v20 }
 0x841   : > { %14432 = vst [vmem:[#allocation32_spill] sm:$0xff] %v13699_v40  ;;  %14433 = vst [vmem:[#allocation33_spill] sm:$0xff] %v13702_v42 }
 0x842   : > { %14434 = vst [vmem:[#allocation34_spill] sm:$0xff] %v13705_v58  ;;  %14435 = vst [vmem:[#allocation35_spill] sm:$0xff] %v13708_v52  ;;  %v7008_v52 = vmul.f32 0.044715, %v13651_v21  ;;  %v7010_v58 = vmul.f32 0.044715, %v13657_v23 }
 0x843   : > { %14436 = vst [vmem:[#allocation36_spill] sm:$0xff] %v13711_v18  ;;  %14437 = vst [vmem:[#allocation37_spill] sm:$0xff] %v13714_v6  ;;  %v7007_v6 = vmul.f32 0.044715, %v13648_v3 }
 0x844   : > { %14438 = vst [vmem:[#allocation38_spill] sm:$0xff] %v13717_v49  ;;  %14439 = vst [vmem:[#allocation39_spill] sm:$0xff] %v13720_v54  ;;  %v7005_v49 = vmul.f32 0.044715, %v13642_v60 }
 0x845   : > { %14440 = vst [vmem:[#allocation40_spill] sm:$0xff] %v13723_v25  ;;  %14441 = vst [vmem:[#allocation41_spill] sm:$0xff] %v13726_v51  ;;  %v7002_v51 = vmul.f32 0.044715, %v13699_v40  ;;  %v7004_v25 = vmul.f32 0.044715, %v13639_v2 }
 0x846   : > { %14442 = vst [vmem:[#allocation42_spill] sm:$0xff] %v13729_v37  ;;  %14443 = vst [vmem:[#allocation43_spill] sm:$0xff] %v13732_v9  ;;  %v7001_v9 = vmul.f32 0.044715, %v13696_v5 }
 0x847   : > { %14444 = vst [vmem:[#allocation44_spill] sm:$0xff] %v13735_v16  ;;  %14445 = vst [vmem:[#allocation45_spill] sm:$0xff] %v13738_v31  ;;  %v6999_v16 = vmul.f32 0.044715, %v13690_v39 }
 0x848   : > { %14446 = vst [vmem:[#allocation46_spill] sm:$0xff] %v13741_v15  ;;  %14447 = vst [vmem:[#allocation47_spill] sm:$0xff] %v13744_v1  ;;  %v6997_v1 = vmul.f32 0.044715, %v13684_v17  ;;  %v6998_v15 = vmul.f32 0.044715, %v13687_v59 }
 0x849   : > { %14448 = vst [vmem:[#allocation48_spill] sm:$0xff] %v13747_v0  ;;  %14449 = vst [vmem:[#allocation49_spill] sm:$0xff] %v13750_v4  ;;  %v6996_v0 = vmul.f32 0.044715, %v13681_v28 }
 0x84a   : > { %14450 = vst [vmem:[#allocation50_spill] sm:$0xff] %v13753_v63  ;;  %14451 = vst [vmem:[#allocation51_spill] sm:$0xff] %v13756_v56  ;;  %v6994_v56 = vmul.f32 0.044715, %v13675_v44  ;;  %v6995_v63 = vmul.f32 0.044715, %v13678_v41 }
 0x84b   : > { %14452 = vst [vmem:[#allocation52_spill] sm:$0xff] %v13759_v61  ;;  %14453 = vst [vmem:[#allocation53_spill] sm:$0xff] %v13762_v30  ;;  %v7013_v30 = vmul.f32 %v6981_v27, %v13609_v11  ;;  %v6993_v61 = vmul.f32 0.044715, %v13672_v22  ;;  %v7000_v27 = vmul.f32 0.044715, %v13693_v14 }
 0x84c   : > { %14454 = vst [vmem:[#allocation54_spill] sm:$0xff] %v13765_v8  ;;  %14455 = vst [vmem:[#allocation55_spill] sm:$0xff] %v13768_v7  ;;  %v6989_v7 = vmul.f32 0.044715, %v13633_v45  ;;  %v6992_v8 = vmul.f32 0.044715, %v13669_v33  ;;  %v7026_v23 = vmul.f32 %v6994_v56, %v13675_v44  ;;  %v7036_v56 = vmul.f32 %v7004_v25, %v13639_v2 }
 0x84d   : > { %14456 = vst [vmem:[#allocation56_spill] sm:$0xff] %v13771_v19  ;;  %14457 = vst [vmem:[#allocation57_spill] sm:$0xff] %v13774_v47  ;;  %v6985_v47 = vmul.f32 0.044715, %v13621_v50  ;;  %v6988_v19 = vmul.f32 0.044715, %v13630_v35 }
 0x84e   : > { %14458 = vst [vmem:[#allocation58_spill] sm:$0xff] %v13777_v55  ;;  %14459 = vst [vmem:[#allocation59_spill] sm:$0xff] %v13780_v53  ;;  %v13799_v55 = vmul.f32 0.5, %v13663_v24  ;;  %v6982_v53 = vmul.f32 0.044715, %v13612_v36  ;;  %v14471_v2 = vld [vmem:[#allocation4_spill] sm:$0xff] }
 0x84f   : > { %14460 = vst [vmem:[#allocation60_spill] sm:$0xff] %v13783_v38  ;;  %14461 = vst [vmem:[#allocation61_spill] sm:$0xff] %v13786_v13  ;;  %v6983_v38 = vmul.f32 0.044715, %v13615_v12  ;;  %v6984_v13 = vmul.f32 0.044715, %v13618_v29  ;;  %v7017_v54 = vmul.f32 %v6985_v47, %v13621_v50  ;;  %v7020_v50 = vmul.f32 %v6988_v19, %v13630_v35 }
 0x850   : > { %14462 = vst [vmem:[#allocation62_spill] sm:$0xff] %v13789_v48  ;;  %14463 = vst [vmem:[#allocation63_spill] sm:$0xff] %v13792_v62  ;;  %v6986_v48 = vmul.f32 0.044715, %v13624_v46  ;;  %v6987_v62 = vmul.f32 0.044715, %v13627_v43  ;;  %v7014_v4 = vmul.f32 %v6982_v53, %v13612_v36  ;;  %v7021_v36 = vmul.f32 %v6989_v7, %v13633_v45 }
 0x851   : > { %14464 = vst [vmem:[#allocation64_spill] sm:$0xff] %v13796_v34  ;;  %14465 = vst [vmem:[#allocation65_spill] sm:$0xff] %v13799_v55  ;;  %v6990_v34 = vmul.f32 0.044715, %v13636_v32  ;;  %v6991_v55 = vmul.f32 0.044715, %v13666_v26  ;;  %v7015_v31 = vmul.f32 %v6983_v38, %v13615_v12  ;;  %v7016_v37 = vmul.f32 %v6984_v13, %v13618_v29 }
 0x852   : > { %v7003_v53 = vmul.f32 0.044715, %v13702_v42  ;;  %v7006_v38 = vmul.f32 0.044715, %v13645_v57  ;;  %v7018_v18 = vmul.f32 %v6986_v48, %v13624_v46  ;;  %v7009_v13 = vmul.f32 0.044715, %v13654_v10 }
 0x853   : > { %v7019_v29 = vmul.f32 %v6987_v62, %v13627_v43  ;;  %v7011_v12 = vmul.f32 0.044715, %v13660_v20  ;;  %v7012_v47 = vmul.f32 0.044715, %v13663_v24  ;;  %v7022_v11 = vmul.f32 %v6990_v34, %v13636_v32 }
 0x854   : > { %v7023_v48 = vmul.f32 %v6991_v55, %v13666_v26  ;;  %v7024_v46 = vmul.f32 %v6992_v8, %v13669_v33  ;;  %v7025_v10 = vmul.f32 %v6993_v61, %v13672_v22  ;;  %v7027_v62 = vmul.f32 %v6995_v63, %v13678_v41 }
 0x855   : > { %v7028_v43 = vmul.f32 %v6996_v0, %v13681_v28  ;;  %v7029_v24 = vmul.f32 %v6997_v1, %v13684_v17  ;;  %v7030_v19 = vmul.f32 %v6998_v15, %v13687_v59  ;;  %v7031_v7 = vmul.f32 %v6999_v16, %v13690_v39  ;;  %v14466_v59 = vld [vmem:[#allocation17_spill] sm:$0xff]  ;;  %v14467_v39 = vld [vmem:[#allocation18_spill] sm:$0xff] }
 0x856   : > { %v7032_v34 = vmul.f32 %v7000_v27, %v13693_v14  ;;  %v7033_v55 = vmul.f32 %v7001_v9, %v13696_v5  ;;  %v7034_v8 = vmul.f32 %v7002_v51, %v13699_v40  ;;  %v7035_v61 = vmul.f32 %v7003_v53, %v13702_v42  ;;  %v14468_v5 = vld [vmem:[#allocation24_spill] sm:$0xff]  ;;  %v14469_v40 = vld [vmem:[#allocation21_spill] sm:$0xff]  ;;  %v14470_v42 = vld [vmem:[#allocation22_spill] sm:$0xff] }
 0x857   : > { %v7037_v63 = vmul.f32 %v7005_v49, %v13642_v60  ;;  %v7038_v0 = vmul.f32 %v7006_v38, %v13645_v57  ;;  %v7039_v1 = vmul.f32 %v7007_v6, %v13648_v3  ;;  %v7040_v15 = vmul.f32 %v7008_v52, %v13651_v21  ;;  %v14472_v60 = vld [vmem:[#allocation6_spill] sm:$0xff]  ;;  %v14473_v57 = vld [vmem:[#allocation7_spill] sm:$0xff]  ;;  %v14474_v3 = vld [vmem:[#allocation8_spill] sm:$0xff] }
 0x858   : > { %v7041_v16 = vmul.f32 %v7009_v13, %v14466_v59  ;;  %v7042_v27 = vmul.f32 %v7010_v58, %v14467_v39  ;;  %v7043_v9 = vmul.f32 %v7011_v12, %v13660_v20  ;;  %v7044_v51 = vmul.f32 %v7012_v47, %v14468_v5  ;;  %v14475_v21 = vld [vmem:[#allocation9_spill] sm:$0xff] }
 0x859   : > { %v7045_v53 = vmul.f32 %v7013_v30, %v14469_v40  ;;  %v7046_v25 = vmul.f32 %v7014_v4, %v14470_v42  ;;  %v7047_v49 = vmul.f32 %v7015_v31, %v14471_v2  ;;  %v7048_v38 = vmul.f32 %v7016_v37, %v14472_v60 }
 0x85a   : > { %v7049_v6 = vmul.f32 %v7017_v54, %v14473_v57  ;;  %v7050_v52 = vmul.f32 %v7018_v18, %v14474_v3  ;;  %v7051_v13 = vmul.f32 %v7019_v29, %v14475_v21  ;;  %v7052_v58 = vmul.f32 %v7020_v50, %v13630_v35  ;;  %v14476_v21 = vld [vmem:[#allocation29_spill] sm:$0xff]  ;;  %v14477_v35 = vld [vmem:[#allocation30_spill] sm:$0xff] }
 0x85b   : > { %v7053_v12 = vmul.f32 %v7021_v36, %v13633_v45  ;;  %v7054_v47 = vmul.f32 %v7022_v11, %v13636_v32  ;;  %v7055_v30 = vmul.f32 %v7023_v48, %v13666_v26  ;;  %v7056_v4 = vmul.f32 %v7024_v46, %v13669_v33  ;;  %v14478_v32 = vld [vmem:[#allocation31_spill] sm:$0xff]  ;;  %v14479_v26 = vld [vmem:[#allocation32_spill] sm:$0xff]  ;;  %v14480_v33 = vld [vmem:[#allocation33_spill] sm:$0xff] }
 0x85c   : > { %v7057_v31 = vmul.f32 %v7025_v10, %v13672_v22  ;;  %v7058_v37 = vmul.f32 %v7026_v23, %v13675_v44  ;;  %v7059_v54 = vmul.f32 %v7027_v62, %v13678_v41  ;;  %v7060_v18 = vmul.f32 %v7028_v43, %v13681_v28  ;;  %v14481_v22 = vld [vmem:[#allocation12_spill] sm:$0xff]  ;;  %v14482_v44 = vld [vmem:[#allocation13_spill] sm:$0xff]  ;;  %v14483_v41 = vld [vmem:[#allocation14_spill] sm:$0xff] }
 0x85d   : > { %v7061_v29 = vmul.f32 %v7029_v24, %v13684_v17  ;;  %v7062_v50 = vmul.f32 %v7030_v19, %v14476_v21  ;;  %v7063_v36 = vmul.f32 %v7031_v7, %v14477_v35  ;;  %v7064_v11 = vmul.f32 %v7032_v34, %v13693_v14  ;;  %v14484_v28 = vld [vmem:[#allocation15_spill] sm:$0xff]  ;;  %v14485_v17 = vld [vmem:[#allocation16_spill] sm:$0xff] }
 0x85e   : > { %v7065_v48 = vmul.f32 %v7033_v55, %v14478_v32  ;;  %v7066_v46 = vmul.f32 %v7034_v8, %v14479_v26  ;;  %v7067_v10 = vmul.f32 %v7035_v61, %v14480_v33  ;;  %v7068_v23 = vmul.f32 %v7036_v56, %v14481_v22 }
 0x85f   : > { %v7069_v62 = vmul.f32 %v7037_v63, %v14482_v44  ;;  %v7070_v43 = vmul.f32 %v7038_v0, %v14483_v41  ;;  %v7071_v24 = vmul.f32 %v7039_v1, %v14484_v28  ;;  %v7072_v19 = vmul.f32 %v7040_v15, %v14485_v17  ;;  %v14486_v17 = vld [vmem:[#allocation9_spill] sm:$0xff] }
 0x860   : > { %v7073_v7 = vmul.f32 %v7041_v16, %v14466_v59  ;;  %v7074_v34 = vmul.f32 %v7042_v27, %v14467_v39  ;;  %v7075_v55 = vmul.f32 %v7043_v9, %v13660_v20  ;;  %v7076_v8 = vmul.f32 %v7044_v51, %v14468_v5  ;;  %v14487_v59 = vld [vmem:[#allocation10_spill] sm:$0xff]  ;;  %v14488_v20 = vld [vmem:[#allocation11_spill] sm:$0xff]  ;;  %v14489_v5 = vld [vmem:[#allocation25_spill] sm:$0xff] }
 0x861   : > { %v7077_v61 = vadd.f32 %v7045_v53, %v14469_v40  ;;  %v7078_v56 = vadd.f32 %v7046_v25, %v14470_v42  ;;  %v7079_v63 = vadd.f32 %v7047_v49, %v14471_v2  ;;  %v7080_v0 = vadd.f32 %v7048_v38, %v14472_v60  ;;  %v14490_v53 = vld [vmem:[#allocation23_spill] sm:$0xff]  ;;  %v14491_v25 = vld [vmem:[#allocation26_spill] sm:$0xff]  ;;  %v14492_v49 = vld [vmem:[#allocation5_spill] sm:$0xff] }
 0x862   : > { %v7081_v1 = vadd.f32 %v7049_v6, %v14473_v57  ;;  %v7082_v15 = vadd.f32 %v7050_v52, %v14474_v3  ;;  %v7083_v16 = vadd.f32 %v7051_v13, %v14486_v17  ;;  %v7084_v27 = vadd.f32 %v7052_v58, %v14487_v59  ;;  %v14493_v38 = vld [vmem:[#allocation20_spill] sm:$0xff]  ;;  %v14494_v6 = vld [vmem:[#allocation27_spill] sm:$0xff] }
 0x863   : > { %v7085_v9 = vadd.f32 %v7053_v12, %v13633_v45  ;;  %v7086_v51 = vadd.f32 %v7054_v47, %v14488_v20  ;;  %v7087_v40 = vadd.f32 %v7055_v30, %v14489_v5  ;;  %v7088_v42 = vadd.f32 %v7056_v4, %v14490_v53  ;;  %v14495_v52 = vld [vmem:[#allocation28_spill] sm:$0xff] }
 0x864   : > { %v7089_v2 = vadd.f32 %v7057_v31, %v14491_v25  ;;  %v7090_v60 = vadd.f32 %v7058_v37, %v14492_v49  ;;  %v7091_v57 = vadd.f32 %v7059_v54, %v14493_v38  ;;  %v7092_v3 = vadd.f32 %v7060_v18, %v14494_v6  ;;  %v14496_v18 = vld [vmem:[#allocation16_spill] sm:$0xff]  ;;  %v14500_v38 = vld [vmem:[#allocation34_spill] sm:$0xff] }
 0x865   : > { %v7093_v17 = vadd.f32 %v7061_v29, %v14495_v52  ;;  %v7094_v59 = vadd.f32 %v7062_v50, %v14476_v21  ;;  %v7095_v45 = vadd.f32 %v7063_v36, %v14477_v35  ;;  %v7109_v13 = vmul.f32 0.7978846, %v7077_v61 }
 0x866   : > { %v7110_v20 = vmul.f32 0.7978846, %v7078_v56  ;;  %v7096_v5 = vadd.f32 %v7064_v11, %v13693_v14  ;;  %v7097_v58 = vadd.f32 %v7065_v48, %v14478_v32  ;;  %v7111_v12 = vmul.f32 0.7978846, %v7079_v63  ;;  %v14499_v48 = vld [vmem:[#allocation24_spill] sm:$0xff] }
 0x867   : > { %v7112_v47 = vmul.f32 0.7978846, %v7080_v0  ;;  %v7098_v30 = vadd.f32 %v7066_v46, %v14479_v26  ;;  %v7099_v4 = vadd.f32 %v7067_v10, %v14480_v33  ;;  %v7113_v31 = vmul.f32 0.7978846, %v7081_v1  ;;  %v14497_v26 = vld [vmem:[#allocation17_spill] sm:$0xff] }
 0x868   : > { %9272 = vtanh.f32 %v7109_v13  ;;  %v7100_v37 = vadd.f32 %v7068_v23, %v14481_v22  ;;  %v7101_v21 = vadd.f32 %v7069_v62, %v14482_v44  ;;  %v7114_v35 = vmul.f32 0.7978846, %v7082_v15  ;;  %v14498_v22 = vld [vmem:[#allocation19_spill] sm:$0xff]  ;;  %v13943_v15 = vld [vmem:[%s13932_s22] ss:$0 sm:$0xff] }
 0x869   : > { %9274 = vtanh.f32 %v7110_v20  ;;  %v7102_v54 = vadd.f32 %v7070_v43, %v14483_v41  ;;  %v7103_v14 = vadd.f32 %v7071_v24, %v14484_v28  ;;  %v7115_v32 = vmul.f32 0.7978846, %v7083_v16  ;;  %v14502_v20 = vld [vmem:[#allocation36_spill] sm:$0xff] }
 0x86a   : > { %9276 = vtanh.f32 %v7111_v12  ;;  %v7104_v29 = vadd.f32 %v7072_v19, %v14496_v18  ;;  %v7105_v50 = vadd.f32 %v7073_v7, %v14497_v26  ;;  %v7116_v36 = vmul.f32 0.7978846, %v7084_v27 }
 0x86b   : > { %9278 = vtanh.f32 %v7112_v47  ;;  %v7106_v33 = vadd.f32 %v7074_v34, %v14467_v39  ;;  %v7107_v11 = vadd.f32 %v7075_v55, %v14498_v22  ;;  %v7117_v44 = vmul.f32 0.7978846, %v7085_v9  ;;  %v14506_v22 = vld [vmem:[#allocation40_spill] sm:$0xff] }
 0x86c   : > { %9280 = vtanh.f32 %v7113_v31  ;;  %v7108_v46 = vadd.f32 %v7076_v8, %v14499_v48  ;;  %v7118_v41 = vmul.f32 0.7978846, %v7086_v51  ;;  %v7119_v10 = vmul.f32 0.7978846, %v7087_v40 }
 0x86d   : > { %9282 = vtanh.f32 %v7114_v35  ;;  %v7120_v28 = vmul.f32 0.7978846, %v7088_v42  ;;  %v7121_v23 = vmul.f32 0.7978846, %v7089_v2  ;;  %v7122_v62 = vmul.f32 0.7978846, %v7090_v60 }
 0x86e   : > { %9284 = vtanh.f32 %v7115_v32  ;;  %v7123_v43 = vmul.f32 0.7978846, %v7091_v57  ;;  %v7124_v39 = vmul.f32 0.7978846, %v7092_v3  ;;  %v7125_v24 = vmul.f32 0.7978846, %v7093_v17 }
 0x86f   : > { %9286 = vtanh.f32 %v7116_v36  ;;  %v7126_v19 = vmul.f32 0.7978846, %v7094_v59  ;;  %v7127_v7 = vmul.f32 0.7978846, %v7095_v45  ;;  %v7128_v34 = vmul.f32 0.7978846, %v7096_v5 }
 0x870   : > { %9288 = vtanh.f32 %v7117_v44  ;;  %v7129_v55 = vmul.f32 0.7978846, %v7097_v58  ;;  %v7130_v8 = vmul.f32 0.7978846, %v7098_v30  ;;  %v13934_v61 = vmul.f32 0.7978846, %v7099_v4 }
 0x871   : > { %9290 = vtanh.f32 %v7118_v41  ;;  %v13936_v63 = vmul.f32 0.7978846, %v7100_v37  ;;  %v13938_v0 = vmul.f32 0.7978846, %v7101_v21  ;;  %v13940_v1 = vmul.f32 0.7978846, %v7102_v54 }
 0x872   : > { %v9273_v56 = vpop.eup %9272  ;;  %9292 = vtanh.f32 %v7119_v10  ;;  %v13945_v27 = vmul.f32 0.7978846, %v7103_v14  ;;  %v13947_v9 = vmul.f32 0.7978846, %v7104_v29  ;;  %v13949_v53 = vmul.f32 0.7978846, %v7105_v50 }
 0x873   : > { %v9275_v16 = vpop.eup %9274  ;;  %9294 = vtanh.f32 %v7120_v28  ;;  %v7173_v51 = vadd.f32 1.0, %v9273_v56  ;;  %v13951_v42 = vmul.f32 0.7978846, %v7106_v33  ;;  %v13953_v49 = vmul.f32 0.7978846, %v7107_v11  ;;  %v14501_v17 = vld [vmem:[#allocation35_spill] sm:$0xff] }
 0x874   : > { %v9277_v40 = vpop.eup %9276  ;;  %9296 = vtanh.f32 %v7121_v23  ;;  %v7174_v25 = vadd.f32 1.0, %v9275_v16  ;;  %v13956_v3 = vmul.f32 0.7978846, %v7108_v46  ;;  %v14503_v30 = vld [vmem:[#allocation37_spill] sm:$0xff]  ;;  %v14504_v35 = vld [vmem:[#allocation38_spill] sm:$0xff]  ;;  %v14505_v29 = vld [vmem:[#allocation39_spill] sm:$0xff] }
 0x875   : > { %v9279_v2 = vpop.eup %9278  ;;  %9298 = vtanh.f32 %v7122_v62  ;;  %v7175_v60 = vadd.f32 1.0, %v9277_v40  ;;  %v7205_v57 = vmul.f32 %v7173_v51, %v14500_v38  ;;  %v14507_v41 = vld [vmem:[#allocation41_spill] sm:$0xff] }
 0x876   : > { %v9281_v6 = vpop.eup %9280  ;;  %9300 = vtanh.f32 %v7123_v43  ;;  %v7176_v52 = vadd.f32 1.0, %v9279_v2  ;;  %v7206_v59 = vmul.f32 %v7174_v25, %v14501_v17  ;;  %v14508_v43 = vld [vmem:[#allocation42_spill] sm:$0xff] }
 0x877   : > { %v9283_v45 = vpop.eup %9282  ;;  %9302 = vtanh.f32 %v7124_v39  ;;  %v7177_v13 = vadd.f32 1.0, %v9281_v6  ;;  %v7207_v5 = vmul.f32 %v7175_v60, %v14502_v20  ;;  %v13961_v58 = vmul.f32 %v13943_v15, %v7205_v57 }
 0x878   : > { %v9285_v12 = vpop.eup %9284  ;;  %9304 = vtanh.f32 %v7125_v24  ;;  %v7178_v47 = vadd.f32 1.0, %v9283_v45  ;;  %v7208_v4 = vmul.f32 %v7176_v52, %v14503_v30  ;;  %v13965_v31 = vmul.f32 %v13943_v15, %v7206_v59  ;;  %v14512_v52 = vld [vmem:[#allocation46_spill] sm:$0xff] }
 0x879   : > { %v9287_v37 = vpop.eup %9286  ;;  %9306 = vtanh.f32 %v7126_v19  ;;  %v7179_v21 = vadd.f32 1.0, %v9285_v12  ;;  %v7209_v54 = vmul.f32 %v7177_v13, %v14504_v35  ;;  %v13969_v14 = vmul.f32 %v13943_v15, %v7207_v5  ;;  %v14513_v13 = vld [vmem:[#allocation47_spill] sm:$0xff] }
 0x87a   : > { %v9289_v32 = vpop.eup %9288  ;;  %9308 = vtanh.f32 %v7127_v7  ;;  %v7180_v18 = vadd.f32 1.0, %v9287_v37  ;;  %v7210_v26 = vmul.f32 %v7178_v47, %v14505_v29  ;;  %v13973_v50 = vmul.f32 %v13943_v15, %v7208_v4  ;;  %v14514_v47 = vld [vmem:[#allocation48_spill] sm:$0xff] }
 0x87b   : > { %v9291_v36 = vpop.eup %9290  ;;  %9310 = vtanh.f32 %v7128_v34  ;;  %v7181_v33 = vadd.f32 1.0, %v9289_v32  ;;  %v7211_v11 = vmul.f32 %v7179_v21, %v14506_v22  ;;  %v13977_v44 = vmul.f32 %v13943_v15, %v7209_v54  ;;  %v14509_v34 = vld [vmem:[#allocation43_spill] sm:$0xff]  ;;  %v14515_v21 = vld [vmem:[#allocation49_spill] sm:$0xff] }
 0x87c   : > { %v9293_v48 = vpop.eup %9292  ;;  %9312 = vtanh.f32 %v7129_v55  ;;  %v7182_v46 = vadd.f32 1.0, %v9291_v36  ;;  %v7212_v10 = vmul.f32 %v7180_v18, %v14507_v41  ;;  %v13981_v28 = vmul.f32 %v13943_v15, %v7210_v26  ;;  %v14516_v18 = vld [vmem:[#allocation50_spill] sm:$0xff]  ;;  %v14026_v26 = vld [vmem:[%s13932_s22 + $0x1] ss:$0 sm:$0xff]  ;;  %v14517_v22 = vld [vmem:[#allocation51_spill] sm:$0xff] }
 0x87d   : > { %v9295_v23 = vpop.eup %9294  ;;  %9314 = vtanh.f32 %v7130_v8  ;;  %v7183_v62 = vadd.f32 1.0, %v9293_v48  ;;  %v7213_v39 = vmul.f32 %v7181_v33, %v14508_v43  ;;  %v13985_v24 = vmul.f32 %v13943_v15, %v7211_v11  ;;  %v14510_v8 = vld [vmem:[#allocation44_spill] sm:$0xff]  ;;  %v14519_v43 = vld [vmem:[#allocation53_spill] sm:$0xff] }
 0x87e   : > { %v9297_v19 = vpop.eup %9296  ;;  %9316 = vtanh.f32 %v13934_v61  ;;  %v7184_v7 = vadd.f32 1.0, %v9295_v23  ;;  %v7214_v55 = vmul.f32 %v7182_v46, %v14509_v34  ;;  %v13990_v56 = vmul.f32 %v13943_v15, %v7212_v10  ;;  %v14511_v61 = vld [vmem:[#allocation45_spill] sm:$0xff]  ;;  %v14518_v41 = vld [vmem:[#allocation52_spill] sm:$0xff] }
 0x87f   : > { %v9299_v16 = vpop.eup %9298  ;;  %9318 = vtanh.f32 %v13936_v63  ;;  %v7185_v51 = vadd.f32 1.0, %v9297_v19  ;;  %v7215_v40 = vmul.f32 %v7183_v62, %v14510_v8  ;;  %v13995_v25 = vmul.f32 %v13943_v15, %v7213_v39 }
 0x880   : > { %v9301_v2 = vpop.eup %9300  ;;  %9320 = vtanh.f32 %v13938_v0  ;;  %v7186_v60 = vadd.f32 1.0, %v9299_v16  ;;  %v7216_v38 = vmul.f32 %v7184_v7, %v14511_v61  ;;  %v14000_v57 = vmul.f32 %v13943_v15, %v7214_v55  ;;  %v14520_v55 = vld [vmem:[#allocation54_spill] sm:$0xff] }
 0x881   : > { %v9303_v6 = vpop.eup %9302  ;;  %9322 = vtanh.f32 %v13940_v1  ;;  %v7187_v63 = vadd.f32 1.0, %v9301_v2  ;;  %v7217_v17 = vmul.f32 %v7185_v51, %v14512_v52  ;;  %v14005_v59 = vmul.f32 %v13943_v15, %v7215_v40  ;;  %v14522_v52 = vld [vmem:[#allocation56_spill] sm:$0xff] }
 0x882   : > { %v9305_v45 = vpop.eup %9304  ;;  %9324 = vtanh.f32 %v13945_v27  ;;  %v7188_v0 = vadd.f32 1.0, %v9303_v6  ;;  %v7218_v20 = vmul.f32 %v7186_v60, %v14513_v13  ;;  %v14010_v5 = vmul.f32 %v13943_v15, %v7216_v38  ;;  %v14521_v60 = vld [vmem:[#allocation55_spill] sm:$0xff] }
 0x883   : > { %v9307_v12 = vpop.eup %9306  ;;  %9326 = vtanh.f32 %v13947_v9  ;;  %v7189_v1 = vadd.f32 1.0, %v9305_v45  ;;  %v7219_v30 = vmul.f32 %v7187_v63, %v14514_v47  ;;  %v14015_v4 = vmul.f32 %v13943_v15, %v7217_v17 }
 0x884   : > { %v9309_v37 = vpop.eup %9308  ;;  %9328 = vtanh.f32 %v13949_v53  ;;  %v7190_v27 = vadd.f32 1.0, %v9307_v12  ;;  %v7220_v35 = vmul.f32 %v7188_v0, %v14515_v21  ;;  %v14021_v54 = vmul.f32 %v13943_v15, %v7218_v20  ;;  %v14523_v20 = vld [vmem:[#allocation57_spill] sm:$0xff] }
 0x885   : > { %v9311_v32 = vpop.eup %9310  ;;  %9330 = vtanh.f32 %v13951_v42  ;;  %v7191_v9 = vadd.f32 1.0, %v9309_v37  ;;  %v7221_v29 = vmul.f32 %v7189_v1, %v14516_v18  ;;  %v14029_v36 = vmul.f32 %v13943_v15, %v7219_v30  ;;  %v14524_v37 = vld [vmem:[#allocation58_spill] sm:$0xff] }
 0x886   : > { %v9313_v33 = vpop.eup %9312  ;;  %9332 = vtanh.f32 %v13953_v49  ;;  %v7192_v53 = vadd.f32 1.0, %v9311_v32  ;;  %v7222_v11 = vmul.f32 %v7190_v27, %v14517_v22  ;;  %v14034_v48 = vmul.f32 %v13943_v15, %v7220_v35  ;;  %v14526_v22 = vld [vmem:[#allocation60_spill] sm:$0xff] }
 0x887   : > { %v9315_v46 = vpop.eup %9314  ;;  %9334 = vtanh.f32 %v13956_v3  ;;  %v7193_v42 = vadd.f32 1.0, %v9313_v33  ;;  %v7223_v10 = vmul.f32 %v7191_v9, %v14518_v41  ;;  %v14044_v23 = vmul.f32 %v13943_v15, %v7221_v29  ;;  %v14525_v9 = vld [vmem:[#allocation59_spill] sm:$0xff] }
 0x888   : > { %v9317_v49 = vpop.eup %9316  ;;  %v7194_v62 = vadd.f32 1.0, %v9315_v46  ;;  %v7224_v39 = vmul.f32 %v7192_v53, %v14519_v43  ;;  %v14048_v19 = vmul.f32 %v13943_v15, %v7222_v11  ;;  %v7279_v7 = vadd.f32 %v14026_v26, %v13961_v58 }
 0x889   : > { %v9319_v34 = vpop.eup %9318  ;;  %v7195_v3 = vadd.f32 1.0, %v9317_v49  ;;  %v7225_v16 = vmul.f32 %v7193_v42, %v14520_v55  ;;  %v14054_v51 = vmul.f32 %v13943_v15, %v7223_v10  ;;  %v7280_v8 = vadd.f32 %v14026_v26, %v13965_v31  ;;  %v14527_v10 = vld [vmem:[#allocation61_spill] sm:$0xff] }
 0x88a   : > { %v9321_v40 = vpop.eup %9320  ;;  %v7196_v2 = vadd.f32 1.0, %v9319_v34  ;;  %v7226_v61 = vmul.f32 %v7194_v62, %v14521_v60  ;;  %v14060_v38 = vmul.f32 %v13943_v15, %v7224_v39  ;;  %v7281_v58 = vadd.f32 %v14026_v26, %v13969_v14  ;;  %7311 = vst.msk [vmem:[%s14039_s25] sm:$0xff] %vm3076_vm12, %v7279_v7  ;;  %v14528_v7 = vld [vmem:[#allocation62_spill] sm:$0xff] }
 0x88b   : > { %v9323_v6 = vpop.eup %9322  ;;  %v7197_v63 = vadd.f32 1.0, %v9321_v40  ;;  %v7227_v17 = vmul.f32 %v7195_v3, %v14522_v52  ;;  %v14068_v31 = vmul.f32 %v13943_v15, %v7225_v16  ;;  %v7282_v45 = vadd.f32 %v14026_v26, %v13973_v50  ;;  %7312 = vst.msk [vmem:[%s14039_s25 + $0x8] sm:$0xff] %vm3076_vm12, %v7280_v8  ;;  %v14529_v16 = vld [vmem:[#allocation63_spill] sm:$0xff] }
 0x88c   : > { %v9325_v0 = vpop.eup %9324  ;;  %v7198_v13 = vadd.f32 1.0, %v9323_v6  ;;  %v7228_v14 = vmul.f32 %v7196_v2, %v14523_v20  ;;  %v7264_v12 = vmul.f32 %v13943_v15, %v7226_v61  ;;  %v7283_v1 = vadd.f32 %v14026_v26, %v13977_v44  ;;  %7313 = vst.msk [vmem:[%s14039_s25 + $0x10] sm:$0xff] %vm3076_vm12, %v7281_v58  ;;  %v14530_v2 = vld [vmem:[#allocation64_spill] sm:$0xff]  ;;  %v14531_v6 = vld [vmem:[#allocation65_spill] sm:$0xff] }
 0x88d   : > { %v9327_v47 = vpop.eup %9326  ;;  %v7199_v30 = vadd.f32 1.0, %v9325_v0  ;;  %v7229_v27 = vmul.f32 %v7197_v63, %v14524_v37  ;;  %v7265_v50 = vmul.f32 %v13943_v15, %v7227_v17  ;;  %v7284_v21 = vadd.f32 %v14026_v26, %v13981_v28  ;;  %7314 = vst.msk [vmem:[%s14039_s25 + $0x18] sm:$0xff] %vm3076_vm12, %v7282_v45 }
 0x88e   : > { %v9329_v35 = vpop.eup %9328  ;;  %v7200_v32 = vadd.f32 1.0, %v9327_v47  ;;  %v7230_v18 = vmul.f32 %v7198_v13, %v14525_v9  ;;  %v7266_v44 = vmul.f32 %v13943_v15, %v7228_v14  ;;  %v7285_v29 = vadd.f32 %v14026_v26, %v13985_v24  ;;  %7315 = vst.msk [vmem:[%s14039_s25 + $0x20] sm:$0xff] %vm3076_vm12, %v7283_v1 }
 0x88f   : > { %v9331_v33 = vpop.eup %9330  ;;  %v7201_v53 = vadd.f32 1.0, %v9329_v35  ;;  %v7231_v11 = vmul.f32 %v7199_v30, %v14526_v22  ;;  %v7267_v28 = vmul.f32 %v13943_v15, %v7229_v27  ;;  %v7286_v46 = vadd.f32 %v14026_v26, %v13990_v56  ;;  %7316 = vst.msk [vmem:[%s14039_s25 + $0x28] sm:$0xff] %vm3076_vm12, %v7284_v21 }
 0x890   : > { %v9333_v42 = vpop.eup %9332  ;;  %v7202_v41 = vadd.f32 1.0, %v9331_v33  ;;  %v7232_v49 = vmul.f32 %v7200_v32, %v14527_v10  ;;  %v7268_v24 = vmul.f32 %v13943_v15, %v7230_v18  ;;  %v7287_v62 = vadd.f32 %v14026_v26, %v13995_v25  ;;  %7317 = vst.msk [vmem:[%s14039_s25 + $0x30] sm:$0xff] %vm3076_vm12, %v7285_v29 }
 0x891   : > { %v9335_v43 = vpop.eup %9334  ;;  %v7203_v39 = vadd.f32 1.0, %v9333_v42  ;;  %v7233_v34 = vmul.f32 %v7201_v53, %v14528_v7  ;;  %v7269_v56 = vmul.f32 %v13943_v15, %v7231_v11  ;;  %v7288_v3 = vadd.f32 %v14026_v26, %v14000_v57  ;;  %7318 = vst.msk [vmem:[%s14039_s25 + $0x38] sm:$0xff] %vm3076_vm12, %v7286_v46 }
 0x892   : > { %v7204_v55 = vadd.f32 1.0, %v9335_v43  ;;  %v7234_v8 = vmul.f32 %v7202_v41, %v14529_v16  ;;  %v7270_v25 = vmul.f32 %v13943_v15, %v7232_v49  ;;  %v7289_v40 = vadd.f32 %v14026_v26, %v14005_v59  ;;  %7319 = vst.msk [vmem:[%s14039_s25 + $0x40] sm:$0xff] %vm3076_vm12, %v7287_v62 }
 0x893   : > { %v7235_v60 = vmul.f32 %v7203_v39, %v14530_v2  ;;  %v7271_v61 = vmul.f32 %v13943_v15, %v7233_v34  ;;  %v7290_v57 = vadd.f32 %v14026_v26, %v14010_v5  ;;  %v7291_v58 = vadd.f32 %v14026_v26, %v14015_v4  ;;  %7320 = vst.msk [vmem:[%s14039_s25 + $0x48] sm:$0xff] %vm3076_vm12, %v7288_v3 }
 0x894   : > { %v7236_v63 = vmul.f32 %v7204_v55, %v14531_v6  ;;  %v7272_v59 = vmul.f32 %v13943_v15, %v7234_v8  ;;  %v7292_v52 = vadd.f32 %v14026_v26, %v14021_v54  ;;  %v7293_v17 = vadd.f32 %v14026_v26, %v14029_v36  ;;  %7321 = vst.msk [vmem:[%s14039_s25 + $0x50] sm:$0xff] %vm3076_vm12, %v7289_v40 }
 0x895   : > { %v7273_v5 = vmul.f32 %v13943_v15, %v7235_v60  ;;  %v7294_v4 = vadd.f32 %v14026_v26, %v14034_v48  ;;  %v7295_v45 = vadd.f32 %v14026_v26, %v14044_v23  ;;  %v7296_v0 = vadd.f32 %v14026_v26, %v14048_v19  ;;  %7322 = vst.msk [vmem:[%s14039_s25 + $0x58] sm:$0xff] %vm3076_vm12, %v7290_v57 }
 0x896   : > { %7323 = vst.msk [vmem:[%s14039_s25 + $0x60] sm:$0xff] %vm3076_vm12, %v7291_v58  ;;  %v7274_v54 = vmul.f32 %v13943_v15, %v7236_v63  ;;  %v7297_v36 = vadd.f32 %v14026_v26, %v14054_v51  ;;  %v7298_v48 = vadd.f32 %v14026_v26, %v14060_v38  ;;  %v7299_v23 = vadd.f32 %v14026_v26, %v14068_v31 }
 0x897   : > { %7324 = vst.msk [vmem:[%s14039_s25 + $0x68] sm:$0xff] %vm3076_vm12, %v7292_v52  ;;  %7325 = vst.msk [vmem:[%s14039_s25 + $0x70] sm:$0xff] %vm3076_vm12, %v7293_v17  ;;  %v7300_v19 = vadd.f32 %v14026_v26, %v7264_v12  ;;  %v7301_v15 = vadd.f32 %v14026_v26, %v7265_v50  ;;  %v7302_v51 = vadd.f32 %v14026_v26, %v7266_v44 }
 0x898   : > { %v7303_v13 = vadd.f32 %v14026_v26, %v7267_v28  ;;  %7326 = vst.msk [vmem:[%s14039_s25 + $0x78] sm:$0xff] %vm3076_vm12, %v7294_v4  ;;  %7327 = vst.msk [vmem:[%s14039_s25 + $0x80] sm:$0xff] %vm3076_vm12, %v7295_v45  ;;  %v7304_v38 = vadd.f32 %v14026_v26, %v7268_v24  ;;  %v7305_v31 = vadd.f32 %v14026_v26, %v7269_v56 }
 0x899   : > { %7328 = vst.msk [vmem:[%s14039_s25 + $0x88] sm:$0xff] %vm3076_vm12, %v7296_v0  ;;  %v7306_v20 = vadd.f32 %v14026_v26, %v7270_v25  ;;  %v7307_v14 = vadd.f32 %v14026_v26, %v7271_v61  ;;  %7329 = vst.msk [vmem:[%s14039_s25 + $0x90] sm:$0xff] %vm3076_vm12, %v7297_v36  ;;  %v7308_v12 = vadd.f32 %v14026_v26, %v7272_v59 }
 0x89a   : > { %7330 = vst.msk [vmem:[%s14039_s25 + $0x98] sm:$0xff] %vm3076_vm12, %v7298_v48  ;;  %7331 = vst.msk [vmem:[%s14039_s25 + $0xa0] sm:$0xff] %vm3076_vm12, %v7299_v23  ;;  %v7309_v1 = vadd.f32 %v14026_v26, %v7273_v5  ;;  %v7310_v47 = vadd.f32 %v14026_v26, %v7274_v54 }
 0x89b   : > { %7332 = vst.msk [vmem:[%s14039_s25 + $0xa8] sm:$0xff] %vm3076_vm12, %v7300_v19  ;;  %7333 = vst.msk [vmem:[%s14039_s25 + $0xb0] sm:$0xff] %vm3076_vm12, %v7301_v15 }
 0x89c   : > { %7334 = vst.msk [vmem:[%s14039_s25 + $0xb8] sm:$0xff] %vm3076_vm12, %v7302_v51  ;;  %7335 = vst.msk [vmem:[%s14039_s25 + $0xc0] sm:$0xff] %vm3076_vm12, %v7303_v13 }
 0x89d   : > { %7336 = vst.msk [vmem:[%s14039_s25 + $0xc8] sm:$0xff] %vm3076_vm12, %v7304_v38  ;;  %7337 = vst.msk [vmem:[%s14039_s25 + $0xd0] sm:$0xff] %vm3076_vm12, %v7305_v31 }
 0x89e   : > { %7338 = vst.msk [vmem:[%s14039_s25 + $0xd8] sm:$0xff] %vm3076_vm12, %v7306_v20  ;;  %7339 = vst.msk [vmem:[%s14039_s25 + $0xe0] sm:$0xff] %vm3076_vm12, %v7307_v14 }
 0x89f   : > { %7340 = vst.msk [vmem:[%s14039_s25 + $0xe8] sm:$0xff] %vm3076_vm12, %v7308_v12  ;;  %7341 = vst.msk [vmem:[%s14039_s25 + $0xf0] sm:$0xff] %vm3076_vm12, %v7309_v1 }
 0x8a0   : > { %7342 = vst.msk [vmem:[%s14039_s25 + $0xf8] sm:$0xff] %vm3076_vm12, %v7310_v47 }
 0x8a1 PF: > { %s18_s27 = sadd.s32 1, %s9342_s27  }
 0x8a2   : > { %p15_p4 = scmp.ge.s32.totalorder %s18_s27, 4  }
 0x8a4   :  { %17 = sbr.rel (!%p15_p4) target bundleno = 1 (0x1), region = 91 }

</bundles_post_ra>
